<compile_context>
chip_gen: v6e
topology: v6e:2x2x1
jax: 0.10.0
libtpu: 0.0.40
codegen_flags: <defaults>
</compile_context>

<pallas_src>
import jax
import jax.numpy as jnp
from jax.experimental import pallas as pl
from jax.experimental.pallas import tpu as pltpu

KSIZE = 27
PAD = 13
EPS = 1e-5
SUBLANE = 8
LANE = 128


def _round_up(v, m):
    return (v + m - 1) // m * m


def residual_block(x, w1, b1, w2, b2, gamma, beta):
    """x: (N, C, L) f32; w*: (C, C, K) PyTorch OIH layout; b*, gamma, beta: (C,)."""
    N, C, L = x.shape
    Cp = _round_up(C, SUBLANE)          # channel padding -> full sublane tiles
    Lp = L + 2 * PAD                    # per-sample zero-padded length
    Wl = _round_up(N * Lp, LANE)        # lane-dense, 128-aligned lane width
    inv_cnt = 1.0 / float(N * L)        # BN statistics over valid (N, L) only

    def kernel(x_ref, w1_ref, b1_ref, w2_ref, b2_ref, g_ref, bt_ref, m_ref,
               out_ref):
        mask = m_ref[...]                                   # (1, Wl): 1 on valid cols
        gamma_v = g_ref[...]                                # (Cp, 1)
        beta_v = bt_ref[...]                                # (Cp, 1)
        x_pad = x_ref[...]                                  # (Cp, Wl), 0 off valid
        ones_cols = jnp.ones((Wl, LANE), jnp.float32)       # MXU reduction operand
        stages = ((w1_ref, b1_ref[...]), (w2_ref, b2_ref[...]))

        a = x_pad
        for _ in range(2):
            for w_ref, bias in stages:
                # ---- BatchNorm1d (training) stats on the idle MXU (frees XLU) ----
                s1 = jnp.dot(a, ones_cols,
                             precision=jax.lax.Precision.HIGHEST,
                             preferred_element_type=jnp.float32)[:, 0:1]
                s2 = jnp.dot(a * a, ones_cols,
                             precision=jax.lax.Precision.HIGHEST,
                             preferred_element_type=jnp.float32)[:, 0:1]
                mean = s1 * inv_cnt
                var = jnp.maximum(s2 * inv_cnt - mean * mean, 0.0)
                scale = gamma_v * jax.lax.rsqrt(var + EPS)
                shift = beta_v - mean * scale
                # ---- BN + ReLU; re-zero pad columns so conv sees zero padding ----
                act = jnp.maximum(a * scale + shift, 0.0) * mask       # (Cp, Wl) f32

                # ---- Conv1d: 27 accumulated MXU matmuls over rolled views ----
                # Valid output col needs inputs within its own sample's padded
                # segment, so rolled wrap-around never reaches an unmasked column.
                acc = None
                for k in range(KSIZE):
                    sh = (PAD - k) % Wl                     # static, non-negative
                    shifted = act if sh == 0 else pltpu.roll(act, shift=sh, axis=1)
                    part = jnp.dot(w_ref[k], shifted.astype(jnp.bfloat16),
                                   preferred_element_type=jnp.float32)
                    acc = part if acc is None else acc + part
                a = (acc + bias) * mask
        out_ref[...] = x_pad + 0.3 * a

    # ---- wrapper-side layout plumbing (tiny XLA ops, done once per call) ----
    def pack_w(w):  # (C_out, C_in, K) OIH -> (K, Cp, Cp) bf16; w3[k, o, i] = w[o, i, k]
        wp = jnp.pad(w.astype(jnp.float32), ((0, Cp - C), (0, Cp - C), (0, 0)))
        return jnp.transpose(wp, (2, 0, 1)).astype(jnp.bfloat16)

    def pack_vec(v):  # (C,) -> (Cp, 1) f32
        return jnp.pad(v.astype(jnp.float32), (0, Cp - C)).reshape(Cp, 1)

    xt = jnp.transpose(x.astype(jnp.float32), (1, 0, 2))            # (C, N, L)
    xt = jnp.pad(xt, ((0, Cp - C), (0, 0), (PAD, PAD)))             # (Cp, N, Lp)
    x_pad = jnp.pad(xt.reshape(Cp, N * Lp), ((0, 0), (0, Wl - N * Lp)))

    m = jnp.zeros((N, Lp), jnp.float32).at[:, PAD:PAD + L].set(1.0)
    mask = jnp.pad(m.reshape(1, N * Lp), ((0, 0), (0, Wl - N * Lp)))

    args = (x_pad, pack_w(w1), pack_vec(b1), pack_w(w2), pack_vec(b2),
            pack_vec(gamma), pack_vec(beta), mask)

    # ---- explicit VMEM budget (review item: size + assert the scoped limit) ----
    f32b, bf16b = 4, 2
    act_tile = Cp * Wl * f32b
    w_bytes = KSIZE * max(Cp, 16) * _round_up(Cp, LANE) * bf16b  # per-tap (16,128) tiles
    vec_bytes = SUBLANE * LANE * f32b
    resident = 2 * act_tile + 2 * w_bytes + 4 * vec_bytes + SUBLANE * Wl * f32b
    temps = 8 * act_tile + Wl * LANE * f32b       # a/act/acc/rolled/bf16/ones temporaries
    vmem_est = resident + temps
    assert vmem_est < 48 * 1024 * 1024, (
        f"single-tile footprint {vmem_est} B exceeds VMEM budget; "
        "use the gridded (haloed) path for this shape")
    vmem_limit = int(min(48 * 1024 * 1024, max(2 * vmem_est, 16 * 1024 * 1024)))

    out_pad = pl.pallas_call(
        kernel,
        out_shape=jax.ShapeDtypeStruct((Cp, Wl), jnp.float32),
        in_specs=[pl.BlockSpec(memory_space=pltpu.MemorySpace.VMEM)] * len(args),
        out_specs=pl.BlockSpec(memory_space=pltpu.MemorySpace.VMEM),
        compiler_params=pltpu.CompilerParams(vmem_limit_bytes=vmem_limit),
    )(*args)

    out = out_pad[:, :N * Lp].reshape(Cp, N, Lp)[:C, :, PAD:PAD + L]
    return jnp.transpose(out, (1, 0, 2)).astype(x.dtype)


def residual_block_ref(x, w1, b1, w2, b2, gamma, beta):
    """Pure-JAX reference (same math, lax.conv at HIGHEST precision)."""
    g = gamma.reshape(1, -1, 1)
    bt = beta.reshape(1, -1, 1)

    def bn(v):
        mean = jnp.mean(v, axis=(0, 2), keepdims=True)
        var = jnp.mean((v - mean) ** 2, axis=(0, 2), keepdims=True)
        return (v - mean) * jax.lax.rsqrt(var + EPS) * g + bt

    def conv(v, w, b):
        out = jax.lax.conv_general_dilated(
            v, w, window_strides=(1,), padding=[(PAD, PAD)],
            dimension_numbers=('NCH', 'OIH', 'NCH'),
            precision=jax.lax.Precision.HIGHEST)
        return out + b.reshape(1, -1, 1)

    res = x
    for _ in range(2):
        res = conv(jnp.maximum(bn(res), 0.0), w1, b1)
        res = conv(jnp.maximum(bn(res), 0.0), w2, b2)
    return x + 0.3 * res


if __name__ == "__main__":
    N, C, L = 2, 4, 32

    key = jax.random.PRNGKey(0)
    kx, kw1, kb1, kw2, kb2 = jax.random.split(key, 5)

    x = jax.random.normal(kx, (N, C, L), dtype=jnp.float32)

    # PyTorch Conv1d default init: U(-bound, bound), bound = 1/sqrt(C_in * K)
    bound = 1.0 / (C * KSIZE) ** 0.5
    w1 = jax.random.uniform(kw1, (C, C, KSIZE), jnp.float32, -bound, bound)
    b1 = jax.random.uniform(kb1, (C,), jnp.float32, -bound, bound)
    w2 = jax.random.uniform(kw2, (C, C, KSIZE), jnp.float32, -bound, bound)
    b2 = jax.random.uniform(kb2, (C,), jnp.float32, -bound, bound)

    # BatchNorm1d affine params: weight=1, bias=0 (PyTorch defaults)
    gamma = jnp.ones((C,), jnp.float32)
    beta = jnp.zeros((C,), jnp.float32)

    out = residual_block(x, w1, b1, w2, b2, gamma, beta)
    out = jax.block_until_ready(out)

    expected = residual_block_ref(x, w1, b1, w2, b2, gamma, beta)
    assert out.shape == (N, C, L)
    # Tolerance accounts for intentional bf16 MXU conv operands (f32 accumulate).
    assert jnp.allclose(out, expected, rtol=2e-2, atol=2e-2), (
        "Pallas output mismatch vs JAX reference")

    print("KERNEL_OK")
</pallas_src>

<mosaic_0001>
module attributes {stable_mosaic.version = 11 : i64} {
  func.func @kernel(%arg0: memref<8x128xf32, #tpu.memory_space<vmem>>, %arg1: memref<27x8x8xbf16, #tpu.memory_space<vmem>>, %arg2: memref<8x1xf32, #tpu.memory_space<vmem>>, %arg3: memref<27x8x8xbf16, #tpu.memory_space<vmem>>, %arg4: memref<8x1xf32, #tpu.memory_space<vmem>>, %arg5: memref<8x1xf32, #tpu.memory_space<vmem>>, %arg6: memref<8x1xf32, #tpu.memory_space<vmem>>, %arg7: memref<1x128xf32, #tpu.memory_space<vmem>>, %arg8: memref<8x128xf32, #tpu.memory_space<vmem>>) attributes {dimension_semantics = [], scalar_prefetch = 0 : i64, scratch_operands = 0 : i64, tpu.core_type = #tpu.core_type<tc>} {
    %c0 = arith.constant 0 : index
    %c0_0 = arith.constant 0 : index
    %0 = vector.load %arg7[%c0, %c0_0] : memref<1x128xf32, #tpu.memory_space<vmem>>, vector<1x128xf32>
    %c0_1 = arith.constant 0 : index
    %c0_2 = arith.constant 0 : index
    %1 = vector.load %arg5[%c0_1, %c0_2] : memref<8x1xf32, #tpu.memory_space<vmem>>, vector<8x1xf32>
    %c0_3 = arith.constant 0 : index
    %c0_4 = arith.constant 0 : index
    %2 = vector.load %arg6[%c0_3, %c0_4] : memref<8x1xf32, #tpu.memory_space<vmem>>, vector<8x1xf32>
    %c0_5 = arith.constant 0 : index
    %c0_6 = arith.constant 0 : index
    %3 = vector.load %arg0[%c0_5, %c0_6] : memref<8x128xf32, #tpu.memory_space<vmem>>, vector<8x128xf32>
    %cst = arith.constant 1.000000e+00 : f32
    %4 = vector.broadcast %cst : f32 to vector<128x128xf32>
    %c0_7 = arith.constant 0 : index
    %c0_8 = arith.constant 0 : index
    %5 = vector.load %arg2[%c0_7, %c0_8] : memref<8x1xf32, #tpu.memory_space<vmem>>, vector<8x1xf32>
    %c0_9 = arith.constant 0 : index
    %c0_10 = arith.constant 0 : index
    %6 = vector.load %arg4[%c0_9, %c0_10] : memref<8x1xf32, #tpu.memory_space<vmem>>, vector<8x1xf32>
    %cst_11 = arith.constant dense<0.000000e+00> : vector<8x128xf32>
    %7 = tpu.matmul %3, %4, %cst_11 {dimension_numbers = #tpu.dot_dimension_numbers<[1], [0], [0], [1], [0, 0, 1, 1], [], []>, precision = #tpu.contract_precision<fp32>} : vector<8x128xf32>, vector<128x128xf32>, vector<8x128xf32> -> vector<8x128xf32>
    %8 = vector.extract_strided_slice %7 {offsets = [0, 0], sizes = [8, 1], strides = [1, 1]} : vector<8x128xf32> to vector<8x1xf32>
    %9 = arith.mulf %3, %3 : vector<8x128xf32>
    %cst_12 = arith.constant dense<0.000000e+00> : vector<8x128xf32>
    %10 = tpu.matmul %9, %4, %cst_12 {dimension_numbers = #tpu.dot_dimension_numbers<[1], [0], [0], [1], [0, 0, 1, 1], [], []>, precision = #tpu.contract_precision<fp32>} : vector<8x128xf32>, vector<128x128xf32>, vector<8x128xf32> -> vector<8x128xf32>
    %11 = vector.extract_strided_slice %10 {offsets = [0, 0], sizes = [8, 1], strides = [1, 1]} : vector<8x128xf32> to vector<8x1xf32>
    %cst_13 = arith.constant 1.562500e-02 : f32
    %12 = vector.broadcast %cst_13 : f32 to vector<8x1xf32>
    %13 = arith.mulf %8, %12 : vector<8x1xf32>
    %cst_14 = arith.constant 1.562500e-02 : f32
    %14 = vector.broadcast %cst_14 : f32 to vector<8x1xf32>
    %15 = arith.mulf %11, %14 : vector<8x1xf32>
    %16 = arith.mulf %13, %13 : vector<8x1xf32>
    %17 = arith.subf %15, %16 : vector<8x1xf32>
    %cst_15 = arith.constant 0.000000e+00 : f32
    %18 = vector.broadcast %cst_15 : f32 to vector<8x1xf32>
    %19 = arith.maximumf %17, %18 : vector<8x1xf32>
    %cst_16 = arith.constant 9.99999974E-6 : f32
    %20 = vector.broadcast %cst_16 : f32 to vector<8x1xf32>
    %21 = arith.addf %19, %20 : vector<8x1xf32>
    %22 = math.rsqrt %21 : vector<8x1xf32>
    %23 = arith.mulf %1, %22 : vector<8x1xf32>
    %24 = arith.mulf %13, %23 : vector<8x1xf32>
    %25 = arith.subf %2, %24 : vector<8x1xf32>
    %26 = vector.broadcast %23 : vector<8x1xf32> to vector<8x128xf32>
    %27 = arith.mulf %3, %26 : vector<8x128xf32>
    %28 = vector.broadcast %25 : vector<8x1xf32> to vector<8x128xf32>
    %29 = arith.addf %27, %28 : vector<8x128xf32>
    %cst_17 = arith.constant 0.000000e+00 : f32
    %30 = vector.broadcast %cst_17 : f32 to vector<8x128xf32>
    %31 = arith.maximumf %29, %30 : vector<8x128xf32>
    %32 = vector.broadcast %0 : vector<1x128xf32> to vector<8x128xf32>
    %33 = arith.mulf %31, %32 : vector<8x128xf32>
    %c13_i32 = arith.constant 13 : i32
    %34 = tpu.dynamic_rotate %33 by %c13_i32 dim 1 : vector<8x128xf32>, i32 -> vector<8x128xf32>
    %c0_18 = arith.constant 0 : index
    %c0_19 = arith.constant 0 : index
    %c0_20 = arith.constant 0 : index
    %35 = vector.load %arg1[%c0_18, %c0_19, %c0_20] : memref<27x8x8xbf16, #tpu.memory_space<vmem>>, vector<1x8x8xbf16>
    %36 = vector.shape_cast %35 : vector<1x8x8xbf16> to vector<8x8xbf16>
    %37 = arith.truncf %34 : vector<8x128xf32> to vector<8x128xbf16>
    %cst_21 = arith.constant dense<0.000000e+00> : vector<8x128xf32>
    %38 = tpu.matmul %36, %37, %cst_21 {dimension_numbers = #tpu.dot_dimension_numbers<[1], [0], [0], [1], [0, 0, 1, 1], [], []>} : vector<8x8xbf16>, vector<8x128xbf16>, vector<8x128xf32> -> vector<8x128xf32>
    %c12_i32 = arith.constant 12 : i32
    %39 = tpu.dynamic_rotate %33 by %c12_i32 dim 1 : vector<8x128xf32>, i32 -> vector<8x128xf32>
    %c1 = arith.constant 1 : index
    %c0_22 = arith.constant 0 : index
    %c0_23 = arith.constant 0 : index
    %40 = vector.load %arg1[%c1, %c0_22, %c0_23] : memref<27x8x8xbf16, #tpu.memory_space<vmem>>, vector<1x8x8xbf16>
    %41 = vector.shape_cast %40 : vector<1x8x8xbf16> to vector<8x8xbf16>
    %42 = arith.truncf %39 : vector<8x128xf32> to vector<8x128xbf16>
    %cst_24 = arith.constant dense<0.000000e+00> : vector<8x128xf32>
    %43 = tpu.matmul %41, %42, %cst_24 {dimension_numbers = #tpu.dot_dimension_numbers<[1], [0], [0], [1], [0, 0, 1, 1], [], []>} : vector<8x8xbf16>, vector<8x128xbf16>, vector<8x128xf32> -> vector<8x128xf32>
    %44 = arith.addf %38, %43 : vector<8x128xf32>
    %c11_i32 = arith.constant 11 : i32
    %45 = tpu.dynamic_rotate %33 by %c11_i32 dim 1 : vector<8x128xf32>, i32 -> vector<8x128xf32>
    %c2 = arith.constant 2 : index
    %c0_25 = arith.constant 0 : index
    %c0_26 = arith.constant 0 : index
    %46 = vector.load %arg1[%c2, %c0_25, %c0_26] : memref<27x8x8xbf16, #tpu.memory_space<vmem>>, vector<1x8x8xbf16>
    %47 = vector.shape_cast %46 : vector<1x8x8xbf16> to vector<8x8xbf16>
    %48 = arith.truncf %45 : vector<8x128xf32> to vector<8x128xbf16>
    %cst_27 = arith.constant dense<0.000000e+00> : vector<8x128xf32>
    %49 = tpu.matmul %47, %48, %cst_27 {dimension_numbers = #tpu.dot_dimension_numbers<[1], [0], [0], [1], [0, 0, 1, 1], [], []>} : vector<8x8xbf16>, vector<8x128xbf16>, vector<8x128xf32> -> vector<8x128xf32>
    %50 = arith.addf %44, %49 : vector<8x128xf32>
    %c10_i32 = arith.constant 10 : i32
    %51 = tpu.dynamic_rotate %33 by %c10_i32 dim 1 : vector<8x128xf32>, i32 -> vector<8x128xf32>
    %c3 = arith.constant 3 : index
    %c0_28 = arith.constant 0 : index
    %c0_29 = arith.constant 0 : index
    %52 = vector.load %arg1[%c3, %c0_28, %c0_29] : memref<27x8x8xbf16, #tpu.memory_space<vmem>>, vector<1x8x8xbf16>
    %53 = vector.shape_cast %52 : vector<1x8x8xbf16> to vector<8x8xbf16>
    %54 = arith.truncf %51 : vector<8x128xf32> to vector<8x128xbf16>
    %cst_30 = arith.constant dense<0.000000e+00> : vector<8x128xf32>
    %55 = tpu.matmul %53, %54, %cst_30 {dimension_numbers = #tpu.dot_dimension_numbers<[1], [0], [0], [1], [0, 0, 1, 1], [], []>} : vector<8x8xbf16>, vector<8x128xbf16>, vector<8x128xf32> -> vector<8x128xf32>
    %56 = arith.addf %50, %55 : vector<8x128xf32>
    %c9_i32 = arith.constant 9 : i32
    %57 = tpu.dynamic_rotate %33 by %c9_i32 dim 1 : vector<8x128xf32>, i32 -> vector<8x128xf32>
    %c4 = arith.constant 4 : index
    %c0_31 = arith.constant 0 : index
    %c0_32 = arith.constant 0 : index
    %58 = vector.load %arg1[%c4, %c0_31, %c0_32] : memref<27x8x8xbf16, #tpu.memory_space<vmem>>, vector<1x8x8xbf16>
    %59 = vector.shape_cast %58 : vector<1x8x8xbf16> to vector<8x8xbf16>
    %60 = arith.truncf %57 : vector<8x128xf32> to vector<8x128xbf16>
    %cst_33 = arith.constant dense<0.000000e+00> : vector<8x128xf32>
    %61 = tpu.matmul %59, %60, %cst_33 {dimension_numbers = #tpu.dot_dimension_numbers<[1], [0], [0], [1], [0, 0, 1, 1], [], []>} : vector<8x8xbf16>, vector<8x128xbf16>, vector<8x128xf32> -> vector<8x128xf32>
    %62 = arith.addf %56, %61 : vector<8x128xf32>
    %c8_i32 = arith.constant 8 : i32
    %63 = tpu.dynamic_rotate %33 by %c8_i32 dim 1 : vector<8x128xf32>, i32 -> vector<8x128xf32>
    %c5 = arith.constant 5 : index
    %c0_34 = arith.constant 0 : index
    %c0_35 = arith.constant 0 : index
    %64 = vector.load %arg1[%c5, %c0_34, %c0_35] : memref<27x8x8xbf16, #tpu.memory_space<vmem>>, vector<1x8x8xbf16>
    %65 = vector.shape_cast %64 : vector<1x8x8xbf16> to vector<8x8xbf16>
    %66 = arith.truncf %63 : vector<8x128xf32> to vector<8x128xbf16>
    %cst_36 = arith.constant dense<0.000000e+00> : vector<8x128xf32>
    %67 = tpu.matmul %65, %66, %cst_36 {dimension_numbers = #tpu.dot_dimension_numbers<[1], [0], [0], [1], [0, 0, 1, 1], [], []>} : vector<8x8xbf16>, vector<8x128xbf16>, vector<8x128xf32> -> vector<8x128xf32>
    %68 = arith.addf %62, %67 : vector<8x128xf32>
    %c7_i32 = arith.constant 7 : i32
    %69 = tpu.dynamic_rotate %33 by %c7_i32 dim 1 : vector<8x128xf32>, i32 -> vector<8x128xf32>
    %c6 = arith.constant 6 : index
    %c0_37 = arith.constant 0 : index
    %c0_38 = arith.constant 0 : index
    %70 = vector.load %arg1[%c6, %c0_37, %c0_38] : memref<27x8x8xbf16, #tpu.memory_space<vmem>>, vector<1x8x8xbf16>
    %71 = vector.shape_cast %70 : vector<1x8x8xbf16> to vector<8x8xbf16>
    %72 = arith.truncf %69 : vector<8x128xf32> to vector<8x128xbf16>
    %cst_39 = arith.constant dense<0.000000e+00> : vector<8x128xf32>
    %73 = tpu.matmul %71, %72, %cst_39 {dimension_numbers = #tpu.dot_dimension_numbers<[1], [0], [0], [1], [0, 0, 1, 1], [], []>} : vector<8x8xbf16>, vector<8x128xbf16>, vector<8x128xf32> -> vector<8x128xf32>
    %74 = arith.addf %68, %73 : vector<8x128xf32>
    %c6_i32 = arith.constant 6 : i32
    %75 = tpu.dynamic_rotate %33 by %c6_i32 dim 1 : vector<8x128xf32>, i32 -> vector<8x128xf32>
    %c7 = arith.constant 7 : index
    %c0_40 = arith.constant 0 : index
    %c0_41 = arith.constant 0 : index
    %76 = vector.load %arg1[%c7, %c0_40, %c0_41] : memref<27x8x8xbf16, #tpu.memory_space<vmem>>, vector<1x8x8xbf16>
    %77 = vector.shape_cast %76 : vector<1x8x8xbf16> to vector<8x8xbf16>
    %78 = arith.truncf %75 : vector<8x128xf32> to vector<8x128xbf16>
    %cst_42 = arith.constant dense<0.000000e+00> : vector<8x128xf32>
    %79 = tpu.matmul %77, %78, %cst_42 {dimension_numbers = #tpu.dot_dimension_numbers<[1], [0], [0], [1], [0, 0, 1, 1], [], []>} : vector<8x8xbf16>, vector<8x128xbf16>, vector<8x128xf32> -> vector<8x128xf32>
    %80 = arith.addf %74, %79 : vector<8x128xf32>
    %c5_i32 = arith.constant 5 : i32
    %81 = tpu.dynamic_rotate %33 by %c5_i32 dim 1 : vector<8x128xf32>, i32 -> vector<8x128xf32>
    %c8 = arith.constant 8 : index
    %c0_43 = arith.constant 0 : index
    %c0_44 = arith.constant 0 : index
    %82 = vector.load %arg1[%c8, %c0_43, %c0_44] : memref<27x8x8xbf16, #tpu.memory_space<vmem>>, vector<1x8x8xbf16>
    %83 = vector.shape_cast %82 : vector<1x8x8xbf16> to vector<8x8xbf16>
    %84 = arith.truncf %81 : vector<8x128xf32> to vector<8x128xbf16>
    %cst_45 = arith.constant dense<0.000000e+00> : vector<8x128xf32>
    %85 = tpu.matmul %83, %84, %cst_45 {dimension_numbers = #tpu.dot_dimension_numbers<[1], [0], [0], [1], [0, 0, 1, 1], [], []>} : vector<8x8xbf16>, vector<8x128xbf16>, vector<8x128xf32> -> vector<8x128xf32>
    %86 = arith.addf %80, %85 : vector<8x128xf32>
    %c4_i32 = arith.constant 4 : i32
    %87 = tpu.dynamic_rotate %33 by %c4_i32 dim 1 : vector<8x128xf32>, i32 -> vector<8x128xf32>
    %c9 = arith.constant 9 : index
    %c0_46 = arith.constant 0 : index
    %c0_47 = arith.constant 0 : index
    %88 = vector.load %arg1[%c9, %c0_46, %c0_47] : memref<27x8x8xbf16, #tpu.memory_space<vmem>>, vector<1x8x8xbf16>
    %89 = vector.shape_cast %88 : vector<1x8x8xbf16> to vector<8x8xbf16>
    %90 = arith.truncf %87 : vector<8x128xf32> to vector<8x128xbf16>
    %cst_48 = arith.constant dense<0.000000e+00> : vector<8x128xf32>
    %91 = tpu.matmul %89, %90, %cst_48 {dimension_numbers = #tpu.dot_dimension_numbers<[1], [0], [0], [1], [0, 0, 1, 1], [], []>} : vector<8x8xbf16>, vector<8x128xbf16>, vector<8x128xf32> -> vector<8x128xf32>
    %92 = arith.addf %86, %91 : vector<8x128xf32>
    %c3_i32 = arith.constant 3 : i32
    %93 = tpu.dynamic_rotate %33 by %c3_i32 dim 1 : vector<8x128xf32>, i32 -> vector<8x128xf32>
    %c10 = arith.constant 10 : index
    %c0_49 = arith.constant 0 : index
    %c0_50 = arith.constant 0 : index
    %94 = vector.load %arg1[%c10, %c0_49, %c0_50] : memref<27x8x8xbf16, #tpu.memory_space<vmem>>, vector<1x8x8xbf16>
    %95 = vector.shape_cast %94 : vector<1x8x8xbf16> to vector<8x8xbf16>
    %96 = arith.truncf %93 : vector<8x128xf32> to vector<8x128xbf16>
    %cst_51 = arith.constant dense<0.000000e+00> : vector<8x128xf32>
    %97 = tpu.matmul %95, %96, %cst_51 {dimension_numbers = #tpu.dot_dimension_numbers<[1], [0], [0], [1], [0, 0, 1, 1], [], []>} : vector<8x8xbf16>, vector<8x128xbf16>, vector<8x128xf32> -> vector<8x128xf32>
    %98 = arith.addf %92, %97 : vector<8x128xf32>
    %c2_i32 = arith.constant 2 : i32
    %99 = tpu.dynamic_rotate %33 by %c2_i32 dim 1 : vector<8x128xf32>, i32 -> vector<8x128xf32>
    %c11 = arith.constant 11 : index
    %c0_52 = arith.constant 0 : index
    %c0_53 = arith.constant 0 : index
    %100 = vector.load %arg1[%c11, %c0_52, %c0_53] : memref<27x8x8xbf16, #tpu.memory_space<vmem>>, vector<1x8x8xbf16>
    %101 = vector.shape_cast %100 : vector<1x8x8xbf16> to vector<8x8xbf16>
    %102 = arith.truncf %99 : vector<8x128xf32> to vector<8x128xbf16>
    %cst_54 = arith.constant dense<0.000000e+00> : vector<8x128xf32>
    %103 = tpu.matmul %101, %102, %cst_54 {dimension_numbers = #tpu.dot_dimension_numbers<[1], [0], [0], [1], [0, 0, 1, 1], [], []>} : vector<8x8xbf16>, vector<8x128xbf16>, vector<8x128xf32> -> vector<8x128xf32>
    %104 = arith.addf %98, %103 : vector<8x128xf32>
    %c1_i32 = arith.constant 1 : i32
    %105 = tpu.dynamic_rotate %33 by %c1_i32 dim 1 : vector<8x128xf32>, i32 -> vector<8x128xf32>
    %c12 = arith.constant 12 : index
    %c0_55 = arith.constant 0 : index
    %c0_56 = arith.constant 0 : index
    %106 = vector.load %arg1[%c12, %c0_55, %c0_56] : memref<27x8x8xbf16, #tpu.memory_space<vmem>>, vector<1x8x8xbf16>
    %107 = vector.shape_cast %106 : vector<1x8x8xbf16> to vector<8x8xbf16>
    %108 = arith.truncf %105 : vector<8x128xf32> to vector<8x128xbf16>
    %cst_57 = arith.constant dense<0.000000e+00> : vector<8x128xf32>
    %109 = tpu.matmul %107, %108, %cst_57 {dimension_numbers = #tpu.dot_dimension_numbers<[1], [0], [0], [1], [0, 0, 1, 1], [], []>} : vector<8x8xbf16>, vector<8x128xbf16>, vector<8x128xf32> -> vector<8x128xf32>
    %110 = arith.addf %104, %109 : vector<8x128xf32>
    %c13 = arith.constant 13 : index
    %c0_58 = arith.constant 0 : index
    %c0_59 = arith.constant 0 : index
    %111 = vector.load %arg1[%c13, %c0_58, %c0_59] : memref<27x8x8xbf16, #tpu.memory_space<vmem>>, vector<1x8x8xbf16>
    %112 = vector.shape_cast %111 : vector<1x8x8xbf16> to vector<8x8xbf16>
    %113 = arith.truncf %33 : vector<8x128xf32> to vector<8x128xbf16>
    %cst_60 = arith.constant dense<0.000000e+00> : vector<8x128xf32>
    %114 = tpu.matmul %112, %113, %cst_60 {dimension_numbers = #tpu.dot_dimension_numbers<[1], [0], [0], [1], [0, 0, 1, 1], [], []>} : vector<8x8xbf16>, vector<8x128xbf16>, vector<8x128xf32> -> vector<8x128xf32>
    %115 = arith.addf %110, %114 : vector<8x128xf32>
    %c127_i32 = arith.constant 127 : i32
    %116 = tpu.dynamic_rotate %33 by %c127_i32 dim 1 : vector<8x128xf32>, i32 -> vector<8x128xf32>
    %c14 = arith.constant 14 : index
    %c0_61 = arith.constant 0 : index
    %c0_62 = arith.constant 0 : index
    %117 = vector.load %arg1[%c14, %c0_61, %c0_62] : memref<27x8x8xbf16, #tpu.memory_space<vmem>>, vector<1x8x8xbf16>
    %118 = vector.shape_cast %117 : vector<1x8x8xbf16> to vector<8x8xbf16>
    %119 = arith.truncf %116 : vector<8x128xf32> to vector<8x128xbf16>
    %cst_63 = arith.constant dense<0.000000e+00> : vector<8x128xf32>
    %120 = tpu.matmul %118, %119, %cst_63 {dimension_numbers = #tpu.dot_dimension_numbers<[1], [0], [0], [1], [0, 0, 1, 1], [], []>} : vector<8x8xbf16>, vector<8x128xbf16>, vector<8x128xf32> -> vector<8x128xf32>
    %121 = arith.addf %115, %120 : vector<8x128xf32>
    %c126_i32 = arith.constant 126 : i32
    %122 = tpu.dynamic_rotate %33 by %c126_i32 dim 1 : vector<8x128xf32>, i32 -> vector<8x128xf32>
    %c15 = arith.constant 15 : index
    %c0_64 = arith.constant 0 : index
    %c0_65 = arith.constant 0 : index
    %123 = vector.load %arg1[%c15, %c0_64, %c0_65] : memref<27x8x8xbf16, #tpu.memory_space<vmem>>, vector<1x8x8xbf16>
    %124 = vector.shape_cast %123 : vector<1x8x8xbf16> to vector<8x8xbf16>
    %125 = arith.truncf %122 : vector<8x128xf32> to vector<8x128xbf16>
    %cst_66 = arith.constant dense<0.000000e+00> : vector<8x128xf32>
    %126 = tpu.matmul %124, %125, %cst_66 {dimension_numbers = #tpu.dot_dimension_numbers<[1], [0], [0], [1], [0, 0, 1, 1], [], []>} : vector<8x8xbf16>, vector<8x128xbf16>, vector<8x128xf32> -> vector<8x128xf32>
    %127 = arith.addf %121, %126 : vector<8x128xf32>
    %c125_i32 = arith.constant 125 : i32
    %128 = tpu.dynamic_rotate %33 by %c125_i32 dim 1 : vector<8x128xf32>, i32 -> vector<8x128xf32>
    %c16 = arith.constant 16 : index
    %c0_67 = arith.constant 0 : index
    %c0_68 = arith.constant 0 : index
    %129 = vector.load %arg1[%c16, %c0_67, %c0_68] : memref<27x8x8xbf16, #tpu.memory_space<vmem>>, vector<1x8x8xbf16>
    %130 = vector.shape_cast %129 : vector<1x8x8xbf16> to vector<8x8xbf16>
    %131 = arith.truncf %128 : vector<8x128xf32> to vector<8x128xbf16>
    %cst_69 = arith.constant dense<0.000000e+00> : vector<8x128xf32>
    %132 = tpu.matmul %130, %131, %cst_69 {dimension_numbers = #tpu.dot_dimension_numbers<[1], [0], [0], [1], [0, 0, 1, 1], [], []>} : vector<8x8xbf16>, vector<8x128xbf16>, vector<8x128xf32> -> vector<8x128xf32>
    %133 = arith.addf %127, %132 : vector<8x128xf32>
    %c124_i32 = arith.constant 124 : i32
    %134 = tpu.dynamic_rotate %33 by %c124_i32 dim 1 : vector<8x128xf32>, i32 -> vector<8x128xf32>
    %c17 = arith.constant 17 : index
    %c0_70 = arith.constant 0 : index
    %c0_71 = arith.constant 0 : index
    %135 = vector.load %arg1[%c17, %c0_70, %c0_71] : memref<27x8x8xbf16, #tpu.memory_space<vmem>>, vector<1x8x8xbf16>
    %136 = vector.shape_cast %135 : vector<1x8x8xbf16> to vector<8x8xbf16>
    %137 = arith.truncf %134 : vector<8x128xf32> to vector<8x128xbf16>
    %cst_72 = arith.constant dense<0.000000e+00> : vector<8x128xf32>
    %138 = tpu.matmul %136, %137, %cst_72 {dimension_numbers = #tpu.dot_dimension_numbers<[1], [0], [0], [1], [0, 0, 1, 1], [], []>} : vector<8x8xbf16>, vector<8x128xbf16>, vector<8x128xf32> -> vector<8x128xf32>
    %139 = arith.addf %133, %138 : vector<8x128xf32>
    %c123_i32 = arith.constant 123 : i32
    %140 = tpu.dynamic_rotate %33 by %c123_i32 dim 1 : vector<8x128xf32>, i32 -> vector<8x128xf32>
    %c18 = arith.constant 18 : index
    %c0_73 = arith.constant 0 : index
    %c0_74 = arith.constant 0 : index
    %141 = vector.load %arg1[%c18, %c0_73, %c0_74] : memref<27x8x8xbf16, #tpu.memory_space<vmem>>, vector<1x8x8xbf16>
    %142 = vector.shape_cast %141 : vector<1x8x8xbf16> to vector<8x8xbf16>
    %143 = arith.truncf %140 : vector<8x128xf32> to vector<8x128xbf16>
    %cst_75 = arith.constant dense<0.000000e+00> : vector<8x128xf32>
    %144 = tpu.matmul %142, %143, %cst_75 {dimension_numbers = #tpu.dot_dimension_numbers<[1], [0], [0], [1], [0, 0, 1, 1], [], []>} : vector<8x8xbf16>, vector<8x128xbf16>, vector<8x128xf32> -> vector<8x128xf32>
    %145 = arith.addf %139, %144 : vector<8x128xf32>
    %c122_i32 = arith.constant 122 : i32
    %146 = tpu.dynamic_rotate %33 by %c122_i32 dim 1 : vector<8x128xf32>, i32 -> vector<8x128xf32>
    %c19 = arith.constant 19 : index
    %c0_76 = arith.constant 0 : index
    %c0_77 = arith.constant 0 : index
    %147 = vector.load %arg1[%c19, %c0_76, %c0_77] : memref<27x8x8xbf16, #tpu.memory_space<vmem>>, vector<1x8x8xbf16>
    %148 = vector.shape_cast %147 : vector<1x8x8xbf16> to vector<8x8xbf16>
    %149 = arith.truncf %146 : vector<8x128xf32> to vector<8x128xbf16>
    %cst_78 = arith.constant dense<0.000000e+00> : vector<8x128xf32>
    %150 = tpu.matmul %148, %149, %cst_78 {dimension_numbers = #tpu.dot_dimension_numbers<[1], [0], [0], [1], [0, 0, 1, 1], [], []>} : vector<8x8xbf16>, vector<8x128xbf16>, vector<8x128xf32> -> vector<8x128xf32>
    %151 = arith.addf %145, %150 : vector<8x128xf32>
    %c121_i32 = arith.constant 121 : i32
    %152 = tpu.dynamic_rotate %33 by %c121_i32 dim 1 : vector<8x128xf32>, i32 -> vector<8x128xf32>
    %c20 = arith.constant 20 : index
    %c0_79 = arith.constant 0 : index
    %c0_80 = arith.constant 0 : index
    %153 = vector.load %arg1[%c20, %c0_79, %c0_80] : memref<27x8x8xbf16, #tpu.memory_space<vmem>>, vector<1x8x8xbf16>
    %154 = vector.shape_cast %153 : vector<1x8x8xbf16> to vector<8x8xbf16>
    %155 = arith.truncf %152 : vector<8x128xf32> to vector<8x128xbf16>
    %cst_81 = arith.constant dense<0.000000e+00> : vector<8x128xf32>
    %156 = tpu.matmul %154, %155, %cst_81 {dimension_numbers = #tpu.dot_dimension_numbers<[1], [0], [0], [1], [0, 0, 1, 1], [], []>} : vector<8x8xbf16>, vector<8x128xbf16>, vector<8x128xf32> -> vector<8x128xf32>
    %157 = arith.addf %151, %156 : vector<8x128xf32>
    %c120_i32 = arith.constant 120 : i32
    %158 = tpu.dynamic_rotate %33 by %c120_i32 dim 1 : vector<8x128xf32>, i32 -> vector<8x128xf32>
    %c21 = arith.constant 21 : index
    %c0_82 = arith.constant 0 : index
    %c0_83 = arith.constant 0 : index
    %159 = vector.load %arg1[%c21, %c0_82, %c0_83] : memref<27x8x8xbf16, #tpu.memory_space<vmem>>, vector<1x8x8xbf16>
    %160 = vector.shape_cast %159 : vector<1x8x8xbf16> to vector<8x8xbf16>
    %161 = arith.truncf %158 : vector<8x128xf32> to vector<8x128xbf16>
    %cst_84 = arith.constant dense<0.000000e+00> : vector<8x128xf32>
    %162 = tpu.matmul %160, %161, %cst_84 {dimension_numbers = #tpu.dot_dimension_numbers<[1], [0], [0], [1], [0, 0, 1, 1], [], []>} : vector<8x8xbf16>, vector<8x128xbf16>, vector<8x128xf32> -> vector<8x128xf32>
    %163 = arith.addf %157, %162 : vector<8x128xf32>
    %c119_i32 = arith.constant 119 : i32
    %164 = tpu.dynamic_rotate %33 by %c119_i32 dim 1 : vector<8x128xf32>, i32 -> vector<8x128xf32>
    %c22 = arith.constant 22 : index
    %c0_85 = arith.constant 0 : index
    %c0_86 = arith.constant 0 : index
    %165 = vector.load %arg1[%c22, %c0_85, %c0_86] : memref<27x8x8xbf16, #tpu.memory_space<vmem>>, vector<1x8x8xbf16>
    %166 = vector.shape_cast %165 : vector<1x8x8xbf16> to vector<8x8xbf16>
    %167 = arith.truncf %164 : vector<8x128xf32> to vector<8x128xbf16>
    %cst_87 = arith.constant dense<0.000000e+00> : vector<8x128xf32>
    %168 = tpu.matmul %166, %167, %cst_87 {dimension_numbers = #tpu.dot_dimension_numbers<[1], [0], [0], [1], [0, 0, 1, 1], [], []>} : vector<8x8xbf16>, vector<8x128xbf16>, vector<8x128xf32> -> vector<8x128xf32>
    %169 = arith.addf %163, %168 : vector<8x128xf32>
    %c118_i32 = arith.constant 118 : i32
    %170 = tpu.dynamic_rotate %33 by %c118_i32 dim 1 : vector<8x128xf32>, i32 -> vector<8x128xf32>
    %c23 = arith.constant 23 : index
    %c0_88 = arith.constant 0 : index
    %c0_89 = arith.constant 0 : index
    %171 = vector.load %arg1[%c23, %c0_88, %c0_89] : memref<27x8x8xbf16, #tpu.memory_space<vmem>>, vector<1x8x8xbf16>
    %172 = vector.shape_cast %171 : vector<1x8x8xbf16> to vector<8x8xbf16>
    %173 = arith.truncf %170 : vector<8x128xf32> to vector<8x128xbf16>
    %cst_90 = arith.constant dense<0.000000e+00> : vector<8x128xf32>
    %174 = tpu.matmul %172, %173, %cst_90 {dimension_numbers = #tpu.dot_dimension_numbers<[1], [0], [0], [1], [0, 0, 1, 1], [], []>} : vector<8x8xbf16>, vector<8x128xbf16>, vector<8x128xf32> -> vector<8x128xf32>
    %175 = arith.addf %169, %174 : vector<8x128xf32>
    %c117_i32 = arith.constant 117 : i32
    %176 = tpu.dynamic_rotate %33 by %c117_i32 dim 1 : vector<8x128xf32>, i32 -> vector<8x128xf32>
    %c24 = arith.constant 24 : index
    %c0_91 = arith.constant 0 : index
    %c0_92 = arith.constant 0 : index
    %177 = vector.load %arg1[%c24, %c0_91, %c0_92] : memref<27x8x8xbf16, #tpu.memory_space<vmem>>, vector<1x8x8xbf16>
    %178 = vector.shape_cast %177 : vector<1x8x8xbf16> to vector<8x8xbf16>
    %179 = arith.truncf %176 : vector<8x128xf32> to vector<8x128xbf16>
    %cst_93 = arith.constant dense<0.000000e+00> : vector<8x128xf32>
    %180 = tpu.matmul %178, %179, %cst_93 {dimension_numbers = #tpu.dot_dimension_numbers<[1], [0], [0], [1], [0, 0, 1, 1], [], []>} : vector<8x8xbf16>, vector<8x128xbf16>, vector<8x128xf32> -> vector<8x128xf32>
    %181 = arith.addf %175, %180 : vector<8x128xf32>
    %c116_i32 = arith.constant 116 : i32
    %182 = tpu.dynamic_rotate %33 by %c116_i32 dim 1 : vector<8x128xf32>, i32 -> vector<8x128xf32>
    %c25 = arith.constant 25 : index
    %c0_94 = arith.constant 0 : index
    %c0_95 = arith.constant 0 : index
    %183 = vector.load %arg1[%c25, %c0_94, %c0_95] : memref<27x8x8xbf16, #tpu.memory_space<vmem>>, vector<1x8x8xbf16>
    %184 = vector.shape_cast %183 : vector<1x8x8xbf16> to vector<8x8xbf16>
    %185 = arith.truncf %182 : vector<8x128xf32> to vector<8x128xbf16>
    %cst_96 = arith.constant dense<0.000000e+00> : vector<8x128xf32>
    %186 = tpu.matmul %184, %185, %cst_96 {dimension_numbers = #tpu.dot_dimension_numbers<[1], [0], [0], [1], [0, 0, 1, 1], [], []>} : vector<8x8xbf16>, vector<8x128xbf16>, vector<8x128xf32> -> vector<8x128xf32>
    %187 = arith.addf %181, %186 : vector<8x128xf32>
    %c115_i32 = arith.constant 115 : i32
    %188 = tpu.dynamic_rotate %33 by %c115_i32 dim 1 : vector<8x128xf32>, i32 -> vector<8x128xf32>
    %c26 = arith.constant 26 : index
    %c0_97 = arith.constant 0 : index
    %c0_98 = arith.constant 0 : index
    %189 = vector.load %arg1[%c26, %c0_97, %c0_98] : memref<27x8x8xbf16, #tpu.memory_space<vmem>>, vector<1x8x8xbf16>
    %190 = vector.shape_cast %189 : vector<1x8x8xbf16> to vector<8x8xbf16>
    %191 = arith.truncf %188 : vector<8x128xf32> to vector<8x128xbf16>
    %cst_99 = arith.constant dense<0.000000e+00> : vector<8x128xf32>
    %192 = tpu.matmul %190, %191, %cst_99 {dimension_numbers = #tpu.dot_dimension_numbers<[1], [0], [0], [1], [0, 0, 1, 1], [], []>} : vector<8x8xbf16>, vector<8x128xbf16>, vector<8x128xf32> -> vector<8x128xf32>
    %193 = arith.addf %187, %192 : vector<8x128xf32>
    %194 = vector.broadcast %5 : vector<8x1xf32> to vector<8x128xf32>
    %195 = arith.addf %193, %194 : vector<8x128xf32>
    %196 = vector.broadcast %0 : vector<1x128xf32> to vector<8x128xf32>
    %197 = arith.mulf %195, %196 : vector<8x128xf32>
    %cst_100 = arith.constant dense<0.000000e+00> : vector<8x128xf32>
    %198 = tpu.matmul %197, %4, %cst_100 {dimension_numbers = #tpu.dot_dimension_numbers<[1], [0], [0], [1], [0, 0, 1, 1], [], []>, precision = #tpu.contract_precision<fp32>} : vector<8x128xf32>, vector<128x128xf32>, vector<8x128xf32> -> vector<8x128xf32>
    %199 = vector.extract_strided_slice %198 {offsets = [0, 0], sizes = [8, 1], strides = [1, 1]} : vector<8x128xf32> to vector<8x1xf32>
    %200 = arith.mulf %197, %197 : vector<8x128xf32>
    %cst_101 = arith.constant dense<0.000000e+00> : vector<8x128xf32>
    %201 = tpu.matmul %200, %4, %cst_101 {dimension_numbers = #tpu.dot_dimension_numbers<[1], [0], [0], [1], [0, 0, 1, 1], [], []>, precision = #tpu.contract_precision<fp32>} : vector<8x128xf32>, vector<128x128xf32>, vector<8x128xf32> -> vector<8x128xf32>
    %202 = vector.extract_strided_slice %201 {offsets = [0, 0], sizes = [8, 1], strides = [1, 1]} : vector<8x128xf32> to vector<8x1xf32>
    %cst_102 = arith.constant 1.562500e-02 : f32
    %203 = vector.broadcast %cst_102 : f32 to vector<8x1xf32>
    %204 = arith.mulf %199, %203 : vector<8x1xf32>
    %cst_103 = arith.constant 1.562500e-02 : f32
    %205 = vector.broadcast %cst_103 : f32 to vector<8x1xf32>
    %206 = arith.mulf %202, %205 : vector<8x1xf32>
    %207 = arith.mulf %204, %204 : vector<8x1xf32>
    %208 = arith.subf %206, %207 : vector<8x1xf32>
    %cst_104 = arith.constant 0.000000e+00 : f32
    %209 = vector.broadcast %cst_104 : f32 to vector<8x1xf32>
    %210 = arith.maximumf %208, %209 : vector<8x1xf32>
    %cst_105 = arith.constant 9.99999974E-6 : f32
    %211 = vector.broadcast %cst_105 : f32 to vector<8x1xf32>
    %212 = arith.addf %210, %211 : vector<8x1xf32>
    %213 = math.rsqrt %212 : vector<8x1xf32>
    %214 = arith.mulf %1, %213 : vector<8x1xf32>
    %215 = arith.mulf %204, %214 : vector<8x1xf32>
    %216 = arith.subf %2, %215 : vector<8x1xf32>
    %217 = vector.broadcast %214 : vector<8x1xf32> to vector<8x128xf32>
    %218 = arith.mulf %197, %217 : vector<8x128xf32>
    %219 = vector.broadcast %216 : vector<8x1xf32> to vector<8x128xf32>
    %220 = arith.addf %218, %219 : vector<8x128xf32>
    %cst_106 = arith.constant 0.000000e+00 : f32
    %221 = vector.broadcast %cst_106 : f32 to vector<8x128xf32>
    %222 = arith.maximumf %220, %221 : vector<8x128xf32>
    %223 = vector.broadcast %0 : vector<1x128xf32> to vector<8x128xf32>
    %224 = arith.mulf %222, %223 : vector<8x128xf32>
    %c13_i32_107 = arith.constant 13 : i32
    %225 = tpu.dynamic_rotate %224 by %c13_i32_107 dim 1 : vector<8x128xf32>, i32 -> vector<8x128xf32>
    %c0_108 = arith.constant 0 : index
    %c0_109 = arith.constant 0 : index
    %c0_110 = arith.constant 0 : index
    %226 = vector.load %arg3[%c0_108, %c0_109, %c0_110] : memref<27x8x8xbf16, #tpu.memory_space<vmem>>, vector<1x8x8xbf16>
    %227 = vector.shape_cast %226 : vector<1x8x8xbf16> to vector<8x8xbf16>
    %228 = arith.truncf %225 : vector<8x128xf32> to vector<8x128xbf16>
    %cst_111 = arith.constant dense<0.000000e+00> : vector<8x128xf32>
    %229 = tpu.matmul %227, %228, %cst_111 {dimension_numbers = #tpu.dot_dimension_numbers<[1], [0], [0], [1], [0, 0, 1, 1], [], []>} : vector<8x8xbf16>, vector<8x128xbf16>, vector<8x128xf32> -> vector<8x128xf32>
    %c12_i32_112 = arith.constant 12 : i32
    %230 = tpu.dynamic_rotate %224 by %c12_i32_112 dim 1 : vector<8x128xf32>, i32 -> vector<8x128xf32>
    %c1_113 = arith.constant 1 : index
    %c0_114 = arith.constant 0 : index
    %c0_115 = arith.constant 0 : index
    %231 = vector.load %arg3[%c1_113, %c0_114, %c0_115] : memref<27x8x8xbf16, #tpu.memory_space<vmem>>, vector<1x8x8xbf16>
    %232 = vector.shape_cast %231 : vector<1x8x8xbf16> to vector<8x8xbf16>
    %233 = arith.truncf %230 : vector<8x128xf32> to vector<8x128xbf16>
    %cst_116 = arith.constant dense<0.000000e+00> : vector<8x128xf32>
    %234 = tpu.matmul %232, %233, %cst_116 {dimension_numbers = #tpu.dot_dimension_numbers<[1], [0], [0], [1], [0, 0, 1, 1], [], []>} : vector<8x8xbf16>, vector<8x128xbf16>, vector<8x128xf32> -> vector<8x128xf32>
    %235 = arith.addf %229, %234 : vector<8x128xf32>
    %c11_i32_117 = arith.constant 11 : i32
    %236 = tpu.dynamic_rotate %224 by %c11_i32_117 dim 1 : vector<8x128xf32>, i32 -> vector<8x128xf32>
    %c2_118 = arith.constant 2 : index
    %c0_119 = arith.constant 0 : index
    %c0_120 = arith.constant 0 : index
    %237 = vector.load %arg3[%c2_118, %c0_119, %c0_120] : memref<27x8x8xbf16, #tpu.memory_space<vmem>>, vector<1x8x8xbf16>
    %238 = vector.shape_cast %237 : vector<1x8x8xbf16> to vector<8x8xbf16>
    %239 = arith.truncf %236 : vector<8x128xf32> to vector<8x128xbf16>
    %cst_121 = arith.constant dense<0.000000e+00> : vector<8x128xf32>
    %240 = tpu.matmul %238, %239, %cst_121 {dimension_numbers = #tpu.dot_dimension_numbers<[1], [0], [0], [1], [0, 0, 1, 1], [], []>} : vector<8x8xbf16>, vector<8x128xbf16>, vector<8x128xf32> -> vector<8x128xf32>
    %241 = arith.addf %235, %240 : vector<8x128xf32>
    %c10_i32_122 = arith.constant 10 : i32
    %242 = tpu.dynamic_rotate %224 by %c10_i32_122 dim 1 : vector<8x128xf32>, i32 -> vector<8x128xf32>
    %c3_123 = arith.constant 3 : index
    %c0_124 = arith.constant 0 : index
    %c0_125 = arith.constant 0 : index
    %243 = vector.load %arg3[%c3_123, %c0_124, %c0_125] : memref<27x8x8xbf16, #tpu.memory_space<vmem>>, vector<1x8x8xbf16>
    %244 = vector.shape_cast %243 : vector<1x8x8xbf16> to vector<8x8xbf16>
    %245 = arith.truncf %242 : vector<8x128xf32> to vector<8x128xbf16>
    %cst_126 = arith.constant dense<0.000000e+00> : vector<8x128xf32>
    %246 = tpu.matmul %244, %245, %cst_126 {dimension_numbers = #tpu.dot_dimension_numbers<[1], [0], [0], [1], [0, 0, 1, 1], [], []>} : vector<8x8xbf16>, vector<8x128xbf16>, vector<8x128xf32> -> vector<8x128xf32>
    %247 = arith.addf %241, %246 : vector<8x128xf32>
    %c9_i32_127 = arith.constant 9 : i32
    %248 = tpu.dynamic_rotate %224 by %c9_i32_127 dim 1 : vector<8x128xf32>, i32 -> vector<8x128xf32>
    %c4_128 = arith.constant 4 : index
    %c0_129 = arith.constant 0 : index
    %c0_130 = arith.constant 0 : index
    %249 = vector.load %arg3[%c4_128, %c0_129, %c0_130] : memref<27x8x8xbf16, #tpu.memory_space<vmem>>, vector<1x8x8xbf16>
    %250 = vector.shape_cast %249 : vector<1x8x8xbf16> to vector<8x8xbf16>
    %251 = arith.truncf %248 : vector<8x128xf32> to vector<8x128xbf16>
    %cst_131 = arith.constant dense<0.000000e+00> : vector<8x128xf32>
    %252 = tpu.matmul %250, %251, %cst_131 {dimension_numbers = #tpu.dot_dimension_numbers<[1], [0], [0], [1], [0, 0, 1, 1], [], []>} : vector<8x8xbf16>, vector<8x128xbf16>, vector<8x128xf32> -> vector<8x128xf32>
    %253 = arith.addf %247, %252 : vector<8x128xf32>
    %c8_i32_132 = arith.constant 8 : i32
    %254 = tpu.dynamic_rotate %224 by %c8_i32_132 dim 1 : vector<8x128xf32>, i32 -> vector<8x128xf32>
    %c5_133 = arith.constant 5 : index
    %c0_134 = arith.constant 0 : index
    %c0_135 = arith.constant 0 : index
    %255 = vector.load %arg3[%c5_133, %c0_134, %c0_135] : memref<27x8x8xbf16, #tpu.memory_space<vmem>>, vector<1x8x8xbf16>
    %256 = vector.shape_cast %255 : vector<1x8x8xbf16> to vector<8x8xbf16>
    %257 = arith.truncf %254 : vector<8x128xf32> to vector<8x128xbf16>
    %cst_136 = arith.constant dense<0.000000e+00> : vector<8x128xf32>
    %258 = tpu.matmul %256, %257, %cst_136 {dimension_numbers = #tpu.dot_dimension_numbers<[1], [0], [0], [1], [0, 0, 1, 1], [], []>} : vector<8x8xbf16>, vector<8x128xbf16>, vector<8x128xf32> -> vector<8x128xf32>
    %259 = arith.addf %253, %258 : vector<8x128xf32>
    %c7_i32_137 = arith.constant 7 : i32
    %260 = tpu.dynamic_rotate %224 by %c7_i32_137 dim 1 : vector<8x128xf32>, i32 -> vector<8x128xf32>
    %c6_138 = arith.constant 6 : index
    %c0_139 = arith.constant 0 : index
    %c0_140 = arith.constant 0 : index
    %261 = vector.load %arg3[%c6_138, %c0_139, %c0_140] : memref<27x8x8xbf16, #tpu.memory_space<vmem>>, vector<1x8x8xbf16>
    %262 = vector.shape_cast %261 : vector<1x8x8xbf16> to vector<8x8xbf16>
    %263 = arith.truncf %260 : vector<8x128xf32> to vector<8x128xbf16>
    %cst_141 = arith.constant dense<0.000000e+00> : vector<8x128xf32>
    %264 = tpu.matmul %262, %263, %cst_141 {dimension_numbers = #tpu.dot_dimension_numbers<[1], [0], [0], [1], [0, 0, 1, 1], [], []>} : vector<8x8xbf16>, vector<8x128xbf16>, vector<8x128xf32> -> vector<8x128xf32>
    %265 = arith.addf %259, %264 : vector<8x128xf32>
    %c6_i32_142 = arith.constant 6 : i32
    %266 = tpu.dynamic_rotate %224 by %c6_i32_142 dim 1 : vector<8x128xf32>, i32 -> vector<8x128xf32>
    %c7_143 = arith.constant 7 : index
    %c0_144 = arith.constant 0 : index
    %c0_145 = arith.constant 0 : index
    %267 = vector.load %arg3[%c7_143, %c0_144, %c0_145] : memref<27x8x8xbf16, #tpu.memory_space<vmem>>, vector<1x8x8xbf16>
    %268 = vector.shape_cast %267 : vector<1x8x8xbf16> to vector<8x8xbf16>
    %269 = arith.truncf %266 : vector<8x128xf32> to vector<8x128xbf16>
    %cst_146 = arith.constant dense<0.000000e+00> : vector<8x128xf32>
    %270 = tpu.matmul %268, %269, %cst_146 {dimension_numbers = #tpu.dot_dimension_numbers<[1], [0], [0], [1], [0, 0, 1, 1], [], []>} : vector<8x8xbf16>, vector<8x128xbf16>, vector<8x128xf32> -> vector<8x128xf32>
    %271 = arith.addf %265, %270 : vector<8x128xf32>
    %c5_i32_147 = arith.constant 5 : i32
    %272 = tpu.dynamic_rotate %224 by %c5_i32_147 dim 1 : vector<8x128xf32>, i32 -> vector<8x128xf32>
    %c8_148 = arith.constant 8 : index
    %c0_149 = arith.constant 0 : index
    %c0_150 = arith.constant 0 : index
    %273 = vector.load %arg3[%c8_148, %c0_149, %c0_150] : memref<27x8x8xbf16, #tpu.memory_space<vmem>>, vector<1x8x8xbf16>
    %274 = vector.shape_cast %273 : vector<1x8x8xbf16> to vector<8x8xbf16>
    %275 = arith.truncf %272 : vector<8x128xf32> to vector<8x128xbf16>
    %cst_151 = arith.constant dense<0.000000e+00> : vector<8x128xf32>
    %276 = tpu.matmul %274, %275, %cst_151 {dimension_numbers = #tpu.dot_dimension_numbers<[1], [0], [0], [1], [0, 0, 1, 1], [], []>} : vector<8x8xbf16>, vector<8x128xbf16>, vector<8x128xf32> -> vector<8x128xf32>
    %277 = arith.addf %271, %276 : vector<8x128xf32>
    %c4_i32_152 = arith.constant 4 : i32
    %278 = tpu.dynamic_rotate %224 by %c4_i32_152 dim 1 : vector<8x128xf32>, i32 -> vector<8x128xf32>
    %c9_153 = arith.constant 9 : index
    %c0_154 = arith.constant 0 : index
    %c0_155 = arith.constant 0 : index
    %279 = vector.load %arg3[%c9_153, %c0_154, %c0_155] : memref<27x8x8xbf16, #tpu.memory_space<vmem>>, vector<1x8x8xbf16>
    %280 = vector.shape_cast %279 : vector<1x8x8xbf16> to vector<8x8xbf16>
    %281 = arith.truncf %278 : vector<8x128xf32> to vector<8x128xbf16>
    %cst_156 = arith.constant dense<0.000000e+00> : vector<8x128xf32>
    %282 = tpu.matmul %280, %281, %cst_156 {dimension_numbers = #tpu.dot_dimension_numbers<[1], [0], [0], [1], [0, 0, 1, 1], [], []>} : vector<8x8xbf16>, vector<8x128xbf16>, vector<8x128xf32> -> vector<8x128xf32>
    %283 = arith.addf %277, %282 : vector<8x128xf32>
    %c3_i32_157 = arith.constant 3 : i32
    %284 = tpu.dynamic_rotate %224 by %c3_i32_157 dim 1 : vector<8x128xf32>, i32 -> vector<8x128xf32>
    %c10_158 = arith.constant 10 : index
    %c0_159 = arith.constant 0 : index
    %c0_160 = arith.constant 0 : index
    %285 = vector.load %arg3[%c10_158, %c0_159, %c0_160] : memref<27x8x8xbf16, #tpu.memory_space<vmem>>, vector<1x8x8xbf16>
    %286 = vector.shape_cast %285 : vector<1x8x8xbf16> to vector<8x8xbf16>
    %287 = arith.truncf %284 : vector<8x128xf32> to vector<8x128xbf16>
    %cst_161 = arith.constant dense<0.000000e+00> : vector<8x128xf32>
    %288 = tpu.matmul %286, %287, %cst_161 {dimension_numbers = #tpu.dot_dimension_numbers<[1], [0], [0], [1], [0, 0, 1, 1], [], []>} : vector<8x8xbf16>, vector<8x128xbf16>, vector<8x128xf32> -> vector<8x128xf32>
    %289 = arith.addf %283, %288 : vector<8x128xf32>
    %c2_i32_162 = arith.constant 2 : i32
    %290 = tpu.dynamic_rotate %224 by %c2_i32_162 dim 1 : vector<8x128xf32>, i32 -> vector<8x128xf32>
    %c11_163 = arith.constant 11 : index
    %c0_164 = arith.constant 0 : index
    %c0_165 = arith.constant 0 : index
    %291 = vector.load %arg3[%c11_163, %c0_164, %c0_165] : memref<27x8x8xbf16, #tpu.memory_space<vmem>>, vector<1x8x8xbf16>
    %292 = vector.shape_cast %291 : vector<1x8x8xbf16> to vector<8x8xbf16>
    %293 = arith.truncf %290 : vector<8x128xf32> to vector<8x128xbf16>
    %cst_166 = arith.constant dense<0.000000e+00> : vector<8x128xf32>
    %294 = tpu.matmul %292, %293, %cst_166 {dimension_numbers = #tpu.dot_dimension_numbers<[1], [0], [0], [1], [0, 0, 1, 1], [], []>} : vector<8x8xbf16>, vector<8x128xbf16>, vector<8x128xf32> -> vector<8x128xf32>
    %295 = arith.addf %289, %294 : vector<8x128xf32>
    %c1_i32_167 = arith.constant 1 : i32
    %296 = tpu.dynamic_rotate %224 by %c1_i32_167 dim 1 : vector<8x128xf32>, i32 -> vector<8x128xf32>
    %c12_168 = arith.constant 12 : index
    %c0_169 = arith.constant 0 : index
    %c0_170 = arith.constant 0 : index
    %297 = vector.load %arg3[%c12_168, %c0_169, %c0_170] : memref<27x8x8xbf16, #tpu.memory_space<vmem>>, vector<1x8x8xbf16>
    %298 = vector.shape_cast %297 : vector<1x8x8xbf16> to vector<8x8xbf16>
    %299 = arith.truncf %296 : vector<8x128xf32> to vector<8x128xbf16>
    %cst_171 = arith.constant dense<0.000000e+00> : vector<8x128xf32>
    %300 = tpu.matmul %298, %299, %cst_171 {dimension_numbers = #tpu.dot_dimension_numbers<[1], [0], [0], [1], [0, 0, 1, 1], [], []>} : vector<8x8xbf16>, vector<8x128xbf16>, vector<8x128xf32> -> vector<8x128xf32>
    %301 = arith.addf %295, %300 : vector<8x128xf32>
    %c13_172 = arith.constant 13 : index
    %c0_173 = arith.constant 0 : index
    %c0_174 = arith.constant 0 : index
    %302 = vector.load %arg3[%c13_172, %c0_173, %c0_174] : memref<27x8x8xbf16, #tpu.memory_space<vmem>>, vector<1x8x8xbf16>
    %303 = vector.shape_cast %302 : vector<1x8x8xbf16> to vector<8x8xbf16>
    %304 = arith.truncf %224 : vector<8x128xf32> to vector<8x128xbf16>
    %cst_175 = arith.constant dense<0.000000e+00> : vector<8x128xf32>
    %305 = tpu.matmul %303, %304, %cst_175 {dimension_numbers = #tpu.dot_dimension_numbers<[1], [0], [0], [1], [0, 0, 1, 1], [], []>} : vector<8x8xbf16>, vector<8x128xbf16>, vector<8x128xf32> -> vector<8x128xf32>
    %306 = arith.addf %301, %305 : vector<8x128xf32>
    %c127_i32_176 = arith.constant 127 : i32
    %307 = tpu.dynamic_rotate %224 by %c127_i32_176 dim 1 : vector<8x128xf32>, i32 -> vector<8x128xf32>
    %c14_177 = arith.constant 14 : index
    %c0_178 = arith.constant 0 : index
    %c0_179 = arith.constant 0 : index
    %308 = vector.load %arg3[%c14_177, %c0_178, %c0_179] : memref<27x8x8xbf16, #tpu.memory_space<vmem>>, vector<1x8x8xbf16>
    %309 = vector.shape_cast %308 : vector<1x8x8xbf16> to vector<8x8xbf16>
    %310 = arith.truncf %307 : vector<8x128xf32> to vector<8x128xbf16>
    %cst_180 = arith.constant dense<0.000000e+00> : vector<8x128xf32>
    %311 = tpu.matmul %309, %310, %cst_180 {dimension_numbers = #tpu.dot_dimension_numbers<[1], [0], [0], [1], [0, 0, 1, 1], [], []>} : vector<8x8xbf16>, vector<8x128xbf16>, vector<8x128xf32> -> vector<8x128xf32>
    %312 = arith.addf %306, %311 : vector<8x128xf32>
    %c126_i32_181 = arith.constant 126 : i32
    %313 = tpu.dynamic_rotate %224 by %c126_i32_181 dim 1 : vector<8x128xf32>, i32 -> vector<8x128xf32>
    %c15_182 = arith.constant 15 : index
    %c0_183 = arith.constant 0 : index
    %c0_184 = arith.constant 0 : index
    %314 = vector.load %arg3[%c15_182, %c0_183, %c0_184] : memref<27x8x8xbf16, #tpu.memory_space<vmem>>, vector<1x8x8xbf16>
    %315 = vector.shape_cast %314 : vector<1x8x8xbf16> to vector<8x8xbf16>
    %316 = arith.truncf %313 : vector<8x128xf32> to vector<8x128xbf16>
    %cst_185 = arith.constant dense<0.000000e+00> : vector<8x128xf32>
    %317 = tpu.matmul %315, %316, %cst_185 {dimension_numbers = #tpu.dot_dimension_numbers<[1], [0], [0], [1], [0, 0, 1, 1], [], []>} : vector<8x8xbf16>, vector<8x128xbf16>, vector<8x128xf32> -> vector<8x128xf32>
    %318 = arith.addf %312, %317 : vector<8x128xf32>
    %c125_i32_186 = arith.constant 125 : i32
    %319 = tpu.dynamic_rotate %224 by %c125_i32_186 dim 1 : vector<8x128xf32>, i32 -> vector<8x128xf32>
    %c16_187 = arith.constant 16 : index
    %c0_188 = arith.constant 0 : index
    %c0_189 = arith.constant 0 : index
    %320 = vector.load %arg3[%c16_187, %c0_188, %c0_189] : memref<27x8x8xbf16, #tpu.memory_space<vmem>>, vector<1x8x8xbf16>
    %321 = vector.shape_cast %320 : vector<1x8x8xbf16> to vector<8x8xbf16>
    %322 = arith.truncf %319 : vector<8x128xf32> to vector<8x128xbf16>
    %cst_190 = arith.constant dense<0.000000e+00> : vector<8x128xf32>
    %323 = tpu.matmul %321, %322, %cst_190 {dimension_numbers = #tpu.dot_dimension_numbers<[1], [0], [0], [1], [0, 0, 1, 1], [], []>} : vector<8x8xbf16>, vector<8x128xbf16>, vector<8x128xf32> -> vector<8x128xf32>
    %324 = arith.addf %318, %323 : vector<8x128xf32>
    %c124_i32_191 = arith.constant 124 : i32
    %325 = tpu.dynamic_rotate %224 by %c124_i32_191 dim 1 : vector<8x128xf32>, i32 -> vector<8x128xf32>
    %c17_192 = arith.constant 17 : index
    %c0_193 = arith.constant 0 : index
    %c0_194 = arith.constant 0 : index
    %326 = vector.load %arg3[%c17_192, %c0_193, %c0_194] : memref<27x8x8xbf16, #tpu.memory_space<vmem>>, vector<1x8x8xbf16>
    %327 = vector.shape_cast %326 : vector<1x8x8xbf16> to vector<8x8xbf16>
    %328 = arith.truncf %325 : vector<8x128xf32> to vector<8x128xbf16>
    %cst_195 = arith.constant dense<0.000000e+00> : vector<8x128xf32>
    %329 = tpu.matmul %327, %328, %cst_195 {dimension_numbers = #tpu.dot_dimension_numbers<[1], [0], [0], [1], [0, 0, 1, 1], [], []>} : vector<8x8xbf16>, vector<8x128xbf16>, vector<8x128xf32> -> vector<8x128xf32>
    %330 = arith.addf %324, %329 : vector<8x128xf32>
    %c123_i32_196 = arith.constant 123 : i32
    %331 = tpu.dynamic_rotate %224 by %c123_i32_196 dim 1 : vector<8x128xf32>, i32 -> vector<8x128xf32>
    %c18_197 = arith.constant 18 : index
    %c0_198 = arith.constant 0 : index
    %c0_199 = arith.constant 0 : index
    %332 = vector.load %arg3[%c18_197, %c0_198, %c0_199] : memref<27x8x8xbf16, #tpu.memory_space<vmem>>, vector<1x8x8xbf16>
    %333 = vector.shape_cast %332 : vector<1x8x8xbf16> to vector<8x8xbf16>
    %334 = arith.truncf %331 : vector<8x128xf32> to vector<8x128xbf16>
    %cst_200 = arith.constant dense<0.000000e+00> : vector<8x128xf32>
    %335 = tpu.matmul %333, %334, %cst_200 {dimension_numbers = #tpu.dot_dimension_numbers<[1], [0], [0], [1], [0, 0, 1, 1], [], []>} : vector<8x8xbf16>, vector<8x128xbf16>, vector<8x128xf32> -> vector<8x128xf32>
    %336 = arith.addf %330, %335 : vector<8x128xf32>
    %c122_i32_201 = arith.constant 122 : i32
    %337 = tpu.dynamic_rotate %224 by %c122_i32_201 dim 1 : vector<8x128xf32>, i32 -> vector<8x128xf32>
    %c19_202 = arith.constant 19 : index
    %c0_203 = arith.constant 0 : index
    %c0_204 = arith.constant 0 : index
    %338 = vector.load %arg3[%c19_202, %c0_203, %c0_204] : memref<27x8x8xbf16, #tpu.memory_space<vmem>>, vector<1x8x8xbf16>
    %339 = vector.shape_cast %338 : vector<1x8x8xbf16> to vector<8x8xbf16>
    %340 = arith.truncf %337 : vector<8x128xf32> to vector<8x128xbf16>
    %cst_205 = arith.constant dense<0.000000e+00> : vector<8x128xf32>
    %341 = tpu.matmul %339, %340, %cst_205 {dimension_numbers = #tpu.dot_dimension_numbers<[1], [0], [0], [1], [0, 0, 1, 1], [], []>} : vector<8x8xbf16>, vector<8x128xbf16>, vector<8x128xf32> -> vector<8x128xf32>
    %342 = arith.addf %336, %341 : vector<8x128xf32>
    %c121_i32_206 = arith.constant 121 : i32
    %343 = tpu.dynamic_rotate %224 by %c121_i32_206 dim 1 : vector<8x128xf32>, i32 -> vector<8x128xf32>
    %c20_207 = arith.constant 20 : index
    %c0_208 = arith.constant 0 : index
    %c0_209 = arith.constant 0 : index
    %344 = vector.load %arg3[%c20_207, %c0_208, %c0_209] : memref<27x8x8xbf16, #tpu.memory_space<vmem>>, vector<1x8x8xbf16>
    %345 = vector.shape_cast %344 : vector<1x8x8xbf16> to vector<8x8xbf16>
    %346 = arith.truncf %343 : vector<8x128xf32> to vector<8x128xbf16>
    %cst_210 = arith.constant dense<0.000000e+00> : vector<8x128xf32>
    %347 = tpu.matmul %345, %346, %cst_210 {dimension_numbers = #tpu.dot_dimension_numbers<[1], [0], [0], [1], [0, 0, 1, 1], [], []>} : vector<8x8xbf16>, vector<8x128xbf16>, vector<8x128xf32> -> vector<8x128xf32>
    %348 = arith.addf %342, %347 : vector<8x128xf32>
    %c120_i32_211 = arith.constant 120 : i32
    %349 = tpu.dynamic_rotate %224 by %c120_i32_211 dim 1 : vector<8x128xf32>, i32 -> vector<8x128xf32>
    %c21_212 = arith.constant 21 : index
    %c0_213 = arith.constant 0 : index
    %c0_214 = arith.constant 0 : index
    %350 = vector.load %arg3[%c21_212, %c0_213, %c0_214] : memref<27x8x8xbf16, #tpu.memory_space<vmem>>, vector<1x8x8xbf16>
    %351 = vector.shape_cast %350 : vector<1x8x8xbf16> to vector<8x8xbf16>
    %352 = arith.truncf %349 : vector<8x128xf32> to vector<8x128xbf16>
    %cst_215 = arith.constant dense<0.000000e+00> : vector<8x128xf32>
    %353 = tpu.matmul %351, %352, %cst_215 {dimension_numbers = #tpu.dot_dimension_numbers<[1], [0], [0], [1], [0, 0, 1, 1], [], []>} : vector<8x8xbf16>, vector<8x128xbf16>, vector<8x128xf32> -> vector<8x128xf32>
    %354 = arith.addf %348, %353 : vector<8x128xf32>
    %c119_i32_216 = arith.constant 119 : i32
    %355 = tpu.dynamic_rotate %224 by %c119_i32_216 dim 1 : vector<8x128xf32>, i32 -> vector<8x128xf32>
    %c22_217 = arith.constant 22 : index
    %c0_218 = arith.constant 0 : index
    %c0_219 = arith.constant 0 : index
    %356 = vector.load %arg3[%c22_217, %c0_218, %c0_219] : memref<27x8x8xbf16, #tpu.memory_space<vmem>>, vector<1x8x8xbf16>
    %357 = vector.shape_cast %356 : vector<1x8x8xbf16> to vector<8x8xbf16>
    %358 = arith.truncf %355 : vector<8x128xf32> to vector<8x128xbf16>
    %cst_220 = arith.constant dense<0.000000e+00> : vector<8x128xf32>
    %359 = tpu.matmul %357, %358, %cst_220 {dimension_numbers = #tpu.dot_dimension_numbers<[1], [0], [0], [1], [0, 0, 1, 1], [], []>} : vector<8x8xbf16>, vector<8x128xbf16>, vector<8x128xf32> -> vector<8x128xf32>
    %360 = arith.addf %354, %359 : vector<8x128xf32>
    %c118_i32_221 = arith.constant 118 : i32
    %361 = tpu.dynamic_rotate %224 by %c118_i32_221 dim 1 : vector<8x128xf32>, i32 -> vector<8x128xf32>
    %c23_222 = arith.constant 23 : index
    %c0_223 = arith.constant 0 : index
    %c0_224 = arith.constant 0 : index
    %362 = vector.load %arg3[%c23_222, %c0_223, %c0_224] : memref<27x8x8xbf16, #tpu.memory_space<vmem>>, vector<1x8x8xbf16>
    %363 = vector.shape_cast %362 : vector<1x8x8xbf16> to vector<8x8xbf16>
    %364 = arith.truncf %361 : vector<8x128xf32> to vector<8x128xbf16>
    %cst_225 = arith.constant dense<0.000000e+00> : vector<8x128xf32>
    %365 = tpu.matmul %363, %364, %cst_225 {dimension_numbers = #tpu.dot_dimension_numbers<[1], [0], [0], [1], [0, 0, 1, 1], [], []>} : vector<8x8xbf16>, vector<8x128xbf16>, vector<8x128xf32> -> vector<8x128xf32>
    %366 = arith.addf %360, %365 : vector<8x128xf32>
    %c117_i32_226 = arith.constant 117 : i32
    %367 = tpu.dynamic_rotate %224 by %c117_i32_226 dim 1 : vector<8x128xf32>, i32 -> vector<8x128xf32>
    %c24_227 = arith.constant 24 : index
    %c0_228 = arith.constant 0 : index
    %c0_229 = arith.constant 0 : index
    %368 = vector.load %arg3[%c24_227, %c0_228, %c0_229] : memref<27x8x8xbf16, #tpu.memory_space<vmem>>, vector<1x8x8xbf16>
    %369 = vector.shape_cast %368 : vector<1x8x8xbf16> to vector<8x8xbf16>
    %370 = arith.truncf %367 : vector<8x128xf32> to vector<8x128xbf16>
    %cst_230 = arith.constant dense<0.000000e+00> : vector<8x128xf32>
    %371 = tpu.matmul %369, %370, %cst_230 {dimension_numbers = #tpu.dot_dimension_numbers<[1], [0], [0], [1], [0, 0, 1, 1], [], []>} : vector<8x8xbf16>, vector<8x128xbf16>, vector<8x128xf32> -> vector<8x128xf32>
    %372 = arith.addf %366, %371 : vector<8x128xf32>
    %c116_i32_231 = arith.constant 116 : i32
    %373 = tpu.dynamic_rotate %224 by %c116_i32_231 dim 1 : vector<8x128xf32>, i32 -> vector<8x128xf32>
    %c25_232 = arith.constant 25 : index
    %c0_233 = arith.constant 0 : index
    %c0_234 = arith.constant 0 : index
    %374 = vector.load %arg3[%c25_232, %c0_233, %c0_234] : memref<27x8x8xbf16, #tpu.memory_space<vmem>>, vector<1x8x8xbf16>
    %375 = vector.shape_cast %374 : vector<1x8x8xbf16> to vector<8x8xbf16>
    %376 = arith.truncf %373 : vector<8x128xf32> to vector<8x128xbf16>
    %cst_235 = arith.constant dense<0.000000e+00> : vector<8x128xf32>
    %377 = tpu.matmul %375, %376, %cst_235 {dimension_numbers = #tpu.dot_dimension_numbers<[1], [0], [0], [1], [0, 0, 1, 1], [], []>} : vector<8x8xbf16>, vector<8x128xbf16>, vector<8x128xf32> -> vector<8x128xf32>
    %378 = arith.addf %372, %377 : vector<8x128xf32>
    %c115_i32_236 = arith.constant 115 : i32
    %379 = tpu.dynamic_rotate %224 by %c115_i32_236 dim 1 : vector<8x128xf32>, i32 -> vector<8x128xf32>
    %c26_237 = arith.constant 26 : index
    %c0_238 = arith.constant 0 : index
    %c0_239 = arith.constant 0 : index
    %380 = vector.load %arg3[%c26_237, %c0_238, %c0_239] : memref<27x8x8xbf16, #tpu.memory_space<vmem>>, vector<1x8x8xbf16>
    %381 = vector.shape_cast %380 : vector<1x8x8xbf16> to vector<8x8xbf16>
    %382 = arith.truncf %379 : vector<8x128xf32> to vector<8x128xbf16>
    %cst_240 = arith.constant dense<0.000000e+00> : vector<8x128xf32>
    %383 = tpu.matmul %381, %382, %cst_240 {dimension_numbers = #tpu.dot_dimension_numbers<[1], [0], [0], [1], [0, 0, 1, 1], [], []>} : vector<8x8xbf16>, vector<8x128xbf16>, vector<8x128xf32> -> vector<8x128xf32>
    %384 = arith.addf %378, %383 : vector<8x128xf32>
    %385 = vector.broadcast %6 : vector<8x1xf32> to vector<8x128xf32>
    %386 = arith.addf %384, %385 : vector<8x128xf32>
    %387 = vector.broadcast %0 : vector<1x128xf32> to vector<8x128xf32>
    %388 = arith.mulf %386, %387 : vector<8x128xf32>
    %cst_241 = arith.constant dense<0.000000e+00> : vector<8x128xf32>
    %389 = tpu.matmul %388, %4, %cst_241 {dimension_numbers = #tpu.dot_dimension_numbers<[1], [0], [0], [1], [0, 0, 1, 1], [], []>, precision = #tpu.contract_precision<fp32>} : vector<8x128xf32>, vector<128x128xf32>, vector<8x128xf32> -> vector<8x128xf32>
    %390 = vector.extract_strided_slice %389 {offsets = [0, 0], sizes = [8, 1], strides = [1, 1]} : vector<8x128xf32> to vector<8x1xf32>
    %391 = arith.mulf %388, %388 : vector<8x128xf32>
    %cst_242 = arith.constant dense<0.000000e+00> : vector<8x128xf32>
    %392 = tpu.matmul %391, %4, %cst_242 {dimension_numbers = #tpu.dot_dimension_numbers<[1], [0], [0], [1], [0, 0, 1, 1], [], []>, precision = #tpu.contract_precision<fp32>} : vector<8x128xf32>, vector<128x128xf32>, vector<8x128xf32> -> vector<8x128xf32>
    %393 = vector.extract_strided_slice %392 {offsets = [0, 0], sizes = [8, 1], strides = [1, 1]} : vector<8x128xf32> to vector<8x1xf32>
    %cst_243 = arith.constant 1.562500e-02 : f32
    %394 = vector.broadcast %cst_243 : f32 to vector<8x1xf32>
    %395 = arith.mulf %390, %394 : vector<8x1xf32>
    %cst_244 = arith.constant 1.562500e-02 : f32
    %396 = vector.broadcast %cst_244 : f32 to vector<8x1xf32>
    %397 = arith.mulf %393, %396 : vector<8x1xf32>
    %398 = arith.mulf %395, %395 : vector<8x1xf32>
    %399 = arith.subf %397, %398 : vector<8x1xf32>
    %cst_245 = arith.constant 0.000000e+00 : f32
    %400 = vector.broadcast %cst_245 : f32 to vector<8x1xf32>
    %401 = arith.maximumf %399, %400 : vector<8x1xf32>
    %cst_246 = arith.constant 9.99999974E-6 : f32
    %402 = vector.broadcast %cst_246 : f32 to vector<8x1xf32>
    %403 = arith.addf %401, %402 : vector<8x1xf32>
    %404 = math.rsqrt %403 : vector<8x1xf32>
    %405 = arith.mulf %1, %404 : vector<8x1xf32>
    %406 = arith.mulf %395, %405 : vector<8x1xf32>
    %407 = arith.subf %2, %406 : vector<8x1xf32>
    %408 = vector.broadcast %405 : vector<8x1xf32> to vector<8x128xf32>
    %409 = arith.mulf %388, %408 : vector<8x128xf32>
    %410 = vector.broadcast %407 : vector<8x1xf32> to vector<8x128xf32>
    %411 = arith.addf %409, %410 : vector<8x128xf32>
    %cst_247 = arith.constant 0.000000e+00 : f32
    %412 = vector.broadcast %cst_247 : f32 to vector<8x128xf32>
    %413 = arith.maximumf %411, %412 : vector<8x128xf32>
    %414 = vector.broadcast %0 : vector<1x128xf32> to vector<8x128xf32>
    %415 = arith.mulf %413, %414 : vector<8x128xf32>
    %c13_i32_248 = arith.constant 13 : i32
    %416 = tpu.dynamic_rotate %415 by %c13_i32_248 dim 1 : vector<8x128xf32>, i32 -> vector<8x128xf32>
    %c0_249 = arith.constant 0 : index
    %c0_250 = arith.constant 0 : index
    %c0_251 = arith.constant 0 : index
    %417 = vector.load %arg1[%c0_249, %c0_250, %c0_251] : memref<27x8x8xbf16, #tpu.memory_space<vmem>>, vector<1x8x8xbf16>
    %418 = vector.shape_cast %417 : vector<1x8x8xbf16> to vector<8x8xbf16>
    %419 = arith.truncf %416 : vector<8x128xf32> to vector<8x128xbf16>
    %cst_252 = arith.constant dense<0.000000e+00> : vector<8x128xf32>
    %420 = tpu.matmul %418, %419, %cst_252 {dimension_numbers = #tpu.dot_dimension_numbers<[1], [0], [0], [1], [0, 0, 1, 1], [], []>} : vector<8x8xbf16>, vector<8x128xbf16>, vector<8x128xf32> -> vector<8x128xf32>
    %c12_i32_253 = arith.constant 12 : i32
    %421 = tpu.dynamic_rotate %415 by %c12_i32_253 dim 1 : vector<8x128xf32>, i32 -> vector<8x128xf32>
    %c1_254 = arith.constant 1 : index
    %c0_255 = arith.constant 0 : index
    %c0_256 = arith.constant 0 : index
    %422 = vector.load %arg1[%c1_254, %c0_255, %c0_256] : memref<27x8x8xbf16, #tpu.memory_space<vmem>>, vector<1x8x8xbf16>
    %423 = vector.shape_cast %422 : vector<1x8x8xbf16> to vector<8x8xbf16>
    %424 = arith.truncf %421 : vector<8x128xf32> to vector<8x128xbf16>
    %cst_257 = arith.constant dense<0.000000e+00> : vector<8x128xf32>
    %425 = tpu.matmul %423, %424, %cst_257 {dimension_numbers = #tpu.dot_dimension_numbers<[1], [0], [0], [1], [0, 0, 1, 1], [], []>} : vector<8x8xbf16>, vector<8x128xbf16>, vector<8x128xf32> -> vector<8x128xf32>
    %426 = arith.addf %420, %425 : vector<8x128xf32>
    %c11_i32_258 = arith.constant 11 : i32
    %427 = tpu.dynamic_rotate %415 by %c11_i32_258 dim 1 : vector<8x128xf32>, i32 -> vector<8x128xf32>
    %c2_259 = arith.constant 2 : index
    %c0_260 = arith.constant 0 : index
    %c0_261 = arith.constant 0 : index
    %428 = vector.load %arg1[%c2_259, %c0_260, %c0_261] : memref<27x8x8xbf16, #tpu.memory_space<vmem>>, vector<1x8x8xbf16>
    %429 = vector.shape_cast %428 : vector<1x8x8xbf16> to vector<8x8xbf16>
    %430 = arith.truncf %427 : vector<8x128xf32> to vector<8x128xbf16>
    %cst_262 = arith.constant dense<0.000000e+00> : vector<8x128xf32>
    %431 = tpu.matmul %429, %430, %cst_262 {dimension_numbers = #tpu.dot_dimension_numbers<[1], [0], [0], [1], [0, 0, 1, 1], [], []>} : vector<8x8xbf16>, vector<8x128xbf16>, vector<8x128xf32> -> vector<8x128xf32>
    %432 = arith.addf %426, %431 : vector<8x128xf32>
    %c10_i32_263 = arith.constant 10 : i32
    %433 = tpu.dynamic_rotate %415 by %c10_i32_263 dim 1 : vector<8x128xf32>, i32 -> vector<8x128xf32>
    %c3_264 = arith.constant 3 : index
    %c0_265 = arith.constant 0 : index
    %c0_266 = arith.constant 0 : index
    %434 = vector.load %arg1[%c3_264, %c0_265, %c0_266] : memref<27x8x8xbf16, #tpu.memory_space<vmem>>, vector<1x8x8xbf16>
    %435 = vector.shape_cast %434 : vector<1x8x8xbf16> to vector<8x8xbf16>
    %436 = arith.truncf %433 : vector<8x128xf32> to vector<8x128xbf16>
    %cst_267 = arith.constant dense<0.000000e+00> : vector<8x128xf32>
    %437 = tpu.matmul %435, %436, %cst_267 {dimension_numbers = #tpu.dot_dimension_numbers<[1], [0], [0], [1], [0, 0, 1, 1], [], []>} : vector<8x8xbf16>, vector<8x128xbf16>, vector<8x128xf32> -> vector<8x128xf32>
    %438 = arith.addf %432, %437 : vector<8x128xf32>
    %c9_i32_268 = arith.constant 9 : i32
    %439 = tpu.dynamic_rotate %415 by %c9_i32_268 dim 1 : vector<8x128xf32>, i32 -> vector<8x128xf32>
    %c4_269 = arith.constant 4 : index
    %c0_270 = arith.constant 0 : index
    %c0_271 = arith.constant 0 : index
    %440 = vector.load %arg1[%c4_269, %c0_270, %c0_271] : memref<27x8x8xbf16, #tpu.memory_space<vmem>>, vector<1x8x8xbf16>
    %441 = vector.shape_cast %440 : vector<1x8x8xbf16> to vector<8x8xbf16>
    %442 = arith.truncf %439 : vector<8x128xf32> to vector<8x128xbf16>
    %cst_272 = arith.constant dense<0.000000e+00> : vector<8x128xf32>
    %443 = tpu.matmul %441, %442, %cst_272 {dimension_numbers = #tpu.dot_dimension_numbers<[1], [0], [0], [1], [0, 0, 1, 1], [], []>} : vector<8x8xbf16>, vector<8x128xbf16>, vector<8x128xf32> -> vector<8x128xf32>
    %444 = arith.addf %438, %443 : vector<8x128xf32>
    %c8_i32_273 = arith.constant 8 : i32
    %445 = tpu.dynamic_rotate %415 by %c8_i32_273 dim 1 : vector<8x128xf32>, i32 -> vector<8x128xf32>
    %c5_274 = arith.constant 5 : index
    %c0_275 = arith.constant 0 : index
    %c0_276 = arith.constant 0 : index
    %446 = vector.load %arg1[%c5_274, %c0_275, %c0_276] : memref<27x8x8xbf16, #tpu.memory_space<vmem>>, vector<1x8x8xbf16>
    %447 = vector.shape_cast %446 : vector<1x8x8xbf16> to vector<8x8xbf16>
    %448 = arith.truncf %445 : vector<8x128xf32> to vector<8x128xbf16>
    %cst_277 = arith.constant dense<0.000000e+00> : vector<8x128xf32>
    %449 = tpu.matmul %447, %448, %cst_277 {dimension_numbers = #tpu.dot_dimension_numbers<[1], [0], [0], [1], [0, 0, 1, 1], [], []>} : vector<8x8xbf16>, vector<8x128xbf16>, vector<8x128xf32> -> vector<8x128xf32>
    %450 = arith.addf %444, %449 : vector<8x128xf32>
    %c7_i32_278 = arith.constant 7 : i32
    %451 = tpu.dynamic_rotate %415 by %c7_i32_278 dim 1 : vector<8x128xf32>, i32 -> vector<8x128xf32>
    %c6_279 = arith.constant 6 : index
    %c0_280 = arith.constant 0 : index
    %c0_281 = arith.constant 0 : index
    %452 = vector.load %arg1[%c6_279, %c0_280, %c0_281] : memref<27x8x8xbf16, #tpu.memory_space<vmem>>, vector<1x8x8xbf16>
    %453 = vector.shape_cast %452 : vector<1x8x8xbf16> to vector<8x8xbf16>
    %454 = arith.truncf %451 : vector<8x128xf32> to vector<8x128xbf16>
    %cst_282 = arith.constant dense<0.000000e+00> : vector<8x128xf32>
    %455 = tpu.matmul %453, %454, %cst_282 {dimension_numbers = #tpu.dot_dimension_numbers<[1], [0], [0], [1], [0, 0, 1, 1], [], []>} : vector<8x8xbf16>, vector<8x128xbf16>, vector<8x128xf32> -> vector<8x128xf32>
    %456 = arith.addf %450, %455 : vector<8x128xf32>
    %c6_i32_283 = arith.constant 6 : i32
    %457 = tpu.dynamic_rotate %415 by %c6_i32_283 dim 1 : vector<8x128xf32>, i32 -> vector<8x128xf32>
    %c7_284 = arith.constant 7 : index
    %c0_285 = arith.constant 0 : index
    %c0_286 = arith.constant 0 : index
    %458 = vector.load %arg1[%c7_284, %c0_285, %c0_286] : memref<27x8x8xbf16, #tpu.memory_space<vmem>>, vector<1x8x8xbf16>
    %459 = vector.shape_cast %458 : vector<1x8x8xbf16> to vector<8x8xbf16>
    %460 = arith.truncf %457 : vector<8x128xf32> to vector<8x128xbf16>
    %cst_287 = arith.constant dense<0.000000e+00> : vector<8x128xf32>
    %461 = tpu.matmul %459, %460, %cst_287 {dimension_numbers = #tpu.dot_dimension_numbers<[1], [0], [0], [1], [0, 0, 1, 1], [], []>} : vector<8x8xbf16>, vector<8x128xbf16>, vector<8x128xf32> -> vector<8x128xf32>
    %462 = arith.addf %456, %461 : vector<8x128xf32>
    %c5_i32_288 = arith.constant 5 : i32
    %463 = tpu.dynamic_rotate %415 by %c5_i32_288 dim 1 : vector<8x128xf32>, i32 -> vector<8x128xf32>
    %c8_289 = arith.constant 8 : index
    %c0_290 = arith.constant 0 : index
    %c0_291 = arith.constant 0 : index
    %464 = vector.load %arg1[%c8_289, %c0_290, %c0_291] : memref<27x8x8xbf16, #tpu.memory_space<vmem>>, vector<1x8x8xbf16>
    %465 = vector.shape_cast %464 : vector<1x8x8xbf16> to vector<8x8xbf16>
    %466 = arith.truncf %463 : vector<8x128xf32> to vector<8x128xbf16>
    %cst_292 = arith.constant dense<0.000000e+00> : vector<8x128xf32>
    %467 = tpu.matmul %465, %466, %cst_292 {dimension_numbers = #tpu.dot_dimension_numbers<[1], [0], [0], [1], [0, 0, 1, 1], [], []>} : vector<8x8xbf16>, vector<8x128xbf16>, vector<8x128xf32> -> vector<8x128xf32>
    %468 = arith.addf %462, %467 : vector<8x128xf32>
    %c4_i32_293 = arith.constant 4 : i32
    %469 = tpu.dynamic_rotate %415 by %c4_i32_293 dim 1 : vector<8x128xf32>, i32 -> vector<8x128xf32>
    %c9_294 = arith.constant 9 : index
    %c0_295 = arith.constant 0 : index
    %c0_296 = arith.constant 0 : index
    %470 = vector.load %arg1[%c9_294, %c0_295, %c0_296] : memref<27x8x8xbf16, #tpu.memory_space<vmem>>, vector<1x8x8xbf16>
    %471 = vector.shape_cast %470 : vector<1x8x8xbf16> to vector<8x8xbf16>
    %472 = arith.truncf %469 : vector<8x128xf32> to vector<8x128xbf16>
    %cst_297 = arith.constant dense<0.000000e+00> : vector<8x128xf32>
    %473 = tpu.matmul %471, %472, %cst_297 {dimension_numbers = #tpu.dot_dimension_numbers<[1], [0], [0], [1], [0, 0, 1, 1], [], []>} : vector<8x8xbf16>, vector<8x128xbf16>, vector<8x128xf32> -> vector<8x128xf32>
    %474 = arith.addf %468, %473 : vector<8x128xf32>
    %c3_i32_298 = arith.constant 3 : i32
    %475 = tpu.dynamic_rotate %415 by %c3_i32_298 dim 1 : vector<8x128xf32>, i32 -> vector<8x128xf32>
    %c10_299 = arith.constant 10 : index
    %c0_300 = arith.constant 0 : index
    %c0_301 = arith.constant 0 : index
    %476 = vector.load %arg1[%c10_299, %c0_300, %c0_301] : memref<27x8x8xbf16, #tpu.memory_space<vmem>>, vector<1x8x8xbf16>
    %477 = vector.shape_cast %476 : vector<1x8x8xbf16> to vector<8x8xbf16>
    %478 = arith.truncf %475 : vector<8x128xf32> to vector<8x128xbf16>
    %cst_302 = arith.constant dense<0.000000e+00> : vector<8x128xf32>
    %479 = tpu.matmul %477, %478, %cst_302 {dimension_numbers = #tpu.dot_dimension_numbers<[1], [0], [0], [1], [0, 0, 1, 1], [], []>} : vector<8x8xbf16>, vector<8x128xbf16>, vector<8x128xf32> -> vector<8x128xf32>
    %480 = arith.addf %474, %479 : vector<8x128xf32>
    %c2_i32_303 = arith.constant 2 : i32
    %481 = tpu.dynamic_rotate %415 by %c2_i32_303 dim 1 : vector<8x128xf32>, i32 -> vector<8x128xf32>
    %c11_304 = arith.constant 11 : index
    %c0_305 = arith.constant 0 : index
    %c0_306 = arith.constant 0 : index
    %482 = vector.load %arg1[%c11_304, %c0_305, %c0_306] : memref<27x8x8xbf16, #tpu.memory_space<vmem>>, vector<1x8x8xbf16>
    %483 = vector.shape_cast %482 : vector<1x8x8xbf16> to vector<8x8xbf16>
    %484 = arith.truncf %481 : vector<8x128xf32> to vector<8x128xbf16>
    %cst_307 = arith.constant dense<0.000000e+00> : vector<8x128xf32>
    %485 = tpu.matmul %483, %484, %cst_307 {dimension_numbers = #tpu.dot_dimension_numbers<[1], [0], [0], [1], [0, 0, 1, 1], [], []>} : vector<8x8xbf16>, vector<8x128xbf16>, vector<8x128xf32> -> vector<8x128xf32>
    %486 = arith.addf %480, %485 : vector<8x128xf32>
    %c1_i32_308 = arith.constant 1 : i32
    %487 = tpu.dynamic_rotate %415 by %c1_i32_308 dim 1 : vector<8x128xf32>, i32 -> vector<8x128xf32>
    %c12_309 = arith.constant 12 : index
    %c0_310 = arith.constant 0 : index
    %c0_311 = arith.constant 0 : index
    %488 = vector.load %arg1[%c12_309, %c0_310, %c0_311] : memref<27x8x8xbf16, #tpu.memory_space<vmem>>, vector<1x8x8xbf16>
    %489 = vector.shape_cast %488 : vector<1x8x8xbf16> to vector<8x8xbf16>
    %490 = arith.truncf %487 : vector<8x128xf32> to vector<8x128xbf16>
    %cst_312 = arith.constant dense<0.000000e+00> : vector<8x128xf32>
    %491 = tpu.matmul %489, %490, %cst_312 {dimension_numbers = #tpu.dot_dimension_numbers<[1], [0], [0], [1], [0, 0, 1, 1], [], []>} : vector<8x8xbf16>, vector<8x128xbf16>, vector<8x128xf32> -> vector<8x128xf32>
    %492 = arith.addf %486, %491 : vector<8x128xf32>
    %c13_313 = arith.constant 13 : index
    %c0_314 = arith.constant 0 : index
    %c0_315 = arith.constant 0 : index
    %493 = vector.load %arg1[%c13_313, %c0_314, %c0_315] : memref<27x8x8xbf16, #tpu.memory_space<vmem>>, vector<1x8x8xbf16>
    %494 = vector.shape_cast %493 : vector<1x8x8xbf16> to vector<8x8xbf16>
    %495 = arith.truncf %415 : vector<8x128xf32> to vector<8x128xbf16>
    %cst_316 = arith.constant dense<0.000000e+00> : vector<8x128xf32>
    %496 = tpu.matmul %494, %495, %cst_316 {dimension_numbers = #tpu.dot_dimension_numbers<[1], [0], [0], [1], [0, 0, 1, 1], [], []>} : vector<8x8xbf16>, vector<8x128xbf16>, vector<8x128xf32> -> vector<8x128xf32>
    %497 = arith.addf %492, %496 : vector<8x128xf32>
    %c127_i32_317 = arith.constant 127 : i32
    %498 = tpu.dynamic_rotate %415 by %c127_i32_317 dim 1 : vector<8x128xf32>, i32 -> vector<8x128xf32>
    %c14_318 = arith.constant 14 : index
    %c0_319 = arith.constant 0 : index
    %c0_320 = arith.constant 0 : index
    %499 = vector.load %arg1[%c14_318, %c0_319, %c0_320] : memref<27x8x8xbf16, #tpu.memory_space<vmem>>, vector<1x8x8xbf16>
    %500 = vector.shape_cast %499 : vector<1x8x8xbf16> to vector<8x8xbf16>
    %501 = arith.truncf %498 : vector<8x128xf32> to vector<8x128xbf16>
    %cst_321 = arith.constant dense<0.000000e+00> : vector<8x128xf32>
    %502 = tpu.matmul %500, %501, %cst_321 {dimension_numbers = #tpu.dot_dimension_numbers<[1], [0], [0], [1], [0, 0, 1, 1], [], []>} : vector<8x8xbf16>, vector<8x128xbf16>, vector<8x128xf32> -> vector<8x128xf32>
    %503 = arith.addf %497, %502 : vector<8x128xf32>
    %c126_i32_322 = arith.constant 126 : i32
    %504 = tpu.dynamic_rotate %415 by %c126_i32_322 dim 1 : vector<8x128xf32>, i32 -> vector<8x128xf32>
    %c15_323 = arith.constant 15 : index
    %c0_324 = arith.constant 0 : index
    %c0_325 = arith.constant 0 : index
    %505 = vector.load %arg1[%c15_323, %c0_324, %c0_325] : memref<27x8x8xbf16, #tpu.memory_space<vmem>>, vector<1x8x8xbf16>
    %506 = vector.shape_cast %505 : vector<1x8x8xbf16> to vector<8x8xbf16>
    %507 = arith.truncf %504 : vector<8x128xf32> to vector<8x128xbf16>
    %cst_326 = arith.constant dense<0.000000e+00> : vector<8x128xf32>
    %508 = tpu.matmul %506, %507, %cst_326 {dimension_numbers = #tpu.dot_dimension_numbers<[1], [0], [0], [1], [0, 0, 1, 1], [], []>} : vector<8x8xbf16>, vector<8x128xbf16>, vector<8x128xf32> -> vector<8x128xf32>
    %509 = arith.addf %503, %508 : vector<8x128xf32>
    %c125_i32_327 = arith.constant 125 : i32
    %510 = tpu.dynamic_rotate %415 by %c125_i32_327 dim 1 : vector<8x128xf32>, i32 -> vector<8x128xf32>
    %c16_328 = arith.constant 16 : index
    %c0_329 = arith.constant 0 : index
    %c0_330 = arith.constant 0 : index
    %511 = vector.load %arg1[%c16_328, %c0_329, %c0_330] : memref<27x8x8xbf16, #tpu.memory_space<vmem>>, vector<1x8x8xbf16>
    %512 = vector.shape_cast %511 : vector<1x8x8xbf16> to vector<8x8xbf16>
    %513 = arith.truncf %510 : vector<8x128xf32> to vector<8x128xbf16>
    %cst_331 = arith.constant dense<0.000000e+00> : vector<8x128xf32>
    %514 = tpu.matmul %512, %513, %cst_331 {dimension_numbers = #tpu.dot_dimension_numbers<[1], [0], [0], [1], [0, 0, 1, 1], [], []>} : vector<8x8xbf16>, vector<8x128xbf16>, vector<8x128xf32> -> vector<8x128xf32>
    %515 = arith.addf %509, %514 : vector<8x128xf32>
    %c124_i32_332 = arith.constant 124 : i32
    %516 = tpu.dynamic_rotate %415 by %c124_i32_332 dim 1 : vector<8x128xf32>, i32 -> vector<8x128xf32>
    %c17_333 = arith.constant 17 : index
    %c0_334 = arith.constant 0 : index
    %c0_335 = arith.constant 0 : index
    %517 = vector.load %arg1[%c17_333, %c0_334, %c0_335] : memref<27x8x8xbf16, #tpu.memory_space<vmem>>, vector<1x8x8xbf16>
    %518 = vector.shape_cast %517 : vector<1x8x8xbf16> to vector<8x8xbf16>
    %519 = arith.truncf %516 : vector<8x128xf32> to vector<8x128xbf16>
    %cst_336 = arith.constant dense<0.000000e+00> : vector<8x128xf32>
    %520 = tpu.matmul %518, %519, %cst_336 {dimension_numbers = #tpu.dot_dimension_numbers<[1], [0], [0], [1], [0, 0, 1, 1], [], []>} : vector<8x8xbf16>, vector<8x128xbf16>, vector<8x128xf32> -> vector<8x128xf32>
    %521 = arith.addf %515, %520 : vector<8x128xf32>
    %c123_i32_337 = arith.constant 123 : i32
    %522 = tpu.dynamic_rotate %415 by %c123_i32_337 dim 1 : vector<8x128xf32>, i32 -> vector<8x128xf32>
    %c18_338 = arith.constant 18 : index
    %c0_339 = arith.constant 0 : index
    %c0_340 = arith.constant 0 : index
    %523 = vector.load %arg1[%c18_338, %c0_339, %c0_340] : memref<27x8x8xbf16, #tpu.memory_space<vmem>>, vector<1x8x8xbf16>
    %524 = vector.shape_cast %523 : vector<1x8x8xbf16> to vector<8x8xbf16>
    %525 = arith.truncf %522 : vector<8x128xf32> to vector<8x128xbf16>
    %cst_341 = arith.constant dense<0.000000e+00> : vector<8x128xf32>
    %526 = tpu.matmul %524, %525, %cst_341 {dimension_numbers = #tpu.dot_dimension_numbers<[1], [0], [0], [1], [0, 0, 1, 1], [], []>} : vector<8x8xbf16>, vector<8x128xbf16>, vector<8x128xf32> -> vector<8x128xf32>
    %527 = arith.addf %521, %526 : vector<8x128xf32>
    %c122_i32_342 = arith.constant 122 : i32
    %528 = tpu.dynamic_rotate %415 by %c122_i32_342 dim 1 : vector<8x128xf32>, i32 -> vector<8x128xf32>
    %c19_343 = arith.constant 19 : index
    %c0_344 = arith.constant 0 : index
    %c0_345 = arith.constant 0 : index
    %529 = vector.load %arg1[%c19_343, %c0_344, %c0_345] : memref<27x8x8xbf16, #tpu.memory_space<vmem>>, vector<1x8x8xbf16>
    %530 = vector.shape_cast %529 : vector<1x8x8xbf16> to vector<8x8xbf16>
    %531 = arith.truncf %528 : vector<8x128xf32> to vector<8x128xbf16>
    %cst_346 = arith.constant dense<0.000000e+00> : vector<8x128xf32>
    %532 = tpu.matmul %530, %531, %cst_346 {dimension_numbers = #tpu.dot_dimension_numbers<[1], [0], [0], [1], [0, 0, 1, 1], [], []>} : vector<8x8xbf16>, vector<8x128xbf16>, vector<8x128xf32> -> vector<8x128xf32>
    %533 = arith.addf %527, %532 : vector<8x128xf32>
    %c121_i32_347 = arith.constant 121 : i32
    %534 = tpu.dynamic_rotate %415 by %c121_i32_347 dim 1 : vector<8x128xf32>, i32 -> vector<8x128xf32>
    %c20_348 = arith.constant 20 : index
    %c0_349 = arith.constant 0 : index
    %c0_350 = arith.constant 0 : index
    %535 = vector.load %arg1[%c20_348, %c0_349, %c0_350] : memref<27x8x8xbf16, #tpu.memory_space<vmem>>, vector<1x8x8xbf16>
    %536 = vector.shape_cast %535 : vector<1x8x8xbf16> to vector<8x8xbf16>
    %537 = arith.truncf %534 : vector<8x128xf32> to vector<8x128xbf16>
    %cst_351 = arith.constant dense<0.000000e+00> : vector<8x128xf32>
    %538 = tpu.matmul %536, %537, %cst_351 {dimension_numbers = #tpu.dot_dimension_numbers<[1], [0], [0], [1], [0, 0, 1, 1], [], []>} : vector<8x8xbf16>, vector<8x128xbf16>, vector<8x128xf32> -> vector<8x128xf32>
    %539 = arith.addf %533, %538 : vector<8x128xf32>
    %c120_i32_352 = arith.constant 120 : i32
    %540 = tpu.dynamic_rotate %415 by %c120_i32_352 dim 1 : vector<8x128xf32>, i32 -> vector<8x128xf32>
    %c21_353 = arith.constant 21 : index
    %c0_354 = arith.constant 0 : index
    %c0_355 = arith.constant 0 : index
    %541 = vector.load %arg1[%c21_353, %c0_354, %c0_355] : memref<27x8x8xbf16, #tpu.memory_space<vmem>>, vector<1x8x8xbf16>
    %542 = vector.shape_cast %541 : vector<1x8x8xbf16> to vector<8x8xbf16>
    %543 = arith.truncf %540 : vector<8x128xf32> to vector<8x128xbf16>
    %cst_356 = arith.constant dense<0.000000e+00> : vector<8x128xf32>
    %544 = tpu.matmul %542, %543, %cst_356 {dimension_numbers = #tpu.dot_dimension_numbers<[1], [0], [0], [1], [0, 0, 1, 1], [], []>} : vector<8x8xbf16>, vector<8x128xbf16>, vector<8x128xf32> -> vector<8x128xf32>
    %545 = arith.addf %539, %544 : vector<8x128xf32>
    %c119_i32_357 = arith.constant 119 : i32
    %546 = tpu.dynamic_rotate %415 by %c119_i32_357 dim 1 : vector<8x128xf32>, i32 -> vector<8x128xf32>
    %c22_358 = arith.constant 22 : index
    %c0_359 = arith.constant 0 : index
    %c0_360 = arith.constant 0 : index
    %547 = vector.load %arg1[%c22_358, %c0_359, %c0_360] : memref<27x8x8xbf16, #tpu.memory_space<vmem>>, vector<1x8x8xbf16>
    %548 = vector.shape_cast %547 : vector<1x8x8xbf16> to vector<8x8xbf16>
    %549 = arith.truncf %546 : vector<8x128xf32> to vector<8x128xbf16>
    %cst_361 = arith.constant dense<0.000000e+00> : vector<8x128xf32>
    %550 = tpu.matmul %548, %549, %cst_361 {dimension_numbers = #tpu.dot_dimension_numbers<[1], [0], [0], [1], [0, 0, 1, 1], [], []>} : vector<8x8xbf16>, vector<8x128xbf16>, vector<8x128xf32> -> vector<8x128xf32>
    %551 = arith.addf %545, %550 : vector<8x128xf32>
    %c118_i32_362 = arith.constant 118 : i32
    %552 = tpu.dynamic_rotate %415 by %c118_i32_362 dim 1 : vector<8x128xf32>, i32 -> vector<8x128xf32>
    %c23_363 = arith.constant 23 : index
    %c0_364 = arith.constant 0 : index
    %c0_365 = arith.constant 0 : index
    %553 = vector.load %arg1[%c23_363, %c0_364, %c0_365] : memref<27x8x8xbf16, #tpu.memory_space<vmem>>, vector<1x8x8xbf16>
    %554 = vector.shape_cast %553 : vector<1x8x8xbf16> to vector<8x8xbf16>
    %555 = arith.truncf %552 : vector<8x128xf32> to vector<8x128xbf16>
    %cst_366 = arith.constant dense<0.000000e+00> : vector<8x128xf32>
    %556 = tpu.matmul %554, %555, %cst_366 {dimension_numbers = #tpu.dot_dimension_numbers<[1], [0], [0], [1], [0, 0, 1, 1], [], []>} : vector<8x8xbf16>, vector<8x128xbf16>, vector<8x128xf32> -> vector<8x128xf32>
    %557 = arith.addf %551, %556 : vector<8x128xf32>
    %c117_i32_367 = arith.constant 117 : i32
    %558 = tpu.dynamic_rotate %415 by %c117_i32_367 dim 1 : vector<8x128xf32>, i32 -> vector<8x128xf32>
    %c24_368 = arith.constant 24 : index
    %c0_369 = arith.constant 0 : index
    %c0_370 = arith.constant 0 : index
    %559 = vector.load %arg1[%c24_368, %c0_369, %c0_370] : memref<27x8x8xbf16, #tpu.memory_space<vmem>>, vector<1x8x8xbf16>
    %560 = vector.shape_cast %559 : vector<1x8x8xbf16> to vector<8x8xbf16>
    %561 = arith.truncf %558 : vector<8x128xf32> to vector<8x128xbf16>
    %cst_371 = arith.constant dense<0.000000e+00> : vector<8x128xf32>
    %562 = tpu.matmul %560, %561, %cst_371 {dimension_numbers = #tpu.dot_dimension_numbers<[1], [0], [0], [1], [0, 0, 1, 1], [], []>} : vector<8x8xbf16>, vector<8x128xbf16>, vector<8x128xf32> -> vector<8x128xf32>
    %563 = arith.addf %557, %562 : vector<8x128xf32>
    %c116_i32_372 = arith.constant 116 : i32
    %564 = tpu.dynamic_rotate %415 by %c116_i32_372 dim 1 : vector<8x128xf32>, i32 -> vector<8x128xf32>
    %c25_373 = arith.constant 25 : index
    %c0_374 = arith.constant 0 : index
    %c0_375 = arith.constant 0 : index
    %565 = vector.load %arg1[%c25_373, %c0_374, %c0_375] : memref<27x8x8xbf16, #tpu.memory_space<vmem>>, vector<1x8x8xbf16>
    %566 = vector.shape_cast %565 : vector<1x8x8xbf16> to vector<8x8xbf16>
    %567 = arith.truncf %564 : vector<8x128xf32> to vector<8x128xbf16>
    %cst_376 = arith.constant dense<0.000000e+00> : vector<8x128xf32>
    %568 = tpu.matmul %566, %567, %cst_376 {dimension_numbers = #tpu.dot_dimension_numbers<[1], [0], [0], [1], [0, 0, 1, 1], [], []>} : vector<8x8xbf16>, vector<8x128xbf16>, vector<8x128xf32> -> vector<8x128xf32>
    %569 = arith.addf %563, %568 : vector<8x128xf32>
    %c115_i32_377 = arith.constant 115 : i32
    %570 = tpu.dynamic_rotate %415 by %c115_i32_377 dim 1 : vector<8x128xf32>, i32 -> vector<8x128xf32>
    %c26_378 = arith.constant 26 : index
    %c0_379 = arith.constant 0 : index
    %c0_380 = arith.constant 0 : index
    %571 = vector.load %arg1[%c26_378, %c0_379, %c0_380] : memref<27x8x8xbf16, #tpu.memory_space<vmem>>, vector<1x8x8xbf16>
    %572 = vector.shape_cast %571 : vector<1x8x8xbf16> to vector<8x8xbf16>
    %573 = arith.truncf %570 : vector<8x128xf32> to vector<8x128xbf16>
    %cst_381 = arith.constant dense<0.000000e+00> : vector<8x128xf32>
    %574 = tpu.matmul %572, %573, %cst_381 {dimension_numbers = #tpu.dot_dimension_numbers<[1], [0], [0], [1], [0, 0, 1, 1], [], []>} : vector<8x8xbf16>, vector<8x128xbf16>, vector<8x128xf32> -> vector<8x128xf32>
    %575 = arith.addf %569, %574 : vector<8x128xf32>
    %576 = vector.broadcast %5 : vector<8x1xf32> to vector<8x128xf32>
    %577 = arith.addf %575, %576 : vector<8x128xf32>
    %578 = vector.broadcast %0 : vector<1x128xf32> to vector<8x128xf32>
    %579 = arith.mulf %577, %578 : vector<8x128xf32>
    %cst_382 = arith.constant dense<0.000000e+00> : vector<8x128xf32>
    %580 = tpu.matmul %579, %4, %cst_382 {dimension_numbers = #tpu.dot_dimension_numbers<[1], [0], [0], [1], [0, 0, 1, 1], [], []>, precision = #tpu.contract_precision<fp32>} : vector<8x128xf32>, vector<128x128xf32>, vector<8x128xf32> -> vector<8x128xf32>
    %581 = vector.extract_strided_slice %580 {offsets = [0, 0], sizes = [8, 1], strides = [1, 1]} : vector<8x128xf32> to vector<8x1xf32>
    %582 = arith.mulf %579, %579 : vector<8x128xf32>
    %cst_383 = arith.constant dense<0.000000e+00> : vector<8x128xf32>
    %583 = tpu.matmul %582, %4, %cst_383 {dimension_numbers = #tpu.dot_dimension_numbers<[1], [0], [0], [1], [0, 0, 1, 1], [], []>, precision = #tpu.contract_precision<fp32>} : vector<8x128xf32>, vector<128x128xf32>, vector<8x128xf32> -> vector<8x128xf32>
    %584 = vector.extract_strided_slice %583 {offsets = [0, 0], sizes = [8, 1], strides = [1, 1]} : vector<8x128xf32> to vector<8x1xf32>
    %cst_384 = arith.constant 1.562500e-02 : f32
    %585 = vector.broadcast %cst_384 : f32 to vector<8x1xf32>
    %586 = arith.mulf %581, %585 : vector<8x1xf32>
    %cst_385 = arith.constant 1.562500e-02 : f32
    %587 = vector.broadcast %cst_385 : f32 to vector<8x1xf32>
    %588 = arith.mulf %584, %587 : vector<8x1xf32>
    %589 = arith.mulf %586, %586 : vector<8x1xf32>
    %590 = arith.subf %588, %589 : vector<8x1xf32>
    %cst_386 = arith.constant 0.000000e+00 : f32
    %591 = vector.broadcast %cst_386 : f32 to vector<8x1xf32>
    %592 = arith.maximumf %590, %591 : vector<8x1xf32>
    %cst_387 = arith.constant 9.99999974E-6 : f32
    %593 = vector.broadcast %cst_387 : f32 to vector<8x1xf32>
    %594 = arith.addf %592, %593 : vector<8x1xf32>
    %595 = math.rsqrt %594 : vector<8x1xf32>
    %596 = arith.mulf %1, %595 : vector<8x1xf32>
    %597 = arith.mulf %586, %596 : vector<8x1xf32>
    %598 = arith.subf %2, %597 : vector<8x1xf32>
    %599 = vector.broadcast %596 : vector<8x1xf32> to vector<8x128xf32>
    %600 = arith.mulf %579, %599 : vector<8x128xf32>
    %601 = vector.broadcast %598 : vector<8x1xf32> to vector<8x128xf32>
    %602 = arith.addf %600, %601 : vector<8x128xf32>
    %cst_388 = arith.constant 0.000000e+00 : f32
    %603 = vector.broadcast %cst_388 : f32 to vector<8x128xf32>
    %604 = arith.maximumf %602, %603 : vector<8x128xf32>
    %605 = vector.broadcast %0 : vector<1x128xf32> to vector<8x128xf32>
    %606 = arith.mulf %604, %605 : vector<8x128xf32>
    %c13_i32_389 = arith.constant 13 : i32
    %607 = tpu.dynamic_rotate %606 by %c13_i32_389 dim 1 : vector<8x128xf32>, i32 -> vector<8x128xf32>
    %c0_390 = arith.constant 0 : index
    %c0_391 = arith.constant 0 : index
    %c0_392 = arith.constant 0 : index
    %608 = vector.load %arg3[%c0_390, %c0_391, %c0_392] : memref<27x8x8xbf16, #tpu.memory_space<vmem>>, vector<1x8x8xbf16>
    %609 = vector.shape_cast %608 : vector<1x8x8xbf16> to vector<8x8xbf16>
    %610 = arith.truncf %607 : vector<8x128xf32> to vector<8x128xbf16>
    %cst_393 = arith.constant dense<0.000000e+00> : vector<8x128xf32>
    %611 = tpu.matmul %609, %610, %cst_393 {dimension_numbers = #tpu.dot_dimension_numbers<[1], [0], [0], [1], [0, 0, 1, 1], [], []>} : vector<8x8xbf16>, vector<8x128xbf16>, vector<8x128xf32> -> vector<8x128xf32>
    %c12_i32_394 = arith.constant 12 : i32
    %612 = tpu.dynamic_rotate %606 by %c12_i32_394 dim 1 : vector<8x128xf32>, i32 -> vector<8x128xf32>
    %c1_395 = arith.constant 1 : index
    %c0_396 = arith.constant 0 : index
    %c0_397 = arith.constant 0 : index
    %613 = vector.load %arg3[%c1_395, %c0_396, %c0_397] : memref<27x8x8xbf16, #tpu.memory_space<vmem>>, vector<1x8x8xbf16>
    %614 = vector.shape_cast %613 : vector<1x8x8xbf16> to vector<8x8xbf16>
    %615 = arith.truncf %612 : vector<8x128xf32> to vector<8x128xbf16>
    %cst_398 = arith.constant dense<0.000000e+00> : vector<8x128xf32>
    %616 = tpu.matmul %614, %615, %cst_398 {dimension_numbers = #tpu.dot_dimension_numbers<[1], [0], [0], [1], [0, 0, 1, 1], [], []>} : vector<8x8xbf16>, vector<8x128xbf16>, vector<8x128xf32> -> vector<8x128xf32>
    %617 = arith.addf %611, %616 : vector<8x128xf32>
    %c11_i32_399 = arith.constant 11 : i32
    %618 = tpu.dynamic_rotate %606 by %c11_i32_399 dim 1 : vector<8x128xf32>, i32 -> vector<8x128xf32>
    %c2_400 = arith.constant 2 : index
    %c0_401 = arith.constant 0 : index
    %c0_402 = arith.constant 0 : index
    %619 = vector.load %arg3[%c2_400, %c0_401, %c0_402] : memref<27x8x8xbf16, #tpu.memory_space<vmem>>, vector<1x8x8xbf16>
    %620 = vector.shape_cast %619 : vector<1x8x8xbf16> to vector<8x8xbf16>
    %621 = arith.truncf %618 : vector<8x128xf32> to vector<8x128xbf16>
    %cst_403 = arith.constant dense<0.000000e+00> : vector<8x128xf32>
    %622 = tpu.matmul %620, %621, %cst_403 {dimension_numbers = #tpu.dot_dimension_numbers<[1], [0], [0], [1], [0, 0, 1, 1], [], []>} : vector<8x8xbf16>, vector<8x128xbf16>, vector<8x128xf32> -> vector<8x128xf32>
    %623 = arith.addf %617, %622 : vector<8x128xf32>
    %c10_i32_404 = arith.constant 10 : i32
    %624 = tpu.dynamic_rotate %606 by %c10_i32_404 dim 1 : vector<8x128xf32>, i32 -> vector<8x128xf32>
    %c3_405 = arith.constant 3 : index
    %c0_406 = arith.constant 0 : index
    %c0_407 = arith.constant 0 : index
    %625 = vector.load %arg3[%c3_405, %c0_406, %c0_407] : memref<27x8x8xbf16, #tpu.memory_space<vmem>>, vector<1x8x8xbf16>
    %626 = vector.shape_cast %625 : vector<1x8x8xbf16> to vector<8x8xbf16>
    %627 = arith.truncf %624 : vector<8x128xf32> to vector<8x128xbf16>
    %cst_408 = arith.constant dense<0.000000e+00> : vector<8x128xf32>
    %628 = tpu.matmul %626, %627, %cst_408 {dimension_numbers = #tpu.dot_dimension_numbers<[1], [0], [0], [1], [0, 0, 1, 1], [], []>} : vector<8x8xbf16>, vector<8x128xbf16>, vector<8x128xf32> -> vector<8x128xf32>
    %629 = arith.addf %623, %628 : vector<8x128xf32>
    %c9_i32_409 = arith.constant 9 : i32
    %630 = tpu.dynamic_rotate %606 by %c9_i32_409 dim 1 : vector<8x128xf32>, i32 -> vector<8x128xf32>
    %c4_410 = arith.constant 4 : index
    %c0_411 = arith.constant 0 : index
    %c0_412 = arith.constant 0 : index
    %631 = vector.load %arg3[%c4_410, %c0_411, %c0_412] : memref<27x8x8xbf16, #tpu.memory_space<vmem>>, vector<1x8x8xbf16>
    %632 = vector.shape_cast %631 : vector<1x8x8xbf16> to vector<8x8xbf16>
    %633 = arith.truncf %630 : vector<8x128xf32> to vector<8x128xbf16>
    %cst_413 = arith.constant dense<0.000000e+00> : vector<8x128xf32>
    %634 = tpu.matmul %632, %633, %cst_413 {dimension_numbers = #tpu.dot_dimension_numbers<[1], [0], [0], [1], [0, 0, 1, 1], [], []>} : vector<8x8xbf16>, vector<8x128xbf16>, vector<8x128xf32> -> vector<8x128xf32>
    %635 = arith.addf %629, %634 : vector<8x128xf32>
    %c8_i32_414 = arith.constant 8 : i32
    %636 = tpu.dynamic_rotate %606 by %c8_i32_414 dim 1 : vector<8x128xf32>, i32 -> vector<8x128xf32>
    %c5_415 = arith.constant 5 : index
    %c0_416 = arith.constant 0 : index
    %c0_417 = arith.constant 0 : index
    %637 = vector.load %arg3[%c5_415, %c0_416, %c0_417] : memref<27x8x8xbf16, #tpu.memory_space<vmem>>, vector<1x8x8xbf16>
    %638 = vector.shape_cast %637 : vector<1x8x8xbf16> to vector<8x8xbf16>
    %639 = arith.truncf %636 : vector<8x128xf32> to vector<8x128xbf16>
    %cst_418 = arith.constant dense<0.000000e+00> : vector<8x128xf32>
    %640 = tpu.matmul %638, %639, %cst_418 {dimension_numbers = #tpu.dot_dimension_numbers<[1], [0], [0], [1], [0, 0, 1, 1], [], []>} : vector<8x8xbf16>, vector<8x128xbf16>, vector<8x128xf32> -> vector<8x128xf32>
    %641 = arith.addf %635, %640 : vector<8x128xf32>
    %c7_i32_419 = arith.constant 7 : i32
    %642 = tpu.dynamic_rotate %606 by %c7_i32_419 dim 1 : vector<8x128xf32>, i32 -> vector<8x128xf32>
    %c6_420 = arith.constant 6 : index
    %c0_421 = arith.constant 0 : index
    %c0_422 = arith.constant 0 : index
    %643 = vector.load %arg3[%c6_420, %c0_421, %c0_422] : memref<27x8x8xbf16, #tpu.memory_space<vmem>>, vector<1x8x8xbf16>
    %644 = vector.shape_cast %643 : vector<1x8x8xbf16> to vector<8x8xbf16>
    %645 = arith.truncf %642 : vector<8x128xf32> to vector<8x128xbf16>
    %cst_423 = arith.constant dense<0.000000e+00> : vector<8x128xf32>
    %646 = tpu.matmul %644, %645, %cst_423 {dimension_numbers = #tpu.dot_dimension_numbers<[1], [0], [0], [1], [0, 0, 1, 1], [], []>} : vector<8x8xbf16>, vector<8x128xbf16>, vector<8x128xf32> -> vector<8x128xf32>
    %647 = arith.addf %641, %646 : vector<8x128xf32>
    %c6_i32_424 = arith.constant 6 : i32
    %648 = tpu.dynamic_rotate %606 by %c6_i32_424 dim 1 : vector<8x128xf32>, i32 -> vector<8x128xf32>
    %c7_425 = arith.constant 7 : index
    %c0_426 = arith.constant 0 : index
    %c0_427 = arith.constant 0 : index
    %649 = vector.load %arg3[%c7_425, %c0_426, %c0_427] : memref<27x8x8xbf16, #tpu.memory_space<vmem>>, vector<1x8x8xbf16>
    %650 = vector.shape_cast %649 : vector<1x8x8xbf16> to vector<8x8xbf16>
    %651 = arith.truncf %648 : vector<8x128xf32> to vector<8x128xbf16>
    %cst_428 = arith.constant dense<0.000000e+00> : vector<8x128xf32>
    %652 = tpu.matmul %650, %651, %cst_428 {dimension_numbers = #tpu.dot_dimension_numbers<[1], [0], [0], [1], [0, 0, 1, 1], [], []>} : vector<8x8xbf16>, vector<8x128xbf16>, vector<8x128xf32> -> vector<8x128xf32>
    %653 = arith.addf %647, %652 : vector<8x128xf32>
    %c5_i32_429 = arith.constant 5 : i32
    %654 = tpu.dynamic_rotate %606 by %c5_i32_429 dim 1 : vector<8x128xf32>, i32 -> vector<8x128xf32>
    %c8_430 = arith.constant 8 : index
    %c0_431 = arith.constant 0 : index
    %c0_432 = arith.constant 0 : index
    %655 = vector.load %arg3[%c8_430, %c0_431, %c0_432] : memref<27x8x8xbf16, #tpu.memory_space<vmem>>, vector<1x8x8xbf16>
    %656 = vector.shape_cast %655 : vector<1x8x8xbf16> to vector<8x8xbf16>
    %657 = arith.truncf %654 : vector<8x128xf32> to vector<8x128xbf16>
    %cst_433 = arith.constant dense<0.000000e+00> : vector<8x128xf32>
    %658 = tpu.matmul %656, %657, %cst_433 {dimension_numbers = #tpu.dot_dimension_numbers<[1], [0], [0], [1], [0, 0, 1, 1], [], []>} : vector<8x8xbf16>, vector<8x128xbf16>, vector<8x128xf32> -> vector<8x128xf32>
    %659 = arith.addf %653, %658 : vector<8x128xf32>
    %c4_i32_434 = arith.constant 4 : i32
    %660 = tpu.dynamic_rotate %606 by %c4_i32_434 dim 1 : vector<8x128xf32>, i32 -> vector<8x128xf32>
    %c9_435 = arith.constant 9 : index
    %c0_436 = arith.constant 0 : index
    %c0_437 = arith.constant 0 : index
    %661 = vector.load %arg3[%c9_435, %c0_436, %c0_437] : memref<27x8x8xbf16, #tpu.memory_space<vmem>>, vector<1x8x8xbf16>
    %662 = vector.shape_cast %661 : vector<1x8x8xbf16> to vector<8x8xbf16>
    %663 = arith.truncf %660 : vector<8x128xf32> to vector<8x128xbf16>
    %cst_438 = arith.constant dense<0.000000e+00> : vector<8x128xf32>
    %664 = tpu.matmul %662, %663, %cst_438 {dimension_numbers = #tpu.dot_dimension_numbers<[1], [0], [0], [1], [0, 0, 1, 1], [], []>} : vector<8x8xbf16>, vector<8x128xbf16>, vector<8x128xf32> -> vector<8x128xf32>
    %665 = arith.addf %659, %664 : vector<8x128xf32>
    %c3_i32_439 = arith.constant 3 : i32
    %666 = tpu.dynamic_rotate %606 by %c3_i32_439 dim 1 : vector<8x128xf32>, i32 -> vector<8x128xf32>
    %c10_440 = arith.constant 10 : index
    %c0_441 = arith.constant 0 : index
    %c0_442 = arith.constant 0 : index
    %667 = vector.load %arg3[%c10_440, %c0_441, %c0_442] : memref<27x8x8xbf16, #tpu.memory_space<vmem>>, vector<1x8x8xbf16>
    %668 = vector.shape_cast %667 : vector<1x8x8xbf16> to vector<8x8xbf16>
    %669 = arith.truncf %666 : vector<8x128xf32> to vector<8x128xbf16>
    %cst_443 = arith.constant dense<0.000000e+00> : vector<8x128xf32>
    %670 = tpu.matmul %668, %669, %cst_443 {dimension_numbers = #tpu.dot_dimension_numbers<[1], [0], [0], [1], [0, 0, 1, 1], [], []>} : vector<8x8xbf16>, vector<8x128xbf16>, vector<8x128xf32> -> vector<8x128xf32>
    %671 = arith.addf %665, %670 : vector<8x128xf32>
    %c2_i32_444 = arith.constant 2 : i32
    %672 = tpu.dynamic_rotate %606 by %c2_i32_444 dim 1 : vector<8x128xf32>, i32 -> vector<8x128xf32>
    %c11_445 = arith.constant 11 : index
    %c0_446 = arith.constant 0 : index
    %c0_447 = arith.constant 0 : index
    %673 = vector.load %arg3[%c11_445, %c0_446, %c0_447] : memref<27x8x8xbf16, #tpu.memory_space<vmem>>, vector<1x8x8xbf16>
    %674 = vector.shape_cast %673 : vector<1x8x8xbf16> to vector<8x8xbf16>
    %675 = arith.truncf %672 : vector<8x128xf32> to vector<8x128xbf16>
    %cst_448 = arith.constant dense<0.000000e+00> : vector<8x128xf32>
    %676 = tpu.matmul %674, %675, %cst_448 {dimension_numbers = #tpu.dot_dimension_numbers<[1], [0], [0], [1], [0, 0, 1, 1], [], []>} : vector<8x8xbf16>, vector<8x128xbf16>, vector<8x128xf32> -> vector<8x128xf32>
    %677 = arith.addf %671, %676 : vector<8x128xf32>
    %c1_i32_449 = arith.constant 1 : i32
    %678 = tpu.dynamic_rotate %606 by %c1_i32_449 dim 1 : vector<8x128xf32>, i32 -> vector<8x128xf32>
    %c12_450 = arith.constant 12 : index
    %c0_451 = arith.constant 0 : index
    %c0_452 = arith.constant 0 : index
    %679 = vector.load %arg3[%c12_450, %c0_451, %c0_452] : memref<27x8x8xbf16, #tpu.memory_space<vmem>>, vector<1x8x8xbf16>
    %680 = vector.shape_cast %679 : vector<1x8x8xbf16> to vector<8x8xbf16>
    %681 = arith.truncf %678 : vector<8x128xf32> to vector<8x128xbf16>
    %cst_453 = arith.constant dense<0.000000e+00> : vector<8x128xf32>
    %682 = tpu.matmul %680, %681, %cst_453 {dimension_numbers = #tpu.dot_dimension_numbers<[1], [0], [0], [1], [0, 0, 1, 1], [], []>} : vector<8x8xbf16>, vector<8x128xbf16>, vector<8x128xf32> -> vector<8x128xf32>
    %683 = arith.addf %677, %682 : vector<8x128xf32>
    %c13_454 = arith.constant 13 : index
    %c0_455 = arith.constant 0 : index
    %c0_456 = arith.constant 0 : index
    %684 = vector.load %arg3[%c13_454, %c0_455, %c0_456] : memref<27x8x8xbf16, #tpu.memory_space<vmem>>, vector<1x8x8xbf16>
    %685 = vector.shape_cast %684 : vector<1x8x8xbf16> to vector<8x8xbf16>
    %686 = arith.truncf %606 : vector<8x128xf32> to vector<8x128xbf16>
    %cst_457 = arith.constant dense<0.000000e+00> : vector<8x128xf32>
    %687 = tpu.matmul %685, %686, %cst_457 {dimension_numbers = #tpu.dot_dimension_numbers<[1], [0], [0], [1], [0, 0, 1, 1], [], []>} : vector<8x8xbf16>, vector<8x128xbf16>, vector<8x128xf32> -> vector<8x128xf32>
    %688 = arith.addf %683, %687 : vector<8x128xf32>
    %c127_i32_458 = arith.constant 127 : i32
    %689 = tpu.dynamic_rotate %606 by %c127_i32_458 dim 1 : vector<8x128xf32>, i32 -> vector<8x128xf32>
    %c14_459 = arith.constant 14 : index
    %c0_460 = arith.constant 0 : index
    %c0_461 = arith.constant 0 : index
    %690 = vector.load %arg3[%c14_459, %c0_460, %c0_461] : memref<27x8x8xbf16, #tpu.memory_space<vmem>>, vector<1x8x8xbf16>
    %691 = vector.shape_cast %690 : vector<1x8x8xbf16> to vector<8x8xbf16>
    %692 = arith.truncf %689 : vector<8x128xf32> to vector<8x128xbf16>
    %cst_462 = arith.constant dense<0.000000e+00> : vector<8x128xf32>
    %693 = tpu.matmul %691, %692, %cst_462 {dimension_numbers = #tpu.dot_dimension_numbers<[1], [0], [0], [1], [0, 0, 1, 1], [], []>} : vector<8x8xbf16>, vector<8x128xbf16>, vector<8x128xf32> -> vector<8x128xf32>
    %694 = arith.addf %688, %693 : vector<8x128xf32>
    %c126_i32_463 = arith.constant 126 : i32
    %695 = tpu.dynamic_rotate %606 by %c126_i32_463 dim 1 : vector<8x128xf32>, i32 -> vector<8x128xf32>
    %c15_464 = arith.constant 15 : index
    %c0_465 = arith.constant 0 : index
    %c0_466 = arith.constant 0 : index
    %696 = vector.load %arg3[%c15_464, %c0_465, %c0_466] : memref<27x8x8xbf16, #tpu.memory_space<vmem>>, vector<1x8x8xbf16>
    %697 = vector.shape_cast %696 : vector<1x8x8xbf16> to vector<8x8xbf16>
    %698 = arith.truncf %695 : vector<8x128xf32> to vector<8x128xbf16>
    %cst_467 = arith.constant dense<0.000000e+00> : vector<8x128xf32>
    %699 = tpu.matmul %697, %698, %cst_467 {dimension_numbers = #tpu.dot_dimension_numbers<[1], [0], [0], [1], [0, 0, 1, 1], [], []>} : vector<8x8xbf16>, vector<8x128xbf16>, vector<8x128xf32> -> vector<8x128xf32>
    %700 = arith.addf %694, %699 : vector<8x128xf32>
    %c125_i32_468 = arith.constant 125 : i32
    %701 = tpu.dynamic_rotate %606 by %c125_i32_468 dim 1 : vector<8x128xf32>, i32 -> vector<8x128xf32>
    %c16_469 = arith.constant 16 : index
    %c0_470 = arith.constant 0 : index
    %c0_471 = arith.constant 0 : index
    %702 = vector.load %arg3[%c16_469, %c0_470, %c0_471] : memref<27x8x8xbf16, #tpu.memory_space<vmem>>, vector<1x8x8xbf16>
    %703 = vector.shape_cast %702 : vector<1x8x8xbf16> to vector<8x8xbf16>
    %704 = arith.truncf %701 : vector<8x128xf32> to vector<8x128xbf16>
    %cst_472 = arith.constant dense<0.000000e+00> : vector<8x128xf32>
    %705 = tpu.matmul %703, %704, %cst_472 {dimension_numbers = #tpu.dot_dimension_numbers<[1], [0], [0], [1], [0, 0, 1, 1], [], []>} : vector<8x8xbf16>, vector<8x128xbf16>, vector<8x128xf32> -> vector<8x128xf32>
    %706 = arith.addf %700, %705 : vector<8x128xf32>
    %c124_i32_473 = arith.constant 124 : i32
    %707 = tpu.dynamic_rotate %606 by %c124_i32_473 dim 1 : vector<8x128xf32>, i32 -> vector<8x128xf32>
    %c17_474 = arith.constant 17 : index
    %c0_475 = arith.constant 0 : index
    %c0_476 = arith.constant 0 : index
    %708 = vector.load %arg3[%c17_474, %c0_475, %c0_476] : memref<27x8x8xbf16, #tpu.memory_space<vmem>>, vector<1x8x8xbf16>
    %709 = vector.shape_cast %708 : vector<1x8x8xbf16> to vector<8x8xbf16>
    %710 = arith.truncf %707 : vector<8x128xf32> to vector<8x128xbf16>
    %cst_477 = arith.constant dense<0.000000e+00> : vector<8x128xf32>
    %711 = tpu.matmul %709, %710, %cst_477 {dimension_numbers = #tpu.dot_dimension_numbers<[1], [0], [0], [1], [0, 0, 1, 1], [], []>} : vector<8x8xbf16>, vector<8x128xbf16>, vector<8x128xf32> -> vector<8x128xf32>
    %712 = arith.addf %706, %711 : vector<8x128xf32>
    %c123_i32_478 = arith.constant 123 : i32
    %713 = tpu.dynamic_rotate %606 by %c123_i32_478 dim 1 : vector<8x128xf32>, i32 -> vector<8x128xf32>
    %c18_479 = arith.constant 18 : index
    %c0_480 = arith.constant 0 : index
    %c0_481 = arith.constant 0 : index
    %714 = vector.load %arg3[%c18_479, %c0_480, %c0_481] : memref<27x8x8xbf16, #tpu.memory_space<vmem>>, vector<1x8x8xbf16>
    %715 = vector.shape_cast %714 : vector<1x8x8xbf16> to vector<8x8xbf16>
    %716 = arith.truncf %713 : vector<8x128xf32> to vector<8x128xbf16>
    %cst_482 = arith.constant dense<0.000000e+00> : vector<8x128xf32>
    %717 = tpu.matmul %715, %716, %cst_482 {dimension_numbers = #tpu.dot_dimension_numbers<[1], [0], [0], [1], [0, 0, 1, 1], [], []>} : vector<8x8xbf16>, vector<8x128xbf16>, vector<8x128xf32> -> vector<8x128xf32>
    %718 = arith.addf %712, %717 : vector<8x128xf32>
    %c122_i32_483 = arith.constant 122 : i32
    %719 = tpu.dynamic_rotate %606 by %c122_i32_483 dim 1 : vector<8x128xf32>, i32 -> vector<8x128xf32>
    %c19_484 = arith.constant 19 : index
    %c0_485 = arith.constant 0 : index
    %c0_486 = arith.constant 0 : index
    %720 = vector.load %arg3[%c19_484, %c0_485, %c0_486] : memref<27x8x8xbf16, #tpu.memory_space<vmem>>, vector<1x8x8xbf16>
    %721 = vector.shape_cast %720 : vector<1x8x8xbf16> to vector<8x8xbf16>
    %722 = arith.truncf %719 : vector<8x128xf32> to vector<8x128xbf16>
    %cst_487 = arith.constant dense<0.000000e+00> : vector<8x128xf32>
    %723 = tpu.matmul %721, %722, %cst_487 {dimension_numbers = #tpu.dot_dimension_numbers<[1], [0], [0], [1], [0, 0, 1, 1], [], []>} : vector<8x8xbf16>, vector<8x128xbf16>, vector<8x128xf32> -> vector<8x128xf32>
    %724 = arith.addf %718, %723 : vector<8x128xf32>
    %c121_i32_488 = arith.constant 121 : i32
    %725 = tpu.dynamic_rotate %606 by %c121_i32_488 dim 1 : vector<8x128xf32>, i32 -> vector<8x128xf32>
    %c20_489 = arith.constant 20 : index
    %c0_490 = arith.constant 0 : index
    %c0_491 = arith.constant 0 : index
    %726 = vector.load %arg3[%c20_489, %c0_490, %c0_491] : memref<27x8x8xbf16, #tpu.memory_space<vmem>>, vector<1x8x8xbf16>
    %727 = vector.shape_cast %726 : vector<1x8x8xbf16> to vector<8x8xbf16>
    %728 = arith.truncf %725 : vector<8x128xf32> to vector<8x128xbf16>
    %cst_492 = arith.constant dense<0.000000e+00> : vector<8x128xf32>
    %729 = tpu.matmul %727, %728, %cst_492 {dimension_numbers = #tpu.dot_dimension_numbers<[1], [0], [0], [1], [0, 0, 1, 1], [], []>} : vector<8x8xbf16>, vector<8x128xbf16>, vector<8x128xf32> -> vector<8x128xf32>
    %730 = arith.addf %724, %729 : vector<8x128xf32>
    %c120_i32_493 = arith.constant 120 : i32
    %731 = tpu.dynamic_rotate %606 by %c120_i32_493 dim 1 : vector<8x128xf32>, i32 -> vector<8x128xf32>
    %c21_494 = arith.constant 21 : index
    %c0_495 = arith.constant 0 : index
    %c0_496 = arith.constant 0 : index
    %732 = vector.load %arg3[%c21_494, %c0_495, %c0_496] : memref<27x8x8xbf16, #tpu.memory_space<vmem>>, vector<1x8x8xbf16>
    %733 = vector.shape_cast %732 : vector<1x8x8xbf16> to vector<8x8xbf16>
    %734 = arith.truncf %731 : vector<8x128xf32> to vector<8x128xbf16>
    %cst_497 = arith.constant dense<0.000000e+00> : vector<8x128xf32>
    %735 = tpu.matmul %733, %734, %cst_497 {dimension_numbers = #tpu.dot_dimension_numbers<[1], [0], [0], [1], [0, 0, 1, 1], [], []>} : vector<8x8xbf16>, vector<8x128xbf16>, vector<8x128xf32> -> vector<8x128xf32>
    %736 = arith.addf %730, %735 : vector<8x128xf32>
    %c119_i32_498 = arith.constant 119 : i32
    %737 = tpu.dynamic_rotate %606 by %c119_i32_498 dim 1 : vector<8x128xf32>, i32 -> vector<8x128xf32>
    %c22_499 = arith.constant 22 : index
    %c0_500 = arith.constant 0 : index
    %c0_501 = arith.constant 0 : index
    %738 = vector.load %arg3[%c22_499, %c0_500, %c0_501] : memref<27x8x8xbf16, #tpu.memory_space<vmem>>, vector<1x8x8xbf16>
    %739 = vector.shape_cast %738 : vector<1x8x8xbf16> to vector<8x8xbf16>
    %740 = arith.truncf %737 : vector<8x128xf32> to vector<8x128xbf16>
    %cst_502 = arith.constant dense<0.000000e+00> : vector<8x128xf32>
    %741 = tpu.matmul %739, %740, %cst_502 {dimension_numbers = #tpu.dot_dimension_numbers<[1], [0], [0], [1], [0, 0, 1, 1], [], []>} : vector<8x8xbf16>, vector<8x128xbf16>, vector<8x128xf32> -> vector<8x128xf32>
    %742 = arith.addf %736, %741 : vector<8x128xf32>
    %c118_i32_503 = arith.constant 118 : i32
    %743 = tpu.dynamic_rotate %606 by %c118_i32_503 dim 1 : vector<8x128xf32>, i32 -> vector<8x128xf32>
    %c23_504 = arith.constant 23 : index
    %c0_505 = arith.constant 0 : index
    %c0_506 = arith.constant 0 : index
    %744 = vector.load %arg3[%c23_504, %c0_505, %c0_506] : memref<27x8x8xbf16, #tpu.memory_space<vmem>>, vector<1x8x8xbf16>
    %745 = vector.shape_cast %744 : vector<1x8x8xbf16> to vector<8x8xbf16>
    %746 = arith.truncf %743 : vector<8x128xf32> to vector<8x128xbf16>
    %cst_507 = arith.constant dense<0.000000e+00> : vector<8x128xf32>
    %747 = tpu.matmul %745, %746, %cst_507 {dimension_numbers = #tpu.dot_dimension_numbers<[1], [0], [0], [1], [0, 0, 1, 1], [], []>} : vector<8x8xbf16>, vector<8x128xbf16>, vector<8x128xf32> -> vector<8x128xf32>
    %748 = arith.addf %742, %747 : vector<8x128xf32>
    %c117_i32_508 = arith.constant 117 : i32
    %749 = tpu.dynamic_rotate %606 by %c117_i32_508 dim 1 : vector<8x128xf32>, i32 -> vector<8x128xf32>
    %c24_509 = arith.constant 24 : index
    %c0_510 = arith.constant 0 : index
    %c0_511 = arith.constant 0 : index
    %750 = vector.load %arg3[%c24_509, %c0_510, %c0_511] : memref<27x8x8xbf16, #tpu.memory_space<vmem>>, vector<1x8x8xbf16>
    %751 = vector.shape_cast %750 : vector<1x8x8xbf16> to vector<8x8xbf16>
    %752 = arith.truncf %749 : vector<8x128xf32> to vector<8x128xbf16>
    %cst_512 = arith.constant dense<0.000000e+00> : vector<8x128xf32>
    %753 = tpu.matmul %751, %752, %cst_512 {dimension_numbers = #tpu.dot_dimension_numbers<[1], [0], [0], [1], [0, 0, 1, 1], [], []>} : vector<8x8xbf16>, vector<8x128xbf16>, vector<8x128xf32> -> vector<8x128xf32>
    %754 = arith.addf %748, %753 : vector<8x128xf32>
    %c116_i32_513 = arith.constant 116 : i32
    %755 = tpu.dynamic_rotate %606 by %c116_i32_513 dim 1 : vector<8x128xf32>, i32 -> vector<8x128xf32>
    %c25_514 = arith.constant 25 : index
    %c0_515 = arith.constant 0 : index
    %c0_516 = arith.constant 0 : index
    %756 = vector.load %arg3[%c25_514, %c0_515, %c0_516] : memref<27x8x8xbf16, #tpu.memory_space<vmem>>, vector<1x8x8xbf16>
    %757 = vector.shape_cast %756 : vector<1x8x8xbf16> to vector<8x8xbf16>
    %758 = arith.truncf %755 : vector<8x128xf32> to vector<8x128xbf16>
    %cst_517 = arith.constant dense<0.000000e+00> : vector<8x128xf32>
    %759 = tpu.matmul %757, %758, %cst_517 {dimension_numbers = #tpu.dot_dimension_numbers<[1], [0], [0], [1], [0, 0, 1, 1], [], []>} : vector<8x8xbf16>, vector<8x128xbf16>, vector<8x128xf32> -> vector<8x128xf32>
    %760 = arith.addf %754, %759 : vector<8x128xf32>
    %c115_i32_518 = arith.constant 115 : i32
    %761 = tpu.dynamic_rotate %606 by %c115_i32_518 dim 1 : vector<8x128xf32>, i32 -> vector<8x128xf32>
    %c26_519 = arith.constant 26 : index
    %c0_520 = arith.constant 0 : index
    %c0_521 = arith.constant 0 : index
    %762 = vector.load %arg3[%c26_519, %c0_520, %c0_521] : memref<27x8x8xbf16, #tpu.memory_space<vmem>>, vector<1x8x8xbf16>
    %763 = vector.shape_cast %762 : vector<1x8x8xbf16> to vector<8x8xbf16>
    %764 = arith.truncf %761 : vector<8x128xf32> to vector<8x128xbf16>
    %cst_522 = arith.constant dense<0.000000e+00> : vector<8x128xf32>
    %765 = tpu.matmul %763, %764, %cst_522 {dimension_numbers = #tpu.dot_dimension_numbers<[1], [0], [0], [1], [0, 0, 1, 1], [], []>} : vector<8x8xbf16>, vector<8x128xbf16>, vector<8x128xf32> -> vector<8x128xf32>
    %766 = arith.addf %760, %765 : vector<8x128xf32>
    %767 = vector.broadcast %6 : vector<8x1xf32> to vector<8x128xf32>
    %768 = arith.addf %766, %767 : vector<8x128xf32>
    %769 = vector.broadcast %0 : vector<1x128xf32> to vector<8x128xf32>
    %770 = arith.mulf %768, %769 : vector<8x128xf32>
    %cst_523 = arith.constant 3.000000e-01 : f32
    %771 = vector.broadcast %cst_523 : f32 to vector<8x128xf32>
    %772 = arith.mulf %771, %770 : vector<8x128xf32>
    %773 = arith.addf %3, %772 : vector<8x128xf32>
    %c0_524 = arith.constant 0 : index
    %c0_525 = arith.constant 0 : index
    %774 = vector.load %arg8[%c0_524, %c0_525] : memref<8x128xf32, #tpu.memory_space<vmem>>, vector<8x128xf32>
    tpu.vector_store %arg8[%c0_524, %c0_525], %773 {strides = array<i32>} : memref<8x128xf32, #tpu.memory_space<vmem>>, vector<8x128xf32>,
    return
  }
}

</mosaic_0001>

<bundles_post_ra>
// kernel: tpu_custom_call.1
= control target key start
LH: loop header
LB: loop body
LE: loop exit
PB: predicated region body
PF: predicated region fallthrough
CT: control target
= control target key end

     0   :  { %s13823_s0 = inlined_call_operand.vmem [shape: f32[8,128], index: 0, kind: input, shape index: {}]   ;;  %s13824_s1 = inlined_call_operand.vmem [shape: bf16[27,8,8], index: 1, kind: input, shape index: {}]   ;;  %s13825_s2 = inlined_call_operand.vmem [shape: f32[8,1], index: 2, kind: input, shape index: {}]   ;;  %s13826_s3 = inlined_call_operand.vmem [shape: bf16[27,8,8], index: 3, kind: input, shape index: {}]   ;;  %s13827_s4 = inlined_call_operand.vmem [shape: f32[8,1], index: 4, kind: input, shape index: {}]   ;;  %s13828_s5 = inlined_call_operand.vmem [shape: f32[8,1], index: 5, kind: input, shape index: {}]   ;;  %s13829_s6 = inlined_call_operand.vmem [shape: f32[8,1], index: 6, kind: input, shape index: {}]   ;;  %s13830_s7 = inlined_call_operand.vmem [shape: f32[1,128], index: 7, kind: input, shape index: {}]   ;;  %s13831_s8 = inlined_call_operand.hbm [shape: f32[8,128], index: 8, kind: output, shape index: {}]  }
   0x1   :  { %v11619_v0 = vld [vmem:[%s13823_s0] sm:$0xff] }
   0x2   :  { %13 = vsyncpa [#allocation3], 0  ;;  %v11540_v1 = vmov 0.0   ;;  %v11624_v2 = vand.u32 4294901760, %v11619_v0  ;;  %v11541_v3 = vmov 1.0   ;;  %vm11542_vm0 = vmmov 0  }
   0x3   :  { %9805 = vmatprep.subr.mxu0 %v11540_v1  ;;  %9840 = vmatprep.subr.mxu1 %v11540_v1  ;;  %v470_v8 = vmul.f32 %v11619_v0, %v11619_v0  ;;  %v11543_v14 = vmov 0   ;;  %v32_v55 = vld [vmem:[%s13828_s5] sm:$0xff]  ;;  %s13871_s13 = smov 11   ;;  %s11545_s14 = smov 12   ;;  %vm947_vm1 = vcmask 1043456   ;;  %vm943_vm2 = vcmask 64512  }
   0x4   :  { %9806 = vmatpush3.msra.mxu0 %v11541_v3  ;;  %9841 = vmatpush3.msra.mxu1 %v11540_v1  ;;  %v11635_v4 = vsub.f32 %v11619_v0, %v11624_v2  ;;  %v33_v58 = vld [vmem:[%s13829_s6] sm:$0xff]  ;;  %s13869_s15 = smov 9   ;;  %s11547_s16 = smov 13  }
   0x5   :  { %9842 = vmatprep.mubr.msk.f32.mxu1 %vm11542_vm0, %v11540_v1  ;;  %9807 = vmatprep.subr.mxu0 %v11540_v1  ;;  %v11745_v9 = vand.u32 4294901760, %v470_v8  ;;  %s13867_s17 = smov 7   ;;  %s13872_s18 = smov 10  }
   0x6   :  { %9843 = vmatmul.mubr.f32.vlgmr.msra.gmra.mxu1 %v11624_v2  ;;  %9845 = vmatprep.subr.mxu1 %v11540_v1  ;;  %v104_v5 = vand.u32 4294901760, %v11635_v4  ;;  %s13864_s19 = smov 5   ;;  %s13870_s20 = smov 8  }
   0x7   :  { %9808 = vmatpush3.msra.mxu0 %v11541_v3  ;;  %9846 = vmatpush3.msra.mxu1 %v11540_v1  ;;  %v11756_v10 = vsub.f32 %v470_v8, %v11745_v9  ;;  %s13858_s21 = smov 3   ;;  %s13868_s22 = smov 6  }
   0x8   :  { %9809 = vmatprep.subr.mxu0 %v11540_v1  ;;  %9847 = vmatprep.mubr.msk.f32.mxu1 %vm11542_vm0, %v11540_v1  ;;  %v105_v6 = vsub.f32 %v11635_v4, %v104_v5  ;;  %s13852_s23 = smov 1   ;;  %s13866_s24 = smov 4  }
   0x9   :  { %9810 = vmatpush3.msra.mxu0 %v11541_v3  ;;  %9850 = vmatprep.subr.mxu1 %v11540_v1  ;;  %v538_v11 = vand.u32 4294901760, %v11756_v10  ;;  %s13838_s25 = smov 126   ;;  %s13862_s26 = smov 2  }
   0xa   :  { %9811 = vmatprep.subr.mxu0 %v11540_v1  ;;  %9848 = vmatmul.mubr.f32.vlgmr.msra.gmra.mxu1 %v11635_v4  ;;  %v106_v7 = vand.u32 4294901760, %v105_v6  ;;  %v11895_v4 = vld [vmem:[%s13830_s7] ss:$0 sm:$0xff]  ;;  %s13834_s27 = smov 124   ;;  %s13854_s28 = smov 127  }
   0xb   :  { %9851 = vmatpush3.msra.mxu1 %v11541_v3  ;;  %9812 = vmatpush3.msra.mxu0 %v11541_v3  ;;  %v539_v12 = vsub.f32 %v11756_v10, %v538_v11  ;;  %s13832_s29 = smov 122   ;;  %s13850_s30 = smov 125  }
   0xc   :  { %9852 = vmatprep.subr.mxu1 %v11540_v1  ;;  %9813 = vmatprep.subr.mxu0 %v11540_v1  ;;  %s13836_s9 = smov 120   ;;  %s13840_s10 = smov 123  }
   0xd   :  { %9853 = vmatpush3.msra.mxu1 %v11541_v3  ;;  %9814 = vmatpush3.msra.mxu0 %v11541_v3  ;;  %v540_v13 = vand.u32 4294901760, %v539_v12  ;;  %s13842_s11 = smov 118   ;;  %s13856_s12 = smov 121  }
   0xe   :  { %9854 = vmatprep.subr.mxu1 %v11540_v1  ;;  %9815 = vmatprep.subr.mxu0 %v11540_v1 }
   0xf   :  { %9855 = vmatpush3.msra.mxu1 %v11541_v3  ;;  %9816 = vmatpush3.msra.mxu0 %v11541_v3 }
  0x10   :  { %9856 = vmatprep.subr.mxu1 %v11540_v1  ;;  %9817 = vmatprep.subr.mxu0 %v11540_v1 }
  0x11   :  { %9857 = vmatpush3.msra.mxu1 %v11541_v3  ;;  %9818 = vmatpush3.msra.mxu0 %v11541_v3 }
  0x12   :  { %9858 = vmatprep.subr.mxu1 %v11540_v1  ;;  %9819 = vmatprep.subr.mxu0 %v11540_v1 }
  0x13   :  { %9859 = vmatpush3.msra.mxu1 %v11541_v3  ;;  %9820 = vmatpush3.msra.mxu0 %v11541_v3 }
  0x14   :  { %9860 = vmatprep.subr.mxu1 %v11540_v1  ;;  %9821 = vmatprep.subr.mxu0 %v11540_v1 }
  0x15   :  { %9861 = vmatpush3.msra.mxu1 %v11541_v3  ;;  %9822 = vmatpush3.msra.mxu0 %v11541_v3 }
  0x16   :  { %9862 = vmatprep.subr.mxu1 %v11540_v1  ;;  %9823 = vmatprep.subr.mxu0 %v11540_v1 }
  0x17   :  { %9863 = vmatpush3.msra.mxu1 %v11541_v3  ;;  %9824 = vmatpush3.msra.mxu0 %v11541_v3 }
  0x18   :  { %9864 = vmatprep.subr.mxu1 %v11540_v1  ;;  %9825 = vmatprep.subr.mxu0 %v11540_v1 }
  0x19   :  { %9865 = vmatpush3.msra.mxu1 %v11541_v3  ;;  %9826 = vmatpush3.msra.mxu0 %v11541_v3 }
  0x1a   :  { %9866 = vmatprep.subr.mxu1 %v11540_v1  ;;  %9827 = vmatprep.subr.mxu0 %v11540_v1 }
  0x1b   :  { %9867 = vmatpush3.msra.mxu1 %v11541_v3  ;;  %9828 = vmatpush3.msra.mxu0 %v11541_v3 }
  0x1c   :  { %9868 = vmatprep.subr.mxu1 %v11540_v1  ;;  %9829 = vmatprep.subr.mxu0 %v11540_v1 }
  0x1d   :  { %9869 = vmatpush3.msra.mxu1 %v11541_v3  ;;  %9830 = vmatpush3.msra.mxu0 %v11541_v3 }
  0x1e   :  { %9870 = vmatprep.subr.mxu1 %v11540_v1  ;;  %9831 = vmatprep.subr.mxu0 %v11540_v1 }
  0x1f   :  { %9871 = vmatpush3.msra.mxu1 %v11541_v3  ;;  %9832 = vmatpush3.msra.mxu0 %v11541_v3 }
  0x20   :  { %9872 = vmatprep.subr.mxu1 %v11540_v1  ;;  %9833 = vmatprep.subr.mxu0 %v11540_v1 }
  0x21   :  { %9873 = vmatpush3.msra.mxu1 %v11541_v3  ;;  %9834 = vmatpush3.msra.mxu0 %v11541_v3 }
  0x22   :  { %9874 = vmatprep.subr.mxu1 %v11540_v1  ;;  %9835 = vmatprep.subr.mxu0 %v11540_v1 }
  0x23   :  { %9875 = vmatpush3.msra.mxu1 %v11541_v3  ;;  %9836 = vmatpush3.msra.mxu0 %v11541_v3 }
  0x24   :  { %9837 = vmatprep.mubr.msk.f32.mxu0 %vm11542_vm0, %v11540_v1  ;;  %9876 = vmatprep.subr.mxu1 %v11540_v1 }
  0x25   :  { %9838 = vmatmul.mubr.f32.vlgmr.msra.gmra.mxu0 %v106_v7  ;;  %9877 = vmatpush3.msra.mxu1 %v11541_v3 }
  0x26   :  { %9878 = vmatprep.subr.mxu1 %v11540_v1  ;;  %9885 = vmatprep.subr.mxu0 %v11540_v1 }
  0x27   :  { %9879 = vmatpush3.msra.mxu1 %v11541_v3  ;;  %9886 = vmatpush3.msra.mxu0 %v11540_v1 }
  0x28   :  { %9880 = vmatprep.subr.mxu1 %v11540_v1  ;;  %9887 = vmatprep.mubr.msk.f32.mxu0 %vm11542_vm0, %v11540_v1 }
  0x29   :  { %9890 = vmatprep.subr.mxu0 %v11540_v1  ;;  %9881 = vmatpush3.msra.mxu1 %v11541_v3 }
  0x2a   :  { %9882 = vmatprep.mubr.msk.f32.mxu1 %vm11542_vm0, %v11540_v1  ;;  %9888 = vmatmul.mubr.f32.vlgmr.msra.gmra.mxu0 %v11624_v2 }
  0x2b   :  { %9891 = vmatpush3.msra.mxu0 %v11541_v3  ;;  %9883 = vmatmul.mubr.f32.vlgmr.msra.gmra.mxu1 %v104_v5 }
  0x2c   :  { %9892 = vmatprep.subr.mxu0 %v11540_v1  ;;  %9925 = vmatprep.subr.mxu1 %v11540_v1 }
  0x2d   :  { %9893 = vmatpush3.msra.mxu0 %v11541_v3  ;;  %9926 = vmatpush3.msra.mxu1 %v11541_v3 }
  0x2e   :  { %9894 = vmatprep.subr.mxu0 %v11540_v1  ;;  %9927 = vmatprep.subr.mxu1 %v11540_v1 }
  0x2f   :  { %9895 = vmatpush3.msra.mxu0 %v11541_v3  ;;  %9928 = vmatpush3.msra.mxu1 %v11541_v3 }
  0x30   :  { %9896 = vmatprep.subr.mxu0 %v11540_v1  ;;  %9929 = vmatprep.subr.mxu1 %v11540_v1 }
  0x31   :  { %9897 = vmatpush3.msra.mxu0 %v11541_v3  ;;  %9930 = vmatpush3.msra.mxu1 %v11541_v3 }
  0x32   :  { %9898 = vmatprep.subr.mxu0 %v11540_v1  ;;  %9931 = vmatprep.subr.mxu1 %v11540_v1 }
  0x33   :  { %9899 = vmatpush3.msra.mxu0 %v11541_v3  ;;  %9932 = vmatpush3.msra.mxu1 %v11541_v3 }
  0x34   :  { %9900 = vmatprep.subr.mxu0 %v11540_v1  ;;  %9933 = vmatprep.subr.mxu1 %v11540_v1 }
  0x35   :  { %9901 = vmatpush3.msra.mxu0 %v11541_v3  ;;  %9934 = vmatpush3.msra.mxu1 %v11541_v3 }
  0x36   :  { %9902 = vmatprep.subr.mxu0 %v11540_v1  ;;  %9935 = vmatprep.subr.mxu1 %v11540_v1 }
  0x37   :  { %9903 = vmatpush3.msra.mxu0 %v11541_v3  ;;  %9936 = vmatpush3.msra.mxu1 %v11541_v3 }
  0x38   :  { %9904 = vmatprep.subr.mxu0 %v11540_v1  ;;  %9937 = vmatprep.subr.mxu1 %v11540_v1 }
  0x39   :  { %9905 = vmatpush3.msra.mxu0 %v11541_v3  ;;  %9938 = vmatpush3.msra.mxu1 %v11541_v3 }
  0x3a   :  { %9906 = vmatprep.subr.mxu0 %v11540_v1  ;;  %9939 = vmatprep.subr.mxu1 %v11540_v1 }
  0x3b   :  { %9907 = vmatpush3.msra.mxu0 %v11541_v3  ;;  %9940 = vmatpush3.msra.mxu1 %v11541_v3 }
  0x3c   :  { %9908 = vmatprep.subr.mxu0 %v11540_v1  ;;  %9941 = vmatprep.subr.mxu1 %v11540_v1 }
  0x3d   :  { %9909 = vmatpush3.msra.mxu0 %v11541_v3  ;;  %9942 = vmatpush3.msra.mxu1 %v11541_v3 }
  0x3e   :  { %9910 = vmatprep.subr.mxu0 %v11540_v1  ;;  %9943 = vmatprep.subr.mxu1 %v11540_v1 }
  0x3f   :  { %9911 = vmatpush3.msra.mxu0 %v11541_v3  ;;  %9944 = vmatpush3.msra.mxu1 %v11541_v3 }
  0x40   :  { %9912 = vmatprep.subr.mxu0 %v11540_v1  ;;  %9945 = vmatprep.subr.mxu1 %v11540_v1 }
  0x41   :  { %9913 = vmatpush3.msra.mxu0 %v11541_v3  ;;  %9946 = vmatpush3.msra.mxu1 %v11541_v3 }
  0x42   :  { %9914 = vmatprep.subr.mxu0 %v11540_v1  ;;  %9947 = vmatprep.subr.mxu1 %v11540_v1 }
  0x43   :  { %9915 = vmatpush3.msra.mxu0 %v11541_v3  ;;  %9948 = vmatpush3.msra.mxu1 %v11541_v3 }
  0x44   :  { %9916 = vmatprep.subr.mxu0 %v11540_v1  ;;  %9949 = vmatprep.subr.mxu1 %v11540_v1 }
  0x45   :  { %9917 = vmatpush3.msra.mxu0 %v11541_v3  ;;  %9950 = vmatpush3.msra.mxu1 %v11541_v3 }
  0x46   :  { %9918 = vmatprep.subr.mxu0 %v11540_v1  ;;  %9951 = vmatprep.subr.mxu1 %v11540_v1 }
  0x47   :  { %9919 = vmatpush3.msra.mxu0 %v11541_v3  ;;  %9952 = vmatpush3.msra.mxu1 %v11541_v3 }
  0x48   :  { %9920 = vmatprep.subr.mxu0 %v11540_v1  ;;  %9953 = vmatprep.subr.mxu1 %v11540_v1 }
  0x49   :  { %9921 = vmatpush3.msra.mxu0 %v11541_v3  ;;  %9922 = vmatprep.mubr.msk.f32.mxu0 %vm11542_vm0, %v11540_v1 }
  0x4a   :  { %9954 = vmatpush3.msra.mxu1 %v11541_v3  ;;  %9923 = vmatmul.mubr.f32.vlgmr.msra.gmra.mxu0 %v11624_v2 }
  0x4b   :  { %9955 = vmatprep.subr.mxu1 %v11540_v1  ;;  %9957 = vmatprep.mubr.msk.f32.mxu1 %vm11542_vm0, %v11540_v1 }
  0x4c   :  { %9956 = vmatpush3.msra.mxu1 %v11541_v3  ;;  %9960 = vmatprep.subr.mxu0 %v11540_v1 }
  0x4d   :  { %9958 = vmatmul.mubr.f32.vlgmr.msra.gmra.mxu1 %v540_v13  ;;  %9961 = vmatpush3.msra.mxu0 %v11540_v1  ;;  %v8973_v13 = vld [vmem:[%s13824_s1 + $0x4] sm:$0xf] }
  0x4e   :  { %9965 = vmatprep.subr.mxu1 %v11540_v1  ;;  %9962 = vmatprep.mubr.msk.f32.mxu0 %vm11542_vm0, %v11540_v1 }
  0x4f   :  { %9966 = vmatpush3.msra.mxu1 %v11540_v1  ;;  %9970 = vmatprep.subr.mxu0 %v11540_v1 }
  0x50   :  { %9963 = vmatmul.mubr.f32.vlgmr.msra.gmra.mxu0 %v11745_v9  ;;  %9967 = vmatprep.mubr.msk.f32.mxu1 %vm11542_vm0, %v11540_v1 }
  0x51   :  { %9971 = vmatpush3.msra.mxu0 %v11541_v3  ;;  %9968 = vmatmul.mubr.f32.vlgmr.msra.gmra.mxu1 %v11756_v10 }
  0x52   :  { %9972 = vmatprep.subr.mxu0 %v11540_v1  ;;  %10005 = vmatprep.subr.mxu1 %v11540_v1 }
  0x53   :  { %9973 = vmatpush3.msra.mxu0 %v11541_v3  ;;  %10006 = vmatpush3.msra.mxu1 %v11540_v1 }
  0x54   :  { %9974 = vmatprep.subr.mxu0 %v11540_v1  ;;  %10007 = vmatprep.mubr.msk.f32.mxu1 %vm11542_vm0, %v11540_v1 }
  0x55   :  { %9975 = vmatpush3.msra.mxu0 %v11541_v3  ;;  %10010 = vmatprep.subr.mxu1 %v11540_v1 }
  0x56   :  { %9976 = vmatprep.subr.mxu0 %v11540_v1  ;;  %10008 = vmatmul.mubr.f32.vlgmr.msra.gmra.mxu1 %v11745_v9 }
  0x57   :  { %9977 = vmatpush3.msra.mxu0 %v11541_v3  ;;  %10011 = vmatpush3.msra.mxu1 %v11541_v3 }
  0x58   :  { %9978 = vmatprep.subr.mxu0 %v11540_v1  ;;  %10012 = vmatprep.subr.mxu1 %v11540_v1 }
  0x59   :  { %9979 = vmatpush3.msra.mxu0 %v11541_v3  ;;  %10013 = vmatpush3.msra.mxu1 %v11541_v3 }
  0x5a   :  { %9980 = vmatprep.subr.mxu0 %v11540_v1  ;;  %10014 = vmatprep.subr.mxu1 %v11540_v1 }
  0x5b   :  { %9981 = vmatpush3.msra.mxu0 %v11541_v3  ;;  %10015 = vmatpush3.msra.mxu1 %v11541_v3 }
  0x5c   :  { %9982 = vmatprep.subr.mxu0 %v11540_v1  ;;  %10016 = vmatprep.subr.mxu1 %v11540_v1 }
  0x5d   :  { %9983 = vmatpush3.msra.mxu0 %v11541_v3  ;;  %10017 = vmatpush3.msra.mxu1 %v11541_v3 }
  0x5e   :  { %9984 = vmatprep.subr.mxu0 %v11540_v1  ;;  %10018 = vmatprep.subr.mxu1 %v11540_v1 }
  0x5f   :  { %9985 = vmatpush3.msra.mxu0 %v11541_v3  ;;  %10019 = vmatpush3.msra.mxu1 %v11541_v3 }
  0x60   :  { %9986 = vmatprep.subr.mxu0 %v11540_v1  ;;  %10020 = vmatprep.subr.mxu1 %v11540_v1 }
  0x61   :  { %9987 = vmatpush3.msra.mxu0 %v11541_v3  ;;  %10021 = vmatpush3.msra.mxu1 %v11541_v3 }
  0x62   :  { %9988 = vmatprep.subr.mxu0 %v11540_v1  ;;  %10022 = vmatprep.subr.mxu1 %v11540_v1 }
  0x63   :  { %9989 = vmatpush3.msra.mxu0 %v11541_v3  ;;  %10023 = vmatpush3.msra.mxu1 %v11541_v3 }
  0x64   :  { %9990 = vmatprep.subr.mxu0 %v11540_v1  ;;  %10024 = vmatprep.subr.mxu1 %v11540_v1 }
  0x65   :  { %9991 = vmatpush3.msra.mxu0 %v11541_v3  ;;  %10025 = vmatpush3.msra.mxu1 %v11541_v3 }
  0x66   :  { %9992 = vmatprep.subr.mxu0 %v11540_v1  ;;  %10026 = vmatprep.subr.mxu1 %v11540_v1 }
  0x67   :  { %9993 = vmatpush3.msra.mxu0 %v11541_v3  ;;  %10027 = vmatpush3.msra.mxu1 %v11541_v3 }
  0x68   :  { %9994 = vmatprep.subr.mxu0 %v11540_v1  ;;  %10028 = vmatprep.subr.mxu1 %v11540_v1 }
  0x69   :  { %9995 = vmatpush3.msra.mxu0 %v11541_v3  ;;  %10029 = vmatpush3.msra.mxu1 %v11541_v3 }
  0x6a   :  { %9996 = vmatprep.subr.mxu0 %v11540_v1  ;;  %10030 = vmatprep.subr.mxu1 %v11540_v1 }
  0x6b   :  { %9997 = vmatpush3.msra.mxu0 %v11541_v3  ;;  %10031 = vmatpush3.msra.mxu1 %v11541_v3 }
  0x6c   :  { %9998 = vmatprep.subr.mxu0 %v11540_v1  ;;  %10032 = vmatprep.subr.mxu1 %v11540_v1 }
  0x6d   :  { %9999 = vmatpush3.msra.mxu0 %v11541_v3  ;;  %10033 = vmatpush3.msra.mxu1 %v11541_v3 }
  0x6e   :  { %10000 = vmatprep.subr.mxu0 %v11540_v1  ;;  %10034 = vmatprep.subr.mxu1 %v11540_v1 }
  0x6f   :  { %10001 = vmatpush3.msra.mxu0 %v11541_v3  ;;  %10002 = vmatprep.mubr.msk.f32.mxu0 %vm11542_vm0, %v11540_v1 }
  0x70   :  { %10035 = vmatpush3.msra.mxu1 %v11541_v3  ;;  %10003 = vmatmul.mubr.f32.vlgmr.msra.gmra.mxu0 %v538_v11 }
  0x71   :  { %10036 = vmatprep.subr.mxu1 %v11540_v1  ;;  %10042 = vmatprep.mubr.msk.f32.mxu1 %vm11542_vm0, %v11540_v1 }
  0x72   :  { %10037 = vmatpush3.msra.mxu1 %v11541_v3  ;;  %10045 = vmatprep.subr.bf16.mxu0 %v11540_v1 }
  0x73   :  { %10038 = vmatprep.subr.mxu1 %v11540_v1  ;;  %10047 = vmatprep.mubr.msk.bf16.mxu0 %vm11542_vm0, %v11540_v1 }
  0x74   :  { %10039 = vmatpush3.msra.mxu1 %v11541_v3  ;;  %11444 = vset.pattern.permute.xlu0 %v11543_v14 }
  0x75   :  { %10040 = vmatprep.subr.mxu1 %v11540_v1  ;;  %11445 = vset.pattern.permute.xlu1 %v11543_v14 }
  0x76   :  { %10041 = vmatpush3.msra.mxu1 %v11541_v3 }
  0x77   :  { %10043 = vmatmul.mubr.f32.vlgmr.msra.gmra.mxu1 %v11745_v9  ;;  %10051 = vmatprep.subr.bf16.mxu1 %v11540_v1 }
  0x78   :  { %10053 = vmatprep.mubr.msk.bf16.mxu1 %vm11542_vm0, %v11540_v1 }
  0xc6   :  { %v179_v15 = vpop.f32.mrf.mxu1 }
  0xc8   :  { %v9844_v16 = vpop.f32.mrf.mxu1 }
  0xca   :  { %v251_v17 = vpop.f32.mrf.mxu1 }
  0xcc   :  { %v9849_v18 = vpop.f32.mrf.mxu1 }
  0xe5   :  { %v108_v19 = vpop.f32.mrf.mxu0 }
  0xe6   :  { %v180_v20 = vadd.f32 %v179_v15, %v108_v19  ;;  %v936_v19 = vld [vmem:[%s13824_s1] sm:$0xf] }
  0xe7   :  { %v9839_v21 = vpop.f32.mrf.mxu0 }
  0xe8   :  { %v252_v22 = vadd.f32 %v251_v17, %v180_v20 }
  0xea   :  { %v395_v23 = vpop.f32.mrf.mxu0 }
  0xeb   :  { %v324_v24 = vpop.f32.mrf.mxu1 }
  0xec   :  { %v325_v25 = vadd.f32 %v324_v24, %v252_v22  ;;  %v9889_v26 = vpop.f32.mrf.mxu0  ;;  %v8976_v24 = vld [vmem:[%s13824_s1 + $0x8] sm:$0xf] }
  0xed   :  { %v9884_v27 = vpop.f32.mrf.mxu1 }
  0xee   :  { %v396_v28 = vadd.f32 %v395_v23, %v325_v25 }
 0x10a   :  { %v466_v29 = vpop.f32.mrf.mxu0 }
 0x10b   :  { %v467_v42 = vadd.f32 %v466_v29, %v396_v28  ;;  %v8978_v28 = vld [vmem:[%s13824_s1 + $0xc] sm:$0xf] }
 0x10c   :  { %v9924_v30 = vpop.f32.mrf.mxu0 }
 0x10d   :  { %v542_v31 = vpop.f32.mrf.mxu1  ;;  %v904_v45 = vmul.f32 0.015625, %v467_v42 }
 0x10f   :  { %v9959_v32 = vpop.f32.mrf.mxu1  ;;  %v906_v50 = vmul.f32 %v904_v45, %v904_v45 }
 0x110   :  { %v613_v33 = vpop.f32.mrf.mxu0  ;;  %v8980_v32 = vld [vmem:[%s13824_s1 + $0x10] sm:$0xf] }
 0x111   :  { %v685_v34 = vpop.f32.mrf.mxu1  ;;  %v614_v39 = vadd.f32 %v613_v33, %v542_v31 }
 0x112   :  { %v9964_v35 = vpop.f32.mrf.mxu0 }
 0x113   :  { %v9969_v36 = vpop.f32.mrf.mxu1  ;;  %v686_v40 = vadd.f32 %v685_v34, %v614_v39 }
 0x114   :  { %v8982_v36 = vld [vmem:[%s13824_s1 + $0x14] sm:$0xf] }
 0x116   :  { %v829_v37 = vpop.f32.mrf.mxu1 }
 0x118   :  { %v10009_v38 = vpop.f32.mrf.mxu1 }
 0x130   :  { %v758_v41 = vpop.f32.mrf.mxu0 }
 0x131   :  { %v759_v43 = vadd.f32 %v758_v41, %v686_v40  ;;  %v8984_v40 = vld [vmem:[%s13824_s1 + $0x18] sm:$0xf] }
 0x132   :  { %v10004_v44 = vpop.f32.mrf.mxu0 }
 0x133   :  { %v830_v46 = vadd.f32 %v829_v37, %v759_v43  ;;  %v8986_v44 = vld [vmem:[%s13824_s1 + $0x1c] sm:$0xf] }
 0x137   :  { %v900_v47 = vpop.f32.mrf.mxu1 }
 0x138   :  { %v901_v48 = vadd.f32 %v900_v47, %v830_v46 }
 0x139   :  { %v10044_v49 = vpop.f32.mrf.mxu1 }
 0x13a   :  { %v905_v51 = vmul.f32 0.015625, %v901_v48  ;;  %v8988_v48 = vld [vmem:[%s13824_s1 + $0x20] sm:$0xf] }
 0x13c   :  { %v907_v52 = vsub.f32 %v905_v51, %v906_v50 }
 0x13e   :  { %v908_v53 = vmax.f32 %v907_v52, 0.0  ;;  %v8990_v52 = vld [vmem:[%s13824_s1 + $0x24] sm:$0xf] }
 0x140   :  { %v909_v54 = vadd.f32 1e-05, %v908_v53 }
 0x142   :  { %11446 = vrsqrt.f32 %v909_v54 }
 0x14f   :  { %v11447_v56 = vpop.eup %11446 }
 0x150   :  { %v911_v57 = vmul.f32 %v11447_v56, %v32_v55  ;;  %v8992_v55 = vld [vmem:[%s13824_s1 + $0x28] sm:$0xf] }
 0x152   :  { %916 = vperm.xlu0 %11444, %v911_v57   ;;  %v912_v59 = vmul.f32 %v911_v57, %v904_v45 }
 0x154   :  { %v913_v60 = vsub.f32 %v33_v58, %v912_v59  ;;  %v8994_v59 = vld [vmem:[%s13824_s1 + $0x2c] sm:$0xf] }
 0x156   :  { %922 = vperm.xlu0 %11444, %v913_v60  }
 0x1cd   :  { %v917_v61 = vpop.permute.xlu0 %916 }
 0x1ce   :  { %v919_v62 = vmul.f32 %v917_v61, %v11619_v0  ;;  %v35_v0 = vld [vmem:[%s13825_s2] sm:$0xff]  ;;  %s13878_s2 = smov 117  }
 0x1d1   :  { %v923_v63 = vpop.permute.xlu0 %922 }
 0x1d2   :  { %v925_v2 = vadd.f32 %v923_v63, %v919_v62  ;;  %v8996_v63 = vld [vmem:[%s13824_s1 + $0x30] sm:$0xf] }
 0x1d4   :  { %v926_v5 = vmax.f32 %v925_v2, 0.0 }
 0x1d6   :  { %v11898_v6 = vmul.f32 %v11895_v4, %v926_v5 }
 0x1d8   :  { %1037 = vrot.lane.b32.xlu0 %v11898_v6, %s13871_s13  ;;  %938 = vrot.lane.b32.xlu1 %v11898_v6, %s11545_s14  ;;  %v1611_v57 = vpack.c.bf16 %v11898_v6, %v11898_v6 }
 0x1da   :  { %v1616_v61 = vsel %vm947_vm1, %v1611_v57, 0 }
 0x1dc   :  { %1141 = vrot.lane.b32.xlu0 %v11898_v6, %s13869_s15  ;;  %934 = vrot.lane.b32.xlu1 %v11898_v6, %s11547_s16 }
 0x1e0   :  { %1245 = vrot.lane.b32.xlu0 %v11898_v6, %s13867_s17  ;;  %1089 = vrot.lane.b32.xlu1 %v11898_v6, %s13872_s18 }
 0x1e4   :  { %1349 = vrot.lane.b32.xlu0 %v11898_v6, %s13864_s19  ;;  %1193 = vrot.lane.b32.xlu1 %v11898_v6, %s13870_s20 }
 0x1e8   :  { %1453 = vrot.lane.b32.xlu0 %v11898_v6, %s13858_s21  ;;  %1297 = vrot.lane.b32.xlu1 %v11898_v6, %s13868_s22 }
 0x1ec   :  { %1557 = vrot.lane.b32.xlu0 %v11898_v6, %s13852_s23  ;;  %1401 = vrot.lane.b32.xlu1 %v11898_v6, %s13866_s24 }
 0x1f0   :  { %1711 = vrot.lane.b32.xlu0 %v11898_v6, %s13838_s25  ;;  %1505 = vrot.lane.b32.xlu1 %v11898_v6, %s13862_s26  ;;  %s13877_s25 = smov 120  }
 0x1f4   :  { %1815 = vrot.lane.b32.xlu0 %v11898_v6, %s13834_s27  ;;  %1659 = vrot.lane.b32.xlu1 %v11898_v6, %s13854_s28  ;;  %s13860_s27 = smov 119  }
 0x1f8   :  { %1919 = vrot.lane.b32.xlu0 %v11898_v6, %s13832_s29  ;;  %1763 = vrot.lane.b32.xlu1 %v11898_v6, %s13850_s30  ;;  %s13844_s29 = smov 116  }
 0x1fc   :  { %2023 = vrot.lane.b32.xlu0 %v11898_v6, %s13836_s9  ;;  %1867 = vrot.lane.b32.xlu1 %v11898_v6, %s13840_s10  ;;  %s13848_s10 = smov 117   ;;  %s13876_s9 = smov 122  }
 0x200   :  { %2127 = vrot.lane.b32.xlu0 %v11898_v6, %s13842_s11  ;;  %1971 = vrot.lane.b32.xlu1 %v11898_v6, %s13856_s12  ;;  %s13846_s11 = smov 115  }
 0x204   :  { %2231 = vrot.lane.b32.xlu0 %v11898_v6, %s13844_s29  ;;  %2075 = vrot.lane.b32.xlu1 %v11898_v6, %s13860_s27  ;;  %s13875_s29 = smov 124  }
 0x208   :  { %2337 = vperm.xlu0 %11444, %v35_v0   ;;  %2179 = vrot.lane.b32.xlu1 %v11898_v6, %s13848_s10  ;;  %v8998_v0 = vld [vmem:[%s13824_s1 + $0x34] sm:$0xf]  ;;  %s13873_s10 = smov 126  }
 0x20c   :  { %2283 = vrot.lane.b32.xlu1 %v11898_v6, %s13846_s11  ;;  %s13874_s11 = smov 123  }
 0x24a   :  { %v1038_v7 = vpop.permute.xlu0 %1037  ;;  %v939_v8 = vpop.permute.xlu1 %938 }
 0x24b   :  { %v942_v9 = vpack.c.bf16 %v939_v8, %v939_v8  ;;  %v1041_v10 = vpack.c.bf16 %v1038_v7, %v1038_v7 }
 0x24d   :  { %v949_v11 = vsel %vm947_vm1, %v942_v9, 0  ;;  %v1046_v16 = vsel %vm947_vm1, %v1041_v10, 0  ;;  %v9000_v10 = vld [vmem:[%s13824_s1 + $0x38] sm:$0xf] }
 0x24e   :  { %10046 = vmatpush3.bf16.msra.mxu0 %v949_v11  ;;  %v935_v12 = vpop.permute.xlu1 %934  ;;  %v1142_v17 = vpop.permute.xlu0 %1141 }
 0x24f   :  { %v937_v14 = vpack.c.bf16 %v935_v12, %v935_v12  ;;  %10057 = vmatprep.subr.bf16.mxu0 %v11540_v1  ;;  %v1145_v21 = vpack.c.bf16 %v1142_v17, %v1142_v17 }
 0x251   :  { %10048 = vmatmul.mubr.msk.bf16.vlgmr.msra.gmra.mxu0 %vm943_vm2, %v8973_v13  ;;  %v995_v15 = vsel %vm947_vm1, %v937_v14, 0  ;;  %v1150_v26 = vsel %vm947_vm1, %v1145_v21, 0  ;;  %v9002_v14 = vld [vmem:[%s13824_s1 + $0x3c] sm:$0xf] }
 0x252   :  { %10052 = vmatpush3.bf16.msra.mxu1 %v995_v15  ;;  %10058 = vmatpush3.bf16.msra.mxu0 %v1046_v16  ;;  %v1090_v18 = vpop.permute.xlu1 %1089  ;;  %v1246_v27 = vpop.permute.xlu0 %1245 }
 0x253   :  { %v1093_v20 = vpack.c.bf16 %v1090_v18, %v1090_v18  ;;  %10063 = vmatprep.subr.bf16.mxu1 %v11540_v1  ;;  %10059 = vmatprep.mubr.msk.bf16.mxu0 %vm11542_vm0, %v11540_v1  ;;  %v1249_v29 = vpack.c.bf16 %v1246_v27, %v1246_v27  ;;  %v9004_v18 = vld [vmem:[%s13824_s1 + $0x40] sm:$0xf] }
 0x254   :  { %10069 = vmatprep.subr.bf16.mxu0 %v11540_v1 }
 0x255   :  { %10054 = vmatmul.mubr.msk.bf16.vlgmr.msra.gmra.mxu1 %vm943_vm2, %v936_v19  ;;  %v1098_v22 = vsel %vm947_vm1, %v1093_v20, 0  ;;  %v1254_v34 = vsel %vm947_vm1, %v1249_v29, 0 }
 0x256   :  { %10064 = vmatpush3.bf16.msra.mxu1 %v1098_v22  ;;  %v1194_v23 = vpop.permute.xlu1 %1193  ;;  %10065 = vmatprep.mubr.msk.bf16.mxu1 %vm11542_vm0, %v11540_v1  ;;  %v1350_v35 = vpop.permute.xlu0 %1349  ;;  %v9006_v22 = vld [vmem:[%s13824_s1 + $0x44] sm:$0xf] }
 0x257   :  { %10075 = vmatprep.subr.bf16.mxu1 %v11540_v1  ;;  %v1197_v25 = vpack.c.bf16 %v1194_v23, %v1194_v23  ;;  %v1353_v37 = vpack.c.bf16 %v1350_v35, %v1350_v35 }
 0x259   :  { %10060 = vmatmul.mubr.msk.bf16.vlgmr.msra.gmra.mxu0 %vm943_vm2, %v8976_v24  ;;  %v1202_v30 = vsel %vm947_vm1, %v1197_v25, 0  ;;  %v1358_v42 = vsel %vm947_vm1, %v1353_v37, 0 }
 0x25a   :  { %10070 = vmatpush3.bf16.msra.mxu0 %v1150_v26  ;;  %10071 = vmatprep.mubr.msk.bf16.mxu0 %vm11542_vm0, %v11540_v1  ;;  %v1298_v31 = vpop.permute.xlu1 %1297  ;;  %v1454_v43 = vpop.permute.xlu0 %1453  ;;  %v9008_v26 = vld [vmem:[%s13824_s1 + $0x48] sm:$0xf] }
 0x25b   :  { %10081 = vmatprep.subr.bf16.mxu0 %v11540_v1  ;;  %v1301_v33 = vpack.c.bf16 %v1298_v31, %v1298_v31  ;;  %v1457_v45 = vpack.c.bf16 %v1454_v43, %v1454_v43 }
 0x25d   :  { %10066 = vmatmul.mubr.msk.bf16.vlgmr.msra.gmra.mxu1 %vm943_vm2, %v8978_v28  ;;  %v1306_v38 = vsel %vm947_vm1, %v1301_v33, 0  ;;  %v1462_v50 = vsel %vm947_vm1, %v1457_v45, 0 }
 0x25e   :  { %10076 = vmatpush3.bf16.msra.mxu1 %v1202_v30  ;;  %10077 = vmatprep.mubr.msk.bf16.mxu1 %vm11542_vm0, %v11540_v1  ;;  %v1402_v39 = vpop.permute.xlu1 %1401  ;;  %v1558_v51 = vpop.permute.xlu0 %1557  ;;  %v9010_v30 = vld [vmem:[%s13824_s1 + $0x4c] sm:$0xf] }
 0x25f   :  { %10087 = vmatprep.subr.bf16.mxu1 %v11540_v1  ;;  %v1405_v41 = vpack.c.bf16 %v1402_v39, %v1402_v39  ;;  %v1561_v53 = vpack.c.bf16 %v1558_v51, %v1558_v51  ;;  %v9022_v51 = vld [vmem:[%s13824_s1 + $0x64] sm:$0xf] }
 0x261   :  { %10072 = vmatmul.mubr.msk.bf16.vlgmr.msra.gmra.mxu0 %vm943_vm2, %v8980_v32  ;;  %v1410_v46 = vsel %vm947_vm1, %v1405_v41, 0  ;;  %v1566_v56 = vsel %vm947_vm1, %v1561_v53, 0 }
 0x262   :  { %10082 = vmatpush3.bf16.msra.mxu0 %v1254_v34  ;;  %10083 = vmatprep.mubr.msk.bf16.mxu0 %vm11542_vm0, %v11540_v1  ;;  %v1506_v47 = vpop.permute.xlu1 %1505  ;;  %v1712_v62 = vpop.permute.xlu0 %1711  ;;  %v9012_v34 = vld [vmem:[%s13824_s1 + $0x50] sm:$0xf] }
 0x263   :  { %10093 = vmatprep.subr.bf16.mxu0 %v11540_v1  ;;  %v1509_v49 = vpack.c.bf16 %v1506_v47, %v1506_v47  ;;  %v1715_v2 = vpack.c.bf16 %v1712_v62, %v1712_v62 }
 0x265   :  { %10078 = vmatmul.mubr.msk.bf16.vlgmr.msra.gmra.mxu1 %vm943_vm2, %v8982_v36  ;;  %v1514_v54 = vsel %vm947_vm1, %v1509_v49, 0  ;;  %v1720_v7 = vsel %vm947_vm1, %v1715_v2, 0  ;;  %v9020_v49 = vld [vmem:[%s13824_s1 + $0x60] sm:$0xf] }
 0x266   :  { %10088 = vmatpush3.bf16.msra.mxu1 %v1306_v38  ;;  %10089 = vmatprep.mubr.msk.bf16.mxu1 %vm11542_vm0, %v11540_v1  ;;  %v1660_v58 = vpop.permute.xlu1 %1659  ;;  %v1816_v9 = vpop.permute.xlu0 %1815  ;;  %v9014_v38 = vld [vmem:[%s13824_s1 + $0x54] sm:$0xf] }
 0x267   :  { %10099 = vmatprep.subr.bf16.mxu1 %v11540_v1  ;;  %v1663_v60 = vpack.c.bf16 %v1660_v58, %v1660_v58  ;;  %v1819_v11 = vpack.c.bf16 %v1816_v9, %v1816_v9 }
 0x269   :  { %10084 = vmatmul.mubr.msk.bf16.vlgmr.msra.gmra.mxu0 %vm943_vm2, %v8984_v40  ;;  %v1668_v5 = vsel %vm947_vm1, %v1663_v60, 0  ;;  %v1824_v15 = vsel %vm947_vm1, %v1819_v11, 0 }
 0x26a   :  { %10094 = vmatpush3.bf16.msra.mxu0 %v1358_v42  ;;  %10095 = vmatprep.mubr.msk.bf16.mxu0 %vm11542_vm0, %v11540_v1  ;;  %v1764_v6 = vpop.permute.xlu1 %1763  ;;  %v1920_v17 = vpop.permute.xlu0 %1919  ;;  %v9016_v42 = vld [vmem:[%s13824_s1 + $0x58] sm:$0xf] }
 0x26b   :  { %10105 = vmatprep.subr.bf16.mxu0 %v11540_v1  ;;  %v1767_v8 = vpack.c.bf16 %v1764_v6, %v1764_v6  ;;  %v1923_v19 = vpack.c.bf16 %v1920_v17, %v1920_v17 }
 0x26d   :  { %10090 = vmatmul.mubr.msk.bf16.vlgmr.msra.gmra.mxu1 %vm943_vm2, %v8986_v44  ;;  %v1772_v12 = vsel %vm947_vm1, %v1767_v8, 0  ;;  %v1928_v23 = vsel %vm947_vm1, %v1923_v19, 0 }
 0x26e   :  { %10100 = vmatpush3.bf16.msra.mxu1 %v1410_v46  ;;  %10101 = vmatprep.mubr.msk.bf16.mxu1 %vm11542_vm0, %v11540_v1  ;;  %v1868_v13 = vpop.permute.xlu1 %1867  ;;  %v2024_v25 = vpop.permute.xlu0 %2023  ;;  %v9018_v46 = vld [vmem:[%s13824_s1 + $0x5c] sm:$0xf] }
 0x26f   :  { %10111 = vmatprep.subr.bf16.mxu1 %v11540_v1  ;;  %v1871_v16 = vpack.c.bf16 %v1868_v13, %v1868_v13  ;;  %v2027_v27 = vpack.c.bf16 %v2024_v25, %v2024_v25 }
 0x271   :  { %10096 = vmatmul.mubr.msk.bf16.vlgmr.msra.gmra.mxu0 %vm943_vm2, %v8988_v48  ;;  %v1876_v20 = vsel %vm947_vm1, %v1871_v16, 0  ;;  %v2032_v31 = vsel %vm947_vm1, %v2027_v27, 0 }
 0x272   :  { %10106 = vmatpush3.bf16.msra.mxu0 %v1462_v50  ;;  %10107 = vmatprep.mubr.msk.bf16.mxu0 %vm11542_vm0, %v11540_v1  ;;  %v1972_v21 = vpop.permute.xlu1 %1971  ;;  %v2128_v33 = vpop.permute.xlu0 %2127 }
 0x273   :  { %10117 = vmatprep.subr.bf16.mxu0 %v11540_v1  ;;  %v1975_v24 = vpack.c.bf16 %v1972_v21, %v1972_v21  ;;  %v2131_v35 = vpack.c.bf16 %v2128_v33, %v2128_v33 }
 0x275   :  { %10102 = vmatmul.mubr.msk.bf16.vlgmr.msra.gmra.mxu1 %vm943_vm2, %v8990_v52  ;;  %v1980_v28 = vsel %vm947_vm1, %v1975_v24, 0  ;;  %v2136_v39 = vsel %vm947_vm1, %v2131_v35, 0  ;;  %v9024_v52 = vld [vmem:[%s13824_s1 + $0x68] sm:$0xf] }
 0x276   :  { %10112 = vmatpush3.bf16.msra.mxu1 %v1514_v54  ;;  %10113 = vmatprep.mubr.msk.bf16.mxu1 %vm11542_vm0, %v11540_v1  ;;  %v2076_v29 = vpop.permute.xlu1 %2075  ;;  %v2232_v41 = vpop.permute.xlu0 %2231 }
 0x277   :  { %10123 = vmatprep.subr.bf16.mxu1 %v11540_v1  ;;  %v2079_v32 = vpack.c.bf16 %v2076_v29, %v2076_v29  ;;  %v2235_v43 = vpack.c.bf16 %v2232_v41, %v2232_v41 }
 0x279   :  { %10108 = vmatmul.mubr.msk.bf16.vlgmr.msra.gmra.mxu0 %vm943_vm2, %v8992_v55  ;;  %v2084_v36 = vsel %vm947_vm1, %v2079_v32, 0  ;;  %v2240_v47 = vsel %vm947_vm1, %v2235_v43, 0 }
 0x27a   :  { %10118 = vmatpush3.bf16.msra.mxu0 %v1566_v56  ;;  %10119 = vmatprep.mubr.msk.bf16.mxu0 %vm11542_vm0, %v11540_v1  ;;  %v2180_v37 = vpop.permute.xlu1 %2179 }
 0x27b   :  { %10129 = vmatprep.subr.bf16.mxu0 %v11540_v1  ;;  %v2183_v40 = vpack.c.bf16 %v2180_v37, %v2180_v37 }
 0x27d   :  { %10114 = vmatmul.mubr.msk.bf16.vlgmr.msra.gmra.mxu1 %vm943_vm2, %v8994_v59  ;;  %v2188_v44 = vsel %vm947_vm1, %v2183_v40, 0 }
 0x27e   :  { %10124 = vmatpush3.bf16.msra.mxu1 %v1616_v61  ;;  %10125 = vmatprep.mubr.msk.bf16.mxu1 %vm11542_vm0, %v11540_v1  ;;  %v2284_v45 = vpop.permute.xlu1 %2283 }
 0x27f   :  { %10135 = vmatprep.subr.bf16.mxu1 %v11540_v1  ;;  %v2287_v48 = vpack.c.bf16 %v2284_v45, %v2284_v45 }
 0x281   :  { %10120 = vmatmul.mubr.msk.bf16.vlgmr.msra.gmra.mxu0 %vm943_vm2, %v8996_v63  ;;  %v2292_v50 = vsel %vm947_vm1, %v2287_v48, 0 }
 0x282   :  { %10130 = vmatpush3.bf16.msra.mxu0 %v1668_v5  ;;  %10131 = vmatprep.mubr.msk.bf16.mxu0 %vm11542_vm0, %v11540_v1 }
 0x283   :  { %10141 = vmatprep.subr.bf16.mxu0 %v11540_v1 }
 0x285   :  { %10126 = vmatmul.mubr.msk.bf16.vlgmr.msra.gmra.mxu1 %vm943_vm2, %v8998_v0 }
 0x286   :  { %10136 = vmatpush3.bf16.msra.mxu1 %v1720_v7  ;;  %10137 = vmatprep.mubr.msk.bf16.mxu1 %vm11542_vm0, %v11540_v1 }
 0x287   :  { %10147 = vmatprep.subr.bf16.mxu1 %v11540_v1 }
 0x289   :  { %10132 = vmatmul.mubr.msk.bf16.vlgmr.msra.gmra.mxu0 %vm943_vm2, %v9000_v10 }
 0x28a   :  { %10142 = vmatpush3.bf16.msra.mxu0 %v1772_v12  ;;  %10143 = vmatprep.mubr.msk.bf16.mxu0 %vm11542_vm0, %v11540_v1 }
 0x28b   :  { %10153 = vmatprep.subr.bf16.mxu0 %v11540_v1 }
 0x28d   :  { %10138 = vmatmul.mubr.msk.bf16.vlgmr.msra.gmra.mxu1 %vm943_vm2, %v9002_v14 }
 0x28e   :  { %10148 = vmatpush3.bf16.msra.mxu1 %v1824_v15  ;;  %10149 = vmatprep.mubr.msk.bf16.mxu1 %vm11542_vm0, %v11540_v1 }
 0x28f   :  { %10159 = vmatprep.subr.bf16.mxu1 %v11540_v1 }
 0x291   :  { %10144 = vmatmul.mubr.msk.bf16.vlgmr.msra.gmra.mxu0 %vm943_vm2, %v9004_v18 }
 0x292   :  { %10154 = vmatpush3.bf16.msra.mxu0 %v1876_v20  ;;  %10155 = vmatprep.mubr.msk.bf16.mxu0 %vm11542_vm0, %v11540_v1 }
 0x293   :  { %10165 = vmatprep.subr.bf16.mxu0 %v11540_v1 }
 0x295   :  { %10150 = vmatmul.mubr.msk.bf16.vlgmr.msra.gmra.mxu1 %vm943_vm2, %v9006_v22 }
 0x296   :  { %10160 = vmatpush3.bf16.msra.mxu1 %v1928_v23  ;;  %10161 = vmatprep.mubr.msk.bf16.mxu1 %vm11542_vm0, %v11540_v1 }
 0x297   :  { %10171 = vmatprep.subr.bf16.mxu1 %v11540_v1 }
 0x299   :  { %10156 = vmatmul.mubr.msk.bf16.vlgmr.msra.gmra.mxu0 %vm943_vm2, %v9008_v26 }
 0x29a   :  { %10166 = vmatpush3.bf16.msra.mxu0 %v1980_v28  ;;  %10167 = vmatprep.mubr.msk.bf16.mxu0 %vm11542_vm0, %v11540_v1 }
 0x29b   :  { %10177 = vmatprep.subr.bf16.mxu0 %v11540_v1 }
 0x29d   :  { %10162 = vmatmul.mubr.msk.bf16.vlgmr.msra.gmra.mxu1 %vm943_vm2, %v9010_v30 }
 0x29e   :  { %10172 = vmatpush3.bf16.msra.mxu1 %v2032_v31  ;;  %10173 = vmatprep.mubr.msk.bf16.mxu1 %vm11542_vm0, %v11540_v1 }
 0x29f   :  { %10183 = vmatprep.subr.bf16.mxu1 %v11540_v1 }
 0x2a1   :  { %10168 = vmatmul.mubr.msk.bf16.vlgmr.msra.gmra.mxu0 %vm943_vm2, %v9012_v34 }
 0x2a2   :  { %10178 = vmatpush3.bf16.msra.mxu0 %v2084_v36  ;;  %10179 = vmatprep.mubr.msk.bf16.mxu0 %vm11542_vm0, %v11540_v1 }
 0x2a3   :  { %10189 = vmatprep.subr.bf16.mxu0 %v11540_v1 }
 0x2a5   :  { %10174 = vmatmul.mubr.msk.bf16.vlgmr.msra.gmra.mxu1 %vm943_vm2, %v9014_v38 }
 0x2a6   :  { %10184 = vmatpush3.bf16.msra.mxu1 %v2136_v39  ;;  %10185 = vmatprep.mubr.msk.bf16.mxu1 %vm11542_vm0, %v11540_v1 }
 0x2a7   :  { %10195 = vmatprep.subr.bf16.mxu1 %v11540_v1 }
 0x2a9   :  { %10180 = vmatmul.mubr.msk.bf16.vlgmr.msra.gmra.mxu0 %vm943_vm2, %v9016_v42 }
 0x2aa   :  { %10190 = vmatpush3.bf16.msra.mxu0 %v2188_v44  ;;  %10191 = vmatprep.mubr.msk.bf16.mxu0 %vm11542_vm0, %v11540_v1 }
 0x2ab   :  { %10201 = vmatprep.subr.bf16.mxu0 %v11540_v1 }
 0x2ad   :  { %10186 = vmatmul.mubr.msk.bf16.vlgmr.msra.gmra.mxu1 %vm943_vm2, %v9018_v46 }
 0x2ae   :  { %10196 = vmatpush3.bf16.msra.mxu1 %v2240_v47  ;;  %10197 = vmatprep.mubr.msk.bf16.mxu1 %vm11542_vm0, %v11540_v1 }
 0x2af   :  { %10207 = vmatprep.subr.mxu1 %v11540_v1 }
 0x2b1   :  { %10192 = vmatmul.mubr.msk.bf16.vlgmr.msra.gmra.mxu0 %vm943_vm2, %v9020_v49 }
 0x2b2   :  { %10202 = vmatpush3.bf16.msra.mxu0 %v2292_v50  ;;  %10203 = vmatprep.mubr.msk.bf16.mxu0 %vm11542_vm0, %v11540_v1 }
 0x2b3   :  { %10242 = vmatprep.subr.mxu0 %v11540_v1 }
 0x2b5   :  { %10198 = vmatmul.mubr.msk.bf16.vlgmr.msra.gmra.mxu1 %vm943_vm2, %v9022_v51 }
 0x2b6   :  { %10208 = vmatpush3.msra.mxu1 %v11541_v3  ;;  %10239 = vmatprep.mubr.msk.f32.mxu1 %vm11542_vm0, %v11540_v1 }
 0x2b7   :  { %10209 = vmatprep.subr.mxu1 %v11540_v1 }
 0x2b8   :  { %10210 = vmatpush3.msra.mxu1 %v11541_v3 }
 0x2b9   :  { %10204 = vmatmul.mubr.msk.bf16.vlgmr.msra.gmra.mxu0 %vm943_vm2, %v9024_v52  ;;  %10211 = vmatprep.subr.mxu1 %v11540_v1 }
 0x2ba   :  { %10212 = vmatpush3.msra.mxu1 %v11541_v3  ;;  %10243 = vmatpush3.msra.mxu0 %v11540_v1 }
 0x2bb   :  { %10213 = vmatprep.subr.mxu1 %v11540_v1  ;;  %10244 = vmatprep.mubr.msk.f32.mxu0 %vm11542_vm0, %v11540_v1 }
 0x2bc   :  { %10214 = vmatpush3.msra.mxu1 %v11541_v3  ;;  %10247 = vmatprep.subr.mxu0 %v11540_v1 }
 0x2bd   :  { %10215 = vmatprep.subr.mxu1 %v11540_v1 }
 0x2be   :  { %10216 = vmatpush3.msra.mxu1 %v11541_v3 }
 0x2bf   :  { %10217 = vmatprep.subr.mxu1 %v11540_v1 }
 0x2c0   :  { %10218 = vmatpush3.msra.mxu1 %v11541_v3 }
 0x2c1   :  { %10219 = vmatprep.subr.mxu1 %v11540_v1 }
 0x2c2   :  { %10220 = vmatpush3.msra.mxu1 %v11541_v3 }
 0x2c3   :  { %10221 = vmatprep.subr.mxu1 %v11540_v1 }
 0x2c4   :  { %10222 = vmatpush3.msra.mxu1 %v11541_v3 }
 0x2c5   :  { %10223 = vmatprep.subr.mxu1 %v11540_v1 }
 0x2c6   :  { %10224 = vmatpush3.msra.mxu1 %v11541_v3 }
 0x2c7   :  { %10225 = vmatprep.subr.mxu1 %v11540_v1 }
 0x2c8   :  { %10226 = vmatpush3.msra.mxu1 %v11541_v3 }
 0x2c9   :  { %10227 = vmatprep.subr.mxu1 %v11540_v1 }
 0x2ca   :  { %10228 = vmatpush3.msra.mxu1 %v11541_v3 }
 0x2cb   :  { %10229 = vmatprep.subr.mxu1 %v11540_v1 }
 0x2cc   :  { %10230 = vmatpush3.msra.mxu1 %v11541_v3 }
 0x2cd   :  { %10231 = vmatprep.subr.mxu1 %v11540_v1 }
 0x2ce   :  { %10232 = vmatpush3.msra.mxu1 %v11541_v3 }
 0x2cf   :  { %10233 = vmatprep.subr.mxu1 %v11540_v1 }
 0x2d0   :  { %10234 = vmatpush3.msra.mxu1 %v11541_v3 }
 0x2d1   :  { %10235 = vmatprep.subr.mxu1 %v11540_v1 }
 0x2d2   :  { %10236 = vmatpush3.msra.mxu1 %v11541_v3 }
 0x2d3   :  { %10237 = vmatprep.subr.mxu1 %v11540_v1 }
 0x2d4   :  { %10238 = vmatpush3.msra.mxu1 %v11541_v3 }
 0x2d5   :  { %10287 = vmatprep.subr.mxu1 %v11540_v1 }
 0x311   :  { %v985_v53 = vpop.f32.mrf.mxu0 }
 0x313   :  { %v10049_v54 = vpop.f32.mrf.mxu0 }
 0x315   :  { %v988_v55 = vpop.f32.mrf.mxu0  ;;  %v1031_v56 = vpop.f32.mrf.mxu1 }
 0x316   :  { %v1032_v46 = vadd.f32 %v1031_v56, %v985_v53 }
 0x317   :  { %v10050_v57 = vpop.f32.mrf.mxu0  ;;  %v10055_v58 = vpop.f32.mrf.mxu1 }
 0x319   :  { %v1034_v59 = vpop.f32.mrf.mxu1  ;;  %v1082_v60 = vpop.f32.mrf.mxu0 }
 0x31a   :  { %v1088_v49 = vadd.f32 %v1082_v60, %v1032_v46 }
 0x31b   :  { %v10056_v61 = vpop.f32.mrf.mxu1  ;;  %v10061_v62 = vpop.f32.mrf.mxu0 }
 0x31d   :  { %v1085_v63 = vpop.f32.mrf.mxu0  ;;  %v1134_v2 = vpop.f32.mrf.mxu1 }
 0x31e   :  { %v1140_v52 = vadd.f32 %v1134_v2, %v1088_v49 }
 0x31f   :  { %v10062_v5 = vpop.f32.mrf.mxu0  ;;  %v10067_v6 = vpop.f32.mrf.mxu1 }
 0x321   :  { %v1137_v0 = vpop.f32.mrf.mxu1  ;;  %v1186_v7 = vpop.f32.mrf.mxu0 }
 0x322   :  { %v1192_v57 = vadd.f32 %v1186_v7, %v1140_v52 }
 0x323   :  { %v10068_v8 = vpop.f32.mrf.mxu1  ;;  %v10073_v9 = vpop.f32.mrf.mxu0 }
 0x325   :  { %v1189_v10 = vpop.f32.mrf.mxu0  ;;  %v1238_v11 = vpop.f32.mrf.mxu1 }
 0x326   :  { %v1244_v61 = vadd.f32 %v1238_v11, %v1192_v57 }
 0x327   :  { %v10074_v12 = vpop.f32.mrf.mxu0  ;;  %v10079_v13 = vpop.f32.mrf.mxu1 }
 0x329   :  { %v1241_v14 = vpop.f32.mrf.mxu1  ;;  %v1290_v15 = vpop.f32.mrf.mxu0 }
 0x32a   :  { %v1296_v5 = vadd.f32 %v1290_v15, %v1244_v61 }
 0x32b   :  { %v10080_v16 = vpop.f32.mrf.mxu1  ;;  %v10085_v17 = vpop.f32.mrf.mxu0 }
 0x32d   :  { %v1293_v18 = vpop.f32.mrf.mxu0  ;;  %v1342_v19 = vpop.f32.mrf.mxu1 }
 0x32e   :  { %v1348_v8 = vadd.f32 %v1342_v19, %v1296_v5 }
 0x32f   :  { %v10086_v20 = vpop.f32.mrf.mxu0  ;;  %v10091_v21 = vpop.f32.mrf.mxu1 }
 0x331   :  { %v1345_v22 = vpop.f32.mrf.mxu1  ;;  %v1394_v23 = vpop.f32.mrf.mxu0 }
 0x332   :  { %v1400_v56 = vadd.f32 %v1394_v23, %v1348_v8 }
 0x333   :  { %v10092_v24 = vpop.f32.mrf.mxu1  ;;  %v10097_v25 = vpop.f32.mrf.mxu0 }
 0x335   :  { %v1397_v26 = vpop.f32.mrf.mxu0  ;;  %v1446_v27 = vpop.f32.mrf.mxu1 }
 0x336   :  { %v1452_v12 = vadd.f32 %v1446_v27, %v1400_v56 }
 0x337   :  { %v10098_v28 = vpop.f32.mrf.mxu0  ;;  %v10103_v29 = vpop.f32.mrf.mxu1 }
 0x339   :  { %v1449_v30 = vpop.f32.mrf.mxu1  ;;  %v1498_v31 = vpop.f32.mrf.mxu0 }
 0x33a   :  { %v1504_v14 = vadd.f32 %v1498_v31, %v1452_v12 }
 0x33b   :  { %v10104_v32 = vpop.f32.mrf.mxu1  ;;  %v10109_v33 = vpop.f32.mrf.mxu0 }
 0x33d   :  { %v1501_v34 = vpop.f32.mrf.mxu0  ;;  %v1550_v35 = vpop.f32.mrf.mxu1 }
 0x33e   :  { %v1556_v17 = vadd.f32 %v1550_v35, %v1504_v14 }
 0x33f   :  { %v10110_v36 = vpop.f32.mrf.mxu0  ;;  %v10115_v37 = vpop.f32.mrf.mxu1 }
 0x341   :  { %v1553_v38 = vpop.f32.mrf.mxu1  ;;  %v1602_v39 = vpop.f32.mrf.mxu0 }
 0x342   :  { %v1608_v20 = vadd.f32 %v1602_v39, %v1556_v17 }
 0x343   :  { %v10116_v40 = vpop.f32.mrf.mxu1  ;;  %v10121_v41 = vpop.f32.mrf.mxu0 }
 0x345   :  { %v1605_v42 = vpop.f32.mrf.mxu0  ;;  %v1652_v43 = vpop.f32.mrf.mxu1 }
 0x346   :  { %v1658_v22 = vadd.f32 %v1652_v43, %v1608_v20 }
 0x347   :  { %v10122_v44 = vpop.f32.mrf.mxu0  ;;  %v10127_v45 = vpop.f32.mrf.mxu1 }
 0x349   :  { %v1655_v47 = vpop.f32.mrf.mxu1  ;;  %v1704_v48 = vpop.f32.mrf.mxu0 }
 0x34a   :  { %v1710_v25 = vadd.f32 %v1704_v48, %v1658_v22 }
 0x34b   :  { %v10128_v50 = vpop.f32.mrf.mxu1  ;;  %v10133_v51 = vpop.f32.mrf.mxu0 }
 0x34d   :  { %v1707_v54 = vpop.f32.mrf.mxu0  ;;  %v1756_v55 = vpop.f32.mrf.mxu1 }
 0x34e   :  { %v1762_v28 = vadd.f32 %v1756_v55, %v1710_v25 }
 0x34f   :  { %v10134_v58 = vpop.f32.mrf.mxu0  ;;  %v10139_v59 = vpop.f32.mrf.mxu1 }
 0x351   :  { %v1759_v62 = vpop.f32.mrf.mxu1  ;;  %v1808_v63 = vpop.f32.mrf.mxu0 }
 0x352   :  { %v1814_v30 = vadd.f32 %v1808_v63, %v1762_v28  ;;  %v12207_v63 = vpop.permute.xlu0 %2337 }
 0x353   :  { %v10140_v6 = vpop.f32.mrf.mxu1  ;;  %v10145_v0 = vpop.f32.mrf.mxu0 }
 0x355   :  { %v1811_v9 = vpop.f32.mrf.mxu0  ;;  %v1860_v53 = vpop.f32.mrf.mxu1 }
 0x356   :  { %v1866_v33 = vadd.f32 %v1860_v53, %v1814_v30 }
 0x357   :  { %v10146_v10 = vpop.f32.mrf.mxu0  ;;  %v10151_v60 = vpop.f32.mrf.mxu1 }
 0x359   :  { %v1863_v13 = vpop.f32.mrf.mxu1  ;;  %v1912_v2 = vpop.f32.mrf.mxu0 }
 0x35a   :  { %v1918_v36 = vadd.f32 %v1912_v2, %v1866_v33 }
 0x35b   :  { %v10152_v16 = vpop.f32.mrf.mxu1  ;;  %v10157_v7 = vpop.f32.mrf.mxu0 }
 0x35d   :  { %v1915_v18 = vpop.f32.mrf.mxu0  ;;  %v1964_v11 = vpop.f32.mrf.mxu1 }
 0x35e   :  { %v1970_v39 = vadd.f32 %v1964_v11, %v1918_v36 }
 0x35f   :  { %v10158_v21 = vpop.f32.mrf.mxu0  ;;  %v10163_v15 = vpop.f32.mrf.mxu1 }
 0x361   :  { %v1967_v24 = vpop.f32.mrf.mxu1  ;;  %v2016_v19 = vpop.f32.mrf.mxu0 }
 0x362   :  { %v2022_v42 = vadd.f32 %v2016_v19, %v1970_v39 }
 0x363   :  { %v10164_v26 = vpop.f32.mrf.mxu1  ;;  %v10169_v23 = vpop.f32.mrf.mxu0 }
 0x365   :  { %v2019_v29 = vpop.f32.mrf.mxu0  ;;  %v2068_v27 = vpop.f32.mrf.mxu1 }
 0x366   :  { %v2074_v45 = vadd.f32 %v2068_v27, %v2022_v42 }
 0x367   :  { %v10170_v32 = vpop.f32.mrf.mxu0  ;;  %v10175_v31 = vpop.f32.mrf.mxu1 }
 0x369   :  { %v2071_v34 = vpop.f32.mrf.mxu1  ;;  %v2120_v35 = vpop.f32.mrf.mxu0 }
 0x36a   :  { %v2126_v48 = vadd.f32 %v2120_v35, %v2074_v45 }
 0x36b   :  { %v10176_v37 = vpop.f32.mrf.mxu1  ;;  %v10181_v38 = vpop.f32.mrf.mxu0 }
 0x36d   :  { %v2123_v40 = vpop.f32.mrf.mxu0  ;;  %v2172_v41 = vpop.f32.mrf.mxu1 }
 0x36e   :  { %v2178_v51 = vadd.f32 %v2172_v41, %v2126_v48 }
 0x36f   :  { %v10182_v43 = vpop.f32.mrf.mxu0  ;;  %v10187_v44 = vpop.f32.mrf.mxu1 }
 0x371   :  { %v2175_v46 = vpop.f32.mrf.mxu1  ;;  %v2224_v47 = vpop.f32.mrf.mxu0 }
 0x372   :  { %v2230_v55 = vadd.f32 %v2224_v47, %v2178_v51 }
 0x373   :  { %v10188_v49 = vpop.f32.mrf.mxu1  ;;  %v10193_v50 = vpop.f32.mrf.mxu0 }
 0x375   :  { %v2227_v52 = vpop.f32.mrf.mxu0  ;;  %v2276_v54 = vpop.f32.mrf.mxu1 }
 0x376   :  { %v2282_v59 = vadd.f32 %v2276_v54, %v2230_v55 }
 0x377   :  { %v10194_v57 = vpop.f32.mrf.mxu0  ;;  %v10199_v58 = vpop.f32.mrf.mxu1 }
 0x379   :  { %v2279_v61 = vpop.f32.mrf.mxu1  ;;  %v2328_v62 = vpop.f32.mrf.mxu0 }
 0x37a   :  { %v2334_v5 = vadd.f32 %v2328_v62, %v2282_v59  ;;  %v11454_v61 = vld [vmem:[%s13828_s5] sm:$0xff] }
 0x37b   :  { %v10200_v6 = vpop.f32.mrf.mxu1  ;;  %v10205_v0 = vpop.f32.mrf.mxu0 }
 0x37c   :  { %v2340_v8 = vadd.f32 %v12207_v63, %v2334_v5  ;;  %v11455_v6 = vld [vmem:[%s13829_s6] sm:$0xff] }
 0x37d   :  { %v2331_v9 = vpop.f32.mrf.mxu0 }
 0x37e   :  { %v12211_v53 = vmul.f32 %v11895_v4, %v2340_v8 }
 0x37f   :  { %v10206_v56 = vpop.f32.mrf.mxu0 }
 0x380   :  { %v12214_v10 = vand.u32 4294901760, %v12211_v53  ;;  %v2775_v2 = vmul.f32 %v12211_v53, %v12211_v53 }
 0x382   :  { %10245 = vmatmul.mubr.f32.vlgmr.msra.gmra.mxu0 %v12214_v10  ;;  %v12219_v60 = vsub.f32 %v12211_v53, %v12214_v10  ;;  %v12319_v14 = vand.u32 4294901760, %v2775_v2 }
 0x383   :  { %10248 = vmatpush3.msra.mxu0 %v11540_v1  ;;  %10249 = vmatprep.mubr.msk.f32.mxu0 %vm11542_vm0, %v11540_v1 }
 0x384   :  { %10252 = vmatprep.subr.mxu0 %v11540_v1  ;;  %v2409_v4 = vand.u32 4294901760, %v12219_v60  ;;  %v12334_v16 = vsub.f32 %v2775_v2, %v12319_v14 }
 0x386   :  { %10250 = vmatmul.mubr.f32.vlgmr.msra.gmra.mxu0 %v12219_v60  ;;  %v2410_v12 = vsub.f32 %v12219_v60, %v2409_v4  ;;  %v2843_v7 = vand.u32 4294901760, %v12334_v16 }
 0x387   :  { %10253 = vmatpush3.msra.mxu0 %v11541_v3  ;;  %10284 = vmatprep.mubr.msk.f32.mxu0 %vm11542_vm0, %v11540_v1 }
 0x388   :  { %10254 = vmatprep.subr.mxu0 %v11540_v1  ;;  %v2411_v13 = vand.u32 4294901760, %v2410_v12  ;;  %v2844_v17 = vsub.f32 %v12334_v16, %v2843_v7 }
 0x389   :  { %10255 = vmatpush3.msra.mxu0 %v11541_v3 }
 0x38a   :  { %10256 = vmatprep.subr.mxu0 %v11540_v1  ;;  %10240 = vmatmul.mubr.f32.vlgmr.msra.gmra.mxu1 %v2411_v13  ;;  %v2845_v18 = vand.u32 4294901760, %v2844_v17 }
 0x38b   :  { %10257 = vmatpush3.msra.mxu0 %v11541_v3  ;;  %10288 = vmatpush3.msra.mxu1 %v11540_v1 }
 0x38c   :  { %10258 = vmatprep.subr.mxu0 %v11540_v1  ;;  %10289 = vmatprep.mubr.msk.f32.mxu1 %vm11542_vm0, %v11540_v1 }
 0x38d   :  { %10259 = vmatpush3.msra.mxu0 %v11541_v3  ;;  %10292 = vmatprep.subr.mxu1 %v11540_v1 }
 0x38e   :  { %10260 = vmatprep.subr.mxu0 %v11540_v1  ;;  %10290 = vmatmul.mubr.f32.vlgmr.msra.gmra.mxu1 %v12214_v10 }
 0x38f   :  { %10261 = vmatpush3.msra.mxu0 %v11541_v3  ;;  %10293 = vmatpush3.msra.mxu1 %v11541_v3 }
 0x390   :  { %10262 = vmatprep.subr.mxu0 %v11540_v1  ;;  %10294 = vmatprep.subr.mxu1 %v11540_v1 }
 0x391   :  { %10263 = vmatpush3.msra.mxu0 %v11541_v3  ;;  %10295 = vmatpush3.msra.mxu1 %v11541_v3 }
 0x392   :  { %10264 = vmatprep.subr.mxu0 %v11540_v1  ;;  %10296 = vmatprep.subr.mxu1 %v11540_v1 }
 0x393   :  { %10265 = vmatpush3.msra.mxu0 %v11541_v3  ;;  %10297 = vmatpush3.msra.mxu1 %v11541_v3 }
 0x394   :  { %10266 = vmatprep.subr.mxu0 %v11540_v1  ;;  %10298 = vmatprep.subr.mxu1 %v11540_v1 }
 0x395   :  { %10267 = vmatpush3.msra.mxu0 %v11541_v3  ;;  %10299 = vmatpush3.msra.mxu1 %v11541_v3 }
 0x396   :  { %10268 = vmatprep.subr.mxu0 %v11540_v1  ;;  %10300 = vmatprep.subr.mxu1 %v11540_v1 }
 0x397   :  { %10269 = vmatpush3.msra.mxu0 %v11541_v3  ;;  %10301 = vmatpush3.msra.mxu1 %v11541_v3 }
 0x398   :  { %10270 = vmatprep.subr.mxu0 %v11540_v1  ;;  %10302 = vmatprep.subr.mxu1 %v11540_v1 }
 0x399   :  { %10271 = vmatpush3.msra.mxu0 %v11541_v3  ;;  %10303 = vmatpush3.msra.mxu1 %v11541_v3 }
 0x39a   :  { %10272 = vmatprep.subr.mxu0 %v11540_v1  ;;  %10304 = vmatprep.subr.mxu1 %v11540_v1 }
 0x39b   :  { %10273 = vmatpush3.msra.mxu0 %v11541_v3  ;;  %10305 = vmatpush3.msra.mxu1 %v11541_v3 }
 0x39c   :  { %10274 = vmatprep.subr.mxu0 %v11540_v1  ;;  %10306 = vmatprep.subr.mxu1 %v11540_v1 }
 0x39d   :  { %10275 = vmatpush3.msra.mxu0 %v11541_v3  ;;  %10307 = vmatpush3.msra.mxu1 %v11541_v3 }
 0x39e   :  { %10276 = vmatprep.subr.mxu0 %v11540_v1  ;;  %10308 = vmatprep.subr.mxu1 %v11540_v1 }
 0x39f   :  { %10277 = vmatpush3.msra.mxu0 %v11541_v3  ;;  %10309 = vmatpush3.msra.mxu1 %v11541_v3 }
 0x3a0   :  { %10278 = vmatprep.subr.mxu0 %v11540_v1  ;;  %10310 = vmatprep.subr.mxu1 %v11540_v1 }
 0x3a1   :  { %10279 = vmatpush3.msra.mxu0 %v11541_v3  ;;  %10311 = vmatpush3.msra.mxu1 %v11541_v3 }
 0x3a2   :  { %10280 = vmatprep.subr.mxu0 %v11540_v1  ;;  %10312 = vmatprep.subr.mxu1 %v11540_v1 }
 0x3a3   :  { %10281 = vmatpush3.msra.mxu0 %v11541_v3  ;;  %10313 = vmatpush3.msra.mxu1 %v11541_v3 }
 0x3a4   :  { %10282 = vmatprep.subr.mxu0 %v11540_v1  ;;  %10314 = vmatprep.subr.mxu1 %v11540_v1 }
 0x3a5   :  { %10283 = vmatpush3.msra.mxu0 %v11541_v3  ;;  %10315 = vmatpush3.msra.mxu1 %v11541_v3 }
 0x3a6   :  { %10285 = vmatmul.mubr.f32.vlgmr.msra.gmra.mxu0 %v2409_v4  ;;  %10316 = vmatprep.subr.mxu1 %v11540_v1  ;;  %v12447_v4 = vld [vmem:[%s13830_s7] ss:$0 sm:$0xff] }
 0x3a7   :  { %10327 = vmatprep.subr.mxu0 %v11540_v1  ;;  %10317 = vmatpush3.msra.mxu1 %v11541_v3 }
 0x3a8   :  { %10328 = vmatpush3.msra.mxu0 %v11541_v3  ;;  %10318 = vmatprep.subr.mxu1 %v11540_v1 }
 0x3a9   :  { %10329 = vmatprep.subr.mxu0 %v11540_v1  ;;  %10319 = vmatpush3.msra.mxu1 %v11541_v3 }
 0x3aa   :  { %10330 = vmatpush3.msra.mxu0 %v11541_v3  ;;  %10320 = vmatprep.subr.mxu1 %v11540_v1 }
 0x3ab   :  { %10331 = vmatprep.subr.mxu0 %v11540_v1  ;;  %10321 = vmatpush3.msra.mxu1 %v11541_v3 }
 0x3ac   :  { %10332 = vmatpush3.msra.mxu0 %v11541_v3  ;;  %10322 = vmatprep.subr.mxu1 %v11540_v1 }
 0x3ad   :  { %10333 = vmatprep.subr.mxu0 %v11540_v1  ;;  %10323 = vmatpush3.msra.mxu1 %v11541_v3 }
 0x3ae   :  { %10324 = vmatprep.mubr.msk.f32.mxu1 %vm11542_vm0, %v11540_v1  ;;  %10334 = vmatpush3.msra.mxu0 %v11541_v3 }
 0x3af   :  { %10325 = vmatmul.mubr.f32.vlgmr.msra.gmra.mxu1 %v12214_v10  ;;  %10335 = vmatprep.subr.mxu0 %v11540_v1 }
 0x3b0   :  { %10336 = vmatpush3.msra.mxu0 %v11541_v3  ;;  %10362 = vmatprep.subr.mxu1 %v11540_v1 }
 0x3b1   :  { %10337 = vmatprep.subr.mxu0 %v11540_v1  ;;  %10363 = vmatpush3.msra.mxu1 %v11540_v1 }
 0x3b2   :  { %10338 = vmatpush3.msra.mxu0 %v11541_v3  ;;  %10364 = vmatprep.mubr.msk.f32.mxu1 %vm11542_vm0, %v11540_v1 }
 0x3b3   :  { %10339 = vmatprep.subr.mxu0 %v11540_v1  ;;  %10365 = vmatmul.mubr.f32.vlgmr.msra.gmra.mxu1 %v12319_v14 }
 0x3b4   :  { %10340 = vmatpush3.msra.mxu0 %v11541_v3  ;;  %10367 = vmatprep.subr.mxu1 %v11540_v1 }
 0x3b5   :  { %10341 = vmatprep.subr.mxu0 %v11540_v1  ;;  %10368 = vmatpush3.msra.mxu1 %v11540_v1 }
 0x3b6   :  { %10342 = vmatpush3.msra.mxu0 %v11541_v3  ;;  %10369 = vmatprep.mubr.msk.f32.mxu1 %vm11542_vm0, %v11540_v1 }
 0x3b7   :  { %10372 = vmatprep.subr.mxu1 %v11540_v1  ;;  %10343 = vmatprep.subr.mxu0 %v11540_v1 }
 0x3b8   :  { %10370 = vmatmul.mubr.f32.vlgmr.msra.gmra.mxu1 %v12334_v16  ;;  %10344 = vmatpush3.msra.mxu0 %v11541_v3 }
 0x3b9   :  { %10373 = vmatpush3.msra.mxu1 %v11541_v3  ;;  %10345 = vmatprep.subr.mxu0 %v11540_v1 }
 0x3ba   :  { %10374 = vmatprep.subr.mxu1 %v11540_v1  ;;  %10346 = vmatpush3.msra.mxu0 %v11541_v3 }
 0x3bb   :  { %10375 = vmatpush3.msra.mxu1 %v11541_v3  ;;  %10347 = vmatprep.subr.mxu0 %v11540_v1 }
 0x3bc   :  { %10376 = vmatprep.subr.mxu1 %v11540_v1  ;;  %10348 = vmatpush3.msra.mxu0 %v11541_v3 }
 0x3bd   :  { %10377 = vmatpush3.msra.mxu1 %v11541_v3  ;;  %10349 = vmatprep.subr.mxu0 %v11540_v1 }
 0x3be   :  { %10378 = vmatprep.subr.mxu1 %v11540_v1  ;;  %10350 = vmatpush3.msra.mxu0 %v11541_v3 }
 0x3bf   :  { %10379 = vmatpush3.msra.mxu1 %v11541_v3  ;;  %10351 = vmatprep.subr.mxu0 %v11540_v1 }
 0x3c0   :  { %10380 = vmatprep.subr.mxu1 %v11540_v1  ;;  %10352 = vmatpush3.msra.mxu0 %v11541_v3 }
 0x3c1   :  { %10381 = vmatpush3.msra.mxu1 %v11541_v3  ;;  %10353 = vmatprep.subr.mxu0 %v11540_v1 }
 0x3c2   :  { %10382 = vmatprep.subr.mxu1 %v11540_v1  ;;  %10354 = vmatpush3.msra.mxu0 %v11541_v3 }
 0x3c3   :  { %10383 = vmatpush3.msra.mxu1 %v11541_v3  ;;  %10355 = vmatprep.subr.mxu0 %v11540_v1 }
 0x3c4   :  { %10384 = vmatprep.subr.mxu1 %v11540_v1  ;;  %10356 = vmatpush3.msra.mxu0 %v11541_v3 }
 0x3c5   :  { %10385 = vmatpush3.msra.mxu1 %v11541_v3  ;;  %10357 = vmatprep.subr.mxu0 %v11540_v1 }
 0x3c6   :  { %10386 = vmatprep.subr.mxu1 %v11540_v1  ;;  %10358 = vmatpush3.msra.mxu0 %v11541_v3 }
 0x3c7   :  { %10387 = vmatpush3.msra.mxu1 %v11541_v3  ;;  %10359 = vmatprep.mubr.msk.f32.mxu0 %vm11542_vm0, %v11540_v1 }
 0x3c8   :  { %10388 = vmatprep.subr.mxu1 %v11540_v1  ;;  %10360 = vmatmul.mubr.f32.vlgmr.msra.gmra.mxu0 %v2845_v18 }
 0x3c9   :  { %10389 = vmatpush3.msra.mxu1 %v11541_v3  ;;  %10407 = vmatprep.subr.mxu0 %v11540_v1 }
 0x3ca   :  { %10390 = vmatprep.subr.mxu1 %v11540_v1  ;;  %10408 = vmatpush3.msra.mxu0 %v11540_v1 }
 0x3cb   :  { %10391 = vmatpush3.msra.mxu1 %v11541_v3  ;;  %10409 = vmatprep.mubr.msk.f32.mxu0 %vm11542_vm0, %v11540_v1 }
 0x3cc   :  { %10392 = vmatprep.subr.mxu1 %v11540_v1  ;;  %10412 = vmatprep.subr.mxu0 %v11540_v1 }
 0x3cd   :  { %10393 = vmatpush3.msra.mxu1 %v11541_v3  ;;  %10410 = vmatmul.mubr.f32.vlgmr.msra.gmra.mxu0 %v12319_v14 }
 0x3ce   :  { %10413 = vmatpush3.msra.mxu0 %v11541_v3  ;;  %10394 = vmatprep.subr.mxu1 %v11540_v1 }
 0x3cf   :  { %10414 = vmatprep.subr.mxu0 %v11540_v1  ;;  %10395 = vmatpush3.msra.mxu1 %v11541_v3 }
 0x3d0   :  { %10415 = vmatpush3.msra.mxu0 %v11541_v3  ;;  %10396 = vmatprep.subr.mxu1 %v11540_v1 }
 0x3d1   :  { %10416 = vmatprep.subr.mxu0 %v11540_v1  ;;  %10397 = vmatpush3.msra.mxu1 %v11541_v3 }
 0x3d2   :  { %10417 = vmatpush3.msra.mxu0 %v11541_v3  ;;  %10398 = vmatprep.subr.mxu1 %v11540_v1 }
 0x3d3   :  { %10418 = vmatprep.subr.mxu0 %v11540_v1  ;;  %10399 = vmatpush3.msra.mxu1 %v11541_v3 }
 0x3d4   :  { %10419 = vmatpush3.msra.mxu0 %v11541_v3  ;;  %10400 = vmatprep.subr.mxu1 %v11540_v1 }
 0x3d5   :  { %10420 = vmatprep.subr.mxu0 %v11540_v1  ;;  %10401 = vmatpush3.msra.mxu1 %v11541_v3 }
 0x3d6   :  { %10421 = vmatpush3.msra.mxu0 %v11541_v3  ;;  %10402 = vmatprep.subr.mxu1 %v11540_v1 }
 0x3d7   :  { %10422 = vmatprep.subr.mxu0 %v11540_v1  ;;  %10403 = vmatpush3.msra.mxu1 %v11541_v3 }
 0x3d8   :  { %10404 = vmatprep.mubr.msk.f32.mxu1 %vm11542_vm0, %v11540_v1  ;;  %10423 = vmatpush3.msra.mxu0 %v11541_v3 }
 0x3d9   :  { %10405 = vmatmul.mubr.f32.vlgmr.msra.gmra.mxu1 %v2843_v7  ;;  %10424 = vmatprep.subr.mxu0 %v11540_v1 }
 0x3da   :  { %10425 = vmatpush3.msra.mxu0 %v11541_v3  ;;  %10444 = vmatprep.mubr.msk.f32.mxu0 %vm11542_vm0, %v11540_v1 }
 0x3db   :  { %10426 = vmatprep.subr.mxu0 %v11540_v1  ;;  %10447 = vmatprep.subr.bf16.mxu1 %v11540_v1 }
 0x3dc   :  { %10427 = vmatpush3.msra.mxu0 %v11541_v3  ;;  %10449 = vmatprep.mubr.msk.bf16.mxu1 %vm11542_vm0, %v11540_v1 }
 0x3dd   :  { %10428 = vmatprep.subr.mxu0 %v11540_v1 }
 0x3de   :  { %10429 = vmatpush3.msra.mxu0 %v11541_v3 }
 0x3df   :  { %10430 = vmatprep.subr.mxu0 %v11540_v1 }
 0x3e0   :  { %10431 = vmatpush3.msra.mxu0 %v11541_v3 }
 0x3e1   :  { %10432 = vmatprep.subr.mxu0 %v11540_v1 }
 0x3e2   :  { %10433 = vmatpush3.msra.mxu0 %v11541_v3 }
 0x3e3   :  { %10434 = vmatprep.subr.mxu0 %v11540_v1 }
 0x3e4   :  { %10435 = vmatpush3.msra.mxu0 %v11541_v3 }
 0x3e5   :  { %10436 = vmatprep.subr.mxu0 %v11540_v1 }
 0x3e6   :  { %10437 = vmatpush3.msra.mxu0 %v11541_v3 }
 0x3e7   :  { %10438 = vmatprep.subr.mxu0 %v11540_v1 }
 0x3e8   :  { %10439 = vmatpush3.msra.mxu0 %v11541_v3 }
 0x3e9   :  { %10440 = vmatprep.subr.mxu0 %v11540_v1 }
 0x3ea   :  { %10441 = vmatpush3.msra.mxu0 %v11541_v3 }
 0x3eb   :  { %10442 = vmatprep.subr.mxu0 %v11540_v1 }
 0x3ec   :  { %10443 = vmatpush3.msra.mxu0 %v11541_v3 }
 0x3ed   :  { %10445 = vmatmul.mubr.f32.vlgmr.msra.gmra.mxu0 %v12319_v14  ;;  %10453 = vmatprep.subr.bf16.mxu0 %v11540_v1 }
 0x3ee   :  { %10455 = vmatprep.mubr.msk.bf16.mxu0 %vm11542_vm0, %v11540_v1 }
 0x442   :  { %v2484_v11 = vpop.f32.mrf.mxu0 }
 0x444   :  { %v10246_v20 = vpop.f32.mrf.mxu0 }
 0x445   :  { %v9026_v20 = vld [vmem:[%s13826_s3 + $0x4] sm:$0xf] }
 0x446   :  { %v2556_v21 = vpop.f32.mrf.mxu0 }
 0x448   :  { %v10251_v15 = vpop.f32.mrf.mxu0 }
 0x44a   :  { %v2413_v22 = vpop.f32.mrf.mxu1 }
 0x44b   :  { %v2485_v24 = vadd.f32 %v2484_v11, %v2413_v22 }
 0x44c   :  { %v10241_v19 = vpop.f32.mrf.mxu1 }
 0x44d   :  { %v2557_v25 = vadd.f32 %v2556_v21, %v2485_v24  ;;  %v3235_v21 = vld [vmem:[%s13826_s3] sm:$0xf] }
 0x44e   :  { %v2700_v26 = vpop.f32.mrf.mxu1 }
 0x450   :  { %v10291_v23 = vpop.f32.mrf.mxu1 }
 0x466   :  { %v2629_v28 = vpop.f32.mrf.mxu0 }
 0x467   :  { %v2630_v29 = vadd.f32 %v2629_v28, %v2557_v25 }
 0x468   :  { %v10286_v27 = vpop.f32.mrf.mxu0 }
 0x469   :  { %v2701_v30 = vadd.f32 %v2700_v26, %v2630_v29  ;;  %v9029_v29 = vld [vmem:[%s13826_s3 + $0x8] sm:$0xf]  ;;  %v9031_v27 = vld [vmem:[%s13826_s3 + $0xc] sm:$0xf] }
 0x46f   :  { %v2771_v32 = vpop.f32.mrf.mxu1 }
 0x470   :  { %v2772_v45 = vadd.f32 %v2771_v32, %v2701_v30 }
 0x471   :  { %v10326_v31 = vpop.f32.mrf.mxu1 }
 0x472   :  { %v3209_v47 = vmul.f32 0.015625, %v2772_v45  ;;  %v9039_v45 = vld [vmem:[%s13826_s3 + $0x1c] sm:$0xf] }
 0x473   :  { %v2918_v33 = vpop.f32.mrf.mxu1 }
 0x474   :  { %v3211_v52 = vmul.f32 %v3209_v47, %v3209_v47 }
 0x475   :  { %v10366_v34 = vpop.f32.mrf.mxu1 }
 0x478   :  { %v2990_v35 = vpop.f32.mrf.mxu1 }
 0x47a   :  { %v10371_v36 = vpop.f32.mrf.mxu1 }
 0x47b   :  { %v9033_v36 = vld [vmem:[%s13826_s3 + $0x10] sm:$0xf] }
 0x488   :  { %v2847_v37 = vpop.f32.mrf.mxu0 }
 0x489   :  { %v2919_v43 = vadd.f32 %v2918_v33, %v2847_v37  ;;  %v9035_v37 = vld [vmem:[%s13826_s3 + $0x14] sm:$0xf] }
 0x48a   :  { %v10361_v38 = vpop.f32.mrf.mxu0 }
 0x48b   :  { %v2991_v44 = vadd.f32 %v2990_v35, %v2919_v43 }
 0x48d   :  { %v3134_v39 = vpop.f32.mrf.mxu0 }
 0x48f   :  { %v10411_v40 = vpop.f32.mrf.mxu0 }
 0x499   :  { %v3063_v41 = vpop.f32.mrf.mxu1 }
 0x49a   :  { %v3064_v46 = vadd.f32 %v3063_v41, %v2991_v44  ;;  %v9037_v44 = vld [vmem:[%s13826_s3 + $0x18] sm:$0xf] }
 0x49b   :  { %v10406_v42 = vpop.f32.mrf.mxu1 }
 0x49c   :  { %v3135_v48 = vadd.f32 %v3134_v39, %v3064_v46 }
 0x4ad   :  { %v3205_v49 = vpop.f32.mrf.mxu0 }
 0x4ae   :  { %v3206_v50 = vadd.f32 %v3205_v49, %v3135_v48 }
 0x4af   :  { %v10446_v51 = vpop.f32.mrf.mxu0 }
 0x4b0   :  { %v3210_v54 = vmul.f32 0.015625, %v3206_v50 }
 0x4b2   :  { %v3212_v55 = vsub.f32 %v3210_v54, %v3211_v52  ;;  %v9041_v52 = vld [vmem:[%s13826_s3 + $0x20] sm:$0xf]  ;;  %v9043_v54 = vld [vmem:[%s13826_s3 + $0x24] sm:$0xf] }
 0x4b4   :  { %v3213_v57 = vmax.f32 %v3212_v55, 0.0 }
 0x4b6   :  { %v3214_v58 = vadd.f32 1e-05, %v3213_v57 }
 0x4b8   :  { %11448 = vrsqrt.f32 %v3214_v58 }
 0x4c5   :  { %v11449_v59 = vpop.eup %11448 }
 0x4c6   :  { %v3216_v62 = vmul.f32 %v11454_v61, %v11449_v59 }
 0x4c8   :  { %3221 = vperm.xlu1 %11445, %v3216_v62   ;;  %v3217_v5 = vmul.f32 %v3216_v62, %v3209_v47  ;;  %v9045_v62 = vld [vmem:[%s13826_s3 + $0x28] sm:$0xf] }
 0x4ca   :  { %v3218_v0 = vsub.f32 %v11455_v6, %v3217_v5  ;;  %v9047_v5 = vld [vmem:[%s13826_s3 + $0x2c] sm:$0xf] }
 0x4cc   :  { %3227 = vperm.xlu0 %11444, %v3218_v0  }
 0x543   :  { %v3222_v8 = vpop.permute.xlu1 %3221 }
 0x544   :  { %v3224_v9 = vmul.f32 %v3222_v8, %v12211_v53  ;;  %v36_v53 = vld [vmem:[%s13827_s4] sm:$0xff]  ;;  %s13886_s4 = smov 1  }
 0x547   :  { %v3228_v56 = vpop.permute.xlu0 %3227 }
 0x548   :  { %v3230_v10 = vadd.f32 %v3228_v56, %v3224_v9 }
 0x54a   :  { %v3231_v60 = vmax.f32 %v3230_v10, 0.0 }
 0x54c   :  { %v12450_v12 = vmul.f32 %v12447_v4, %v3231_v60  ;;  %v9049_v60 = vld [vmem:[%s13826_s3 + $0x30] sm:$0xf] }
 0x54e   :  { %3233 = vrot.lane.b32.xlu0 %v12450_v12, %s11547_s16  ;;  %3237 = vrot.lane.b32.xlu1 %v12450_v12, %s11545_s14  ;;  %v3908_v61 = vpack.c.bf16 %v12450_v12, %v12450_v12 }
 0x550   :  { %v3913_v0 = vsel %vm947_vm1, %v3908_v61, 0 }
 0x552   :  { %3386 = vrot.lane.b32.xlu0 %v12450_v12, %s13872_s18  ;;  %3334 = vrot.lane.b32.xlu1 %v12450_v12, %s13871_s13 }
 0x556   :  { %3490 = vrot.lane.b32.xlu0 %v12450_v12, %s13870_s20  ;;  %3438 = vrot.lane.b32.xlu1 %v12450_v12, %s13869_s15 }
 0x55a   :  { %3594 = vrot.lane.b32.xlu0 %v12450_v12, %s13868_s22  ;;  %3542 = vrot.lane.b32.xlu1 %v12450_v12, %s13867_s17 }
 0x55e   :  { %3698 = vrot.lane.b32.xlu0 %v12450_v12, %s13866_s24  ;;  %3646 = vrot.lane.b32.xlu1 %v12450_v12, %s13864_s19  ;;  %s13887_s19 = smov 125  }
 0x562   :  { %3802 = vrot.lane.b32.xlu0 %v12450_v12, %s13862_s26  ;;  %3750 = vrot.lane.b32.xlu1 %v12450_v12, %s13858_s21  ;;  %s13882_s26 = smov 5   ;;  %s13885_s21 = smov 127  }
 0x566   :  { %3956 = vrot.lane.b32.xlu0 %v12450_v12, %s13854_s28  ;;  %3854 = vrot.lane.b32.xlu1 %v12450_v12, %s13852_s23  ;;  %s13880_s23 = smov 115   ;;  %s13881_s28 = smov 116  }
 0x56a   :  { %4060 = vrot.lane.b32.xlu0 %v12450_v12, %s13850_s30  ;;  %4008 = vrot.lane.b32.xlu1 %v12450_v12, %s13873_s10  ;;  %s13879_s30 = smov 118  }
 0x56e   :  { %4164 = vrot.lane.b32.xlu0 %v12450_v12, %s13874_s11  ;;  %4112 = vrot.lane.b32.xlu1 %v12450_v12, %s13875_s29 }
 0x572   :  { %4268 = vrot.lane.b32.xlu0 %v12450_v12, %s13856_s12  ;;  %4216 = vrot.lane.b32.xlu1 %v12450_v12, %s13876_s9  ;;  %s13884_s12 = smov 3  }
 0x576   :  { %4372 = vrot.lane.b32.xlu0 %v12450_v12, %s13860_s27  ;;  %4320 = vrot.lane.b32.xlu1 %v12450_v12, %s13877_s25  ;;  %s13883_s27 = smov 2  }
 0x57a   :  { %4476 = vrot.lane.b32.xlu0 %v12450_v12, %s13878_s2  ;;  %4424 = vrot.lane.b32.xlu1 %v12450_v12, %s13879_s30 }
 0x57e   :  { %4580 = vrot.lane.b32.xlu0 %v12450_v12, %s13880_s23  ;;  %4528 = vrot.lane.b32.xlu1 %v12450_v12, %s13881_s28  ;;  %v9051_v12 = vld [vmem:[%s13826_s3 + $0x34] sm:$0xf] }
 0x582   :  { %4634 = vperm.xlu1 %11445, %v36_v53  }
 0x5c0   :  { %v3234_v13 = vpop.permute.xlu0 %3233  ;;  %v3238_v2 = vpop.permute.xlu1 %3237 }
 0x5c1   :  { %v3236_v14 = vpack.c.bf16 %v3234_v13, %v3234_v13  ;;  %v3241_v16 = vpack.c.bf16 %v3238_v2, %v3238_v2 }
 0x5c3   :  { %v3292_v7 = vsel %vm947_vm1, %v3236_v14, 0  ;;  %v3246_v17 = vsel %vm947_vm1, %v3241_v16, 0 }
 0x5c4   :  { %10454 = vmatpush3.bf16.msra.mxu0 %v3292_v7  ;;  %v3387_v18 = vpop.permute.xlu0 %3386  ;;  %10448 = vmatpush3.bf16.msra.mxu1 %v3246_v17  ;;  %v3335_v11 = vpop.permute.xlu1 %3334  ;;  %v9053_v17 = vld [vmem:[%s13826_s3 + $0x38] sm:$0xf] }
 0x5c5   :  { %v3390_v15 = vpack.c.bf16 %v3387_v18, %v3387_v18  ;;  %v3338_v22 = vpack.c.bf16 %v3335_v11, %v3335_v11  ;;  %10459 = vmatprep.subr.bf16.mxu1 %v11540_v1  ;;  %10465 = vmatprep.subr.bf16.mxu0 %v11540_v1  ;;  %v9055_v18 = vld [vmem:[%s13826_s3 + $0x3c] sm:$0xf] }
 0x5c7   :  { %v3395_v24 = vsel %vm947_vm1, %v3390_v15, 0  ;;  %v3343_v19 = vsel %vm947_vm1, %v3338_v22, 0  ;;  %10450 = vmatmul.mubr.msk.bf16.vlgmr.msra.gmra.mxu1 %vm943_vm2, %v9026_v20  ;;  %10456 = vmatmul.mubr.msk.bf16.vlgmr.msra.gmra.mxu0 %vm943_vm2, %v3235_v21 }
 0x5c8   :  { %10466 = vmatpush3.bf16.msra.mxu0 %v3395_v24  ;;  %v3491_v25 = vpop.permute.xlu0 %3490  ;;  %10460 = vmatpush3.bf16.msra.mxu1 %v3343_v19  ;;  %v3439_v26 = vpop.permute.xlu1 %3438  ;;  %v9057_v19 = vld [vmem:[%s13826_s3 + $0x40] sm:$0xf] }
 0x5c9   :  { %10461 = vmatprep.mubr.msk.bf16.mxu1 %vm11542_vm0, %v11540_v1  ;;  %10467 = vmatprep.mubr.msk.bf16.mxu0 %vm11542_vm0, %v11540_v1  ;;  %v3494_v23 = vpack.c.bf16 %v3491_v25, %v3491_v25  ;;  %v3442_v28 = vpack.c.bf16 %v3439_v26, %v3439_v26  ;;  %v9059_v25 = vld [vmem:[%s13826_s3 + $0x44] sm:$0xf] }
 0x5ca   :  { %10471 = vmatprep.subr.bf16.mxu1 %v11540_v1  ;;  %10477 = vmatprep.subr.bf16.mxu0 %v11540_v1 }
 0x5cb   :  { %v3499_v30 = vsel %vm947_vm1, %v3494_v23, 0  ;;  %v3447_v32 = vsel %vm947_vm1, %v3442_v28, 0 }
 0x5cc   :  { %v3595_v31 = vpop.permute.xlu0 %3594  ;;  %v3543_v33 = vpop.permute.xlu1 %3542 }
 0x5cd   :  { %v3598_v34 = vpack.c.bf16 %v3595_v31, %v3595_v31  ;;  %v3546_v35 = vpack.c.bf16 %v3543_v33, %v3543_v33  ;;  %v9063_v31 = vld [vmem:[%s13826_s3 + $0x4c] sm:$0xf] }
 0x5cf   :  { %10462 = vmatmul.mubr.msk.bf16.vlgmr.msra.gmra.mxu1 %vm943_vm2, %v9029_v29  ;;  %10468 = vmatmul.mubr.msk.bf16.vlgmr.msra.gmra.mxu0 %vm943_vm2, %v9031_v27  ;;  %v3603_v38 = vsel %vm947_vm1, %v3598_v34, 0  ;;  %v3551_v39 = vsel %vm947_vm1, %v3546_v35, 0 }
 0x5d0   :  { %10472 = vmatpush3.bf16.msra.mxu1 %v3447_v32  ;;  %10478 = vmatpush3.bf16.msra.mxu0 %v3499_v30  ;;  %v3699_v40 = vpop.permute.xlu0 %3698  ;;  %v3647_v41 = vpop.permute.xlu1 %3646  ;;  %v9061_v32 = vld [vmem:[%s13826_s3 + $0x48] sm:$0xf] }
 0x5d1   :  { %10473 = vmatprep.mubr.msk.bf16.mxu1 %vm11542_vm0, %v11540_v1  ;;  %10479 = vmatprep.mubr.msk.bf16.mxu0 %vm11542_vm0, %v11540_v1  ;;  %v3702_v42 = vpack.c.bf16 %v3699_v40, %v3699_v40  ;;  %v3650_v43 = vpack.c.bf16 %v3647_v41, %v3647_v41  ;;  %v9067_v40 = vld [vmem:[%s13826_s3 + $0x54] sm:$0xf] }
 0x5d2   :  { %10483 = vmatprep.subr.bf16.mxu1 %v11540_v1  ;;  %10489 = vmatprep.subr.bf16.mxu0 %v11540_v1 }
 0x5d3   :  { %v3707_v46 = vsel %vm947_vm1, %v3702_v42, 0  ;;  %v3655_v47 = vsel %vm947_vm1, %v3650_v43, 0 }
 0x5d4   :  { %v3803_v48 = vpop.permute.xlu0 %3802  ;;  %v3751_v49 = vpop.permute.xlu1 %3750 }
 0x5d5   :  { %v3806_v50 = vpack.c.bf16 %v3803_v48, %v3803_v48  ;;  %v3754_v51 = vpack.c.bf16 %v3751_v49, %v3751_v49  ;;  %v9071_v48 = vld [vmem:[%s13826_s3 + $0x5c] sm:$0xf] }
 0x5d7   :  { %10474 = vmatmul.mubr.msk.bf16.vlgmr.msra.gmra.mxu1 %vm943_vm2, %v9033_v36  ;;  %10480 = vmatmul.mubr.msk.bf16.vlgmr.msra.gmra.mxu0 %vm943_vm2, %v9035_v37  ;;  %v3811_v55 = vsel %vm947_vm1, %v3806_v50, 0  ;;  %v3759_v57 = vsel %vm947_vm1, %v3754_v51, 0 }
 0x5d8   :  { %10484 = vmatpush3.bf16.msra.mxu1 %v3551_v39  ;;  %10490 = vmatpush3.bf16.msra.mxu0 %v3603_v38  ;;  %v3855_v58 = vpop.permute.xlu1 %3854  ;;  %v3957_v8 = vpop.permute.xlu0 %3956  ;;  %v9065_v39 = vld [vmem:[%s13826_s3 + $0x50] sm:$0xf] }
 0x5d9   :  { %10485 = vmatprep.mubr.msk.bf16.mxu1 %vm11542_vm0, %v11540_v1  ;;  %10491 = vmatprep.mubr.msk.bf16.mxu0 %vm11542_vm0, %v11540_v1  ;;  %v3858_v59 = vpack.c.bf16 %v3855_v58, %v3855_v58  ;;  %v3960_v56 = vpack.c.bf16 %v3957_v8, %v3957_v8  ;;  %v9077_v58 = vld [vmem:[%s13826_s3 + $0x68] sm:$0xf] }
 0x5da   :  { %10495 = vmatprep.subr.bf16.mxu1 %v11540_v1  ;;  %10501 = vmatprep.subr.bf16.mxu0 %v11540_v1 }
 0x5db   :  { %v3863_v6 = vsel %vm947_vm1, %v3858_v59, 0  ;;  %v3965_v53 = vsel %vm947_vm1, %v3960_v56, 0 }
 0x5dc   :  { %v4009_v9 = vpop.permute.xlu1 %4008  ;;  %v4061_v2 = vpop.permute.xlu0 %4060 }
 0x5dd   :  { %v4012_v10 = vpack.c.bf16 %v4009_v9, %v4009_v9  ;;  %v4064_v16 = vpack.c.bf16 %v4061_v2, %v4061_v2 }
 0x5df   :  { %10486 = vmatmul.mubr.msk.bf16.vlgmr.msra.gmra.mxu1 %vm943_vm2, %v9037_v44  ;;  %10492 = vmatmul.mubr.msk.bf16.vlgmr.msra.gmra.mxu0 %vm943_vm2, %v9039_v45  ;;  %v4017_v13 = vsel %vm947_vm1, %v4012_v10, 0  ;;  %v4069_v11 = vsel %vm947_vm1, %v4064_v16, 0 }
 0x5e0   :  { %10496 = vmatpush3.bf16.msra.mxu1 %v3655_v47  ;;  %10502 = vmatpush3.bf16.msra.mxu0 %v3707_v46  ;;  %v4113_v14 = vpop.permute.xlu1 %4112  ;;  %v4165_v21 = vpop.permute.xlu0 %4164  ;;  %v9069_v47 = vld [vmem:[%s13826_s3 + $0x58] sm:$0xf] }
 0x5e1   :  { %10497 = vmatprep.mubr.msk.bf16.mxu1 %vm11542_vm0, %v11540_v1  ;;  %10503 = vmatprep.mubr.msk.bf16.mxu0 %vm11542_vm0, %v11540_v1  ;;  %v4116_v7 = vpack.c.bf16 %v4113_v14, %v4113_v14  ;;  %v4168_v22 = vpack.c.bf16 %v4165_v21, %v4165_v21 }
 0x5e2   :  { %10507 = vmatprep.subr.bf16.mxu1 %v11540_v1  ;;  %10513 = vmatprep.subr.bf16.mxu0 %v11540_v1 }
 0x5e3   :  { %v4121_v20 = vsel %vm947_vm1, %v4116_v7, 0  ;;  %v4173_v26 = vsel %vm947_vm1, %v4168_v22, 0 }
 0x5e4   :  { %v4217_v15 = vpop.permute.xlu1 %4216  ;;  %v4269_v28 = vpop.permute.xlu0 %4268 }
 0x5e5   :  { %v4220_v24 = vpack.c.bf16 %v4217_v15, %v4217_v15  ;;  %v4272_v27 = vpack.c.bf16 %v4269_v28, %v4269_v28 }
 0x5e7   :  { %10498 = vmatmul.mubr.msk.bf16.vlgmr.msra.gmra.mxu1 %vm943_vm2, %v9041_v52  ;;  %10504 = vmatmul.mubr.msk.bf16.vlgmr.msra.gmra.mxu0 %vm943_vm2, %v9043_v54  ;;  %v4225_v23 = vsel %vm947_vm1, %v4220_v24, 0  ;;  %v4277_v33 = vsel %vm947_vm1, %v4272_v27, 0  ;;  %v9073_v54 = vld [vmem:[%s13826_s3 + $0x60] sm:$0xf] }
 0x5e8   :  { %10508 = vmatpush3.bf16.msra.mxu1 %v3759_v57  ;;  %10514 = vmatpush3.bf16.msra.mxu0 %v3811_v55  ;;  %v4321_v29 = vpop.permute.xlu1 %4320  ;;  %v4373_v35 = vpop.permute.xlu0 %4372  ;;  %v9075_v55 = vld [vmem:[%s13826_s3 + $0x64] sm:$0xf] }
 0x5e9   :  { %10509 = vmatprep.mubr.msk.bf16.mxu1 %vm11542_vm0, %v11540_v1  ;;  %10515 = vmatprep.mubr.msk.bf16.mxu0 %vm11542_vm0, %v11540_v1  ;;  %v4324_v30 = vpack.c.bf16 %v4321_v29, %v4321_v29  ;;  %v4376_v37 = vpack.c.bf16 %v4373_v35, %v4373_v35 }
 0x5ea   :  { %10519 = vmatprep.subr.bf16.mxu1 %v11540_v1  ;;  %10525 = vmatprep.subr.bf16.mxu0 %v11540_v1 }
 0x5eb   :  { %v4329_v34 = vsel %vm947_vm1, %v4324_v30, 0  ;;  %v4381_v41 = vsel %vm947_vm1, %v4376_v37, 0 }
 0x5ec   :  { %v4425_v36 = vpop.permute.xlu1 %4424  ;;  %v4477_v43 = vpop.permute.xlu0 %4476 }
 0x5ed   :  { %v4428_v38 = vpack.c.bf16 %v4425_v36, %v4425_v36  ;;  %v4480_v45 = vpack.c.bf16 %v4477_v43, %v4477_v43 }
 0x5ef   :  { %10510 = vmatmul.mubr.msk.bf16.vlgmr.msra.gmra.mxu1 %vm943_vm2, %v9045_v62  ;;  %10516 = vmatmul.mubr.msk.bf16.vlgmr.msra.gmra.mxu0 %vm943_vm2, %v9047_v5  ;;  %v4433_v42 = vsel %vm947_vm1, %v4428_v38, 0  ;;  %v4485_v49 = vsel %vm947_vm1, %v4480_v45, 0 }
 0x5f0   :  { %10520 = vmatpush3.bf16.msra.mxu1 %v3863_v6  ;;  %10526 = vmatpush3.bf16.msra.mxu0 %v3913_v0  ;;  %v4529_v44 = vpop.permute.xlu1 %4528  ;;  %v4581_v51 = vpop.permute.xlu0 %4580 }
 0x5f1   :  { %10521 = vmatprep.mubr.msk.bf16.mxu1 %vm11542_vm0, %v11540_v1  ;;  %10527 = vmatprep.mubr.msk.bf16.mxu0 %vm11542_vm0, %v11540_v1  ;;  %v4532_v46 = vpack.c.bf16 %v4529_v44, %v4529_v44  ;;  %v4584_v52 = vpack.c.bf16 %v4581_v51, %v4581_v51 }
 0x5f2   :  { %10531 = vmatprep.subr.bf16.mxu1 %v11540_v1  ;;  %10537 = vmatprep.subr.bf16.mxu0 %v11540_v1 }
 0x5f3   :  { %v4537_v50 = vsel %vm947_vm1, %v4532_v46, 0  ;;  %v4589_v57 = vsel %vm947_vm1, %v4584_v52, 0 }
 0x5f7   :  { %10522 = vmatmul.mubr.msk.bf16.vlgmr.msra.gmra.mxu1 %vm943_vm2, %v9049_v60  ;;  %10528 = vmatmul.mubr.msk.bf16.vlgmr.msra.gmra.mxu0 %vm943_vm2, %v9051_v12 }
 0x5f8   :  { %10532 = vmatpush3.bf16.msra.mxu1 %v3965_v53  ;;  %10538 = vmatpush3.bf16.msra.mxu0 %v4017_v13 }
 0x5f9   :  { %10533 = vmatprep.mubr.msk.bf16.mxu1 %vm11542_vm0, %v11540_v1  ;;  %10539 = vmatprep.mubr.msk.bf16.mxu0 %vm11542_vm0, %v11540_v1 }
 0x5fa   :  { %10543 = vmatprep.subr.bf16.mxu1 %v11540_v1  ;;  %10549 = vmatprep.subr.bf16.mxu0 %v11540_v1 }
 0x5ff   :  { %10534 = vmatmul.mubr.msk.bf16.vlgmr.msra.gmra.mxu1 %vm943_vm2, %v9053_v17  ;;  %10540 = vmatmul.mubr.msk.bf16.vlgmr.msra.gmra.mxu0 %vm943_vm2, %v9055_v18 }
 0x600   :  { %10544 = vmatpush3.bf16.msra.mxu1 %v4069_v11  ;;  %10550 = vmatpush3.bf16.msra.mxu0 %v4121_v20 }
 0x601   :  { %10545 = vmatprep.mubr.msk.bf16.mxu1 %vm11542_vm0, %v11540_v1  ;;  %10551 = vmatprep.mubr.msk.bf16.mxu0 %vm11542_vm0, %v11540_v1 }
 0x602   :  { %10555 = vmatprep.subr.bf16.mxu1 %v11540_v1  ;;  %10561 = vmatprep.subr.bf16.mxu0 %v11540_v1 }
 0x607   :  { %10546 = vmatmul.mubr.msk.bf16.vlgmr.msra.gmra.mxu1 %vm943_vm2, %v9057_v19  ;;  %10552 = vmatmul.mubr.msk.bf16.vlgmr.msra.gmra.mxu0 %vm943_vm2, %v9059_v25 }
 0x608   :  { %10556 = vmatpush3.bf16.msra.mxu1 %v4173_v26  ;;  %10562 = vmatpush3.bf16.msra.mxu0 %v4225_v23 }
 0x609   :  { %10557 = vmatprep.mubr.msk.bf16.mxu1 %vm11542_vm0, %v11540_v1  ;;  %10563 = vmatprep.mubr.msk.bf16.mxu0 %vm11542_vm0, %v11540_v1 }
 0x60a   :  { %10567 = vmatprep.subr.bf16.mxu1 %v11540_v1  ;;  %10573 = vmatprep.subr.bf16.mxu0 %v11540_v1 }
 0x60f   :  { %10558 = vmatmul.mubr.msk.bf16.vlgmr.msra.gmra.mxu1 %vm943_vm2, %v9061_v32  ;;  %10564 = vmatmul.mubr.msk.bf16.vlgmr.msra.gmra.mxu0 %vm943_vm2, %v9063_v31 }
 0x610   :  { %10568 = vmatpush3.bf16.msra.mxu1 %v4277_v33  ;;  %10574 = vmatpush3.bf16.msra.mxu0 %v4329_v34 }
 0x611   :  { %10569 = vmatprep.mubr.msk.bf16.mxu1 %vm11542_vm0, %v11540_v1  ;;  %10575 = vmatprep.mubr.msk.bf16.mxu0 %vm11542_vm0, %v11540_v1 }
 0x612   :  { %10579 = vmatprep.subr.bf16.mxu1 %v11540_v1  ;;  %10585 = vmatprep.subr.bf16.mxu0 %v11540_v1 }
 0x617   :  { %10570 = vmatmul.mubr.msk.bf16.vlgmr.msra.gmra.mxu1 %vm943_vm2, %v9065_v39  ;;  %10576 = vmatmul.mubr.msk.bf16.vlgmr.msra.gmra.mxu0 %vm943_vm2, %v9067_v40 }
 0x618   :  { %10580 = vmatpush3.bf16.msra.mxu1 %v4381_v41  ;;  %10586 = vmatpush3.bf16.msra.mxu0 %v4433_v42 }
 0x619   :  { %10581 = vmatprep.mubr.msk.bf16.mxu1 %vm11542_vm0, %v11540_v1  ;;  %10587 = vmatprep.mubr.msk.bf16.mxu0 %vm11542_vm0, %v11540_v1 }
 0x61a   :  { %10591 = vmatprep.subr.bf16.mxu1 %v11540_v1  ;;  %10597 = vmatprep.subr.bf16.mxu0 %v11540_v1 }
 0x61f   :  { %10582 = vmatmul.mubr.msk.bf16.vlgmr.msra.gmra.mxu1 %vm943_vm2, %v9069_v47  ;;  %10588 = vmatmul.mubr.msk.bf16.vlgmr.msra.gmra.mxu0 %vm943_vm2, %v9071_v48 }
 0x620   :  { %10592 = vmatpush3.bf16.msra.mxu1 %v4485_v49  ;;  %10598 = vmatpush3.bf16.msra.mxu0 %v4537_v50 }
 0x621   :  { %10593 = vmatprep.mubr.msk.bf16.mxu1 %vm11542_vm0, %v11540_v1  ;;  %10599 = vmatprep.mubr.msk.bf16.mxu0 %vm11542_vm0, %v11540_v1 }
 0x622   :  { %10603 = vmatprep.subr.bf16.mxu1 %v11540_v1  ;;  %10609 = vmatprep.subr.mxu0 %v11540_v1 }
 0x627   :  { %10594 = vmatmul.mubr.msk.bf16.vlgmr.msra.gmra.mxu1 %vm943_vm2, %v9073_v54  ;;  %10600 = vmatmul.mubr.msk.bf16.vlgmr.msra.gmra.mxu0 %vm943_vm2, %v9075_v55 }
 0x628   :  { %10604 = vmatpush3.bf16.msra.mxu1 %v4589_v57  ;;  %10605 = vmatprep.mubr.msk.bf16.mxu1 %vm11542_vm0, %v11540_v1 }
 0x629   :  { %10610 = vmatpush3.msra.mxu0 %v11541_v3  ;;  %10644 = vmatprep.subr.mxu1 %v11540_v1 }
 0x62a   :  { %10611 = vmatprep.subr.mxu0 %v11540_v1  ;;  %10641 = vmatprep.mubr.msk.f32.mxu0 %vm11542_vm0, %v11540_v1 }
 0x62b   :  { %10612 = vmatpush3.msra.mxu0 %v11541_v3 }
 0x62c   :  { %10613 = vmatprep.subr.mxu0 %v11540_v1 }
 0x62d   :  { %10614 = vmatpush3.msra.mxu0 %v11541_v3 }
 0x62e   :  { %10615 = vmatprep.subr.mxu0 %v11540_v1 }
 0x62f   :  { %10606 = vmatmul.mubr.msk.bf16.vlgmr.msra.gmra.mxu1 %vm943_vm2, %v9077_v58  ;;  %10616 = vmatpush3.msra.mxu0 %v11541_v3 }
 0x630   :  { %10617 = vmatprep.subr.mxu0 %v11540_v1  ;;  %10645 = vmatpush3.msra.mxu1 %v11540_v1 }
 0x631   :  { %10618 = vmatpush3.msra.mxu0 %v11541_v3  ;;  %10646 = vmatprep.mubr.msk.f32.mxu1 %vm11542_vm0, %v11540_v1 }
 0x632   :  { %10619 = vmatprep.subr.mxu0 %v11540_v1  ;;  %10649 = vmatprep.subr.mxu1 %v11540_v1 }
 0x633   :  { %10620 = vmatpush3.msra.mxu0 %v11541_v3 }
 0x634   :  { %10621 = vmatprep.subr.mxu0 %v11540_v1 }
 0x635   :  { %10622 = vmatpush3.msra.mxu0 %v11541_v3 }
 0x636   :  { %10623 = vmatprep.subr.mxu0 %v11540_v1 }
 0x637   :  { %10624 = vmatpush3.msra.mxu0 %v11541_v3 }
 0x638   :  { %10625 = vmatprep.subr.mxu0 %v11540_v1 }
 0x639   :  { %10626 = vmatpush3.msra.mxu0 %v11541_v3 }
 0x63a   :  { %10627 = vmatprep.subr.mxu0 %v11540_v1 }
 0x63b   :  { %10628 = vmatpush3.msra.mxu0 %v11541_v3 }
 0x63c   :  { %10629 = vmatprep.subr.mxu0 %v11540_v1 }
 0x63d   :  { %10630 = vmatpush3.msra.mxu0 %v11541_v3 }
 0x63e   :  { %10631 = vmatprep.subr.mxu0 %v11540_v1 }
 0x63f   :  { %10632 = vmatpush3.msra.mxu0 %v11541_v3 }
 0x640   :  { %10633 = vmatprep.subr.mxu0 %v11540_v1 }
 0x641   :  { %10634 = vmatpush3.msra.mxu0 %v11541_v3 }
 0x642   :  { %10635 = vmatprep.subr.mxu0 %v11540_v1 }
 0x643   :  { %10636 = vmatpush3.msra.mxu0 %v11541_v3 }
 0x644   :  { %10637 = vmatprep.subr.mxu0 %v11540_v1 }
 0x645   :  { %10638 = vmatpush3.msra.mxu0 %v11541_v3 }
 0x646   :  { %10639 = vmatprep.subr.mxu0 %v11540_v1 }
 0x647   :  { %10640 = vmatpush3.msra.mxu0 %v11541_v3 }
 0x648   :  { %10689 = vmatprep.subr.mxu0 %v11540_v1 }
 0x687   :  { %v3282_v59 = vpop.f32.mrf.mxu1  ;;  %v3328_v61 = vpop.f32.mrf.mxu0 }
 0x688   :  { %v3329_v27 = vadd.f32 %v3328_v61, %v3282_v59 }
 0x689   :  { %v10451_v62 = vpop.f32.mrf.mxu1  ;;  %v10457_v5 = vpop.f32.mrf.mxu0 }
 0x68b   :  { %v3285_v6 = vpop.f32.mrf.mxu1  ;;  %v3331_v0 = vpop.f32.mrf.mxu0 }
 0x68d   :  { %v10452_v8 = vpop.f32.mrf.mxu1  ;;  %v10458_v9 = vpop.f32.mrf.mxu0 }
 0x68f   :  { %v3379_v56 = vpop.f32.mrf.mxu1  ;;  %v3431_v10 = vpop.f32.mrf.mxu0 }
 0x690   :  { %v3385_v31 = vadd.f32 %v3379_v56, %v3329_v27 }
 0x691   :  { %v10463_v60 = vpop.f32.mrf.mxu1  ;;  %v10469_v12 = vpop.f32.mrf.mxu0 }
 0x692   :  { %v3437_v37 = vadd.f32 %v3431_v10, %v3385_v31 }
 0x693   :  { %v3382_v53 = vpop.f32.mrf.mxu1  ;;  %v3434_v13 = vpop.f32.mrf.mxu0 }
 0x695   :  { %v10464_v2 = vpop.f32.mrf.mxu1  ;;  %v10470_v14 = vpop.f32.mrf.mxu0 }
 0x697   :  { %v3483_v16 = vpop.f32.mrf.mxu1  ;;  %v3535_v7 = vpop.f32.mrf.mxu0 }
 0x698   :  { %v3489_v40 = vadd.f32 %v3483_v16, %v3437_v37 }
 0x699   :  { %v10475_v17 = vpop.f32.mrf.mxu1  ;;  %v10481_v18 = vpop.f32.mrf.mxu0 }
 0x69a   :  { %v3541_v45 = vadd.f32 %v3535_v7, %v3489_v40 }
 0x69b   :  { %v3486_v11 = vpop.f32.mrf.mxu1  ;;  %v3538_v20 = vpop.f32.mrf.mxu0 }
 0x69d   :  { %v10476_v21 = vpop.f32.mrf.mxu1  ;;  %v10482_v15 = vpop.f32.mrf.mxu0 }
 0x69f   :  { %v3587_v22 = vpop.f32.mrf.mxu1  ;;  %v3639_v24 = vpop.f32.mrf.mxu0 }
 0x6a0   :  { %v3593_v48 = vadd.f32 %v3587_v22, %v3541_v45 }
 0x6a1   :  { %v10487_v19 = vpop.f32.mrf.mxu1  ;;  %v10493_v25 = vpop.f32.mrf.mxu0 }
 0x6a2   :  { %v3645_v54 = vadd.f32 %v3639_v24, %v3593_v48 }
 0x6a3   :  { %v3590_v26 = vpop.f32.mrf.mxu1  ;;  %v3642_v23 = vpop.f32.mrf.mxu0 }
 0x6a5   :  { %v10488_v28 = vpop.f32.mrf.mxu1  ;;  %v10494_v29 = vpop.f32.mrf.mxu0 }
 0x6a7   :  { %v3691_v30 = vpop.f32.mrf.mxu1  ;;  %v3743_v32 = vpop.f32.mrf.mxu0 }
 0x6a8   :  { %v3697_v58 = vadd.f32 %v3691_v30, %v3645_v54 }
 0x6a9   :  { %v10499_v33 = vpop.f32.mrf.mxu1  ;;  %v10505_v34 = vpop.f32.mrf.mxu0 }
 0x6aa   :  { %v3749_v6 = vadd.f32 %v3743_v32, %v3697_v58 }
 0x6ab   :  { %v3694_v35 = vpop.f32.mrf.mxu1  ;;  %v3746_v36 = vpop.f32.mrf.mxu0 }
 0x6ad   :  { %v10500_v38 = vpop.f32.mrf.mxu1  ;;  %v10506_v39 = vpop.f32.mrf.mxu0 }
 0x6af   :  { %v3795_v41 = vpop.f32.mrf.mxu1  ;;  %v3847_v42 = vpop.f32.mrf.mxu0 }
 0x6b0   :  { %v3801_v9 = vadd.f32 %v3795_v41, %v3749_v6 }
 0x6b1   :  { %v10511_v43 = vpop.f32.mrf.mxu1  ;;  %v10517_v44 = vpop.f32.mrf.mxu0 }
 0x6b2   :  { %v3853_v53 = vadd.f32 %v3847_v42, %v3801_v9 }
 0x6b3   :  { %v3798_v46 = vpop.f32.mrf.mxu1  ;;  %v3850_v47 = vpop.f32.mrf.mxu0 }
 0x6b5   :  { %v10512_v49 = vpop.f32.mrf.mxu1  ;;  %v10518_v50 = vpop.f32.mrf.mxu0 }
 0x6b7   :  { %v3899_v51 = vpop.f32.mrf.mxu1  ;;  %v3949_v52 = vpop.f32.mrf.mxu0 }
 0x6b8   :  { %v3905_v14 = vadd.f32 %v3899_v51, %v3853_v53 }
 0x6b9   :  { %v10523_v55 = vpop.f32.mrf.mxu1  ;;  %v10529_v57 = vpop.f32.mrf.mxu0 }
 0x6ba   :  { %v3955_v11 = vadd.f32 %v3949_v52, %v3905_v14 }
 0x6bb   :  { %v3902_v59 = vpop.f32.mrf.mxu1  ;;  %v3952_v61 = vpop.f32.mrf.mxu0 }
 0x6bd   :  { %v10524_v62 = vpop.f32.mrf.mxu1  ;;  %v10530_v5 = vpop.f32.mrf.mxu0 }
 0x6bf   :  { %v4001_v0 = vpop.f32.mrf.mxu1  ;;  %v4053_v8 = vpop.f32.mrf.mxu0 }
 0x6c0   :  { %v4007_v15 = vadd.f32 %v4001_v0, %v3955_v11 }
 0x6c1   :  { %v10535_v56 = vpop.f32.mrf.mxu1  ;;  %v10541_v10 = vpop.f32.mrf.mxu0 }
 0x6c2   :  { %v4059_v26 = vadd.f32 %v4053_v8, %v4007_v15 }
 0x6c3   :  { %v4004_v60 = vpop.f32.mrf.mxu1  ;;  %v4056_v12 = vpop.f32.mrf.mxu0 }
 0x6c4   :  { %v12759_v12 = vpop.permute.xlu1 %4634 }
 0x6c5   :  { %v10536_v13 = vpop.f32.mrf.mxu1  ;;  %v10542_v2 = vpop.f32.mrf.mxu0 }
 0x6c7   :  { %v4105_v16 = vpop.f32.mrf.mxu1  ;;  %v4157_v7 = vpop.f32.mrf.mxu0 }
 0x6c8   :  { %v4111_v29 = vadd.f32 %v4105_v16, %v4059_v26 }
 0x6c9   :  { %v10547_v17 = vpop.f32.mrf.mxu1  ;;  %v10553_v18 = vpop.f32.mrf.mxu0 }
 0x6ca   :  { %v4163_v33 = vadd.f32 %v4157_v7, %v4111_v29 }
 0x6cb   :  { %v4108_v20 = vpop.f32.mrf.mxu1  ;;  %v4160_v21 = vpop.f32.mrf.mxu0 }
 0x6cd   :  { %v10548_v22 = vpop.f32.mrf.mxu1  ;;  %v10554_v24 = vpop.f32.mrf.mxu0 }
 0x6cf   :  { %v4209_v19 = vpop.f32.mrf.mxu1  ;;  %v4261_v25 = vpop.f32.mrf.mxu0 }
 0x6d0   :  { %v4215_v36 = vadd.f32 %v4209_v19, %v4163_v33 }
 0x6d1   :  { %v10559_v23 = vpop.f32.mrf.mxu1  ;;  %v10565_v28 = vpop.f32.mrf.mxu0 }
 0x6d2   :  { %v4267_v41 = vadd.f32 %v4261_v25, %v4215_v36 }
 0x6d3   :  { %v4212_v27 = vpop.f32.mrf.mxu1  ;;  %v4264_v30 = vpop.f32.mrf.mxu0 }
 0x6d5   :  { %v10560_v32 = vpop.f32.mrf.mxu1  ;;  %v10566_v31 = vpop.f32.mrf.mxu0 }
 0x6d7   :  { %v4313_v34 = vpop.f32.mrf.mxu1  ;;  %v4365_v35 = vpop.f32.mrf.mxu0 }
 0x6d8   :  { %v4319_v44 = vadd.f32 %v4313_v34, %v4267_v41 }
 0x6d9   :  { %v10571_v37 = vpop.f32.mrf.mxu1  ;;  %v10577_v38 = vpop.f32.mrf.mxu0 }
 0x6da   :  { %v4371_v49 = vadd.f32 %v4365_v35, %v4319_v44 }
 0x6db   :  { %v4316_v39 = vpop.f32.mrf.mxu1  ;;  %v4368_v40 = vpop.f32.mrf.mxu0 }
 0x6dd   :  { %v10572_v42 = vpop.f32.mrf.mxu1  ;;  %v10578_v43 = vpop.f32.mrf.mxu0 }
 0x6df   :  { %v4417_v45 = vpop.f32.mrf.mxu1  ;;  %v4469_v46 = vpop.f32.mrf.mxu0 }
 0x6e0   :  { %v4423_v52 = vadd.f32 %v4417_v45, %v4371_v49 }
 0x6e1   :  { %v10583_v47 = vpop.f32.mrf.mxu1  ;;  %v10589_v48 = vpop.f32.mrf.mxu0 }
 0x6e2   :  { %v4475_v59 = vadd.f32 %v4469_v46, %v4423_v52 }
 0x6e3   :  { %v4420_v50 = vpop.f32.mrf.mxu1  ;;  %v4472_v51 = vpop.f32.mrf.mxu0 }
 0x6e5   :  { %v10584_v54 = vpop.f32.mrf.mxu1  ;;  %v10590_v55 = vpop.f32.mrf.mxu0 }
 0x6e7   :  { %v4521_v57 = vpop.f32.mrf.mxu1  ;;  %v4573_v58 = vpop.f32.mrf.mxu0 }
 0x6e8   :  { %v4527_v5 = vadd.f32 %v4521_v57, %v4475_v59 }
 0x6e9   :  { %v10595_v61 = vpop.f32.mrf.mxu1  ;;  %v10601_v62 = vpop.f32.mrf.mxu0 }
 0x6ea   :  { %v4579_v56 = vadd.f32 %v4573_v58, %v4527_v5 }
 0x6eb   :  { %v4524_v6 = vpop.f32.mrf.mxu1  ;;  %v4576_v0 = vpop.f32.mrf.mxu0 }
 0x6ed   :  { %v10596_v8 = vpop.f32.mrf.mxu1  ;;  %v10602_v9 = vpop.f32.mrf.mxu0 }
 0x6ef   :  { %v4625_v10 = vpop.f32.mrf.mxu1 }
 0x6f0   :  { %v4631_v60 = vadd.f32 %v4625_v10, %v4579_v56  ;;  %v11457_v56 = vld [vmem:[%s13828_s5] sm:$0xff] }
 0x6f1   :  { %v10607_v53 = vpop.f32.mrf.mxu1 }
 0x6f2   :  { %v4637_v13 = vadd.f32 %v12759_v12, %v4631_v60  ;;  %v11458_v53 = vld [vmem:[%s13829_s6] sm:$0xff] }
 0x6f3   :  { %v4628_v2 = vpop.f32.mrf.mxu1 }
 0x6f4   :  { %v12763_v14 = vmul.f32 %v12447_v4, %v4637_v13 }
 0x6f5   :  { %v10608_v16 = vpop.f32.mrf.mxu1 }
 0x6f6   :  { %v12766_v7 = vand.u32 4294901760, %v12763_v14  ;;  %v5072_v20 = vmul.f32 %v12763_v14, %v12763_v14 }
 0x6f8   :  { %10647 = vmatmul.mubr.f32.vlgmr.msra.gmra.mxu1 %v12766_v7  ;;  %v12771_v17 = vsub.f32 %v12763_v14, %v12766_v7  ;;  %v12871_v21 = vand.u32 4294901760, %v5072_v20 }
 0x6f9   :  { %10650 = vmatpush3.msra.mxu1 %v11540_v1  ;;  %10651 = vmatprep.mubr.msk.f32.mxu1 %vm11542_vm0, %v11540_v1 }
 0x6fa   :  { %10654 = vmatprep.subr.mxu1 %v11540_v1  ;;  %v4706_v4 = vand.u32 4294901760, %v12771_v17  ;;  %v12886_v15 = vsub.f32 %v5072_v20, %v12871_v21 }
 0x6fc   :  { %10652 = vmatmul.mubr.f32.vlgmr.msra.gmra.mxu1 %v12771_v17  ;;  %v4707_v18 = vsub.f32 %v12771_v17, %v4706_v4  ;;  %v5140_v22 = vand.u32 4294901760, %v12886_v15 }
 0x6fd   :  { %10655 = vmatpush3.msra.mxu1 %v11541_v3  ;;  %10686 = vmatprep.mubr.msk.f32.mxu1 %vm11542_vm0, %v11540_v1 }
 0x6fe   :  { %10656 = vmatprep.subr.mxu1 %v11540_v1  ;;  %v4708_v11 = vand.u32 4294901760, %v4707_v18  ;;  %v5141_v24 = vsub.f32 %v12886_v15, %v5140_v22  ;;  %v12999_v18 = vld [vmem:[%s13830_s7] ss:$0 sm:$0xff] }
 0x6ff   :  { %10657 = vmatpush3.msra.mxu1 %v11541_v3 }
 0x700   :  { %10658 = vmatprep.subr.mxu1 %v11540_v1  ;;  %10642 = vmatmul.mubr.f32.vlgmr.msra.gmra.mxu0 %v4708_v11  ;;  %v5142_v19 = vand.u32 4294901760, %v5141_v24 }
 0x701   :  { %10659 = vmatpush3.msra.mxu1 %v11541_v3  ;;  %10690 = vmatpush3.msra.mxu0 %v11540_v1 }
 0x702   :  { %10660 = vmatprep.subr.mxu1 %v11540_v1  ;;  %10691 = vmatprep.mubr.msk.f32.mxu0 %vm11542_vm0, %v11540_v1 }
 0x703   :  { %10661 = vmatpush3.msra.mxu1 %v11541_v3  ;;  %10694 = vmatprep.subr.mxu0 %v11540_v1 }
 0x704   :  { %10662 = vmatprep.subr.mxu1 %v11540_v1  ;;  %10692 = vmatmul.mubr.f32.vlgmr.msra.gmra.mxu0 %v12766_v7 }
 0x705   :  { %10663 = vmatpush3.msra.mxu1 %v11541_v3  ;;  %10695 = vmatpush3.msra.mxu0 %v11541_v3 }
 0x706   :  { %10664 = vmatprep.subr.mxu1 %v11540_v1  ;;  %10696 = vmatprep.subr.mxu0 %v11540_v1 }
 0x707   :  { %10665 = vmatpush3.msra.mxu1 %v11541_v3  ;;  %10697 = vmatpush3.msra.mxu0 %v11541_v3 }
 0x708   :  { %10666 = vmatprep.subr.mxu1 %v11540_v1  ;;  %10698 = vmatprep.subr.mxu0 %v11540_v1 }
 0x709   :  { %10667 = vmatpush3.msra.mxu1 %v11541_v3  ;;  %10699 = vmatpush3.msra.mxu0 %v11541_v3 }
 0x70a   :  { %10668 = vmatprep.subr.mxu1 %v11540_v1  ;;  %10700 = vmatprep.subr.mxu0 %v11540_v1 }
 0x70b   :  { %10669 = vmatpush3.msra.mxu1 %v11541_v3  ;;  %10701 = vmatpush3.msra.mxu0 %v11541_v3 }
 0x70c   :  { %10670 = vmatprep.subr.mxu1 %v11540_v1  ;;  %10702 = vmatprep.subr.mxu0 %v11540_v1 }
 0x70d   :  { %10671 = vmatpush3.msra.mxu1 %v11541_v3  ;;  %10703 = vmatpush3.msra.mxu0 %v11541_v3 }
 0x70e   :  { %10672 = vmatprep.subr.mxu1 %v11540_v1  ;;  %10704 = vmatprep.subr.mxu0 %v11540_v1 }
 0x70f   :  { %10673 = vmatpush3.msra.mxu1 %v11541_v3  ;;  %10705 = vmatpush3.msra.mxu0 %v11541_v3 }
 0x710   :  { %10674 = vmatprep.subr.mxu1 %v11540_v1  ;;  %10706 = vmatprep.subr.mxu0 %v11540_v1 }
 0x711   :  { %10675 = vmatpush3.msra.mxu1 %v11541_v3  ;;  %10707 = vmatpush3.msra.mxu0 %v11541_v3 }
 0x712   :  { %10676 = vmatprep.subr.mxu1 %v11540_v1  ;;  %10708 = vmatprep.subr.mxu0 %v11540_v1 }
 0x713   :  { %10677 = vmatpush3.msra.mxu1 %v11541_v3  ;;  %10709 = vmatpush3.msra.mxu0 %v11541_v3 }
 0x714   :  { %10678 = vmatprep.subr.mxu1 %v11540_v1  ;;  %10710 = vmatprep.subr.mxu0 %v11540_v1 }
 0x715   :  { %10679 = vmatpush3.msra.mxu1 %v11541_v3  ;;  %10711 = vmatpush3.msra.mxu0 %v11541_v3 }
 0x716   :  { %10680 = vmatprep.subr.mxu1 %v11540_v1  ;;  %10712 = vmatprep.subr.mxu0 %v11540_v1 }
 0x717   :  { %10681 = vmatpush3.msra.mxu1 %v11541_v3  ;;  %10713 = vmatpush3.msra.mxu0 %v11541_v3 }
 0x718   :  { %10682 = vmatprep.subr.mxu1 %v11540_v1  ;;  %10714 = vmatprep.subr.mxu0 %v11540_v1 }
 0x719   :  { %10683 = vmatpush3.msra.mxu1 %v11541_v3  ;;  %10715 = vmatpush3.msra.mxu0 %v11541_v3 }
 0x71a   :  { %10684 = vmatprep.subr.mxu1 %v11540_v1  ;;  %10716 = vmatprep.subr.mxu0 %v11540_v1 }
 0x71b   :  { %10685 = vmatpush3.msra.mxu1 %v11541_v3  ;;  %10717 = vmatpush3.msra.mxu0 %v11541_v3 }
 0x71c   :  { %10687 = vmatmul.mubr.f32.vlgmr.msra.gmra.mxu1 %v4706_v4  ;;  %10718 = vmatprep.subr.mxu0 %v11540_v1 }
 0x71d   :  { %10729 = vmatprep.subr.mxu1 %v11540_v1  ;;  %10719 = vmatpush3.msra.mxu0 %v11541_v3 }
 0x71e   :  { %10730 = vmatpush3.msra.mxu1 %v11541_v3  ;;  %10720 = vmatprep.subr.mxu0 %v11540_v1 }
 0x71f   :  { %10731 = vmatprep.subr.mxu1 %v11540_v1  ;;  %10721 = vmatpush3.msra.mxu0 %v11541_v3 }
 0x720   :  { %10732 = vmatpush3.msra.mxu1 %v11541_v3  ;;  %10722 = vmatprep.subr.mxu0 %v11540_v1 }
 0x721   :  { %10733 = vmatprep.subr.mxu1 %v11540_v1  ;;  %10723 = vmatpush3.msra.mxu0 %v11541_v3 }
 0x722   :  { %10734 = vmatpush3.msra.mxu1 %v11541_v3  ;;  %10724 = vmatprep.subr.mxu0 %v11540_v1 }
 0x723   :  { %10735 = vmatprep.subr.mxu1 %v11540_v1  ;;  %10725 = vmatpush3.msra.mxu0 %v11541_v3 }
 0x724   :  { %10726 = vmatprep.mubr.msk.f32.mxu0 %vm11542_vm0, %v11540_v1  ;;  %10736 = vmatpush3.msra.mxu1 %v11541_v3 }
 0x725   :  { %10727 = vmatmul.mubr.f32.vlgmr.msra.gmra.mxu0 %v12766_v7  ;;  %10737 = vmatprep.subr.mxu1 %v11540_v1 }
 0x726   :  { %10738 = vmatpush3.msra.mxu1 %v11541_v3  ;;  %10764 = vmatprep.subr.mxu0 %v11540_v1 }
 0x727   :  { %10739 = vmatprep.subr.mxu1 %v11540_v1  ;;  %10765 = vmatpush3.msra.mxu0 %v11540_v1 }
 0x728   :  { %10740 = vmatpush3.msra.mxu1 %v11541_v3  ;;  %10766 = vmatprep.mubr.msk.f32.mxu0 %vm11542_vm0, %v11540_v1 }
 0x729   :  { %10741 = vmatprep.subr.mxu1 %v11540_v1  ;;  %10767 = vmatmul.mubr.f32.vlgmr.msra.gmra.mxu0 %v12871_v21 }
 0x72a   :  { %10742 = vmatpush3.msra.mxu1 %v11541_v3  ;;  %10769 = vmatprep.subr.mxu0 %v11540_v1 }
 0x72b   :  { %10743 = vmatprep.subr.mxu1 %v11540_v1  ;;  %10770 = vmatpush3.msra.mxu0 %v11540_v1 }
 0x72c   :  { %10744 = vmatpush3.msra.mxu1 %v11541_v3  ;;  %10771 = vmatprep.mubr.msk.f32.mxu0 %vm11542_vm0, %v11540_v1 }
 0x72d   :  { %10774 = vmatprep.subr.mxu0 %v11540_v1  ;;  %10745 = vmatprep.subr.mxu1 %v11540_v1 }
 0x72e   :  { %10772 = vmatmul.mubr.f32.vlgmr.msra.gmra.mxu0 %v12886_v15  ;;  %10746 = vmatpush3.msra.mxu1 %v11541_v3 }
 0x72f   :  { %10775 = vmatpush3.msra.mxu0 %v11541_v3  ;;  %10747 = vmatprep.subr.mxu1 %v11540_v1 }
 0x730   :  { %10776 = vmatprep.subr.mxu0 %v11540_v1  ;;  %10748 = vmatpush3.msra.mxu1 %v11541_v3 }
 0x731   :  { %10777 = vmatpush3.msra.mxu0 %v11541_v3  ;;  %10749 = vmatprep.subr.mxu1 %v11540_v1 }
 0x732   :  { %10778 = vmatprep.subr.mxu0 %v11540_v1  ;;  %10750 = vmatpush3.msra.mxu1 %v11541_v3 }
 0x733   :  { %10779 = vmatpush3.msra.mxu0 %v11541_v3  ;;  %10751 = vmatprep.subr.mxu1 %v11540_v1 }
 0x734   :  { %10780 = vmatprep.subr.mxu0 %v11540_v1  ;;  %10752 = vmatpush3.msra.mxu1 %v11541_v3 }
 0x735   :  { %10781 = vmatpush3.msra.mxu0 %v11541_v3  ;;  %10753 = vmatprep.subr.mxu1 %v11540_v1 }
 0x736   :  { %10782 = vmatprep.subr.mxu0 %v11540_v1  ;;  %10754 = vmatpush3.msra.mxu1 %v11541_v3 }
 0x737   :  { %10783 = vmatpush3.msra.mxu0 %v11541_v3  ;;  %10755 = vmatprep.subr.mxu1 %v11540_v1 }
 0x738   :  { %10784 = vmatprep.subr.mxu0 %v11540_v1  ;;  %10756 = vmatpush3.msra.mxu1 %v11541_v3 }
 0x739   :  { %10785 = vmatpush3.msra.mxu0 %v11541_v3  ;;  %10757 = vmatprep.subr.mxu1 %v11540_v1 }
 0x73a   :  { %10786 = vmatprep.subr.mxu0 %v11540_v1  ;;  %10758 = vmatpush3.msra.mxu1 %v11541_v3 }
 0x73b   :  { %10787 = vmatpush3.msra.mxu0 %v11541_v3  ;;  %10759 = vmatprep.subr.mxu1 %v11540_v1 }
 0x73c   :  { %10788 = vmatprep.subr.mxu0 %v11540_v1  ;;  %10760 = vmatpush3.msra.mxu1 %v11541_v3 }
 0x73d   :  { %10789 = vmatpush3.msra.mxu0 %v11541_v3  ;;  %10761 = vmatprep.mubr.msk.f32.mxu1 %vm11542_vm0, %v11540_v1 }
 0x73e   :  { %10790 = vmatprep.subr.mxu0 %v11540_v1  ;;  %10762 = vmatmul.mubr.f32.vlgmr.msra.gmra.mxu1 %v5142_v19 }
 0x73f   :  { %10791 = vmatpush3.msra.mxu0 %v11541_v3  ;;  %10809 = vmatprep.subr.mxu1 %v11540_v1 }
 0x740   :  { %10792 = vmatprep.subr.mxu0 %v11540_v1  ;;  %10810 = vmatpush3.msra.mxu1 %v11540_v1 }
 0x741   :  { %10793 = vmatpush3.msra.mxu0 %v11541_v3  ;;  %10811 = vmatprep.mubr.msk.f32.mxu1 %vm11542_vm0, %v11540_v1 }
 0x742   :  { %10794 = vmatprep.subr.mxu0 %v11540_v1  ;;  %10814 = vmatprep.subr.mxu1 %v11540_v1 }
 0x743   :  { %10795 = vmatpush3.msra.mxu0 %v11541_v3  ;;  %10812 = vmatmul.mubr.f32.vlgmr.msra.gmra.mxu1 %v12871_v21 }
 0x744   :  { %10815 = vmatpush3.msra.mxu1 %v11541_v3  ;;  %10796 = vmatprep.subr.mxu0 %v11540_v1 }
 0x745   :  { %10816 = vmatprep.subr.mxu1 %v11540_v1  ;;  %10797 = vmatpush3.msra.mxu0 %v11541_v3 }
 0x746   :  { %10817 = vmatpush3.msra.mxu1 %v11541_v3  ;;  %10798 = vmatprep.subr.mxu0 %v11540_v1 }
 0x747   :  { %10818 = vmatprep.subr.mxu1 %v11540_v1  ;;  %10799 = vmatpush3.msra.mxu0 %v11541_v3 }
 0x748   :  { %10819 = vmatpush3.msra.mxu1 %v11541_v3  ;;  %10800 = vmatprep.subr.mxu0 %v11540_v1 }
 0x749   :  { %10820 = vmatprep.subr.mxu1 %v11540_v1  ;;  %10801 = vmatpush3.msra.mxu0 %v11541_v3 }
 0x74a   :  { %10821 = vmatpush3.msra.mxu1 %v11541_v3  ;;  %10802 = vmatprep.subr.mxu0 %v11540_v1 }
 0x74b   :  { %10822 = vmatprep.subr.mxu1 %v11540_v1  ;;  %10803 = vmatpush3.msra.mxu0 %v11541_v3 }
 0x74c   :  { %10823 = vmatpush3.msra.mxu1 %v11541_v3  ;;  %10804 = vmatprep.subr.mxu0 %v11540_v1 }
 0x74d   :  { %10824 = vmatprep.subr.mxu1 %v11540_v1  ;;  %10805 = vmatpush3.msra.mxu0 %v11541_v3 }
 0x74e   :  { %10806 = vmatprep.mubr.msk.f32.mxu0 %vm11542_vm0, %v11540_v1  ;;  %10825 = vmatpush3.msra.mxu1 %v11541_v3 }
 0x74f   :  { %10807 = vmatmul.mubr.f32.vlgmr.msra.gmra.mxu0 %v5140_v22  ;;  %10826 = vmatprep.subr.mxu1 %v11540_v1 }
 0x750   :  { %10827 = vmatpush3.msra.mxu1 %v11541_v3  ;;  %10846 = vmatprep.mubr.msk.f32.mxu1 %vm11542_vm0, %v11540_v1 }
 0x751   :  { %10828 = vmatprep.subr.mxu1 %v11540_v1  ;;  %10849 = vmatprep.subr.bf16.mxu0 %v11540_v1 }
 0x752   :  { %10829 = vmatpush3.msra.mxu1 %v11541_v3  ;;  %10851 = vmatprep.mubr.msk.bf16.mxu0 %vm11542_vm0, %v11540_v1 }
 0x753   :  { %10830 = vmatprep.subr.mxu1 %v11540_v1 }
 0x754   :  { %10831 = vmatpush3.msra.mxu1 %v11541_v3 }
 0x755   :  { %10832 = vmatprep.subr.mxu1 %v11540_v1 }
 0x756   :  { %10833 = vmatpush3.msra.mxu1 %v11541_v3 }
 0x757   :  { %10834 = vmatprep.subr.mxu1 %v11540_v1 }
 0x758   :  { %10835 = vmatpush3.msra.mxu1 %v11541_v3 }
 0x759   :  { %10836 = vmatprep.subr.mxu1 %v11540_v1 }
 0x75a   :  { %10837 = vmatpush3.msra.mxu1 %v11541_v3 }
 0x75b   :  { %10838 = vmatprep.subr.mxu1 %v11540_v1 }
 0x75c   :  { %10839 = vmatpush3.msra.mxu1 %v11541_v3 }
 0x75d   :  { %10840 = vmatprep.subr.mxu1 %v11540_v1 }
 0x75e   :  { %10841 = vmatpush3.msra.mxu1 %v11541_v3 }
 0x75f   :  { %10842 = vmatprep.subr.mxu1 %v11540_v1 }
 0x760   :  { %10843 = vmatpush3.msra.mxu1 %v11541_v3 }
 0x761   :  { %10844 = vmatprep.subr.mxu1 %v11540_v1 }
 0x762   :  { %10845 = vmatpush3.msra.mxu1 %v11541_v3 }
 0x763   :  { %10847 = vmatmul.mubr.f32.vlgmr.msra.gmra.mxu1 %v12871_v21  ;;  %10855 = vmatprep.subr.bf16.mxu1 %v11540_v1 }
 0x764   :  { %10857 = vmatprep.mubr.msk.bf16.mxu1 %vm11542_vm0, %v11540_v1 }
 0x7b8   :  { %v4781_v25 = vpop.f32.mrf.mxu1 }
 0x7ba   :  { %v10648_v26 = vpop.f32.mrf.mxu1 }
 0x7bc   :  { %v4853_v23 = vpop.f32.mrf.mxu1 }
 0x7be   :  { %v10653_v28 = vpop.f32.mrf.mxu1 }
 0x7c0   :  { %v4710_v29 = vpop.f32.mrf.mxu0 }
 0x7c1   :  { %v4782_v27 = vadd.f32 %v4781_v25, %v4710_v29 }
 0x7c2   :  { %v10643_v30 = vpop.f32.mrf.mxu0 }
 0x7c3   :  { %v4854_v32 = vadd.f32 %v4853_v23, %v4782_v27  ;;  %v11460_v27 = vld [vmem:[%s13824_s1 + $0x4] sm:$0xf]  ;;  %v11461_v30 = vld [vmem:[%s13824_s1] sm:$0xf] }
 0x7c4   :  { %v4997_v31 = vpop.f32.mrf.mxu0 }
 0x7c6   :  { %v10693_v33 = vpop.f32.mrf.mxu0 }
 0x7dc   :  { %v4926_v34 = vpop.f32.mrf.mxu1 }
 0x7dd   :  { %v4927_v35 = vadd.f32 %v4926_v34, %v4854_v32 }
 0x7de   :  { %v10688_v36 = vpop.f32.mrf.mxu1 }
 0x7df   :  { %v4998_v37 = vadd.f32 %v4997_v31, %v4927_v35 }
 0x7e5   :  { %v5068_v38 = vpop.f32.mrf.mxu0 }
 0x7e6   :  { %v5069_v52 = vadd.f32 %v5068_v38, %v4998_v37  ;;  %v11462_v37 = vld [vmem:[%s13824_s1 + $0x8] sm:$0xf]  ;;  %v11463_v38 = vld [vmem:[%s13824_s1 + $0xc] sm:$0xf] }
 0x7e7   :  { %v10728_v39 = vpop.f32.mrf.mxu0 }
 0x7e8   :  { %v5506_v55 = vmul.f32 0.015625, %v5069_v52 }
 0x7e9   :  { %v5215_v40 = vpop.f32.mrf.mxu0 }
 0x7ea   :  { %v5508_v62 = vmul.f32 %v5506_v55, %v5506_v55 }
 0x7eb   :  { %v10768_v41 = vpop.f32.mrf.mxu0 }
 0x7ee   :  { %v5287_v42 = vpop.f32.mrf.mxu0 }
 0x7f0   :  { %v10773_v43 = vpop.f32.mrf.mxu0 }
 0x7fe   :  { %v5144_v44 = vpop.f32.mrf.mxu1 }
 0x7ff   :  { %v5216_v50 = vadd.f32 %v5215_v40, %v5144_v44 }
 0x800   :  { %v10763_v45 = vpop.f32.mrf.mxu1 }
 0x801   :  { %v5288_v51 = vadd.f32 %v5287_v42, %v5216_v50  ;;  %v11464_v45 = vld [vmem:[%s13824_s1 + $0x10] sm:$0xf] }
 0x803   :  { %v5431_v46 = vpop.f32.mrf.mxu1 }
 0x805   :  { %v10813_v47 = vpop.f32.mrf.mxu1 }
 0x80f   :  { %v5360_v48 = vpop.f32.mrf.mxu0 }
 0x810   :  { %v5361_v54 = vadd.f32 %v5360_v48, %v5288_v51 }
 0x811   :  { %v10808_v49 = vpop.f32.mrf.mxu0 }
 0x812   :  { %v5432_v57 = vadd.f32 %v5431_v46, %v5361_v54  ;;  %v11465_v46 = vld [vmem:[%s13824_s1 + $0x14] sm:$0xf]  ;;  %v11466_v54 = vld [vmem:[%s13824_s1 + $0x18] sm:$0xf] }
 0x823   :  { %v5502_v58 = vpop.f32.mrf.mxu1 }
 0x824   :  { %v5503_v59 = vadd.f32 %v5502_v58, %v5432_v57 }
 0x825   :  { %v10848_v61 = vpop.f32.mrf.mxu1 }
 0x826   :  { %v5507_v5 = vmul.f32 0.015625, %v5503_v59 }
 0x828   :  { %v5509_v6 = vsub.f32 %v5507_v5, %v5508_v62 }
 0x82a   :  { %v5510_v0 = vmax.f32 %v5509_v6, 0.0  ;;  %v11468_v6 = vld [vmem:[%s13824_s1 + $0x20] sm:$0xf] }
 0x82c   :  { %v5511_v8 = vadd.f32 1e-05, %v5510_v0  ;;  %v11469_v0 = vld [vmem:[%s13824_s1 + $0x24] sm:$0xf] }
 0x82e   :  { %11450 = vrsqrt.f32 %v5511_v8 }
 0x83b   :  { %v11451_v9 = vpop.eup %11450 }
 0x83c   :  { %v5513_v10 = vmul.f32 %v11457_v56, %v11451_v9 }
 0x83e   :  { %5518 = vperm.xlu0 %11444, %v5513_v10   ;;  %v5514_v60 = vmul.f32 %v5513_v10, %v5506_v55  ;;  %v11467_v55 = vld [vmem:[%s13824_s1 + $0x1c] sm:$0xf] }
 0x840   :  { %v5515_v13 = vsub.f32 %v11458_v53, %v5514_v60  ;;  %v11470_v60 = vld [vmem:[%s13824_s1 + $0x28] sm:$0xf]  ;;  %v11471_v53 = vld [vmem:[%s13824_s1 + $0x2c] sm:$0xf] }
 0x842   :  { %5524 = vperm.xlu1 %11445, %v5515_v13  }
 0x8b9   :  { %v5519_v2 = vpop.permute.xlu0 %5518 }
 0x8ba   :  { %v5521_v16 = vmul.f32 %v5519_v2, %v12763_v14 }
 0x8bd   :  { %v5525_v7 = vpop.permute.xlu1 %5524 }
 0x8be   :  { %v5527_v17 = vadd.f32 %v5525_v7, %v5521_v16 }
 0x8c0   :  { %v5528_v4 = vmax.f32 %v5527_v17, 0.0 }
 0x8c2   :  { %v13002_v11 = vmul.f32 %v12999_v18, %v5528_v4 }
 0x8c4   :  { %5530 = vrot.lane.b32.xlu1 %v13002_v11, %s11547_s16  ;;  %5533 = vrot.lane.b32.xlu0 %v13002_v11, %s11545_s14  ;;  %v6139_v56 = vpack.c.bf16 %v13002_v11, %v13002_v11 }
 0x8c6   :  { %v6141_v13 = vsel %vm947_vm1, %v6139_v56, 0 }
 0x8c8   :  { %5669 = vrot.lane.b32.xlu1 %v13002_v11, %s13872_s18  ;;  %5622 = vrot.lane.b32.xlu0 %v13002_v11, %s13871_s13  ;;  %s13894_s18 = smov 6  }
 0x8cc   :  { %5763 = vrot.lane.b32.xlu1 %v13002_v11, %s13870_s20  ;;  %5716 = vrot.lane.b32.xlu0 %v13002_v11, %s13869_s15  ;;  %s13895_s20 = smov 7  }
 0x8d0   :  { %5857 = vrot.lane.b32.xlu1 %v13002_v11, %s13868_s22  ;;  %5810 = vrot.lane.b32.xlu0 %v13002_v11, %s13867_s17  ;;  %s13889_s17 = smov 119  }
 0x8d4   :  { %5951 = vrot.lane.b32.xlu1 %v13002_v11, %s13866_s24  ;;  %5904 = vrot.lane.b32.xlu0 %v13002_v11, %s13882_s26  ;;  %s13888_s24 = smov 121  }
 0x8d8   :  { %6045 = vrot.lane.b32.xlu1 %v13002_v11, %s13883_s27  ;;  %5998 = vrot.lane.b32.xlu0 %v13002_v11, %s13884_s12 }
 0x8dc   :  { %6184 = vrot.lane.b32.xlu1 %v13002_v11, %s13885_s21  ;;  %6092 = vrot.lane.b32.xlu0 %v13002_v11, %s13886_s4 }
 0x8e0   :  { %6278 = vrot.lane.b32.xlu1 %v13002_v11, %s13887_s19  ;;  %6231 = vrot.lane.b32.xlu0 %v13002_v11, %s13873_s10 }
 0x8e4   :  { %6372 = vrot.lane.b32.xlu1 %v13002_v11, %s13874_s11  ;;  %6325 = vrot.lane.b32.xlu0 %v13002_v11, %s13875_s29 }
 0x8e8   :  { %6466 = vrot.lane.b32.xlu1 %v13002_v11, %s13888_s24  ;;  %6419 = vrot.lane.b32.xlu0 %v13002_v11, %s13876_s9 }
 0x8ec   :  { %6560 = vrot.lane.b32.xlu1 %v13002_v11, %s13889_s17  ;;  %6513 = vrot.lane.b32.xlu0 %v13002_v11, %s13877_s25 }
 0x8f0   :  { %6654 = vrot.lane.b32.xlu1 %v13002_v11, %s13878_s2  ;;  %6607 = vrot.lane.b32.xlu0 %v13002_v11, %s13879_s30 }
 0x8f4   :  { %6748 = vrot.lane.b32.xlu1 %v13002_v11, %s13880_s23  ;;  %6701 = vrot.lane.b32.xlu0 %v13002_v11, %s13881_s28 }
 0x936   :  { %v5531_v14 = vpop.permute.xlu1 %5530  ;;  %v5534_v20 = vpop.permute.xlu0 %5533 }
 0x937   :  { %v5532_v21 = vpack.c.bf16 %v5531_v14, %v5531_v14  ;;  %v5535_v15 = vpack.c.bf16 %v5534_v20, %v5534_v20  ;;  %v11472_v14 = vld [vmem:[%s13824_s1 + $0x30] sm:$0xf]  ;;  %v11473_v20 = vld [vmem:[%s13824_s1 + $0x34] sm:$0xf] }
 0x939   :  { %v5580_v22 = vsel %vm947_vm1, %v5532_v21, 0  ;;  %v5537_v24 = vsel %vm947_vm1, %v5535_v15, 0 }
 0x93a   :  { %10856 = vmatpush3.bf16.msra.mxu1 %v5580_v22  ;;  %v5670_v19 = vpop.permute.xlu1 %5669  ;;  %10850 = vmatpush3.bf16.msra.mxu0 %v5537_v24  ;;  %v5623_v25 = vpop.permute.xlu0 %5622 }
 0x93b   :  { %v5671_v26 = vpack.c.bf16 %v5670_v19, %v5670_v19  ;;  %v5624_v23 = vpack.c.bf16 %v5623_v25, %v5623_v25  ;;  %10861 = vmatprep.subr.bf16.mxu0 %v11540_v1  ;;  %10867 = vmatprep.subr.bf16.mxu1 %v11540_v1 }
 0x93d   :  { %v5673_v28 = vsel %vm947_vm1, %v5671_v26, 0  ;;  %v5626_v29 = vsel %vm947_vm1, %v5624_v23, 0  ;;  %10852 = vmatmul.mubr.msk.bf16.vlgmr.msra.gmra.mxu0 %vm943_vm2, %v11460_v27  ;;  %10858 = vmatmul.mubr.msk.bf16.vlgmr.msra.gmra.mxu1 %vm943_vm2, %v11461_v30  ;;  %v11474_v26 = vld [vmem:[%s13824_s1 + $0x38] sm:$0xf]  ;;  %v11475_v23 = vld [vmem:[%s13824_s1 + $0x3c] sm:$0xf] }
 0x93e   :  { %10868 = vmatpush3.bf16.msra.mxu1 %v5673_v28  ;;  %v5764_v32 = vpop.permute.xlu1 %5763  ;;  %10862 = vmatpush3.bf16.msra.mxu0 %v5626_v29  ;;  %v5717_v31 = vpop.permute.xlu0 %5716 }
 0x93f   :  { %10863 = vmatprep.mubr.msk.bf16.mxu0 %vm11542_vm0, %v11540_v1  ;;  %10869 = vmatprep.mubr.msk.bf16.mxu1 %vm11542_vm0, %v11540_v1  ;;  %v5765_v33 = vpack.c.bf16 %v5764_v32, %v5764_v32  ;;  %v5718_v34 = vpack.c.bf16 %v5717_v31, %v5717_v31 }
 0x940   :  { %10873 = vmatprep.subr.bf16.mxu0 %v11540_v1  ;;  %10879 = vmatprep.subr.bf16.mxu1 %v11540_v1 }
 0x941   :  { %v5767_v35 = vsel %vm947_vm1, %v5765_v33, 0  ;;  %v5720_v36 = vsel %vm947_vm1, %v5718_v34, 0  ;;  %v11476_v33 = vld [vmem:[%s13824_s1 + $0x40] sm:$0xf]  ;;  %v11477_v34 = vld [vmem:[%s13824_s1 + $0x44] sm:$0xf] }
 0x942   :  { %v5858_v39 = vpop.permute.xlu1 %5857  ;;  %v5811_v40 = vpop.permute.xlu0 %5810 }
 0x943   :  { %v5859_v41 = vpack.c.bf16 %v5858_v39, %v5858_v39  ;;  %v5812_v42 = vpack.c.bf16 %v5811_v40, %v5811_v40 }
 0x945   :  { %10864 = vmatmul.mubr.msk.bf16.vlgmr.msra.gmra.mxu0 %vm943_vm2, %v11462_v37  ;;  %10870 = vmatmul.mubr.msk.bf16.vlgmr.msra.gmra.mxu1 %vm943_vm2, %v11463_v38  ;;  %v5861_v43 = vsel %vm947_vm1, %v5859_v41, 0  ;;  %v5814_v44 = vsel %vm947_vm1, %v5812_v42, 0  ;;  %v11478_v41 = vld [vmem:[%s13824_s1 + $0x48] sm:$0xf]  ;;  %v11479_v42 = vld [vmem:[%s13824_s1 + $0x4c] sm:$0xf] }
 0x946   :  { %10874 = vmatpush3.bf16.msra.mxu0 %v5720_v36  ;;  %10880 = vmatpush3.bf16.msra.mxu1 %v5767_v35  ;;  %v5952_v47 = vpop.permute.xlu1 %5951  ;;  %v5905_v48 = vpop.permute.xlu0 %5904 }
 0x947   :  { %10875 = vmatprep.mubr.msk.bf16.mxu0 %vm11542_vm0, %v11540_v1  ;;  %10881 = vmatprep.mubr.msk.bf16.mxu1 %vm11542_vm0, %v11540_v1  ;;  %v5953_v49 = vpack.c.bf16 %v5952_v47, %v5952_v47  ;;  %v5906_v50 = vpack.c.bf16 %v5905_v48, %v5905_v48 }
 0x948   :  { %10885 = vmatprep.subr.bf16.mxu0 %v11540_v1  ;;  %10891 = vmatprep.subr.bf16.mxu1 %v11540_v1 }
 0x949   :  { %v5955_v51 = vsel %vm947_vm1, %v5953_v49, 0  ;;  %v5908_v52 = vsel %vm947_vm1, %v5906_v50, 0  ;;  %v11480_v49 = vld [vmem:[%s13824_s1 + $0x50] sm:$0xf]  ;;  %v11481_v50 = vld [vmem:[%s13824_s1 + $0x54] sm:$0xf] }
 0x94a   :  { %v6046_v57 = vpop.permute.xlu1 %6045  ;;  %v5999_v58 = vpop.permute.xlu0 %5998 }
 0x94b   :  { %v6047_v59 = vpack.c.bf16 %v6046_v57, %v6046_v57  ;;  %v6000_v61 = vpack.c.bf16 %v5999_v58, %v5999_v58 }
 0x94d   :  { %10876 = vmatmul.mubr.msk.bf16.vlgmr.msra.gmra.mxu0 %vm943_vm2, %v11464_v45  ;;  %10882 = vmatmul.mubr.msk.bf16.vlgmr.msra.gmra.mxu1 %vm943_vm2, %v11465_v46  ;;  %v6049_v62 = vsel %vm947_vm1, %v6047_v59, 0  ;;  %v6002_v5 = vsel %vm947_vm1, %v6000_v61, 0  ;;  %v11482_v59 = vld [vmem:[%s13824_s1 + $0x58] sm:$0xf]  ;;  %v11483_v61 = vld [vmem:[%s13824_s1 + $0x5c] sm:$0xf] }
 0x94e   :  { %10886 = vmatpush3.bf16.msra.mxu0 %v5814_v44  ;;  %10892 = vmatpush3.bf16.msra.mxu1 %v5861_v43  ;;  %v6093_v8 = vpop.permute.xlu0 %6092  ;;  %v6185_v2 = vpop.permute.xlu1 %6184 }
 0x94f   :  { %10887 = vmatprep.mubr.msk.bf16.mxu0 %vm11542_vm0, %v11540_v1  ;;  %10893 = vmatprep.mubr.msk.bf16.mxu1 %vm11542_vm0, %v11540_v1  ;;  %v6094_v9 = vpack.c.bf16 %v6093_v8, %v6093_v8  ;;  %v6186_v7 = vpack.c.bf16 %v6185_v2, %v6185_v2  ;;  %v11485_v8 = vld [vmem:[%s13824_s1 + $0x64] sm:$0xf] }
 0x950   :  { %10897 = vmatprep.subr.bf16.mxu0 %v11540_v1  ;;  %10903 = vmatprep.subr.bf16.mxu1 %v11540_v1 }
 0x951   :  { %v6096_v10 = vsel %vm947_vm1, %v6094_v9, 0  ;;  %v6188_v4 = vsel %vm947_vm1, %v6186_v7, 0  ;;  %v11486_v9 = vld [vmem:[%s13824_s1 + $0x68] sm:$0xf] }
 0x952   :  { %v6232_v16 = vpop.permute.xlu0 %6231  ;;  %v6279_v21 = vpop.permute.xlu1 %6278 }
 0x953   :  { %v6233_v17 = vpack.c.bf16 %v6232_v16, %v6232_v16  ;;  %v6280_v22 = vpack.c.bf16 %v6279_v21, %v6279_v21 }
 0x955   :  { %10888 = vmatmul.mubr.msk.bf16.vlgmr.msra.gmra.mxu0 %vm943_vm2, %v11466_v54  ;;  %10894 = vmatmul.mubr.msk.bf16.vlgmr.msra.gmra.mxu1 %vm943_vm2, %v11467_v55  ;;  %v6235_v11 = vsel %vm947_vm1, %v6233_v17, 0  ;;  %v6282_v19 = vsel %vm947_vm1, %v6280_v22, 0 }
 0x956   :  { %10898 = vmatpush3.bf16.msra.mxu0 %v5908_v52  ;;  %10904 = vmatpush3.bf16.msra.mxu1 %v5955_v51  ;;  %v6326_v15 = vpop.permute.xlu0 %6325  ;;  %v6373_v28 = vpop.permute.xlu1 %6372 }
 0x957   :  { %10899 = vmatprep.mubr.msk.bf16.mxu0 %vm11542_vm0, %v11540_v1  ;;  %10905 = vmatprep.mubr.msk.bf16.mxu1 %vm11542_vm0, %v11540_v1  ;;  %v6327_v24 = vpack.c.bf16 %v6326_v15, %v6326_v15  ;;  %v6374_v27 = vpack.c.bf16 %v6373_v28, %v6373_v28 }
 0x958   :  { %10909 = vmatprep.subr.bf16.mxu0 %v11540_v1  ;;  %10915 = vmatprep.subr.bf16.mxu1 %v11540_v1 }
 0x959   :  { %v6329_v25 = vsel %vm947_vm1, %v6327_v24, 0  ;;  %v6376_v32 = vsel %vm947_vm1, %v6374_v27, 0 }
 0x95a   :  { %v6420_v29 = vpop.permute.xlu0 %6419  ;;  %v6467_v35 = vpop.permute.xlu1 %6466 }
 0x95b   :  { %v6421_v30 = vpack.c.bf16 %v6420_v29, %v6420_v29  ;;  %v6468_v37 = vpack.c.bf16 %v6467_v35, %v6467_v35 }
 0x95d   :  { %10900 = vmatmul.mubr.msk.bf16.vlgmr.msra.gmra.mxu0 %vm943_vm2, %v11468_v6  ;;  %10906 = vmatmul.mubr.msk.bf16.vlgmr.msra.gmra.mxu1 %vm943_vm2, %v11469_v0  ;;  %v6423_v31 = vsel %vm947_vm1, %v6421_v30, 0  ;;  %v6470_v39 = vsel %vm947_vm1, %v6468_v37, 0  ;;  %v11484_v0 = vld [vmem:[%s13824_s1 + $0x60] sm:$0xf]  ;;  %s13892_s1 = smov 8  }
 0x95e   :  { %10910 = vmatpush3.bf16.msra.mxu0 %v6002_v5  ;;  %10916 = vmatpush3.bf16.msra.mxu1 %v6049_v62  ;;  %v6514_v36 = vpop.permute.xlu0 %6513  ;;  %v6561_v43 = vpop.permute.xlu1 %6560 }
 0x95f   :  { %10911 = vmatprep.mubr.msk.bf16.mxu0 %vm11542_vm0, %v11540_v1  ;;  %10917 = vmatprep.mubr.msk.bf16.mxu1 %vm11542_vm0, %v11540_v1  ;;  %v6515_v38 = vpack.c.bf16 %v6514_v36, %v6514_v36  ;;  %v6562_v45 = vpack.c.bf16 %v6561_v43, %v6561_v43 }
 0x960   :  { %10921 = vmatprep.subr.bf16.mxu0 %v11540_v1  ;;  %10927 = vmatprep.subr.bf16.mxu1 %v11540_v1 }
 0x961   :  { %v6517_v40 = vsel %vm947_vm1, %v6515_v38, 0  ;;  %v6564_v47 = vsel %vm947_vm1, %v6562_v45, 0 }
 0x962   :  { %v6608_v44 = vpop.permute.xlu0 %6607  ;;  %v6655_v51 = vpop.permute.xlu1 %6654 }
 0x963   :  { %v6609_v46 = vpack.c.bf16 %v6608_v44, %v6608_v44  ;;  %v6656_v54 = vpack.c.bf16 %v6655_v51, %v6655_v51 }
 0x965   :  { %10912 = vmatmul.mubr.msk.bf16.vlgmr.msra.gmra.mxu0 %vm943_vm2, %v11470_v60  ;;  %10918 = vmatmul.mubr.msk.bf16.vlgmr.msra.gmra.mxu1 %vm943_vm2, %v11471_v53  ;;  %v6611_v48 = vsel %vm947_vm1, %v6609_v46, 0  ;;  %v6658_v57 = vsel %vm947_vm1, %v6656_v54, 0 }
 0x966   :  { %10922 = vmatpush3.bf16.msra.mxu0 %v6096_v10  ;;  %10928 = vmatpush3.bf16.msra.mxu1 %v6141_v13  ;;  %v6702_v52 = vpop.permute.xlu0 %6701  ;;  %v6749_v62 = vpop.permute.xlu1 %6748 }
 0x967   :  { %10923 = vmatprep.mubr.msk.bf16.mxu0 %vm11542_vm0, %v11540_v1  ;;  %10929 = vmatprep.mubr.msk.bf16.mxu1 %vm11542_vm0, %v11540_v1  ;;  %v6703_v55 = vpack.c.bf16 %v6702_v52, %v6702_v52  ;;  %v6750_v5 = vpack.c.bf16 %v6749_v62, %v6749_v62 }
 0x968   :  { %10933 = vmatprep.subr.bf16.mxu0 %v11540_v1  ;;  %10939 = vmatprep.subr.bf16.mxu1 %v11540_v1 }
 0x969   :  { %v6705_v58 = vsel %vm947_vm1, %v6703_v55, 0  ;;  %v6752_v6 = vsel %vm947_vm1, %v6750_v5, 0 }
 0x96d   :  { %10924 = vmatmul.mubr.msk.bf16.vlgmr.msra.gmra.mxu0 %vm943_vm2, %v11472_v14  ;;  %10930 = vmatmul.mubr.msk.bf16.vlgmr.msra.gmra.mxu1 %vm943_vm2, %v11473_v20 }
 0x96e   :  { %10934 = vmatpush3.bf16.msra.mxu0 %v6188_v4  ;;  %10940 = vmatpush3.bf16.msra.mxu1 %v6235_v11 }
 0x96f   :  { %10935 = vmatprep.mubr.msk.bf16.mxu0 %vm11542_vm0, %v11540_v1  ;;  %10941 = vmatprep.mubr.msk.bf16.mxu1 %vm11542_vm0, %v11540_v1 }
 0x970   :  { %10945 = vmatprep.subr.bf16.mxu0 %v11540_v1  ;;  %10951 = vmatprep.subr.bf16.mxu1 %v11540_v1 }
 0x975   :  { %10936 = vmatmul.mubr.msk.bf16.vlgmr.msra.gmra.mxu0 %vm943_vm2, %v11474_v26  ;;  %10942 = vmatmul.mubr.msk.bf16.vlgmr.msra.gmra.mxu1 %vm943_vm2, %v11475_v23 }
 0x976   :  { %10946 = vmatpush3.bf16.msra.mxu0 %v6282_v19  ;;  %10952 = vmatpush3.bf16.msra.mxu1 %v6329_v25 }
 0x977   :  { %10947 = vmatprep.mubr.msk.bf16.mxu0 %vm11542_vm0, %v11540_v1  ;;  %10953 = vmatprep.mubr.msk.bf16.mxu1 %vm11542_vm0, %v11540_v1 }
 0x978   :  { %10957 = vmatprep.subr.bf16.mxu0 %v11540_v1  ;;  %10963 = vmatprep.subr.bf16.mxu1 %v11540_v1 }
 0x97d   :  { %10948 = vmatmul.mubr.msk.bf16.vlgmr.msra.gmra.mxu0 %vm943_vm2, %v11476_v33  ;;  %10954 = vmatmul.mubr.msk.bf16.vlgmr.msra.gmra.mxu1 %vm943_vm2, %v11477_v34 }
 0x97e   :  { %10958 = vmatpush3.bf16.msra.mxu0 %v6376_v32  ;;  %10964 = vmatpush3.bf16.msra.mxu1 %v6423_v31 }
 0x97f   :  { %10959 = vmatprep.mubr.msk.bf16.mxu0 %vm11542_vm0, %v11540_v1  ;;  %10965 = vmatprep.mubr.msk.bf16.mxu1 %vm11542_vm0, %v11540_v1 }
 0x980   :  { %10969 = vmatprep.subr.bf16.mxu0 %v11540_v1  ;;  %10975 = vmatprep.subr.bf16.mxu1 %v11540_v1 }
 0x985   :  { %10960 = vmatmul.mubr.msk.bf16.vlgmr.msra.gmra.mxu0 %vm943_vm2, %v11478_v41  ;;  %10966 = vmatmul.mubr.msk.bf16.vlgmr.msra.gmra.mxu1 %vm943_vm2, %v11479_v42 }
 0x986   :  { %10970 = vmatpush3.bf16.msra.mxu0 %v6470_v39  ;;  %10976 = vmatpush3.bf16.msra.mxu1 %v6517_v40 }
 0x987   :  { %10971 = vmatprep.mubr.msk.bf16.mxu0 %vm11542_vm0, %v11540_v1  ;;  %10977 = vmatprep.mubr.msk.bf16.mxu1 %vm11542_vm0, %v11540_v1 }
 0x988   :  { %10981 = vmatprep.subr.bf16.mxu0 %v11540_v1  ;;  %10987 = vmatprep.subr.bf16.mxu1 %v11540_v1 }
 0x98d   :  { %10972 = vmatmul.mubr.msk.bf16.vlgmr.msra.gmra.mxu0 %vm943_vm2, %v11480_v49  ;;  %10978 = vmatmul.mubr.msk.bf16.vlgmr.msra.gmra.mxu1 %vm943_vm2, %v11481_v50 }
 0x98e   :  { %10982 = vmatpush3.bf16.msra.mxu0 %v6564_v47  ;;  %10988 = vmatpush3.bf16.msra.mxu1 %v6611_v48 }
 0x98f   :  { %10983 = vmatprep.mubr.msk.bf16.mxu0 %vm11542_vm0, %v11540_v1  ;;  %10989 = vmatprep.mubr.msk.bf16.mxu1 %vm11542_vm0, %v11540_v1 }
 0x990   :  { %10993 = vmatprep.subr.bf16.mxu0 %v11540_v1  ;;  %10999 = vmatprep.subr.bf16.mxu1 %v11540_v1 }
 0x995   :  { %10984 = vmatmul.mubr.msk.bf16.vlgmr.msra.gmra.mxu0 %vm943_vm2, %v11482_v59  ;;  %10990 = vmatmul.mubr.msk.bf16.vlgmr.msra.gmra.mxu1 %vm943_vm2, %v11483_v61 }
 0x996   :  { %10994 = vmatpush3.bf16.msra.mxu0 %v6658_v57  ;;  %11000 = vmatpush3.bf16.msra.mxu1 %v6705_v58 }
 0x997   :  { %10995 = vmatprep.mubr.msk.bf16.mxu0 %vm11542_vm0, %v11540_v1  ;;  %11001 = vmatprep.mubr.msk.bf16.mxu1 %vm11542_vm0, %v11540_v1 }
 0x998   :  { %11005 = vmatprep.subr.bf16.mxu0 %v11540_v1  ;;  %11011 = vmatprep.subr.mxu1 %v11540_v1 }
 0x99d   :  { %10996 = vmatmul.mubr.msk.bf16.vlgmr.msra.gmra.mxu0 %vm943_vm2, %v11484_v0  ;;  %11002 = vmatmul.mubr.msk.bf16.vlgmr.msra.gmra.mxu1 %vm943_vm2, %v11485_v8 }
 0x99e   :  { %11006 = vmatpush3.bf16.msra.mxu0 %v6752_v6  ;;  %11007 = vmatprep.mubr.msk.bf16.mxu0 %vm11542_vm0, %v11540_v1 }
 0x99f   :  { %11012 = vmatpush3.msra.mxu1 %v11541_v3  ;;  %11046 = vmatprep.subr.mxu0 %v11540_v1 }
 0x9a0   :  { %11013 = vmatprep.subr.mxu1 %v11540_v1  ;;  %11043 = vmatprep.mubr.msk.f32.mxu1 %vm11542_vm0, %v11540_v1 }
 0x9a1   :  { %11014 = vmatpush3.msra.mxu1 %v11541_v3 }
 0x9a2   :  { %11015 = vmatprep.subr.mxu1 %v11540_v1 }
 0x9a3   :  { %11016 = vmatpush3.msra.mxu1 %v11541_v3 }
 0x9a4   :  { %11017 = vmatprep.subr.mxu1 %v11540_v1 }
 0x9a5   :  { %11008 = vmatmul.mubr.msk.bf16.vlgmr.msra.gmra.mxu0 %vm943_vm2, %v11486_v9  ;;  %11018 = vmatpush3.msra.mxu1 %v11541_v3 }
 0x9a6   :  { %11019 = vmatprep.subr.mxu1 %v11540_v1  ;;  %11047 = vmatpush3.msra.mxu0 %v11540_v1 }
 0x9a7   :  { %11020 = vmatpush3.msra.mxu1 %v11541_v3  ;;  %11048 = vmatprep.mubr.msk.f32.mxu0 %vm11542_vm0, %v11540_v1 }
 0x9a8   :  { %11021 = vmatprep.subr.mxu1 %v11540_v1  ;;  %11051 = vmatprep.subr.mxu0 %v11540_v1 }
 0x9a9   :  { %11022 = vmatpush3.msra.mxu1 %v11541_v3 }
 0x9aa   :  { %11023 = vmatprep.subr.mxu1 %v11540_v1 }
 0x9ab   :  { %11024 = vmatpush3.msra.mxu1 %v11541_v3 }
 0x9ac   :  { %11025 = vmatprep.subr.mxu1 %v11540_v1 }
 0x9ad   :  { %11026 = vmatpush3.msra.mxu1 %v11541_v3 }
 0x9ae   :  { %11027 = vmatprep.subr.mxu1 %v11540_v1 }
 0x9af   :  { %11028 = vmatpush3.msra.mxu1 %v11541_v3 }
 0x9b0   :  { %11029 = vmatprep.subr.mxu1 %v11540_v1 }
 0x9b1   :  { %11030 = vmatpush3.msra.mxu1 %v11541_v3 }
 0x9b2   :  { %11031 = vmatprep.subr.mxu1 %v11540_v1 }
 0x9b3   :  { %11032 = vmatpush3.msra.mxu1 %v11541_v3 }
 0x9b4   :  { %11033 = vmatprep.subr.mxu1 %v11540_v1 }
 0x9b5   :  { %11034 = vmatpush3.msra.mxu1 %v11541_v3 }
 0x9b6   :  { %11035 = vmatprep.subr.mxu1 %v11540_v1 }
 0x9b7   :  { %11036 = vmatpush3.msra.mxu1 %v11541_v3 }
 0x9b8   :  { %11037 = vmatprep.subr.mxu1 %v11540_v1 }
 0x9b9   :  { %11038 = vmatpush3.msra.mxu1 %v11541_v3 }
 0x9ba   :  { %11039 = vmatprep.subr.mxu1 %v11540_v1 }
 0x9bb   :  { %11040 = vmatpush3.msra.mxu1 %v11541_v3 }
 0x9bc   :  { %11041 = vmatprep.subr.mxu1 %v11540_v1 }
 0x9bd   :  { %11042 = vmatpush3.msra.mxu1 %v11541_v3 }
 0x9be   :  { %11091 = vmatprep.subr.mxu1 %v11540_v1 }
 0x9fd   :  { %v5573_v56 = vpop.f32.mrf.mxu0  ;;  %v5616_v10 = vpop.f32.mrf.mxu1 }
 0x9fe   :  { %v5617_v38 = vadd.f32 %v5616_v10, %v5573_v56 }
 0x9ff   :  { %v10853_v60 = vpop.f32.mrf.mxu0  ;;  %v10859_v53 = vpop.f32.mrf.mxu1 }
 0xa01   :  { %v5576_v13 = vpop.f32.mrf.mxu0  ;;  %v5619_v2 = vpop.f32.mrf.mxu1 }
 0xa03   :  { %v10854_v16 = vpop.f32.mrf.mxu0  ;;  %v10860_v7 = vpop.f32.mrf.mxu1 }
 0xa05   :  { %v5662_v17 = vpop.f32.mrf.mxu0  ;;  %v5709_v4 = vpop.f32.mrf.mxu1 }
 0xa06   :  { %v5668_v41 = vadd.f32 %v5662_v17, %v5617_v38 }
 0xa07   :  { %v10865_v11 = vpop.f32.mrf.mxu0  ;;  %v10871_v14 = vpop.f32.mrf.mxu1 }
 0xa08   :  { %v5715_v46 = vadd.f32 %v5709_v4, %v5668_v41 }
 0xa09   :  { %v5665_v20 = vpop.f32.mrf.mxu0  ;;  %v5712_v21 = vpop.f32.mrf.mxu1 }
 0xa0b   :  { %v10866_v15 = vpop.f32.mrf.mxu0  ;;  %v10872_v22 = vpop.f32.mrf.mxu1 }
 0xa0d   :  { %v5756_v24 = vpop.f32.mrf.mxu0  ;;  %v5803_v19 = vpop.f32.mrf.mxu1 }
 0xa0e   :  { %v5762_v49 = vadd.f32 %v5756_v24, %v5715_v46 }
 0xa0f   :  { %v10877_v25 = vpop.f32.mrf.mxu0  ;;  %v10883_v26 = vpop.f32.mrf.mxu1 }
 0xa10   :  { %v5809_v55 = vadd.f32 %v5803_v19, %v5762_v49 }
 0xa11   :  { %v5759_v23 = vpop.f32.mrf.mxu0  ;;  %v5806_v28 = vpop.f32.mrf.mxu1 }
 0xa13   :  { %v10878_v29 = vpop.f32.mrf.mxu0  ;;  %v10884_v27 = vpop.f32.mrf.mxu1 }
 0xa15   :  { %v5850_v30 = vpop.f32.mrf.mxu0  ;;  %v5897_v32 = vpop.f32.mrf.mxu1 }
 0xa16   :  { %v5856_v59 = vadd.f32 %v5850_v30, %v5809_v55 }
 0xa17   :  { %v10889_v31 = vpop.f32.mrf.mxu0  ;;  %v10895_v33 = vpop.f32.mrf.mxu1 }
 0xa18   :  { %v5903_v0 = vadd.f32 %v5897_v32, %v5856_v59 }
 0xa19   :  { %v5853_v34 = vpop.f32.mrf.mxu0  ;;  %v5900_v35 = vpop.f32.mrf.mxu1 }
 0xa1b   :  { %v10890_v36 = vpop.f32.mrf.mxu0  ;;  %v10896_v37 = vpop.f32.mrf.mxu1 }
 0xa1d   :  { %v5944_v39 = vpop.f32.mrf.mxu0  ;;  %v5991_v40 = vpop.f32.mrf.mxu1 }
 0xa1e   :  { %v5950_v56 = vadd.f32 %v5944_v39, %v5903_v0 }
 0xa1f   :  { %v10901_v42 = vpop.f32.mrf.mxu0  ;;  %v10907_v43 = vpop.f32.mrf.mxu1 }
 0xa20   :  { %v5997_v2 = vadd.f32 %v5991_v40, %v5950_v56 }
 0xa21   :  { %v5947_v44 = vpop.f32.mrf.mxu0  ;;  %v5994_v45 = vpop.f32.mrf.mxu1 }
 0xa23   :  { %v10902_v47 = vpop.f32.mrf.mxu0  ;;  %v10908_v48 = vpop.f32.mrf.mxu1 }
 0xa25   :  { %v6038_v50 = vpop.f32.mrf.mxu0  ;;  %v6085_v51 = vpop.f32.mrf.mxu1 }
 0xa26   :  { %v6044_v17 = vadd.f32 %v6038_v50, %v5997_v2 }
 0xa27   :  { %v10913_v52 = vpop.f32.mrf.mxu0  ;;  %v10919_v54 = vpop.f32.mrf.mxu1 }
 0xa28   :  { %v6091_v21 = vadd.f32 %v6085_v51, %v6044_v17 }
 0xa29   :  { %v6041_v57 = vpop.f32.mrf.mxu0  ;;  %v6088_v58 = vpop.f32.mrf.mxu1 }
 0xa2b   :  { %v10914_v61 = vpop.f32.mrf.mxu0  ;;  %v10920_v62 = vpop.f32.mrf.mxu1 }
 0xa2d   :  { %v6132_v5 = vpop.f32.mrf.mxu0  ;;  %v6177_v6 = vpop.f32.mrf.mxu1 }
 0xa2e   :  { %v6138_v24 = vadd.f32 %v6132_v5, %v6091_v21 }
 0xa2f   :  { %v10925_v8 = vpop.f32.mrf.mxu0  ;;  %v10931_v9 = vpop.f32.mrf.mxu1 }
 0xa30   :  { %v6183_v28 = vadd.f32 %v6177_v6, %v6138_v24 }
 0xa31   :  { %v6135_v10 = vpop.f32.mrf.mxu0  ;;  %v6180_v60 = vpop.f32.mrf.mxu1 }
 0xa33   :  { %v10926_v53 = vpop.f32.mrf.mxu0  ;;  %v10932_v13 = vpop.f32.mrf.mxu1 }
 0xa35   :  { %v6224_v16 = vpop.f32.mrf.mxu0  ;;  %v6271_v7 = vpop.f32.mrf.mxu1 }
 0xa36   :  { %v6230_v30 = vadd.f32 %v6224_v16, %v6183_v28 }
 0xa37   :  { %v10937_v4 = vpop.f32.mrf.mxu0  ;;  %v10943_v11 = vpop.f32.mrf.mxu1 }
 0xa38   :  { %v6277_v35 = vadd.f32 %v6271_v7, %v6230_v30 }
 0xa39   :  { %v6227_v14 = vpop.f32.mrf.mxu0  ;;  %v6274_v20 = vpop.f32.mrf.mxu1 }
 0xa3b   :  { %v10938_v15 = vpop.f32.mrf.mxu0  ;;  %v10944_v22 = vpop.f32.mrf.mxu1 }
 0xa3d   :  { %v6318_v19 = vpop.f32.mrf.mxu0  ;;  %v6365_v25 = vpop.f32.mrf.mxu1 }
 0xa3e   :  { %v6324_v38 = vadd.f32 %v6318_v19, %v6277_v35 }
 0xa3f   :  { %v10949_v26 = vpop.f32.mrf.mxu0  ;;  %v10955_v23 = vpop.f32.mrf.mxu1 }
 0xa40   :  { %v6371_v43 = vadd.f32 %v6365_v25, %v6324_v38 }
 0xa41   :  { %v6321_v29 = vpop.f32.mrf.mxu0  ;;  %v6368_v27 = vpop.f32.mrf.mxu1 }
 0xa43   :  { %v10950_v32 = vpop.f32.mrf.mxu0  ;;  %v10956_v31 = vpop.f32.mrf.mxu1 }
 0xa45   :  { %v6412_v33 = vpop.f32.mrf.mxu0  ;;  %v6459_v34 = vpop.f32.mrf.mxu1 }
 0xa46   :  { %v6418_v46 = vadd.f32 %v6412_v33, %v6371_v43 }
 0xa47   :  { %v10961_v36 = vpop.f32.mrf.mxu0  ;;  %v10967_v37 = vpop.f32.mrf.mxu1 }
 0xa48   :  { %v6465_v51 = vadd.f32 %v6459_v34, %v6418_v46 }
 0xa49   :  { %v6415_v39 = vpop.f32.mrf.mxu0  ;;  %v6462_v40 = vpop.f32.mrf.mxu1 }
 0xa4b   :  { %v10962_v41 = vpop.f32.mrf.mxu0  ;;  %v10968_v42 = vpop.f32.mrf.mxu1 }
 0xa4d   :  { %v6506_v44 = vpop.f32.mrf.mxu0  ;;  %v6553_v45 = vpop.f32.mrf.mxu1 }
 0xa4e   :  { %v6512_v55 = vadd.f32 %v6506_v44, %v6465_v51 }
 0xa4f   :  { %v10973_v47 = vpop.f32.mrf.mxu0  ;;  %v10979_v48 = vpop.f32.mrf.mxu1 }
 0xa50   :  { %v6559_v62 = vadd.f32 %v6553_v45, %v6512_v55 }
 0xa51   :  { %v6509_v49 = vpop.f32.mrf.mxu0  ;;  %v6556_v50 = vpop.f32.mrf.mxu1 }
 0xa53   :  { %v10974_v52 = vpop.f32.mrf.mxu0  ;;  %v10980_v54 = vpop.f32.mrf.mxu1 }
 0xa55   :  { %v6600_v57 = vpop.f32.mrf.mxu0  ;;  %v6647_v58 = vpop.f32.mrf.mxu1 }
 0xa56   :  { %v6606_v0 = vadd.f32 %v6600_v57, %v6559_v62 }
 0xa57   :  { %v10985_v59 = vpop.f32.mrf.mxu0  ;;  %v10991_v61 = vpop.f32.mrf.mxu1 }
 0xa58   :  { %v6653_v60 = vadd.f32 %v6647_v58, %v6606_v0 }
 0xa59   :  { %v6603_v5 = vpop.f32.mrf.mxu0  ;;  %v6650_v6 = vpop.f32.mrf.mxu1 }
 0xa5b   :  { %v10986_v8 = vpop.f32.mrf.mxu0  ;;  %v10992_v9 = vpop.f32.mrf.mxu1 }
 0xa5d   :  { %v6694_v56 = vpop.f32.mrf.mxu0  ;;  %v6741_v10 = vpop.f32.mrf.mxu1 }
 0xa5e   :  { %v6700_v2 = vadd.f32 %v6694_v56, %v6653_v60 }
 0xa5f   :  { %v10997_v53 = vpop.f32.mrf.mxu0  ;;  %v11003_v13 = vpop.f32.mrf.mxu1 }
 0xa60   :  { %v6747_v11 = vadd.f32 %v6741_v10, %v6700_v2 }
 0xa61   :  { %v6697_v16 = vpop.f32.mrf.mxu0  ;;  %v6744_v7 = vpop.f32.mrf.mxu1 }
 0xa63   :  { %v10998_v17 = vpop.f32.mrf.mxu0  ;;  %v11004_v4 = vpop.f32.mrf.mxu1 }
 0xa64   :  { %v11487_v17 = vld [vmem:[%s13828_s5] sm:$0xff]  ;;  %s13890_s5 = smov 10  }
 0xa65   :  { %v6788_v14 = vpop.f32.mrf.mxu0 }
 0xa66   :  { %v6794_v20 = vadd.f32 %v6788_v14, %v6747_v11  ;;  %v11488_v14 = vld [vmem:[%s13829_s6] sm:$0xff]  ;;  %s13891_s6 = smov 11  }
 0xa67   :  { %v11009_v21 = vpop.f32.mrf.mxu0 }
 0xa68   :  { %v6795_v15 = vadd.f32 %v6794_v20, %v12207_v63 }
 0xa69   :  { %v6791_v22 = vpop.f32.mrf.mxu0 }
 0xa6a   :  { %v13310_v24 = vmul.f32 %v12999_v18, %v6795_v15 }
 0xa6b   :  { %v11010_v19 = vpop.f32.mrf.mxu0 }
 0xa6c   :  { %v13313_v25 = vand.u32 4294901760, %v13310_v24  ;;  %v7230_v28 = vmul.f32 %v13310_v24, %v13310_v24 }
 0xa6e   :  { %11049 = vmatmul.mubr.f32.vlgmr.msra.gmra.mxu0 %v13313_v25  ;;  %v13318_v26 = vsub.f32 %v13310_v24, %v13313_v25  ;;  %v13418_v29 = vand.u32 4294901760, %v7230_v28 }
 0xa6f   :  { %11052 = vmatpush3.msra.mxu0 %v11540_v1  ;;  %11053 = vmatprep.mubr.msk.f32.mxu0 %vm11542_vm0, %v11540_v1 }
 0xa70   :  { %11056 = vmatprep.subr.mxu0 %v11540_v1  ;;  %v6864_v63 = vand.u32 4294901760, %v13318_v26  ;;  %v13433_v27 = vsub.f32 %v7230_v28, %v13418_v29 }
 0xa72   :  { %11054 = vmatmul.mubr.f32.vlgmr.msra.gmra.mxu0 %v13318_v26  ;;  %v6865_v18 = vsub.f32 %v13318_v26, %v6864_v63  ;;  %v7298_v30 = vand.u32 4294901760, %v13433_v27  ;;  %v13546_v26 = vld [vmem:[%s13830_s7] ss:$0 sm:$0xff]  ;;  %s13893_s7 = smov 9  }
 0xa73   :  { %11057 = vmatpush3.msra.mxu0 %v11541_v3  ;;  %11088 = vmatprep.mubr.msk.f32.mxu0 %vm11542_vm0, %v11540_v1 }
 0xa74   :  { %11058 = vmatprep.subr.mxu0 %v11540_v1  ;;  %v6866_v23 = vand.u32 4294901760, %v6865_v18  ;;  %v7299_v32 = vsub.f32 %v13433_v27, %v7298_v30 }
 0xa75   :  { %11059 = vmatpush3.msra.mxu0 %v11541_v3 }
 0xa76   :  { %11060 = vmatprep.subr.mxu0 %v11540_v1  ;;  %11044 = vmatmul.mubr.f32.vlgmr.msra.gmra.mxu1 %v6866_v23  ;;  %v7300_v31 = vand.u32 4294901760, %v7299_v32 }
 0xa77   :  { %11061 = vmatpush3.msra.mxu0 %v11541_v3  ;;  %11092 = vmatpush3.msra.mxu1 %v11540_v1 }
 0xa78   :  { %11062 = vmatprep.subr.mxu0 %v11540_v1  ;;  %11093 = vmatprep.mubr.msk.f32.mxu1 %vm11542_vm0, %v11540_v1 }
 0xa79   :  { %11063 = vmatpush3.msra.mxu0 %v11541_v3  ;;  %11096 = vmatprep.subr.mxu1 %v11540_v1 }
 0xa7a   :  { %11064 = vmatprep.subr.mxu0 %v11540_v1  ;;  %11094 = vmatmul.mubr.f32.vlgmr.msra.gmra.mxu1 %v13313_v25 }
 0xa7b   :  { %11065 = vmatpush3.msra.mxu0 %v11541_v3  ;;  %11097 = vmatpush3.msra.mxu1 %v11541_v3 }
 0xa7c   :  { %11066 = vmatprep.subr.mxu0 %v11540_v1  ;;  %11098 = vmatprep.subr.mxu1 %v11540_v1 }
 0xa7d   :  { %11067 = vmatpush3.msra.mxu0 %v11541_v3  ;;  %11099 = vmatpush3.msra.mxu1 %v11541_v3 }
 0xa7e   :  { %11068 = vmatprep.subr.mxu0 %v11540_v1  ;;  %11100 = vmatprep.subr.mxu1 %v11540_v1 }
 0xa7f   :  { %11069 = vmatpush3.msra.mxu0 %v11541_v3  ;;  %11101 = vmatpush3.msra.mxu1 %v11541_v3 }
 0xa80   :  { %11070 = vmatprep.subr.mxu0 %v11540_v1  ;;  %11102 = vmatprep.subr.mxu1 %v11540_v1 }
 0xa81   :  { %11071 = vmatpush3.msra.mxu0 %v11541_v3  ;;  %11103 = vmatpush3.msra.mxu1 %v11541_v3 }
 0xa82   :  { %11072 = vmatprep.subr.mxu0 %v11540_v1  ;;  %11104 = vmatprep.subr.mxu1 %v11540_v1 }
 0xa83   :  { %11073 = vmatpush3.msra.mxu0 %v11541_v3  ;;  %11105 = vmatpush3.msra.mxu1 %v11541_v3 }
 0xa84   :  { %11074 = vmatprep.subr.mxu0 %v11540_v1  ;;  %11106 = vmatprep.subr.mxu1 %v11540_v1 }
 0xa85   :  { %11075 = vmatpush3.msra.mxu0 %v11541_v3  ;;  %11107 = vmatpush3.msra.mxu1 %v11541_v3 }
 0xa86   :  { %11076 = vmatprep.subr.mxu0 %v11540_v1  ;;  %11108 = vmatprep.subr.mxu1 %v11540_v1 }
 0xa87   :  { %11077 = vmatpush3.msra.mxu0 %v11541_v3  ;;  %11109 = vmatpush3.msra.mxu1 %v11541_v3 }
 0xa88   :  { %11078 = vmatprep.subr.mxu0 %v11540_v1  ;;  %11110 = vmatprep.subr.mxu1 %v11540_v1 }
 0xa89   :  { %11079 = vmatpush3.msra.mxu0 %v11541_v3  ;;  %11111 = vmatpush3.msra.mxu1 %v11541_v3 }
 0xa8a   :  { %11080 = vmatprep.subr.mxu0 %v11540_v1  ;;  %11112 = vmatprep.subr.mxu1 %v11540_v1 }
 0xa8b   :  { %11081 = vmatpush3.msra.mxu0 %v11541_v3  ;;  %11113 = vmatpush3.msra.mxu1 %v11541_v3 }
 0xa8c   :  { %11082 = vmatprep.subr.mxu0 %v11540_v1  ;;  %11114 = vmatprep.subr.mxu1 %v11540_v1 }
 0xa8d   :  { %11083 = vmatpush3.msra.mxu0 %v11541_v3  ;;  %11115 = vmatpush3.msra.mxu1 %v11541_v3 }
 0xa8e   :  { %11084 = vmatprep.subr.mxu0 %v11540_v1  ;;  %11116 = vmatprep.subr.mxu1 %v11540_v1 }
 0xa8f   :  { %11085 = vmatpush3.msra.mxu0 %v11541_v3  ;;  %11117 = vmatpush3.msra.mxu1 %v11541_v3 }
 0xa90   :  { %11086 = vmatprep.subr.mxu0 %v11540_v1  ;;  %11118 = vmatprep.subr.mxu1 %v11540_v1 }
 0xa91   :  { %11087 = vmatpush3.msra.mxu0 %v11541_v3  ;;  %11119 = vmatpush3.msra.mxu1 %v11541_v3 }
 0xa92   :  { %11089 = vmatmul.mubr.f32.vlgmr.msra.gmra.mxu0 %v6864_v63  ;;  %11120 = vmatprep.subr.mxu1 %v11540_v1 }
 0xa93   :  { %11131 = vmatprep.subr.mxu0 %v11540_v1  ;;  %11121 = vmatpush3.msra.mxu1 %v11541_v3 }
 0xa94   :  { %11132 = vmatpush3.msra.mxu0 %v11541_v3  ;;  %11122 = vmatprep.subr.mxu1 %v11540_v1 }
 0xa95   :  { %11133 = vmatprep.subr.mxu0 %v11540_v1  ;;  %11123 = vmatpush3.msra.mxu1 %v11541_v3 }
 0xa96   :  { %11134 = vmatpush3.msra.mxu0 %v11541_v3  ;;  %11124 = vmatprep.subr.mxu1 %v11540_v1 }
 0xa97   :  { %11135 = vmatprep.subr.mxu0 %v11540_v1  ;;  %11125 = vmatpush3.msra.mxu1 %v11541_v3 }
 0xa98   :  { %11136 = vmatpush3.msra.mxu0 %v11541_v3  ;;  %11126 = vmatprep.subr.mxu1 %v11540_v1 }
 0xa99   :  { %11137 = vmatprep.subr.mxu0 %v11540_v1  ;;  %11127 = vmatpush3.msra.mxu1 %v11541_v3 }
 0xa9a   :  { %11128 = vmatprep.mubr.msk.f32.mxu1 %vm11542_vm0, %v11540_v1  ;;  %11138 = vmatpush3.msra.mxu0 %v11541_v3 }
 0xa9b   :  { %11129 = vmatmul.mubr.f32.vlgmr.msra.gmra.mxu1 %v13313_v25  ;;  %11139 = vmatprep.subr.mxu0 %v11540_v1 }
 0xa9c   :  { %11140 = vmatpush3.msra.mxu0 %v11541_v3  ;;  %11166 = vmatprep.subr.mxu1 %v11540_v1 }
 0xa9d   :  { %11141 = vmatprep.subr.mxu0 %v11540_v1  ;;  %11167 = vmatpush3.msra.mxu1 %v11540_v1 }
 0xa9e   :  { %11142 = vmatpush3.msra.mxu0 %v11541_v3  ;;  %11168 = vmatprep.mubr.msk.f32.mxu1 %vm11542_vm0, %v11540_v1 }
 0xa9f   :  { %11143 = vmatprep.subr.mxu0 %v11540_v1  ;;  %11169 = vmatmul.mubr.f32.vlgmr.msra.gmra.mxu1 %v13418_v29 }
 0xaa0   :  { %11144 = vmatpush3.msra.mxu0 %v11541_v3  ;;  %11171 = vmatprep.subr.mxu1 %v11540_v1 }
 0xaa1   :  { %11145 = vmatprep.subr.mxu0 %v11540_v1  ;;  %11172 = vmatpush3.msra.mxu1 %v11540_v1 }
 0xaa2   :  { %11146 = vmatpush3.msra.mxu0 %v11541_v3  ;;  %11173 = vmatprep.mubr.msk.f32.mxu1 %vm11542_vm0, %v11540_v1 }
 0xaa3   :  { %11176 = vmatprep.subr.mxu1 %v11540_v1  ;;  %11147 = vmatprep.subr.mxu0 %v11540_v1 }
 0xaa4   :  { %11174 = vmatmul.mubr.f32.vlgmr.msra.gmra.mxu1 %v13433_v27  ;;  %11148 = vmatpush3.msra.mxu0 %v11541_v3 }
 0xaa5   :  { %11177 = vmatpush3.msra.mxu1 %v11541_v3  ;;  %11149 = vmatprep.subr.mxu0 %v11540_v1 }
 0xaa6   :  { %11178 = vmatprep.subr.mxu1 %v11540_v1  ;;  %11150 = vmatpush3.msra.mxu0 %v11541_v3 }
 0xaa7   :  { %11179 = vmatpush3.msra.mxu1 %v11541_v3  ;;  %11151 = vmatprep.subr.mxu0 %v11540_v1 }
 0xaa8   :  { %11180 = vmatprep.subr.mxu1 %v11540_v1  ;;  %11152 = vmatpush3.msra.mxu0 %v11541_v3 }
 0xaa9   :  { %11181 = vmatpush3.msra.mxu1 %v11541_v3  ;;  %11153 = vmatprep.subr.mxu0 %v11540_v1 }
 0xaaa   :  { %11182 = vmatprep.subr.mxu1 %v11540_v1  ;;  %11154 = vmatpush3.msra.mxu0 %v11541_v3 }
 0xaab   :  { %11183 = vmatpush3.msra.mxu1 %v11541_v3  ;;  %11155 = vmatprep.subr.mxu0 %v11540_v1 }
 0xaac   :  { %11184 = vmatprep.subr.mxu1 %v11540_v1  ;;  %11156 = vmatpush3.msra.mxu0 %v11541_v3 }
 0xaad   :  { %11185 = vmatpush3.msra.mxu1 %v11541_v3  ;;  %11157 = vmatprep.subr.mxu0 %v11540_v1 }
 0xaae   :  { %11186 = vmatprep.subr.mxu1 %v11540_v1  ;;  %11158 = vmatpush3.msra.mxu0 %v11541_v3 }
 0xaaf   :  { %11187 = vmatpush3.msra.mxu1 %v11541_v3  ;;  %11159 = vmatprep.subr.mxu0 %v11540_v1 }
 0xab0   :  { %11188 = vmatprep.subr.mxu1 %v11540_v1  ;;  %11160 = vmatpush3.msra.mxu0 %v11541_v3 }
 0xab1   :  { %11189 = vmatpush3.msra.mxu1 %v11541_v3  ;;  %11161 = vmatprep.subr.mxu0 %v11540_v1 }
 0xab2   :  { %11190 = vmatprep.subr.mxu1 %v11540_v1  ;;  %11162 = vmatpush3.msra.mxu0 %v11541_v3 }
 0xab3   :  { %11191 = vmatpush3.msra.mxu1 %v11541_v3  ;;  %11163 = vmatprep.mubr.msk.f32.mxu0 %vm11542_vm0, %v11540_v1 }
 0xab4   :  { %11192 = vmatprep.subr.mxu1 %v11540_v1  ;;  %11164 = vmatmul.mubr.f32.vlgmr.msra.gmra.mxu0 %v7300_v31 }
 0xab5   :  { %11193 = vmatpush3.msra.mxu1 %v11541_v3  ;;  %11211 = vmatprep.subr.mxu0 %v11540_v1 }
 0xab6   :  { %11194 = vmatprep.subr.mxu1 %v11540_v1  ;;  %11212 = vmatpush3.msra.mxu0 %v11540_v1 }
 0xab7   :  { %11195 = vmatpush3.msra.mxu1 %v11541_v3  ;;  %11213 = vmatprep.mubr.msk.f32.mxu0 %vm11542_vm0, %v11540_v1 }
 0xab8   :  { %11196 = vmatprep.subr.mxu1 %v11540_v1  ;;  %11216 = vmatprep.subr.mxu0 %v11540_v1 }
 0xab9   :  { %11197 = vmatpush3.msra.mxu1 %v11541_v3  ;;  %11214 = vmatmul.mubr.f32.vlgmr.msra.gmra.mxu0 %v13418_v29 }
 0xaba   :  { %11217 = vmatpush3.msra.mxu0 %v11541_v3  ;;  %11198 = vmatprep.subr.mxu1 %v11540_v1 }
 0xabb   :  { %11218 = vmatprep.subr.mxu0 %v11540_v1  ;;  %11199 = vmatpush3.msra.mxu1 %v11541_v3 }
 0xabc   :  { %11219 = vmatpush3.msra.mxu0 %v11541_v3  ;;  %11200 = vmatprep.subr.mxu1 %v11540_v1 }
 0xabd   :  { %11220 = vmatprep.subr.mxu0 %v11540_v1  ;;  %11201 = vmatpush3.msra.mxu1 %v11541_v3 }
 0xabe   :  { %11221 = vmatpush3.msra.mxu0 %v11541_v3  ;;  %11202 = vmatprep.subr.mxu1 %v11540_v1 }
 0xabf   :  { %11222 = vmatprep.subr.mxu0 %v11540_v1  ;;  %11203 = vmatpush3.msra.mxu1 %v11541_v3 }
 0xac0   :  { %11223 = vmatpush3.msra.mxu0 %v11541_v3  ;;  %11204 = vmatprep.subr.mxu1 %v11540_v1 }
 0xac1   :  { %11224 = vmatprep.subr.mxu0 %v11540_v1  ;;  %11205 = vmatpush3.msra.mxu1 %v11541_v3 }
 0xac2   :  { %11225 = vmatpush3.msra.mxu0 %v11541_v3  ;;  %11206 = vmatprep.subr.mxu1 %v11540_v1 }
 0xac3   :  { %11226 = vmatprep.subr.mxu0 %v11540_v1  ;;  %11207 = vmatpush3.msra.mxu1 %v11541_v3 }
 0xac4   :  { %11208 = vmatprep.mubr.msk.f32.mxu1 %vm11542_vm0, %v11540_v1  ;;  %11227 = vmatpush3.msra.mxu0 %v11541_v3 }
 0xac5   :  { %11209 = vmatmul.mubr.f32.vlgmr.msra.gmra.mxu1 %v7298_v30  ;;  %11228 = vmatprep.subr.mxu0 %v11540_v1 }
 0xac6   :  { %11229 = vmatpush3.msra.mxu0 %v11541_v3  ;;  %11248 = vmatprep.mubr.msk.f32.mxu0 %vm11542_vm0, %v11540_v1 }
 0xac7   :  { %11230 = vmatprep.subr.mxu0 %v11540_v1  ;;  %11251 = vmatprep.subr.bf16.mxu1 %v11540_v1 }
 0xac8   :  { %11231 = vmatpush3.msra.mxu0 %v11541_v3  ;;  %11253 = vmatprep.mubr.msk.bf16.mxu1 %vm11542_vm0, %v11540_v1 }
 0xac9   :  { %11232 = vmatprep.subr.mxu0 %v11540_v1 }
 0xaca   :  { %11233 = vmatpush3.msra.mxu0 %v11541_v3 }
 0xacb   :  { %11234 = vmatprep.subr.mxu0 %v11540_v1 }
 0xacc   :  { %11235 = vmatpush3.msra.mxu0 %v11541_v3 }
 0xacd   :  { %11236 = vmatprep.subr.mxu0 %v11540_v1 }
 0xace   :  { %11237 = vmatpush3.msra.mxu0 %v11541_v3 }
 0xacf   :  { %11238 = vmatprep.subr.mxu0 %v11540_v1 }
 0xad0   :  { %11239 = vmatpush3.msra.mxu0 %v11541_v3 }
 0xad1   :  { %11240 = vmatprep.subr.mxu0 %v11540_v1 }
 0xad2   :  { %11241 = vmatpush3.msra.mxu0 %v11541_v3 }
 0xad3   :  { %11242 = vmatprep.subr.mxu0 %v11540_v1 }
 0xad4   :  { %11243 = vmatpush3.msra.mxu0 %v11541_v3 }
 0xad5   :  { %11244 = vmatprep.subr.mxu0 %v11540_v1 }
 0xad6   :  { %11245 = vmatpush3.msra.mxu0 %v11541_v3 }
 0xad7   :  { %11246 = vmatprep.subr.mxu0 %v11540_v1 }
 0xad8   :  { %11247 = vmatpush3.msra.mxu0 %v11541_v3 }
 0xad9   :  { %11249 = vmatmul.mubr.f32.vlgmr.msra.gmra.mxu0 %v13418_v29  ;;  %11257 = vmatprep.subr.bf16.mxu0 %v11540_v1 }
 0xada   :  { %11259 = vmatprep.mubr.msk.bf16.mxu0 %vm11542_vm0, %v11540_v1 }
 0xb2e   :  { %v6939_v33 = vpop.f32.mrf.mxu0 }
 0xb30   :  { %v11050_v34 = vpop.f32.mrf.mxu0 }
 0xb32   :  { %v7011_v35 = vpop.f32.mrf.mxu0 }
 0xb34   :  { %v11055_v36 = vpop.f32.mrf.mxu0 }
 0xb35   :  { %v11490_v36 = vld [vmem:[%s13826_s3 + $0x4] sm:$0xf] }
 0xb36   :  { %v6868_v37 = vpop.f32.mrf.mxu1 }
 0xb37   :  { %v6940_v38 = vadd.f32 %v6939_v33, %v6868_v37  ;;  %v11491_v37 = vld [vmem:[%s13826_s3] sm:$0xf] }
 0xb38   :  { %v11045_v39 = vpop.f32.mrf.mxu1 }
 0xb39   :  { %v7012_v40 = vadd.f32 %v7011_v35, %v6940_v38 }
 0xb3a   :  { %v7155_v41 = vpop.f32.mrf.mxu1 }
 0xb3c   :  { %v11095_v42 = vpop.f32.mrf.mxu1 }
 0xb52   :  { %v7084_v43 = vpop.f32.mrf.mxu0 }
 0xb53   :  { %v7085_v44 = vadd.f32 %v7084_v43, %v7012_v40 }
 0xb54   :  { %v11090_v3 = vpop.f32.mrf.mxu0 }
 0xb55   :  { %v7156_v45 = vadd.f32 %v7155_v41, %v7085_v44  ;;  %v11492_v44 = vld [vmem:[%s13826_s3 + $0x8] sm:$0xf]  ;;  %v11493_v3 = vld [vmem:[%s13826_s3 + $0xc] sm:$0xf] }
 0xb5b   :  { %v7226_v46 = vpop.f32.mrf.mxu1 }
 0xb5c   :  { %v7227_v5 = vadd.f32 %v7226_v46, %v7156_v45 }
 0xb5d   :  { %v11130_v47 = vpop.f32.mrf.mxu1 }
 0xb5e   :  { %v7664_v0 = vmul.f32 0.015625, %v7227_v5  ;;  %v11497_v5 = vld [vmem:[%s13826_s3 + $0x1c] sm:$0xf] }
 0xb5f   :  { %v7373_v48 = vpop.f32.mrf.mxu1 }
 0xb60   :  { %v7666_v60 = vmul.f32 %v7664_v0, %v7664_v0 }
 0xb61   :  { %v11170_v49 = vpop.f32.mrf.mxu1 }
 0xb64   :  { %v7445_v50 = vpop.f32.mrf.mxu1 }
 0xb66   :  { %v11175_v51 = vpop.f32.mrf.mxu1 }
 0xb67   :  { %v11494_v51 = vld [vmem:[%s13826_s3 + $0x10] sm:$0xf] }
 0xb74   :  { %v7302_v52 = vpop.f32.mrf.mxu0 }
 0xb75   :  { %v7374_v61 = vadd.f32 %v7373_v48, %v7302_v52  ;;  %v11495_v52 = vld [vmem:[%s13826_s3 + $0x14] sm:$0xf] }
 0xb76   :  { %v11165_v54 = vpop.f32.mrf.mxu0 }
 0xb77   :  { %v7446_v62 = vadd.f32 %v7445_v50, %v7374_v61 }
 0xb79   :  { %v7589_v55 = vpop.f32.mrf.mxu0 }
 0xb7b   :  { %v11215_v57 = vpop.f32.mrf.mxu0 }
 0xb85   :  { %v7518_v58 = vpop.f32.mrf.mxu1 }
 0xb86   :  { %v7519_v6 = vadd.f32 %v7518_v58, %v7446_v62  ;;  %v11496_v62 = vld [vmem:[%s13826_s3 + $0x18] sm:$0xf] }
 0xb87   :  { %v11210_v59 = vpop.f32.mrf.mxu1 }
 0xb88   :  { %v7590_v8 = vadd.f32 %v7589_v55, %v7519_v6 }
 0xb99   :  { %v7660_v9 = vpop.f32.mrf.mxu0 }
 0xb9a   :  { %v7661_v56 = vadd.f32 %v7660_v9, %v7590_v8 }
 0xb9b   :  { %v11250_v10 = vpop.f32.mrf.mxu0 }
 0xb9c   :  { %v7665_v53 = vmul.f32 0.015625, %v7661_v56 }
 0xb9e   :  { %v7667_v13 = vsub.f32 %v7665_v53, %v7666_v60  ;;  %v11498_v60 = vld [vmem:[%s13826_s3 + $0x20] sm:$0xf]  ;;  %v11499_v53 = vld [vmem:[%s13826_s3 + $0x24] sm:$0xf] }
 0xba0   :  { %v7668_v2 = vmax.f32 %v7667_v13, 0.0 }
 0xba2   :  { %v7669_v16 = vadd.f32 1e-05, %v7668_v2 }
 0xba4   :  { %11452 = vrsqrt.f32 %v7669_v16 }
 0xbb1   :  { %v11453_v7 = vpop.eup %11452 }
 0xbb2   :  { %v7671_v4 = vmul.f32 %v11487_v17, %v11453_v7  ;;  %v11500_v17 = vld [vmem:[%s13826_s3 + $0x28] sm:$0xf] }
 0xbb4   :  { %7676 = vperm.xlu0 %11444, %v7671_v4   ;;  %v7672_v11 = vmul.f32 %v7671_v4, %v7664_v0  ;;  %v11501_v4 = vld [vmem:[%s13826_s3 + $0x2c] sm:$0xf] }
 0xbb6   :  { %v7673_v20 = vsub.f32 %v11488_v14, %v7672_v11 }
 0xbb8   :  { %7682 = vperm.xlu1 %11445, %v7673_v20  }
 0xc2f   :  { %v7677_v21 = vpop.permute.xlu0 %7676 }
 0xc30   :  { %v7679_v15 = vmul.f32 %v7677_v21, %v13310_v24 }
 0xc33   :  { %v7683_v22 = vpop.permute.xlu1 %7682 }
 0xc34   :  { %v7685_v19 = vadd.f32 %v7683_v22, %v7679_v15 }
 0xc36   :  { %v7686_v25 = vmax.f32 %v7685_v19, 0.0 }
 0xc38   :  { %v13549_v63 = vmul.f32 %v13546_v26, %v7686_v25  ;;  %v11502_v25 = vld [vmem:[%s13826_s3 + $0x30] sm:$0xf] }
 0xc3a   :  { %7688 = vrot.lane.b32.xlu1 %v13549_v63, %s11547_s16  ;;  %7691 = vrot.lane.b32.xlu0 %v13549_v63, %s11545_s14  ;;  %s13896_s16 = smov 4   ;;  %v8297_v16 = vpack.c.bf16 %v13549_v63, %v13549_v63 }
 0xc3c   :  { %v8299_v11 = vsel %vm947_vm1, %v8297_v16, 0 }
 0xc3e   :  { %7827 = vrot.lane.b32.xlu1 %v13549_v63, %s13890_s5  ;;  %7780 = vrot.lane.b32.xlu0 %v13549_v63, %s13891_s6 }
 0xc42   :  { %7921 = vrot.lane.b32.xlu1 %v13549_v63, %s13892_s1  ;;  %7874 = vrot.lane.b32.xlu0 %v13549_v63, %s13893_s7 }
 0xc46   :  { %8015 = vrot.lane.b32.xlu1 %v13549_v63, %s13894_s18  ;;  %7968 = vrot.lane.b32.xlu0 %v13549_v63, %s13895_s20 }
 0xc4a   :  { %8109 = vrot.lane.b32.xlu1 %v13549_v63, %s13896_s16  ;;  %8062 = vrot.lane.b32.xlu0 %v13549_v63, %s13882_s26 }
 0xc4e   :  { %8203 = vrot.lane.b32.xlu1 %v13549_v63, %s13883_s27  ;;  %8156 = vrot.lane.b32.xlu0 %v13549_v63, %s13884_s12 }
 0xc52   :  { %8342 = vrot.lane.b32.xlu1 %v13549_v63, %s13885_s21  ;;  %8250 = vrot.lane.b32.xlu0 %v13549_v63, %s13886_s4 }
 0xc56   :  { %8436 = vrot.lane.b32.xlu1 %v13549_v63, %s13887_s19  ;;  %8389 = vrot.lane.b32.xlu0 %v13549_v63, %s13873_s10 }
 0xc5a   :  { %8530 = vrot.lane.b32.xlu1 %v13549_v63, %s13874_s11  ;;  %8483 = vrot.lane.b32.xlu0 %v13549_v63, %s13875_s29 }
 0xc5e   :  { %8624 = vrot.lane.b32.xlu1 %v13549_v63, %s13888_s24  ;;  %8577 = vrot.lane.b32.xlu0 %v13549_v63, %s13876_s9 }
 0xc62   :  { %8718 = vrot.lane.b32.xlu1 %v13549_v63, %s13889_s17  ;;  %8671 = vrot.lane.b32.xlu0 %v13549_v63, %s13877_s25 }
 0xc66   :  { %8812 = vrot.lane.b32.xlu1 %v13549_v63, %s13878_s2  ;;  %8765 = vrot.lane.b32.xlu0 %v13549_v63, %s13879_s30 }
 0xc6a   :  { %8906 = vrot.lane.b32.xlu1 %v13549_v63, %s13880_s23  ;;  %8859 = vrot.lane.b32.xlu0 %v13549_v63, %s13881_s28  ;;  %v11503_v63 = vld [vmem:[%s13826_s3 + $0x34] sm:$0xf] }
 0xcac   :  { %v7689_v24 = vpop.permute.xlu1 %7688  ;;  %v7692_v18 = vpop.permute.xlu0 %7691 }
 0xcad   :  { %v7690_v23 = vpack.c.bf16 %v7689_v24, %v7689_v24  ;;  %v7693_v28 = vpack.c.bf16 %v7692_v18, %v7692_v18 }
 0xcaf   :  { %v7738_v29 = vsel %vm947_vm1, %v7690_v23, 0  ;;  %v7695_v27 = vsel %vm947_vm1, %v7693_v28, 0 }
 0xcb0   :  { %11258 = vmatpush3.bf16.msra.mxu0 %v7738_v29  ;;  %v7828_v30 = vpop.permute.xlu1 %7827  ;;  %11252 = vmatpush3.bf16.msra.mxu1 %v7695_v27  ;;  %v7781_v32 = vpop.permute.xlu0 %7780 }
 0xcb1   :  { %v7829_v31 = vpack.c.bf16 %v7828_v30, %v7828_v30  ;;  %v7782_v33 = vpack.c.bf16 %v7781_v32, %v7781_v32  ;;  %11263 = vmatprep.subr.bf16.mxu1 %v11540_v1  ;;  %11269 = vmatprep.subr.bf16.mxu0 %v11540_v1  ;;  %v11504_v30 = vld [vmem:[%s13826_s3 + $0x38] sm:$0xf]  ;;  %v11505_v32 = vld [vmem:[%s13826_s3 + $0x3c] sm:$0xf] }
 0xcb3   :  { %v7831_v34 = vsel %vm947_vm1, %v7829_v31, 0  ;;  %v7784_v35 = vsel %vm947_vm1, %v7782_v33, 0  ;;  %11254 = vmatmul.mubr.msk.bf16.vlgmr.msra.gmra.mxu1 %vm943_vm2, %v11490_v36  ;;  %11260 = vmatmul.mubr.msk.bf16.vlgmr.msra.gmra.mxu0 %vm943_vm2, %v11491_v37 }
 0xcb4   :  { %11270 = vmatpush3.bf16.msra.mxu0 %v7831_v34  ;;  %v7922_v38 = vpop.permute.xlu1 %7921  ;;  %11264 = vmatpush3.bf16.msra.mxu1 %v7784_v35  ;;  %v7875_v39 = vpop.permute.xlu0 %7874 }
 0xcb5   :  { %11265 = vmatprep.mubr.msk.bf16.mxu1 %vm11542_vm0, %v11540_v1  ;;  %11271 = vmatprep.mubr.msk.bf16.mxu0 %vm11542_vm0, %v11540_v1  ;;  %v7923_v40 = vpack.c.bf16 %v7922_v38, %v7922_v38  ;;  %v7876_v41 = vpack.c.bf16 %v7875_v39, %v7875_v39  ;;  %v11506_v38 = vld [vmem:[%s13826_s3 + $0x40] sm:$0xf]  ;;  %v11507_v39 = vld [vmem:[%s13826_s3 + $0x44] sm:$0xf] }
 0xcb6   :  { %11275 = vmatprep.subr.bf16.mxu1 %v11540_v1  ;;  %11281 = vmatprep.subr.bf16.mxu0 %v11540_v1 }
 0xcb7   :  { %v7925_v42 = vsel %vm947_vm1, %v7923_v40, 0  ;;  %v7878_v43 = vsel %vm947_vm1, %v7876_v41, 0 }
 0xcb8   :  { %v8016_v45 = vpop.permute.xlu1 %8015  ;;  %v7969_v46 = vpop.permute.xlu0 %7968 }
 0xcb9   :  { %v8017_v47 = vpack.c.bf16 %v8016_v45, %v8016_v45  ;;  %v7970_v48 = vpack.c.bf16 %v7969_v46, %v7969_v46  ;;  %v11508_v45 = vld [vmem:[%s13826_s3 + $0x48] sm:$0xf]  ;;  %v11509_v46 = vld [vmem:[%s13826_s3 + $0x4c] sm:$0xf] }
 0xcbb   :  { %11266 = vmatmul.mubr.msk.bf16.vlgmr.msra.gmra.mxu1 %vm943_vm2, %v11492_v44  ;;  %11272 = vmatmul.mubr.msk.bf16.vlgmr.msra.gmra.mxu0 %vm943_vm2, %v11493_v3  ;;  %v8019_v49 = vsel %vm947_vm1, %v8017_v47, 0  ;;  %v7972_v50 = vsel %vm947_vm1, %v7970_v48, 0 }
 0xcbc   :  { %11276 = vmatpush3.bf16.msra.mxu1 %v7878_v43  ;;  %11282 = vmatpush3.bf16.msra.mxu0 %v7925_v42  ;;  %v8110_v54 = vpop.permute.xlu1 %8109  ;;  %v8063_v55 = vpop.permute.xlu0 %8062 }
 0xcbd   :  { %11277 = vmatprep.mubr.msk.bf16.mxu1 %vm11542_vm0, %v11540_v1  ;;  %11283 = vmatprep.mubr.msk.bf16.mxu0 %vm11542_vm0, %v11540_v1  ;;  %v8111_v57 = vpack.c.bf16 %v8110_v54, %v8110_v54  ;;  %v8064_v58 = vpack.c.bf16 %v8063_v55, %v8063_v55  ;;  %v11510_v54 = vld [vmem:[%s13826_s3 + $0x50] sm:$0xf]  ;;  %v11511_v55 = vld [vmem:[%s13826_s3 + $0x54] sm:$0xf] }
 0xcbe   :  { %11287 = vmatprep.subr.bf16.mxu1 %v11540_v1  ;;  %11293 = vmatprep.subr.bf16.mxu0 %v11540_v1 }
 0xcbf   :  { %v8113_v59 = vsel %vm947_vm1, %v8111_v57, 0  ;;  %v8066_v61 = vsel %vm947_vm1, %v8064_v58, 0 }
 0xcc0   :  { %v8204_v6 = vpop.permute.xlu1 %8203  ;;  %v8157_v0 = vpop.permute.xlu0 %8156 }
 0xcc1   :  { %v8205_v8 = vpack.c.bf16 %v8204_v6, %v8204_v6  ;;  %v8158_v9 = vpack.c.bf16 %v8157_v0, %v8157_v0  ;;  %v11512_v6 = vld [vmem:[%s13826_s3 + $0x58] sm:$0xf]  ;;  %v11513_v0 = vld [vmem:[%s13826_s3 + $0x5c] sm:$0xf] }
 0xcc3   :  { %11278 = vmatmul.mubr.msk.bf16.vlgmr.msra.gmra.mxu1 %vm943_vm2, %v11494_v51  ;;  %11284 = vmatmul.mubr.msk.bf16.vlgmr.msra.gmra.mxu0 %vm943_vm2, %v11495_v52  ;;  %v8207_v56 = vsel %vm947_vm1, %v8205_v8, 0  ;;  %v8160_v10 = vsel %vm947_vm1, %v8158_v9, 0 }
 0xcc4   :  { %11288 = vmatpush3.bf16.msra.mxu1 %v7972_v50  ;;  %11294 = vmatpush3.bf16.msra.mxu0 %v8019_v49  ;;  %v8251_v13 = vpop.permute.xlu0 %8250  ;;  %v8343_v14 = vpop.permute.xlu1 %8342 }
 0xcc5   :  { %11289 = vmatprep.mubr.msk.bf16.mxu1 %vm11542_vm0, %v11540_v1  ;;  %11295 = vmatprep.mubr.msk.bf16.mxu0 %vm11542_vm0, %v11540_v1  ;;  %v8252_v2 = vpack.c.bf16 %v8251_v13, %v8251_v13  ;;  %v8344_v21 = vpack.c.bf16 %v8343_v14, %v8343_v14 }
 0xcc6   :  { %11299 = vmatprep.subr.bf16.mxu1 %v11540_v1  ;;  %11305 = vmatprep.subr.bf16.mxu0 %v11540_v1 }
 0xcc7   :  { %v8254_v7 = vsel %vm947_vm1, %v8252_v2, 0  ;;  %v8346_v22 = vsel %vm947_vm1, %v8344_v21, 0 }
 0xcc8   :  { %v8390_v20 = vpop.permute.xlu0 %8389  ;;  %v8437_v24 = vpop.permute.xlu1 %8436 }
 0xcc9   :  { %v8391_v15 = vpack.c.bf16 %v8390_v20, %v8390_v20  ;;  %v8438_v23 = vpack.c.bf16 %v8437_v24, %v8437_v24 }
 0xccb   :  { %11290 = vmatmul.mubr.msk.bf16.vlgmr.msra.gmra.mxu1 %vm943_vm2, %v11496_v62  ;;  %11296 = vmatmul.mubr.msk.bf16.vlgmr.msra.gmra.mxu0 %vm943_vm2, %v11497_v5  ;;  %v8393_v19 = vsel %vm947_vm1, %v8391_v15, 0  ;;  %v8440_v29 = vsel %vm947_vm1, %v8438_v23, 0 }
 0xccc   :  { %11300 = vmatpush3.bf16.msra.mxu1 %v8066_v61  ;;  %11306 = vmatpush3.bf16.msra.mxu0 %v8113_v59  ;;  %v8484_v18 = vpop.permute.xlu0 %8483  ;;  %v8531_v31 = vpop.permute.xlu1 %8530 }
 0xccd   :  { %11301 = vmatprep.mubr.msk.bf16.mxu1 %vm11542_vm0, %v11540_v1  ;;  %11307 = vmatprep.mubr.msk.bf16.mxu0 %vm11542_vm0, %v11540_v1  ;;  %v8485_v28 = vpack.c.bf16 %v8484_v18, %v8484_v18  ;;  %v8532_v34 = vpack.c.bf16 %v8531_v31, %v8531_v31 }
 0xcce   :  { %11311 = vmatprep.subr.bf16.mxu1 %v11540_v1  ;;  %11317 = vmatprep.subr.bf16.mxu0 %v11540_v1 }
 0xccf   :  { %v8487_v27 = vsel %vm947_vm1, %v8485_v28, 0  ;;  %v8534_v36 = vsel %vm947_vm1, %v8532_v34, 0 }
 0xcd0   :  { %v8578_v33 = vpop.permute.xlu0 %8577  ;;  %v8625_v40 = vpop.permute.xlu1 %8624 }
 0xcd1   :  { %v8579_v35 = vpack.c.bf16 %v8578_v33, %v8578_v33  ;;  %v8626_v42 = vpack.c.bf16 %v8625_v40, %v8625_v40 }
 0xcd3   :  { %11302 = vmatmul.mubr.msk.bf16.vlgmr.msra.gmra.mxu1 %vm943_vm2, %v11498_v60  ;;  %11308 = vmatmul.mubr.msk.bf16.vlgmr.msra.gmra.mxu0 %vm943_vm2, %v11499_v53  ;;  %v8581_v37 = vsel %vm947_vm1, %v8579_v35, 0  ;;  %v8628_v44 = vsel %vm947_vm1, %v8626_v42, 0  ;;  %v11515_v60 = vld [vmem:[%s13826_s3 + $0x64] sm:$0xf]  ;;  %v11516_v53 = vld [vmem:[%s13826_s3 + $0x68] sm:$0xf] }
 0xcd4   :  { %11312 = vmatpush3.bf16.msra.mxu1 %v8160_v10  ;;  %11318 = vmatpush3.bf16.msra.mxu0 %v8207_v56  ;;  %v8672_v41 = vpop.permute.xlu0 %8671  ;;  %v8719_v47 = vpop.permute.xlu1 %8718  ;;  %v11514_v10 = vld [vmem:[%s13826_s3 + $0x60] sm:$0xf]  ;;  %s11570_s3 = smov [#allocation2]  }
 0xcd5   :  { %11313 = vmatprep.mubr.msk.bf16.mxu1 %vm11542_vm0, %v11540_v1  ;;  %11319 = vmatprep.mubr.msk.bf16.mxu0 %vm11542_vm0, %v11540_v1  ;;  %v8673_v43 = vpack.c.bf16 %v8672_v41, %v8672_v41  ;;  %v8720_v49 = vpack.c.bf16 %v8719_v47, %v8719_v47  ;;  %s8964_s20 = sshll.u32 %s11570_s3, 4  ;;  %s8965_s20 = int_to_ptr.vmem [resolvable:$true] %s8964_s20 }
 0xcd6   :  { %11323 = vmatprep.subr.bf16.mxu1 %v11540_v1  ;;  %11329 = vmatprep.subr.bf16.mxu0 %v11540_v1  ;;  %s11518_s17 = scalar_lea.vmem %s8965_s20, 128  ;;  %p11523_p1 = scmp.lt.s32.totalorder %s8965_s20, %s8965_s20 }
 0xcd7   :  { %v8675_v3 = vsel %vm947_vm1, %v8673_v43, 0  ;;  %v8722_v51 = vsel %vm947_vm1, %v8720_v49, 0  ;;  %p11519_p0 = scmp.ne.s32.totalorder %s8965_s20, %s11518_s17  ;;  %p11524_p2 = scmp.lt.s32.totalorder %s11518_s17, %s11518_s17 }
 0xcd8   :  { %v8766_v48 = vpop.permute.xlu0 %8765  ;;  %v8813_v57 = vpop.permute.xlu1 %8812 }
 0xcd9   :  { %v8767_v50 = vpack.c.bf16 %v8766_v48, %v8766_v48  ;;  %v8814_v59 = vpack.c.bf16 %v8813_v57, %v8813_v57  ;;  %p11525_p3 = por %p11524_p2, %p11523_p1 }
 0xcdb   :  { %11314 = vmatmul.mubr.msk.bf16.vlgmr.msra.gmra.mxu1 %vm943_vm2, %v11500_v17  ;;  %11320 = vmatmul.mubr.msk.bf16.vlgmr.msra.gmra.mxu0 %vm943_vm2, %v11501_v4  ;;  %v8769_v52 = vsel %vm947_vm1, %v8767_v50, 0  ;;  %v8816_v62 = vsel %vm947_vm1, %v8814_v59, 0  ;;  %p11526_p4 = pnand %p11525_p3, %p11519_p0 }
 0xcdc   :  { %11324 = vmatpush3.bf16.msra.mxu1 %v8254_v7  ;;  %11330 = vmatpush3.bf16.msra.mxu0 %v8299_v11  ;;  %v8860_v58 = vpop.permute.xlu0 %8859  ;;  %v8907_v8 = vpop.permute.xlu1 %8906 }
 0xcdd   :  { %11325 = vmatprep.mubr.msk.bf16.mxu1 %vm11542_vm0, %v11540_v1  ;;  %11331 = vmatprep.mubr.msk.bf16.mxu0 %vm11542_vm0, %v11540_v1  ;;  %v8861_v61 = vpack.c.bf16 %v8860_v58, %v8860_v58  ;;  %v8908_v9 = vpack.c.bf16 %v8907_v8, %v8907_v8 }
 0xcde   :  { %11335 = vmatprep.subr.bf16.mxu1 %v11540_v1  ;;  %11341 = vmatprep.subr.bf16.mxu0 %v11540_v1 }
 0xcdf   :  { %v8863_v5 = vsel %vm947_vm1, %v8861_v61, 0  ;;  %v8910_v56 = vsel %vm947_vm1, %v8908_v9, 0 }
 0xce3   :  { %11326 = vmatmul.mubr.msk.bf16.vlgmr.msra.gmra.mxu1 %vm943_vm2, %v11502_v25  ;;  %11332 = vmatmul.mubr.msk.bf16.vlgmr.msra.gmra.mxu0 %vm943_vm2, %v11503_v63 }
 0xce4   :  { %11336 = vmatpush3.bf16.msra.mxu1 %v8346_v22  ;;  %11342 = vmatpush3.bf16.msra.mxu0 %v8393_v19 }
 0xce5   :  { %11337 = vmatprep.mubr.msk.bf16.mxu1 %vm11542_vm0, %v11540_v1  ;;  %11343 = vmatprep.mubr.msk.bf16.mxu0 %vm11542_vm0, %v11540_v1 }
 0xce6   :  { %11347 = vmatprep.subr.bf16.mxu1 %v11540_v1  ;;  %11353 = vmatprep.subr.bf16.mxu0 %v11540_v1 }
 0xceb   :  { %11338 = vmatmul.mubr.msk.bf16.vlgmr.msra.gmra.mxu1 %vm943_vm2, %v11504_v30  ;;  %11344 = vmatmul.mubr.msk.bf16.vlgmr.msra.gmra.mxu0 %vm943_vm2, %v11505_v32 }
 0xcec   :  { %11348 = vmatpush3.bf16.msra.mxu1 %v8440_v29  ;;  %11354 = vmatpush3.bf16.msra.mxu0 %v8487_v27 }
 0xced   :  { %11349 = vmatprep.mubr.msk.bf16.mxu1 %vm11542_vm0, %v11540_v1  ;;  %11355 = vmatprep.mubr.msk.bf16.mxu0 %vm11542_vm0, %v11540_v1 }
 0xcee   :  { %11359 = vmatprep.subr.bf16.mxu1 %v11540_v1  ;;  %11365 = vmatprep.subr.bf16.mxu0 %v11540_v1 }
 0xcf3   :  { %11350 = vmatmul.mubr.msk.bf16.vlgmr.msra.gmra.mxu1 %vm943_vm2, %v11506_v38  ;;  %11356 = vmatmul.mubr.msk.bf16.vlgmr.msra.gmra.mxu0 %vm943_vm2, %v11507_v39 }
 0xcf4   :  { %11360 = vmatpush3.bf16.msra.mxu1 %v8534_v36  ;;  %11366 = vmatpush3.bf16.msra.mxu0 %v8581_v37 }
 0xcf5   :  { %11361 = vmatprep.mubr.msk.bf16.mxu1 %vm11542_vm0, %v11540_v1  ;;  %11367 = vmatprep.mubr.msk.bf16.mxu0 %vm11542_vm0, %v11540_v1 }
 0xcf6   :  { %11371 = vmatprep.subr.bf16.mxu1 %v11540_v1  ;;  %11377 = vmatprep.subr.bf16.mxu0 %v11540_v1 }
 0xcfb   :  { %11362 = vmatmul.mubr.msk.bf16.vlgmr.msra.gmra.mxu1 %vm943_vm2, %v11508_v45  ;;  %11368 = vmatmul.mubr.msk.bf16.vlgmr.msra.gmra.mxu0 %vm943_vm2, %v11509_v46 }
 0xcfc   :  { %11372 = vmatpush3.bf16.msra.mxu1 %v8628_v44  ;;  %11378 = vmatpush3.bf16.msra.mxu0 %v8675_v3 }
 0xcfd   :  { %11373 = vmatprep.mubr.msk.bf16.mxu1 %vm11542_vm0, %v11540_v1  ;;  %11379 = vmatprep.mubr.msk.bf16.mxu0 %vm11542_vm0, %v11540_v1 }
 0xcfe   :  { %11383 = vmatprep.subr.bf16.mxu1 %v11540_v1  ;;  %11389 = vmatprep.subr.bf16.mxu0 %v11540_v1 }
 0xd03   :  { %11374 = vmatmul.mubr.msk.bf16.vlgmr.msra.gmra.mxu1 %vm943_vm2, %v11510_v54  ;;  %11380 = vmatmul.mubr.msk.bf16.vlgmr.msra.gmra.mxu0 %vm943_vm2, %v11511_v55 }
 0xd04   :  { %11384 = vmatpush3.bf16.msra.mxu1 %v8722_v51  ;;  %11390 = vmatpush3.bf16.msra.mxu0 %v8769_v52 }
 0xd05   :  { %11385 = vmatprep.mubr.msk.bf16.mxu1 %vm11542_vm0, %v11540_v1  ;;  %11391 = vmatprep.mubr.msk.bf16.mxu0 %vm11542_vm0, %v11540_v1 }
 0xd06   :  { %11395 = vmatprep.subr.bf16.mxu1 %v11540_v1  ;;  %11401 = vmatprep.subr.bf16.mxu0 %v11540_v1 }
 0xd0b   :  { %11386 = vmatmul.mubr.msk.bf16.vlgmr.msra.gmra.mxu1 %vm943_vm2, %v11512_v6  ;;  %11392 = vmatmul.mubr.msk.bf16.vlgmr.msra.gmra.mxu0 %vm943_vm2, %v11513_v0 }
 0xd0c   :  { %11396 = vmatpush3.bf16.msra.mxu1 %v8816_v62  ;;  %11402 = vmatpush3.bf16.msra.mxu0 %v8863_v5 }
 0xd0d   :  { %11397 = vmatprep.mubr.msk.bf16.mxu1 %vm11542_vm0, %v11540_v1  ;;  %11407 = vmatprep.subr.bf16.mxu1 %v11540_v1 }
 0xd0e   :  { %11403 = vmatprep.mubr.msk.bf16.mxu0 %vm11542_vm0, %v11540_v1 }
 0xd13   :  { %11398 = vmatmul.mubr.msk.bf16.vlgmr.msra.gmra.mxu1 %vm943_vm2, %v11514_v10  ;;  %11404 = vmatmul.mubr.msk.bf16.vlgmr.msra.gmra.mxu0 %vm943_vm2, %v11515_v60 }
 0xd14   :  { %11408 = vmatpush3.bf16.msra.mxu1 %v8910_v56  ;;  %11409 = vmatprep.mubr.msk.bf16.mxu1 %vm11542_vm0, %v11540_v1 }
 0xd1b   :  { %11410 = vmatmul.mubr.msk.bf16.vlgmr.msra.gmra.mxu1 %vm943_vm2, %v11516_v53 }
 0xd73   :  { %v7731_v13 = vpop.f32.mrf.mxu1  ;;  %v7774_v2 = vpop.f32.mrf.mxu0 }
 0xd74   :  { %v7775_v40 = vadd.f32 %v7774_v2, %v7731_v13 }
 0xd75   :  { %v11255_v16 = vpop.f32.mrf.mxu1  ;;  %v11261_v7 = vpop.f32.mrf.mxu0 }
 0xd77   :  { %v7734_v17 = vpop.f32.mrf.mxu1  ;;  %v7777_v4 = vpop.f32.mrf.mxu0 }
 0xd79   :  { %v11256_v11 = vpop.f32.mrf.mxu1  ;;  %v11262_v14 = vpop.f32.mrf.mxu0 }
 0xd7b   :  { %v7820_v20 = vpop.f32.mrf.mxu1  ;;  %v7867_v21 = vpop.f32.mrf.mxu0 }
 0xd7c   :  { %v7826_v43 = vadd.f32 %v7820_v20, %v7775_v40 }
 0xd7d   :  { %v11267_v15 = vpop.f32.mrf.mxu1  ;;  %v11273_v22 = vpop.f32.mrf.mxu0 }
 0xd7e   :  { %v7873_v47 = vadd.f32 %v7867_v21, %v7826_v43 }
 0xd7f   :  { %v7823_v19 = vpop.f32.mrf.mxu1  ;;  %v7870_v1 = vpop.f32.mrf.mxu0 }
 0xd81   :  { %v11268_v25 = vpop.f32.mrf.mxu1  ;;  %v11274_v63 = vpop.f32.mrf.mxu0 }
 0xd83   :  { %v7914_v24 = vpop.f32.mrf.mxu1  ;;  %v7961_v18 = vpop.f32.mrf.mxu0 }
 0xd84   :  { %v7920_v50 = vadd.f32 %v7914_v24, %v7873_v47 }
 0xd85   :  { %v11279_v23 = vpop.f32.mrf.mxu1  ;;  %v11285_v28 = vpop.f32.mrf.mxu0 }
 0xd86   :  { %v7967_v57 = vadd.f32 %v7961_v18, %v7920_v50 }
 0xd87   :  { %v7917_v29 = vpop.f32.mrf.mxu1  ;;  %v7964_v27 = vpop.f32.mrf.mxu0 }
 0xd89   :  { %v11280_v30 = vpop.f32.mrf.mxu1  ;;  %v11286_v32 = vpop.f32.mrf.mxu0 }
 0xd8b   :  { %v8008_v31 = vpop.f32.mrf.mxu1  ;;  %v8055_v33 = vpop.f32.mrf.mxu0 }
 0xd8c   :  { %v8014_v61 = vadd.f32 %v8008_v31, %v7967_v57 }
 0xd8d   :  { %v11291_v34 = vpop.f32.mrf.mxu1  ;;  %v11297_v35 = vpop.f32.mrf.mxu0 }
 0xd8e   :  { %v8061_v8 = vadd.f32 %v8055_v33, %v8014_v61 }
 0xd8f   :  { %v8011_v36 = vpop.f32.mrf.mxu1  ;;  %v8058_v37 = vpop.f32.mrf.mxu0 }
 0xd91   :  { %v11292_v38 = vpop.f32.mrf.mxu1  ;;  %v11298_v39 = vpop.f32.mrf.mxu0 }
 0xd93   :  { %v8102_v41 = vpop.f32.mrf.mxu1  ;;  %v8149_v42 = vpop.f32.mrf.mxu0 }
 0xd94   :  { %v8108_v10 = vadd.f32 %v8102_v41, %v8061_v8 }
 0xd95   :  { %v11303_v44 = vpop.f32.mrf.mxu1  ;;  %v11309_v3 = vpop.f32.mrf.mxu0 }
 0xd96   :  { %v8155_v16 = vadd.f32 %v8149_v42, %v8108_v10 }
 0xd97   :  { %v8105_v45 = vpop.f32.mrf.mxu1  ;;  %v8152_v46 = vpop.f32.mrf.mxu0 }
 0xd99   :  { %v11304_v48 = vpop.f32.mrf.mxu1  ;;  %v11310_v49 = vpop.f32.mrf.mxu0 }
 0xd9b   :  { %v8196_v51 = vpop.f32.mrf.mxu1  ;;  %v8243_v52 = vpop.f32.mrf.mxu0 }
 0xd9c   :  { %v8202_v4 = vadd.f32 %v8196_v51, %v8155_v16 }
 0xd9d   :  { %v11315_v54 = vpop.f32.mrf.mxu1  ;;  %v11321_v55 = vpop.f32.mrf.mxu0 }
 0xd9e   :  { %v8249_v15 = vadd.f32 %v8243_v52, %v8202_v4 }
 0xd9f   :  { %v8199_v58 = vpop.f32.mrf.mxu1  ;;  %v8246_v59 = vpop.f32.mrf.mxu0 }
 0xda1   :  { %v11316_v62 = vpop.f32.mrf.mxu1  ;;  %v11322_v5 = vpop.f32.mrf.mxu0 }
 0xda3   :  { %v8290_v6 = vpop.f32.mrf.mxu1  ;;  %v8335_v0 = vpop.f32.mrf.mxu0 }
 0xda4   :  { %v8296_v1 = vadd.f32 %v8290_v6, %v8249_v15 }
 0xda5   :  { %v11327_v9 = vpop.f32.mrf.mxu1  ;;  %v11333_v56 = vpop.f32.mrf.mxu0 }
 0xda6   :  { %v8341_v23 = vadd.f32 %v8335_v0, %v8296_v1  ;;  %v11517_v1 = vld [vmem:[%s13823_s0] sm:$0xff] }
 0xda7   :  { %v8293_v60 = vpop.f32.mrf.mxu1  ;;  %v8338_v53 = vpop.f32.mrf.mxu0 }
 0xda9   :  { %v11328_v13 = vpop.f32.mrf.mxu1  ;;  %v11334_v2 = vpop.f32.mrf.mxu0 }
 0xdab   :  { %v8382_v7 = vpop.f32.mrf.mxu1  ;;  %v8429_v17 = vpop.f32.mrf.mxu0 }
 0xdac   :  { %v8388_v27 = vadd.f32 %v8382_v7, %v8341_v23 }
 0xdad   :  { %v11339_v11 = vpop.f32.mrf.mxu1  ;;  %v11345_v14 = vpop.f32.mrf.mxu0 }
 0xdae   :  { %v8435_v34 = vadd.f32 %v8429_v17, %v8388_v27 }
 0xdaf   :  { %v8385_v20 = vpop.f32.mrf.mxu1  ;;  %v8432_v21 = vpop.f32.mrf.mxu0 }
 0xdb1   :  { %v11340_v22 = vpop.f32.mrf.mxu1  ;;  %v11346_v19 = vpop.f32.mrf.mxu0 }
 0xdb3   :  { %v8476_v25 = vpop.f32.mrf.mxu1  ;;  %v8523_v63 = vpop.f32.mrf.mxu0 }
 0xdb4   :  { %v8482_v37 = vadd.f32 %v8476_v25, %v8435_v34 }
 0xdb5   :  { %v11351_v24 = vpop.f32.mrf.mxu1  ;;  %v11357_v18 = vpop.f32.mrf.mxu0 }
 0xdb6   :  { %v8529_v42 = vadd.f32 %v8523_v63, %v8482_v37 }
 0xdb7   :  { %v8479_v28 = vpop.f32.mrf.mxu1  ;;  %v8526_v29 = vpop.f32.mrf.mxu0 }
 0xdb9   :  { %v11352_v30 = vpop.f32.mrf.mxu1  ;;  %v11358_v32 = vpop.f32.mrf.mxu0 }
 0xdbb   :  { %v8570_v31 = vpop.f32.mrf.mxu1  ;;  %v8617_v33 = vpop.f32.mrf.mxu0 }
 0xdbc   :  { %v8576_v3 = vadd.f32 %v8570_v31, %v8529_v42 }
 0xdbd   :  { %v11363_v35 = vpop.f32.mrf.mxu1  ;;  %v11369_v36 = vpop.f32.mrf.mxu0 }
 0xdbe   :  { %v8623_v49 = vadd.f32 %v8617_v33, %v8576_v3 }
 0xdbf   :  { %v8573_v38 = vpop.f32.mrf.mxu1  ;;  %v8620_v39 = vpop.f32.mrf.mxu0 }
 0xdc1   :  { %v11364_v40 = vpop.f32.mrf.mxu1  ;;  %v11370_v41 = vpop.f32.mrf.mxu0 }
 0xdc3   :  { %v8664_v43 = vpop.f32.mrf.mxu1  ;;  %v8711_v44 = vpop.f32.mrf.mxu0 }
 0xdc4   :  { %v8670_v52 = vadd.f32 %v8664_v43, %v8623_v49 }
 0xdc5   :  { %v11375_v45 = vpop.f32.mrf.mxu1  ;;  %v11381_v46 = vpop.f32.mrf.mxu0 }
 0xdc6   :  { %v8717_v59 = vadd.f32 %v8711_v44, %v8670_v52 }
 0xdc7   :  { %v8667_v47 = vpop.f32.mrf.mxu1  ;;  %v8714_v48 = vpop.f32.mrf.mxu0 }
 0xdc9   :  { %v11376_v50 = vpop.f32.mrf.mxu1  ;;  %v11382_v51 = vpop.f32.mrf.mxu0 }
 0xdcb   :  { %v8758_v54 = vpop.f32.mrf.mxu1  ;;  %v8805_v55 = vpop.f32.mrf.mxu0 }
 0xdcc   :  { %v8764_v5 = vadd.f32 %v8758_v54, %v8717_v59 }
 0xdcd   :  { %v11387_v57 = vpop.f32.mrf.mxu1  ;;  %v11393_v58 = vpop.f32.mrf.mxu0 }
 0xdce   :  { %v8811_v56 = vadd.f32 %v8805_v55, %v8764_v5 }
 0xdcf   :  { %v8761_v61 = vpop.f32.mrf.mxu1  ;;  %v8808_v62 = vpop.f32.mrf.mxu0 }
 0xdd1   :  { %v11388_v6 = vpop.f32.mrf.mxu1  ;;  %v11394_v0 = vpop.f32.mrf.mxu0 }
 0xdd3   :  { %v8852_v8 = vpop.f32.mrf.mxu1  ;;  %v8899_v9 = vpop.f32.mrf.mxu0 }
 0xdd4   :  { %v8858_v53 = vadd.f32 %v8852_v8, %v8811_v56 }
 0xdd5   :  { %v11399_v10 = vpop.f32.mrf.mxu1  ;;  %v11405_v60 = vpop.f32.mrf.mxu0 }
 0xdd6   :  { %v8905_v17 = vadd.f32 %v8899_v9, %v8858_v53 }
 0xdd7   :  { %v8855_v13 = vpop.f32.mrf.mxu1  ;;  %v8902_v2 = vpop.f32.mrf.mxu0 }
 0xdd9   :  { %v11400_v16 = vpop.f32.mrf.mxu1  ;;  %v11406_v7 = vpop.f32.mrf.mxu0 }
 0xddb   :  { %v8946_v4 = vpop.f32.mrf.mxu1 }
 0xddc   :  { %v8952_v11 = vadd.f32 %v8946_v4, %v8905_v17 }
 0xddd   :  { %v11411_v14 = vpop.f32.mrf.mxu1 }
 0xdde   :  { %v8953_v20 = vadd.f32 %v8952_v11, %v12759_v12 }
 0xddf   :  { %v8949_v21 = vpop.f32.mrf.mxu1 }
 0xde0   :  { %v8954_v15 = vmul.f32 %v13546_v26, %v8953_v20 }
 0xde1   :  { %v11412_v22 = vpop.f32.mrf.mxu1 }
 0xde2   :  { %v8955_v19 = vmul.f32 0.3, %v8954_v15 }
 0xde4   :  { %v8956_v25 = vadd.f32 %v11517_v1, %v8955_v19 }
 0xde6   :  { %8957 = vst [vmem:[#allocation2] sm:$0xff] %v8956_v25 }
 0xde7   :  { %11529 = shalt.err (!%p11526_p4)
}
 0xde8   :  { %8967 = dma.vmem_to_hbm [thread:$0]  %s8965_s20, 128, %s13831_s8, [#allocation3]  }
 0xde9   :  { %11538 = dma.done.wait [#allocation3], 128  }
 0xdea   :  { %11539 = vsyncadd [#allocation3], 4294967168 }
 0xdeb   :  { %8971 = vsyncpa [#allocation3], 1 }

</bundles_post_ra>
